<compile_context>
chip_gen: v7x
topology: tpu7x:2x2x1
jax: 0.10.0
libtpu: 0.0.40
codegen_flags: <defaults>
</compile_context>

<pallas_src>
import math

import jax
import jax.numpy as jnp
from jax.experimental import pallas as pl
from jax.experimental.pallas import tpu as pltpu  # noqa: F401  (kept for TPU-specific knobs)

# ----------------------------- synthetic config -----------------------------
SPATIAL_RESOLUTION = (8, 8, 8)          # finest (output) resolution
EMB_CHANNELS = 16
NUM_CHANNELS = (16, 8)                  # coarsest level -> finest level
NUM_RES_BLOCKS = (1, 1)
UPSAMPLE_RATIO = (2, 2)
USE_SPATIAL_ATTENTION = (False, False)  # attention disabled in this config
NUM_INPUT_PROJ_CHANNELS = 8
NUM_OUTPUT_PROJ_CHANNELS = 8
BATCH = 2
DTYPE = jnp.float32
# Matmul-input dtype.  Keep f32 to match the reference module (dtype=float32);
# set to jnp.bfloat16 on v6e/v7x for ~2x MXU rate (accumulation stays f32).
MXU_DTYPE = jnp.float32
_INV_SQRT2 = 1.0 / math.sqrt(2.0)


def _level_resolutions():
    res = [SPATIAL_RESOLUTION]
    for level in range(len(NUM_CHANNELS)):
        res.append(tuple(int(r / UPSAMPLE_RATIO[level]) for r in res[-1]))
    res = res[::-1]
    res.pop()
    return res  # res[level] = resolution that level `level` operates at


LEVEL_RES = _level_resolutions()        # [(2,2,2), (4,4,4)]


# --------------------------- in-kernel helpers --------------------------------
def _gn_swish_val(x, gm, gmT, gamma, beta):
    """GroupNorm (per-sample stats over spatial + channels-in-group) + swish.

    x: (S, C) float32 value.  gm: (C, G) one-hot group membership.
    All statistics (sums, E[x^2]-E[x]^2, rsqrt) stay in float32."""
    s_dim, c_dim = x.shape
    g_dim = gm.shape[1]
    n = float(s_dim * (c_dim // g_dim))
    s1 = jnp.sum(x, axis=0, keepdims=True)          # (1, C)
    s2 = jnp.sum(x * x, axis=0, keepdims=True)      # (1, C)
    mean_g = jnp.dot(s1, gm, preferred_element_type=jnp.float32) / n
    ex2_g = jnp.dot(s2, gm, preferred_element_type=jnp.float32) / n
    var_g = ex2_g - mean_g * mean_g
    inv_g = jax.lax.rsqrt(var_g + 1e-5)
    mean_c = jnp.dot(mean_g, gmT, preferred_element_type=jnp.float32)
    inv_c = jnp.dot(inv_g, gmT, preferred_element_type=jnp.float32)
    h = (x - mean_c) * inv_c * gamma + beta
    return h * jax.nn.sigmoid(h)


# ------------------------------ Pallas kernels -------------------------------
def _make_combine_kernel(project: bool, with_gn: bool):
    """out_comb = (residual + proj_or_id(skip)) / sqrt(2)
       out_act  = swish(GroupNorm(out_comb))  (only when with_gn).
    `project` / `with_gn` are static Python flags -> specialized kernels
    (no identity-matrix matmul on the non-projecting path)."""

    def kernel(*refs):
        i = 0
        res_ref = refs[i]; i += 1
        skip_ref = refs[i]; i += 1
        if project:
            pw_ref = refs[i]; pb_ref = refs[i + 1]; i += 2
        if with_gn:
            gm_ref, gmT_ref, gamma_ref, beta_ref = refs[i:i + 4]; i += 4
        comb_ref = refs[i]; i += 1
        if with_gn:
            act_ref = refs[i]

        nb = res_ref.shape[0]          # static batch, unrolled (B == 2)
        for b in range(nb):
            r = res_ref[b].astype(jnp.float32)                   # (S, Cr)
            s = skip_ref[b]                                      # (S, Cs)
            if project:
                s = jnp.dot(s.astype(MXU_DTYPE), pw_ref[...].astype(MXU_DTYPE),
                            preferred_element_type=jnp.float32) + pb_ref[...]
            else:
                s = s.astype(jnp.float32)
            c = (r + s) * _INV_SQRT2
            comb_ref[b] = c.astype(comb_ref.dtype)
            if with_gn:
                act_ref[b] = _gn_swish_val(
                    c, gm_ref[...], gmT_ref[...], gamma_ref[...], beta_ref[...]
                ).astype(act_ref.dtype)

    return kernel


def _conv_film_gn_kernel(cols_ref, w_ref, b_ref, scale_ref, shift_ref,
                         gm_ref, gmT_ref, gamma_ref, beta_ref, o_ref):
    """One big-K conv matmul (K = 27*Cin) + bias + FiLM (precomputed scale/
    shift) + GroupNorm + swish.  Per-sample loop is a static unroll (B==2)."""
    w = w_ref[...].astype(MXU_DTYPE)
    b = b_ref[...]
    gm = gm_ref[...]
    gmT = gmT_ref[...]
    gamma = gamma_ref[...]
    beta = beta_ref[...]
    nb = cols_ref.shape[0]
    for bb in range(nb):
        h = jnp.dot(cols_ref[bb].astype(MXU_DTYPE), w,
                    preferred_element_type=jnp.float32) + b       # (S, Cout)
        h = h * (scale_ref[bb] + 1.0) + shift_ref[bb]             # FiLM
        o_ref[bb] = _gn_swish_val(h, gm, gmT, gamma, beta).astype(o_ref.dtype)


def _make_conv_residual_kernel(project: bool):
    """out = (conv(cols) + proj_or_id(residual_input)) / sqrt(2).
    Batch is flattened into matmul rows (no per-sample math here)."""
    if project:
        def kernel(cols_ref, w_ref, b_ref, res_ref, pw_ref, pb_ref, o_ref):
            h = jnp.dot(cols_ref[...].astype(MXU_DTYPE), w_ref[...].astype(MXU_DTYPE),
                        preferred_element_type=jnp.float32) + b_ref[...]
            r = jnp.dot(res_ref[...].astype(MXU_DTYPE), pw_ref[...].astype(MXU_DTYPE),
                        preferred_element_type=jnp.float32) + pb_ref[...]
            o_ref[...] = ((h + r) * _INV_SQRT2).astype(o_ref.dtype)
    else:
        def kernel(cols_ref, w_ref, b_ref, res_ref, o_ref):
            h = jnp.dot(cols_ref[...].astype(MXU_DTYPE), w_ref[...].astype(MXU_DTYPE),
                        preferred_element_type=jnp.float32) + b_ref[...]
            o_ref[...] = ((h + res_ref[...].astype(jnp.float32))
                          * _INV_SQRT2).astype(o_ref.dtype)
    return kernel


def _conv_bias_kernel(cols_ref, w_ref, b_ref, o_ref):
    """Plain conv: one big-K matmul + bias, batch flattened into rows."""
    o_ref[...] = (jnp.dot(cols_ref[...].astype(MXU_DTYPE),
                          w_ref[...].astype(MXU_DTYPE),
                          preferred_element_type=jnp.float32)
                  + b_ref[...]).astype(o_ref.dtype)


# ------------------------------ JAX-side glue ---------------------------------
def _im2col_circular(x):
    """(B, D, H, W, C) -> (B, D*H*W, 27*C): 3x3x3 circular taps packed
    tap-major on the last (lane) axis, matching the (27*Cin, Cout) weights."""
    B, D, H, W, C = x.shape
    xp = jnp.pad(x, ((0, 0), (1, 1), (1, 1), (1, 1), (0, 0)), mode="wrap")
    cols = [xp[:, kd:kd + D, kh:kh + H, kw:kw + W, :]
            for kd in range(3) for kh in range(3) for kw in range(3)]
    cols = jnp.concatenate(cols, axis=-1)            # (B, D, H, W, 27*C)
    return cols.reshape(B, D * H * W, 27 * C)


def film_scale_shift(emb, p):
    """AdaptiveScale: Dense(swish(emb)) -> (B,1,C) scale/shift, in plain JAX."""
    e = emb.astype(jnp.float32)
    e = e * jax.nn.sigmoid(e)
    scale = jnp.dot(e, p["w_scale"]) + p["b_scale"]
    shift = jnp.dot(e, p["w_shift"]) + p["b_shift"]
    return scale[:, None, :], shift[:, None, :]


def channel_to_space(x, r):
    # ChannelToSpace / 3-D pixel shuffle, channel split convention (rd, rh, rw, C)
    B, D, H, W, Crrr = x.shape
    C = Crrr // (r ** 3)
    x = x.reshape(B, D, H, W, r, r, r, C)
    x = jnp.transpose(x, (0, 1, 4, 2, 5, 3, 6, 7))
    return x.reshape(B, D * r, H * r, W * r, C)


# ------------------------------ kernel wrappers -------------------------------
# All kernels are gridless (single invocation, whole arrays in VMEM): every
# tensor here is < 1 MiB, so per-grid-step overhead and repeated weight DMA
# would dominate any tiling.

def combine_skip_gn_swish(residual, skip, pc, pg=None):
    """(residual + proj_or_id(skip))/sqrt(2), plus optional GN+swish output."""
    B, D, H, W, Cr = residual.shape
    Cs = skip.shape[-1]
    S = D * H * W
    project = "w" in pc
    with_gn = pg is not None
    kernel = _make_combine_kernel(project, with_gn)
    args = [residual.reshape(B, S, Cr), skip.reshape(B, S, Cs)]
    if project:
        args += [pc["w"], pc["b"]]
    if with_gn:
        args += [pg["gm"], pg["gmT"], pg["gamma"], pg["beta"]]
        out_shape = (jax.ShapeDtypeStruct((B, S, Cr), residual.dtype),
                     jax.ShapeDtypeStruct((B, S, Cr), residual.dtype))
        comb, act = pl.pallas_call(kernel, out_shape=out_shape)(*args)
        return comb.reshape(B, D, H, W, Cr), act.reshape(B, D, H, W, Cr)
    out_shape = jax.ShapeDtypeStruct((B, S, Cr), residual.dtype)
    comb = pl.pallas_call(kernel, out_shape=out_shape)(*args)
    return comb.reshape(B, D, H, W, Cr), None


def conv_film_gn_swish(x_act, pconv, scale, shift, pg):
    """3x3x3 circular conv (one K=27*Cin matmul) + FiLM + GroupNorm + swish."""
    B, D, H, W, Cin = x_act.shape
    S = D * H * W
    Cout = pconv["w"].shape[1]
    cols = _im2col_circular(x_act)                   # (B, S, 27*Cin)
    out = pl.pallas_call(
        _conv_film_gn_kernel,
        out_shape=jax.ShapeDtypeStruct((B, S, Cout), x_act.dtype),
    )(cols, pconv["w"], pconv["b"], scale, shift,
      pg["gm"], pg["gmT"], pg["gamma"], pg["beta"])
    return out.reshape(B, D, H, W, Cout)


def conv_residual_combine(h_mid, h_comb, pconv, pres):
    """3x3x3 circular conv + residual combine (skip = the block input)."""
    B, D, H, W, Cmid = h_mid.shape
    S = D * H * W
    Cout = pconv["w"].shape[1]
    Cres = h_comb.shape[-1]
    project = "w" in pres
    cols = _im2col_circular(h_mid).reshape(B * S, 27 * Cmid)
    kernel = _make_conv_residual_kernel(project)
    args = [cols, pconv["w"], pconv["b"], h_comb.reshape(B * S, Cres)]
    if project:
        args += [pres["w"], pres["b"]]
    out = pl.pallas_call(
        kernel, out_shape=jax.ShapeDtypeStruct((B * S, Cout), h_mid.dtype))(*args)
    return out.reshape(B, D, H, W, Cout)


def conv_plain(x, pconv):
    """Plain 3x3x3 circular conv (up_conv / output projection)."""
    B, D, H, W, Cin = x.shape
    S = D * H * W
    Cout = pconv["w"].shape[1]
    cols = _im2col_circular(x).reshape(B * S, 27 * Cin)
    out = pl.pallas_call(
        _conv_bias_kernel,
        out_shape=jax.ShapeDtypeStruct((B * S, Cout), x.dtype),
    )(cols, pconv["w"], pconv["b"])
    return out.reshape(B, D, H, W, Cout)


# ------------------------------ parameters ------------------------------------
def _make_conv(key, cin, cout):
    kw, kb = jax.random.split(key)
    w = jax.random.normal(kw, (27 * cin, cout), DTYPE) / math.sqrt(27 * cin)
    b = 0.01 * jax.random.normal(kb, (1, cout), DTYPE)
    return {"w": w, "b": b}


def _make_groupnorm(c):
    g = min(c // 4, 32)
    gm = jax.nn.one_hot(jnp.arange(c) // (c // g), g, dtype=DTYPE)   # (C, G)
    return {"gm": gm, "gmT": gm.T, "gamma": jnp.ones((1, c), DTYPE),
            "beta": jnp.zeros((1, c), DTYPE)}


def _make_combine(key, cs, cr, project):
    if not project:
        assert cs == cr
        return {}                                     # identity path: no params
    w = jax.random.normal(key, (cs, cr), DTYPE) / math.sqrt(cs)
    return {"w": w, "b": jnp.zeros((1, cr), DTYPE)}


def _make_film(key, e, c):
    k1, k2 = jax.random.split(key)
    return {"w_scale": jax.random.normal(k1, (e, c), DTYPE) / math.sqrt(e),
            "b_scale": jnp.zeros((1, c), DTYPE),
            "w_shift": jax.random.normal(k2, (e, c), DTYPE) / math.sqrt(e),
            "b_shift": jnp.zeros((1, c), DTYPE)}


def _make_conv_block(keys, cin, cout, e):
    return {
        "gn1": _make_groupnorm(cin),
        "conv1": _make_conv(next(keys), cin, cout),
        "film": _make_film(next(keys), e, cout),
        "gn2": _make_groupnorm(cout),
        "conv2": _make_conv(next(keys), cout, cout),
        "res_out": _make_combine(next(keys), cs=cin, cr=cout, project=(cin != cout)),
    }


def build_params(key):
    keys = iter(jax.random.split(key, 256))
    params = {"levels": []}
    for level, channel in enumerate(NUM_CHANNELS):
        lvl = {"blocks": []}
        for block_id in range(NUM_RES_BLOCKS[level]):
            if block_id == 0 and level > 0:
                in_ch = NUM_CHANNELS[level - 1]
            else:
                in_ch = channel
            blk = {
                "res_skip": _make_combine(next(keys), cs=channel, cr=in_ch,
                                          project=(in_ch != channel)),
                "conv_block": _make_conv_block(keys, in_ch, channel, EMB_CHANNELS),
            }
            lvl["blocks"].append(blk)
        r = UPSAMPLE_RATIO[level]
        lvl["up_conv"] = _make_conv(next(keys), channel, (r ** 3) * channel)
        params["levels"].append(lvl)
    params["final_res_skip"] = _make_combine(
        next(keys), cs=NUM_INPUT_PROJ_CHANNELS, cr=NUM_CHANNELS[-1],
        project=(NUM_CHANNELS[-1] != NUM_INPUT_PROJ_CHANNELS))
    params["out_conv"] = _make_conv(next(keys), NUM_CHANNELS[-1],
                                    NUM_OUTPUT_PROJ_CHANNELS)
    return params


# ------------------------------ forward pass ----------------------------------
def res_block_forward(h, skip, emb, blk):
    cb = blk["conv_block"]
    # fused: combine-with-skip + GroupNorm1 + swish (2 outputs: raw + activated)
    h_comb, h_act = combine_skip_gn_swish(h, skip, blk["res_skip"], cb["gn1"])
    # FiLM scale/shift precomputed in plain JAX, folded into the conv1 epilogue
    scale, shift = film_scale_shift(emb, cb["film"])
    # fused: conv1 + FiLM + GroupNorm2 + swish (dropout_rate = 0 -> identity)
    h_mid = conv_film_gn_swish(h_act, cb["conv1"], scale, shift, cb["gn2"])
    # fused: conv2 + residual combine with the block input
    return conv_residual_combine(h_mid, h_comb, cb["conv2"], cb["res_out"])


def ustack_forward(params, x, emb, skips):
    assert x.ndim == 5 and x.shape[0] == emb.shape[0]
    skips = list(skips)
    h = x
    for level in range(len(NUM_CHANNELS)):
        lvl = params["levels"][level]
        for block_id in range(NUM_RES_BLOCKS[level]):
            h = res_block_forward(h, skips.pop(), emb, lvl["blocks"][block_id])
            # TODO(synk): AxialSelfAttentionBlock not implemented; this config
            # uses use_spatial_attention=(False, False) so it is never invoked.
        h = conv_plain(h, lvl["up_conv"])
        h = channel_to_space(h, UPSAMPLE_RATIO[level])
    h, _ = combine_skip_gn_swish(h, skips.pop(), params["final_res_skip"], None)
    h = conv_plain(h, params["out_conv"])
    return h


# ----------------------------------- main --------------------------------------
if __name__ == "__main__":
    key = jax.random.PRNGKey(0)
    kp, kx, ke, kin, klv = jax.random.split(key, 5)

    params = build_params(kp)

    # x enters at the coarsest resolution with NUM_CHANNELS[0] channels (NDHWC).
    x = jax.random.normal(kx, (BATCH, *LEVEL_RES[0], NUM_CHANNELS[0]), DTYPE)
    emb = jax.random.normal(ke, (BATCH, EMB_CHANNELS), DTYPE)

    # skips are popped from the end: level0 skips last, input-proj skip first.
    skips = [jax.random.normal(
        kin, (BATCH, *SPATIAL_RESOLUTION, NUM_INPUT_PROJ_CHANNELS), DTYPE)]
    kiter = iter(jax.random.split(klv, 32))
    for level in reversed(range(len(NUM_CHANNELS))):
        for _ in reversed(range(NUM_RES_BLOCKS[level])):
            skips.append(jax.random.normal(
                next(kiter), (BATCH, *LEVEL_RES[level], NUM_CHANNELS[level]), DTYPE))

    fwd = jax.jit(ustack_forward)
    out = fwd(params, x, emb, tuple(skips))
    out = jax.block_until_ready(out)

    assert out.shape == (BATCH, *SPATIAL_RESOLUTION, NUM_OUTPUT_PROJ_CHANNELS), out.shape
    assert bool(jnp.all(jnp.isfinite(out)))
    print("KERNEL_OK")
</pallas_src>

<mosaic_0001>
module attributes {stable_mosaic.version = 11 : i64} {
  func.func @kernel(%arg0: memref<2x8x16xf32, #tpu.memory_space<vmem>>, %arg1: memref<2x8x16xf32, #tpu.memory_space<vmem>>, %arg2: memref<16x4xf32, #tpu.memory_space<vmem>>, %arg3: memref<4x16xf32, #tpu.memory_space<vmem>>, %arg4: memref<1x16xf32, #tpu.memory_space<vmem>>, %arg5: memref<1x16xf32, #tpu.memory_space<vmem>>, %arg6: memref<2x8x16xf32, #tpu.memory_space<vmem>>, %arg7: memref<2x8x16xf32, #tpu.memory_space<vmem>>) attributes {dimension_semantics = [], scalar_prefetch = 0 : i64, scratch_operands = 0 : i64, tpu.core_type = #tpu.core_type<tc>} {
    %c0 = arith.constant 0 : index
    %c0_0 = arith.constant 0 : index
    %c0_1 = arith.constant 0 : index
    %0 = vector.load %arg0[%c0, %c0_0, %c0_1] : memref<2x8x16xf32, #tpu.memory_space<vmem>>, vector<1x8x16xf32>
    %1 = vector.shape_cast %0 : vector<1x8x16xf32> to vector<8x16xf32>
    %c0_2 = arith.constant 0 : index
    %c0_3 = arith.constant 0 : index
    %c0_4 = arith.constant 0 : index
    %2 = vector.load %arg1[%c0_2, %c0_3, %c0_4] : memref<2x8x16xf32, #tpu.memory_space<vmem>>, vector<1x8x16xf32>
    %3 = vector.shape_cast %2 : vector<1x8x16xf32> to vector<8x16xf32>
    %4 = arith.addf %1, %3 : vector<8x16xf32>
    %cst = arith.constant 0.707106769 : f32
    %5 = vector.broadcast %cst : f32 to vector<8x16xf32>
    %6 = arith.mulf %4, %5 : vector<8x16xf32>
    %c0_5 = arith.constant 0 : index
    %c0_6 = arith.constant 0 : index
    %c0_7 = arith.constant 0 : index
    %7 = vector.load %arg6[%c0_5, %c0_6, %c0_7] : memref<2x8x16xf32, #tpu.memory_space<vmem>>, vector<1x8x16xf32>
    %8 = vector.shape_cast %7 : vector<1x8x16xf32> to vector<8x16xf32>
    %9 = vector.shape_cast %6 : vector<8x16xf32> to vector<1x8x16xf32>
    tpu.vector_store %arg6[%c0_5, %c0_6, %c0_7], %9 {strides = array<i32>} : memref<2x8x16xf32, #tpu.memory_space<vmem>>, vector<1x8x16xf32>,
    %c0_8 = arith.constant 0 : index
    %c0_9 = arith.constant 0 : index
    %10 = vector.load %arg2[%c0_8, %c0_9] : memref<16x4xf32, #tpu.memory_space<vmem>>, vector<16x4xf32>
    %c0_10 = arith.constant 0 : index
    %c0_11 = arith.constant 0 : index
    %11 = vector.load %arg3[%c0_10, %c0_11] : memref<4x16xf32, #tpu.memory_space<vmem>>, vector<4x16xf32>
    %c0_12 = arith.constant 0 : index
    %c0_13 = arith.constant 0 : index
    %12 = vector.load %arg4[%c0_12, %c0_13] : memref<1x16xf32, #tpu.memory_space<vmem>>, vector<1x16xf32>
    %c0_14 = arith.constant 0 : index
    %c0_15 = arith.constant 0 : index
    %13 = vector.load %arg5[%c0_14, %c0_15] : memref<1x16xf32, #tpu.memory_space<vmem>>, vector<1x16xf32>
    %cst_16 = arith.constant dense<0.000000e+00> : vector<16xf32>
    %14 = vector.multi_reduction <add>, %6, %cst_16 [0] : vector<8x16xf32> to vector<16xf32>
    %15 = vector.shape_cast %14 : vector<16xf32> to vector<1x16xf32>
    %16 = arith.mulf %6, %6 : vector<8x16xf32>
    %cst_17 = arith.constant dense<0.000000e+00> : vector<16xf32>
    %17 = vector.multi_reduction <add>, %16, %cst_17 [0] : vector<8x16xf32> to vector<16xf32>
    %18 = vector.shape_cast %17 : vector<16xf32> to vector<1x16xf32>
    %cst_18 = arith.constant dense<0.000000e+00> : vector<1x4xf32>
    %19 = tpu.matmul %15, %10, %cst_18 {dimension_numbers = #tpu.dot_dimension_numbers<[1], [0], [0], [1], [0, 0, 1, 1], [], []>} : vector<1x16xf32>, vector<16x4xf32>, vector<1x4xf32> -> vector<1x4xf32>
    %cst_19 = arith.constant 3.200000e+01 : f32
    %20 = vector.broadcast %cst_19 : f32 to vector<1x4xf32>
    %21 = arith.divf %19, %20 : vector<1x4xf32>
    %cst_20 = arith.constant dense<0.000000e+00> : vector<1x4xf32>
    %22 = tpu.matmul %18, %10, %cst_20 {dimension_numbers = #tpu.dot_dimension_numbers<[1], [0], [0], [1], [0, 0, 1, 1], [], []>} : vector<1x16xf32>, vector<16x4xf32>, vector<1x4xf32> -> vector<1x4xf32>
    %cst_21 = arith.constant 3.200000e+01 : f32
    %23 = vector.broadcast %cst_21 : f32 to vector<1x4xf32>
    %24 = arith.divf %22, %23 : vector<1x4xf32>
    %25 = arith.mulf %21, %21 : vector<1x4xf32>
    %26 = arith.subf %24, %25 : vector<1x4xf32>
    %cst_22 = arith.constant 9.99999974E-6 : f32
    %27 = vector.broadcast %cst_22 : f32 to vector<1x4xf32>
    %28 = arith.addf %26, %27 : vector<1x4xf32>
    %29 = math.rsqrt %28 : vector<1x4xf32>
    %cst_23 = arith.constant dense<0.000000e+00> : vector<1x16xf32>
    %30 = tpu.matmul %21, %11, %cst_23 {dimension_numbers = #tpu.dot_dimension_numbers<[1], [0], [0], [1], [0, 0, 1, 1], [], []>} : vector<1x4xf32>, vector<4x16xf32>, vector<1x16xf32> -> vector<1x16xf32>
    %cst_24 = arith.constant dense<0.000000e+00> : vector<1x16xf32>
    %31 = tpu.matmul %29, %11, %cst_24 {dimension_numbers = #tpu.dot_dimension_numbers<[1], [0], [0], [1], [0, 0, 1, 1], [], []>} : vector<1x4xf32>, vector<4x16xf32>, vector<1x16xf32> -> vector<1x16xf32>
    %32 = vector.broadcast %30 : vector<1x16xf32> to vector<8x16xf32>
    %33 = arith.subf %6, %32 : vector<8x16xf32>
    %34 = vector.broadcast %31 : vector<1x16xf32> to vector<8x16xf32>
    %35 = arith.mulf %33, %34 : vector<8x16xf32>
    %36 = vector.broadcast %12 : vector<1x16xf32> to vector<8x16xf32>
    %37 = arith.mulf %35, %36 : vector<8x16xf32>
    %38 = vector.broadcast %13 : vector<1x16xf32> to vector<8x16xf32>
    %39 = arith.addf %37, %38 : vector<8x16xf32>
    %40 = arith.negf %39 : vector<8x16xf32>
    %41 = math.exp %40 : vector<8x16xf32>
    %cst_25 = arith.constant 1.000000e+00 : f32
    %42 = vector.broadcast %cst_25 : f32 to vector<8x16xf32>
    %43 = arith.addf %42, %41 : vector<8x16xf32>
    %44 = arith.divf %42, %43 : vector<8x16xf32>
    %45 = arith.mulf %39, %44 : vector<8x16xf32>
    %c0_26 = arith.constant 0 : index
    %c0_27 = arith.constant 0 : index
    %c0_28 = arith.constant 0 : index
    %46 = vector.load %arg7[%c0_26, %c0_27, %c0_28] : memref<2x8x16xf32, #tpu.memory_space<vmem>>, vector<1x8x16xf32>
    %47 = vector.shape_cast %46 : vector<1x8x16xf32> to vector<8x16xf32>
    %48 = vector.shape_cast %45 : vector<8x16xf32> to vector<1x8x16xf32>
    tpu.vector_store %arg7[%c0_26, %c0_27, %c0_28], %48 {strides = array<i32>} : memref<2x8x16xf32, #tpu.memory_space<vmem>>, vector<1x8x16xf32>,
    %c1 = arith.constant 1 : index
    %c0_29 = arith.constant 0 : index
    %c0_30 = arith.constant 0 : index
    %49 = vector.load %arg0[%c1, %c0_29, %c0_30] : memref<2x8x16xf32, #tpu.memory_space<vmem>>, vector<1x8x16xf32>
    %50 = vector.shape_cast %49 : vector<1x8x16xf32> to vector<8x16xf32>
    %c1_31 = arith.constant 1 : index
    %c0_32 = arith.constant 0 : index
    %c0_33 = arith.constant 0 : index
    %51 = vector.load %arg1[%c1_31, %c0_32, %c0_33] : memref<2x8x16xf32, #tpu.memory_space<vmem>>, vector<1x8x16xf32>
    %52 = vector.shape_cast %51 : vector<1x8x16xf32> to vector<8x16xf32>
    %53 = arith.addf %50, %52 : vector<8x16xf32>
    %cst_34 = arith.constant 0.707106769 : f32
    %54 = vector.broadcast %cst_34 : f32 to vector<8x16xf32>
    %55 = arith.mulf %53, %54 : vector<8x16xf32>
    %c1_35 = arith.constant 1 : index
    %c0_36 = arith.constant 0 : index
    %c0_37 = arith.constant 0 : index
    %56 = vector.load %arg6[%c1_35, %c0_36, %c0_37] : memref<2x8x16xf32, #tpu.memory_space<vmem>>, vector<1x8x16xf32>
    %57 = vector.shape_cast %56 : vector<1x8x16xf32> to vector<8x16xf32>
    %58 = vector.shape_cast %55 : vector<8x16xf32> to vector<1x8x16xf32>
    tpu.vector_store %arg6[%c1_35, %c0_36, %c0_37], %58 {strides = array<i32>} : memref<2x8x16xf32, #tpu.memory_space<vmem>>, vector<1x8x16xf32>,
    %c0_38 = arith.constant 0 : index
    %c0_39 = arith.constant 0 : index
    %59 = vector.load %arg2[%c0_38, %c0_39] : memref<16x4xf32, #tpu.memory_space<vmem>>, vector<16x4xf32>
    %c0_40 = arith.constant 0 : index
    %c0_41 = arith.constant 0 : index
    %60 = vector.load %arg3[%c0_40, %c0_41] : memref<4x16xf32, #tpu.memory_space<vmem>>, vector<4x16xf32>
    %c0_42 = arith.constant 0 : index
    %c0_43 = arith.constant 0 : index
    %61 = vector.load %arg4[%c0_42, %c0_43] : memref<1x16xf32, #tpu.memory_space<vmem>>, vector<1x16xf32>
    %c0_44 = arith.constant 0 : index
    %c0_45 = arith.constant 0 : index
    %62 = vector.load %arg5[%c0_44, %c0_45] : memref<1x16xf32, #tpu.memory_space<vmem>>, vector<1x16xf32>
    %cst_46 = arith.constant dense<0.000000e+00> : vector<16xf32>
    %63 = vector.multi_reduction <add>, %55, %cst_46 [0] : vector<8x16xf32> to vector<16xf32>
    %64 = vector.shape_cast %63 : vector<16xf32> to vector<1x16xf32>
    %65 = arith.mulf %55, %55 : vector<8x16xf32>
    %cst_47 = arith.constant dense<0.000000e+00> : vector<16xf32>
    %66 = vector.multi_reduction <add>, %65, %cst_47 [0] : vector<8x16xf32> to vector<16xf32>
    %67 = vector.shape_cast %66 : vector<16xf32> to vector<1x16xf32>
    %cst_48 = arith.constant dense<0.000000e+00> : vector<1x4xf32>
    %68 = tpu.matmul %64, %59, %cst_48 {dimension_numbers = #tpu.dot_dimension_numbers<[1], [0], [0], [1], [0, 0, 1, 1], [], []>} : vector<1x16xf32>, vector<16x4xf32>, vector<1x4xf32> -> vector<1x4xf32>
    %cst_49 = arith.constant 3.200000e+01 : f32
    %69 = vector.broadcast %cst_49 : f32 to vector<1x4xf32>
    %70 = arith.divf %68, %69 : vector<1x4xf32>
    %cst_50 = arith.constant dense<0.000000e+00> : vector<1x4xf32>
    %71 = tpu.matmul %67, %59, %cst_50 {dimension_numbers = #tpu.dot_dimension_numbers<[1], [0], [0], [1], [0, 0, 1, 1], [], []>} : vector<1x16xf32>, vector<16x4xf32>, vector<1x4xf32> -> vector<1x4xf32>
    %cst_51 = arith.constant 3.200000e+01 : f32
    %72 = vector.broadcast %cst_51 : f32 to vector<1x4xf32>
    %73 = arith.divf %71, %72 : vector<1x4xf32>
    %74 = arith.mulf %70, %70 : vector<1x4xf32>
    %75 = arith.subf %73, %74 : vector<1x4xf32>
    %cst_52 = arith.constant 9.99999974E-6 : f32
    %76 = vector.broadcast %cst_52 : f32 to vector<1x4xf32>
    %77 = arith.addf %75, %76 : vector<1x4xf32>
    %78 = math.rsqrt %77 : vector<1x4xf32>
    %cst_53 = arith.constant dense<0.000000e+00> : vector<1x16xf32>
    %79 = tpu.matmul %70, %60, %cst_53 {dimension_numbers = #tpu.dot_dimension_numbers<[1], [0], [0], [1], [0, 0, 1, 1], [], []>} : vector<1x4xf32>, vector<4x16xf32>, vector<1x16xf32> -> vector<1x16xf32>
    %cst_54 = arith.constant dense<0.000000e+00> : vector<1x16xf32>
    %80 = tpu.matmul %78, %60, %cst_54 {dimension_numbers = #tpu.dot_dimension_numbers<[1], [0], [0], [1], [0, 0, 1, 1], [], []>} : vector<1x4xf32>, vector<4x16xf32>, vector<1x16xf32> -> vector<1x16xf32>
    %81 = vector.broadcast %79 : vector<1x16xf32> to vector<8x16xf32>
    %82 = arith.subf %55, %81 : vector<8x16xf32>
    %83 = vector.broadcast %80 : vector<1x16xf32> to vector<8x16xf32>
    %84 = arith.mulf %82, %83 : vector<8x16xf32>
    %85 = vector.broadcast %61 : vector<1x16xf32> to vector<8x16xf32>
    %86 = arith.mulf %84, %85 : vector<8x16xf32>
    %87 = vector.broadcast %62 : vector<1x16xf32> to vector<8x16xf32>
    %88 = arith.addf %86, %87 : vector<8x16xf32>
    %89 = arith.negf %88 : vector<8x16xf32>
    %90 = math.exp %89 : vector<8x16xf32>
    %cst_55 = arith.constant 1.000000e+00 : f32
    %91 = vector.broadcast %cst_55 : f32 to vector<8x16xf32>
    %92 = arith.addf %91, %90 : vector<8x16xf32>
    %93 = arith.divf %91, %92 : vector<8x16xf32>
    %94 = arith.mulf %88, %93 : vector<8x16xf32>
    %c1_56 = arith.constant 1 : index
    %c0_57 = arith.constant 0 : index
    %c0_58 = arith.constant 0 : index
    %95 = vector.load %arg7[%c1_56, %c0_57, %c0_58] : memref<2x8x16xf32, #tpu.memory_space<vmem>>, vector<1x8x16xf32>
    %96 = vector.shape_cast %95 : vector<1x8x16xf32> to vector<8x16xf32>
    %97 = vector.shape_cast %94 : vector<8x16xf32> to vector<1x8x16xf32>
    tpu.vector_store %arg7[%c1_56, %c0_57, %c0_58], %97 {strides = array<i32>} : memref<2x8x16xf32, #tpu.memory_space<vmem>>, vector<1x8x16xf32>,
    return
  }
}

module attributes {stable_mosaic.version = 11 : i64} {
  func.func @_conv_film_gn_kernel(%arg0: memref<2x8x432xf32, #tpu.memory_space<vmem>>, %arg1: memref<432x16xf32, #tpu.memory_space<vmem>>, %arg2: memref<1x16xf32, #tpu.memory_space<vmem>>, %arg3: memref<2x1x16xf32, #tpu.memory_space<vmem>>, %arg4: memref<2x1x16xf32, #tpu.memory_space<vmem>>, %arg5: memref<16x4xf32, #tpu.memory_space<vmem>>, %arg6: memref<4x16xf32, #tpu.memory_space<vmem>>, %arg7: memref<1x16xf32, #tpu.memory_space<vmem>>, %arg8: memref<1x16xf32, #tpu.memory_space<vmem>>, %arg9: memref<2x8x16xf32, #tpu.memory_space<vmem>>) attributes {dimension_semantics = [], scalar_prefetch = 0 : i64, scratch_operands = 0 : i64, tpu.core_type = #tpu.core_type<tc>} {
    %c0 = arith.constant 0 : index
    %c0_0 = arith.constant 0 : index
    %0 = vector.load %arg1[%c0, %c0_0] : memref<432x16xf32, #tpu.memory_space<vmem>>, vector<432x16xf32>
    %c0_1 = arith.constant 0 : index
    %c0_2 = arith.constant 0 : index
    %1 = vector.load %arg2[%c0_1, %c0_2] : memref<1x16xf32, #tpu.memory_space<vmem>>, vector<1x16xf32>
    %c0_3 = arith.constant 0 : index
    %c0_4 = arith.constant 0 : index
    %2 = vector.load %arg5[%c0_3, %c0_4] : memref<16x4xf32, #tpu.memory_space<vmem>>, vector<16x4xf32>
    %c0_5 = arith.constant 0 : index
    %c0_6 = arith.constant 0 : index
    %3 = vector.load %arg6[%c0_5, %c0_6] : memref<4x16xf32, #tpu.memory_space<vmem>>, vector<4x16xf32>
    %c0_7 = arith.constant 0 : index
    %c0_8 = arith.constant 0 : index
    %4 = vector.load %arg7[%c0_7, %c0_8] : memref<1x16xf32, #tpu.memory_space<vmem>>, vector<1x16xf32>
    %c0_9 = arith.constant 0 : index
    %c0_10 = arith.constant 0 : index
    %5 = vector.load %arg8[%c0_9, %c0_10] : memref<1x16xf32, #tpu.memory_space<vmem>>, vector<1x16xf32>
    %c0_11 = arith.constant 0 : index
    %c0_12 = arith.constant 0 : index
    %c0_13 = arith.constant 0 : index
    %6 = vector.load %arg0[%c0_11, %c0_12, %c0_13] : memref<2x8x432xf32, #tpu.memory_space<vmem>>, vector<1x8x432xf32>
    %7 = vector.shape_cast %6 : vector<1x8x432xf32> to vector<8x432xf32>
    %cst = arith.constant dense<0.000000e+00> : vector<8x16xf32>
    %8 = tpu.matmul %7, %0, %cst {dimension_numbers = #tpu.dot_dimension_numbers<[1], [0], [0], [1], [0, 0, 1, 1], [], []>} : vector<8x432xf32>, vector<432x16xf32>, vector<8x16xf32> -> vector<8x16xf32>
    %9 = vector.broadcast %1 : vector<1x16xf32> to vector<8x16xf32>
    %10 = arith.addf %8, %9 : vector<8x16xf32>
    %c0_14 = arith.constant 0 : index
    %c0_15 = arith.constant 0 : index
    %c0_16 = arith.constant 0 : index
    %11 = vector.load %arg3[%c0_14, %c0_15, %c0_16] : memref<2x1x16xf32, #tpu.memory_space<vmem>>, vector<1x1x16xf32>
    %12 = vector.shape_cast %11 : vector<1x1x16xf32> to vector<1x16xf32>
    %cst_17 = arith.constant 1.000000e+00 : f32
    %13 = vector.broadcast %cst_17 : f32 to vector<1x16xf32>
    %14 = arith.addf %12, %13 : vector<1x16xf32>
    %15 = vector.broadcast %14 : vector<1x16xf32> to vector<8x16xf32>
    %16 = arith.mulf %10, %15 : vector<8x16xf32>
    %c0_18 = arith.constant 0 : index
    %c0_19 = arith.constant 0 : index
    %c0_20 = arith.constant 0 : index
    %17 = vector.load %arg4[%c0_18, %c0_19, %c0_20] : memref<2x1x16xf32, #tpu.memory_space<vmem>>, vector<1x1x16xf32>
    %18 = vector.shape_cast %17 : vector<1x1x16xf32> to vector<1x16xf32>
    %19 = vector.broadcast %18 : vector<1x16xf32> to vector<8x16xf32>
    %20 = arith.addf %16, %19 : vector<8x16xf32>
    %cst_21 = arith.constant dense<0.000000e+00> : vector<16xf32>
    %21 = vector.multi_reduction <add>, %20, %cst_21 [0] : vector<8x16xf32> to vector<16xf32>
    %22 = vector.shape_cast %21 : vector<16xf32> to vector<1x16xf32>
    %23 = arith.mulf %20, %20 : vector<8x16xf32>
    %cst_22 = arith.constant dense<0.000000e+00> : vector<16xf32>
    %24 = vector.multi_reduction <add>, %23, %cst_22 [0] : vector<8x16xf32> to vector<16xf32>
    %25 = vector.shape_cast %24 : vector<16xf32> to vector<1x16xf32>
    %cst_23 = arith.constant dense<0.000000e+00> : vector<1x4xf32>
    %26 = tpu.matmul %22, %2, %cst_23 {dimension_numbers = #tpu.dot_dimension_numbers<[1], [0], [0], [1], [0, 0, 1, 1], [], []>} : vector<1x16xf32>, vector<16x4xf32>, vector<1x4xf32> -> vector<1x4xf32>
    %cst_24 = arith.constant 3.200000e+01 : f32
    %27 = vector.broadcast %cst_24 : f32 to vector<1x4xf32>
    %28 = arith.divf %26, %27 : vector<1x4xf32>
    %cst_25 = arith.constant dense<0.000000e+00> : vector<1x4xf32>
    %29 = tpu.matmul %25, %2, %cst_25 {dimension_numbers = #tpu.dot_dimension_numbers<[1], [0], [0], [1], [0, 0, 1, 1], [], []>} : vector<1x16xf32>, vector<16x4xf32>, vector<1x4xf32> -> vector<1x4xf32>
    %cst_26 = arith.constant 3.200000e+01 : f32
    %30 = vector.broadcast %cst_26 : f32 to vector<1x4xf32>
    %31 = arith.divf %29, %30 : vector<1x4xf32>
    %32 = arith.mulf %28, %28 : vector<1x4xf32>
    %33 = arith.subf %31, %32 : vector<1x4xf32>
    %cst_27 = arith.constant 9.99999974E-6 : f32
    %34 = vector.broadcast %cst_27 : f32 to vector<1x4xf32>
    %35 = arith.addf %33, %34 : vector<1x4xf32>
    %36 = math.rsqrt %35 : vector<1x4xf32>
    %cst_28 = arith.constant dense<0.000000e+00> : vector<1x16xf32>
    %37 = tpu.matmul %28, %3, %cst_28 {dimension_numbers = #tpu.dot_dimension_numbers<[1], [0], [0], [1], [0, 0, 1, 1], [], []>} : vector<1x4xf32>, vector<4x16xf32>, vector<1x16xf32> -> vector<1x16xf32>
    %cst_29 = arith.constant dense<0.000000e+00> : vector<1x16xf32>
    %38 = tpu.matmul %36, %3, %cst_29 {dimension_numbers = #tpu.dot_dimension_numbers<[1], [0], [0], [1], [0, 0, 1, 1], [], []>} : vector<1x4xf32>, vector<4x16xf32>, vector<1x16xf32> -> vector<1x16xf32>
    %39 = vector.broadcast %37 : vector<1x16xf32> to vector<8x16xf32>
    %40 = arith.subf %20, %39 : vector<8x16xf32>
    %41 = vector.broadcast %38 : vector<1x16xf32> to vector<8x16xf32>
    %42 = arith.mulf %40, %41 : vector<8x16xf32>
    %43 = vector.broadcast %4 : vector<1x16xf32> to vector<8x16xf32>
    %44 = arith.mulf %42, %43 : vector<8x16xf32>
    %45 = vector.broadcast %5 : vector<1x16xf32> to vector<8x16xf32>
    %46 = arith.addf %44, %45 : vector<8x16xf32>
    %47 = arith.negf %46 : vector<8x16xf32>
    %48 = math.exp %47 : vector<8x16xf32>
    %cst_30 = arith.constant 1.000000e+00 : f32
    %49 = vector.broadcast %cst_30 : f32 to vector<8x16xf32>
    %50 = arith.addf %49, %48 : vector<8x16xf32>
    %51 = arith.divf %49, %50 : vector<8x16xf32>
    %52 = arith.mulf %46, %51 : vector<8x16xf32>
    %c0_31 = arith.constant 0 : index
    %c0_32 = arith.constant 0 : index
    %c0_33 = arith.constant 0 : index
    %53 = vector.load %arg9[%c0_31, %c0_32, %c0_33] : memref<2x8x16xf32, #tpu.memory_space<vmem>>, vector<1x8x16xf32>
    %54 = vector.shape_cast %53 : vector<1x8x16xf32> to vector<8x16xf32>
    %55 = vector.shape_cast %52 : vector<8x16xf32> to vector<1x8x16xf32>
    tpu.vector_store %arg9[%c0_31, %c0_32, %c0_33], %55 {strides = array<i32>} : memref<2x8x16xf32, #tpu.memory_space<vmem>>, vector<1x8x16xf32>,
    %c1 = arith.constant 1 : index
    %c0_34 = arith.constant 0 : index
    %c0_35 = arith.constant 0 : index
    %56 = vector.load %arg0[%c1, %c0_34, %c0_35] : memref<2x8x432xf32, #tpu.memory_space<vmem>>, vector<1x8x432xf32>
    %57 = vector.shape_cast %56 : vector<1x8x432xf32> to vector<8x432xf32>
    %cst_36 = arith.constant dense<0.000000e+00> : vector<8x16xf32>
    %58 = tpu.matmul %57, %0, %cst_36 {dimension_numbers = #tpu.dot_dimension_numbers<[1], [0], [0], [1], [0, 0, 1, 1], [], []>} : vector<8x432xf32>, vector<432x16xf32>, vector<8x16xf32> -> vector<8x16xf32>
    %59 = vector.broadcast %1 : vector<1x16xf32> to vector<8x16xf32>
    %60 = arith.addf %58, %59 : vector<8x16xf32>
    %c1_37 = arith.constant 1 : index
    %c0_38 = arith.constant 0 : index
    %c0_39 = arith.constant 0 : index
    %61 = vector.load %arg3[%c1_37, %c0_38, %c0_39] : memref<2x1x16xf32, #tpu.memory_space<vmem>>, vector<1x1x16xf32>
    %62 = vector.shape_cast %61 : vector<1x1x16xf32> to vector<1x16xf32>
    %cst_40 = arith.constant 1.000000e+00 : f32
    %63 = vector.broadcast %cst_40 : f32 to vector<1x16xf32>
    %64 = arith.addf %62, %63 : vector<1x16xf32>
    %65 = vector.broadcast %64 : vector<1x16xf32> to vector<8x16xf32>
    %66 = arith.mulf %60, %65 : vector<8x16xf32>
    %c1_41 = arith.constant 1 : index
    %c0_42 = arith.constant 0 : index
    %c0_43 = arith.constant 0 : index
    %67 = vector.load %arg4[%c1_41, %c0_42, %c0_43] : memref<2x1x16xf32, #tpu.memory_space<vmem>>, vector<1x1x16xf32>
    %68 = vector.shape_cast %67 : vector<1x1x16xf32> to vector<1x16xf32>
    %69 = vector.broadcast %68 : vector<1x16xf32> to vector<8x16xf32>
    %70 = arith.addf %66, %69 : vector<8x16xf32>
    %cst_44 = arith.constant dense<0.000000e+00> : vector<16xf32>
    %71 = vector.multi_reduction <add>, %70, %cst_44 [0] : vector<8x16xf32> to vector<16xf32>
    %72 = vector.shape_cast %71 : vector<16xf32> to vector<1x16xf32>
    %73 = arith.mulf %70, %70 : vector<8x16xf32>
    %cst_45 = arith.constant dense<0.000000e+00> : vector<16xf32>
    %74 = vector.multi_reduction <add>, %73, %cst_45 [0] : vector<8x16xf32> to vector<16xf32>
    %75 = vector.shape_cast %74 : vector<16xf32> to vector<1x16xf32>
    %cst_46 = arith.constant dense<0.000000e+00> : vector<1x4xf32>
    %76 = tpu.matmul %72, %2, %cst_46 {dimension_numbers = #tpu.dot_dimension_numbers<[1], [0], [0], [1], [0, 0, 1, 1], [], []>} : vector<1x16xf32>, vector<16x4xf32>, vector<1x4xf32> -> vector<1x4xf32>
    %cst_47 = arith.constant 3.200000e+01 : f32
    %77 = vector.broadcast %cst_47 : f32 to vector<1x4xf32>
    %78 = arith.divf %76, %77 : vector<1x4xf32>
    %cst_48 = arith.constant dense<0.000000e+00> : vector<1x4xf32>
    %79 = tpu.matmul %75, %2, %cst_48 {dimension_numbers = #tpu.dot_dimension_numbers<[1], [0], [0], [1], [0, 0, 1, 1], [], []>} : vector<1x16xf32>, vector<16x4xf32>, vector<1x4xf32> -> vector<1x4xf32>
    %cst_49 = arith.constant 3.200000e+01 : f32
    %80 = vector.broadcast %cst_49 : f32 to vector<1x4xf32>
    %81 = arith.divf %79, %80 : vector<1x4xf32>
    %82 = arith.mulf %78, %78 : vector<1x4xf32>
    %83 = arith.subf %81, %82 : vector<1x4xf32>
    %cst_50 = arith.constant 9.99999974E-6 : f32
    %84 = vector.broadcast %cst_50 : f32 to vector<1x4xf32>
    %85 = arith.addf %83, %84 : vector<1x4xf32>
    %86 = math.rsqrt %85 : vector<1x4xf32>
    %cst_51 = arith.constant dense<0.000000e+00> : vector<1x16xf32>
    %87 = tpu.matmul %78, %3, %cst_51 {dimension_numbers = #tpu.dot_dimension_numbers<[1], [0], [0], [1], [0, 0, 1, 1], [], []>} : vector<1x4xf32>, vector<4x16xf32>, vector<1x16xf32> -> vector<1x16xf32>
    %cst_52 = arith.constant dense<0.000000e+00> : vector<1x16xf32>
    %88 = tpu.matmul %86, %3, %cst_52 {dimension_numbers = #tpu.dot_dimension_numbers<[1], [0], [0], [1], [0, 0, 1, 1], [], []>} : vector<1x4xf32>, vector<4x16xf32>, vector<1x16xf32> -> vector<1x16xf32>
    %89 = vector.broadcast %87 : vector<1x16xf32> to vector<8x16xf32>
    %90 = arith.subf %70, %89 : vector<8x16xf32>
    %91 = vector.broadcast %88 : vector<1x16xf32> to vector<8x16xf32>
    %92 = arith.mulf %90, %91 : vector<8x16xf32>
    %93 = vector.broadcast %4 : vector<1x16xf32> to vector<8x16xf32>
    %94 = arith.mulf %92, %93 : vector<8x16xf32>
    %95 = vector.broadcast %5 : vector<1x16xf32> to vector<8x16xf32>
    %96 = arith.addf %94, %95 : vector<8x16xf32>
    %97 = arith.negf %96 : vector<8x16xf32>
    %98 = math.exp %97 : vector<8x16xf32>
    %cst_53 = arith.constant 1.000000e+00 : f32
    %99 = vector.broadcast %cst_53 : f32 to vector<8x16xf32>
    %100 = arith.addf %99, %98 : vector<8x16xf32>
    %101 = arith.divf %99, %100 : vector<8x16xf32>
    %102 = arith.mulf %96, %101 : vector<8x16xf32>
    %c1_54 = arith.constant 1 : index
    %c0_55 = arith.constant 0 : index
    %c0_56 = arith.constant 0 : index
    %103 = vector.load %arg9[%c1_54, %c0_55, %c0_56] : memref<2x8x16xf32, #tpu.memory_space<vmem>>, vector<1x8x16xf32>
    %104 = vector.shape_cast %103 : vector<1x8x16xf32> to vector<8x16xf32>
    %105 = vector.shape_cast %102 : vector<8x16xf32> to vector<1x8x16xf32>
    tpu.vector_store %arg9[%c1_54, %c0_55, %c0_56], %105 {strides = array<i32>} : memref<2x8x16xf32, #tpu.memory_space<vmem>>, vector<1x8x16xf32>,
    return
  }
}

module attributes {stable_mosaic.version = 11 : i64} {
  func.func @kernel(%arg0: memref<16x432xf32, #tpu.memory_space<vmem>>, %arg1: memref<432x16xf32, #tpu.memory_space<vmem>>, %arg2: memref<1x16xf32, #tpu.memory_space<vmem>>, %arg3: memref<16x16xf32, #tpu.memory_space<vmem>>, %arg4: memref<16x16xf32, #tpu.memory_space<vmem>>) attributes {dimension_semantics = [], scalar_prefetch = 0 : i64, scratch_operands = 0 : i64, tpu.core_type = #tpu.core_type<tc>} {
    %c0 = arith.constant 0 : index
    %c0_0 = arith.constant 0 : index
    %0 = vector.load %arg0[%c0, %c0_0] : memref<16x432xf32, #tpu.memory_space<vmem>>, vector<16x432xf32>
    %c0_1 = arith.constant 0 : index
    %c0_2 = arith.constant 0 : index
    %1 = vector.load %arg1[%c0_1, %c0_2] : memref<432x16xf32, #tpu.memory_space<vmem>>, vector<432x16xf32>
    %cst = arith.constant dense<0.000000e+00> : vector<16x16xf32>
    %2 = tpu.matmul %0, %1, %cst {dimension_numbers = #tpu.dot_dimension_numbers<[1], [0], [0], [1], [0, 0, 1, 1], [], []>} : vector<16x432xf32>, vector<432x16xf32>, vector<16x16xf32> -> vector<16x16xf32>
    %c0_3 = arith.constant 0 : index
    %c0_4 = arith.constant 0 : index
    %3 = vector.load %arg2[%c0_3, %c0_4] : memref<1x16xf32, #tpu.memory_space<vmem>>, vector<1x16xf32>
    %4 = vector.broadcast %3 : vector<1x16xf32> to vector<16x16xf32>
    %5 = arith.addf %2, %4 : vector<16x16xf32>
    %c0_5 = arith.constant 0 : index
    %c0_6 = arith.constant 0 : index
    %6 = vector.load %arg3[%c0_5, %c0_6] : memref<16x16xf32, #tpu.memory_space<vmem>>, vector<16x16xf32>
    %7 = arith.addf %5, %6 : vector<16x16xf32>
    %cst_7 = arith.constant 0.707106769 : f32
    %8 = vector.broadcast %cst_7 : f32 to vector<16x16xf32>
    %9 = arith.mulf %7, %8 : vector<16x16xf32>
    %c0_8 = arith.constant 0 : index
    %c0_9 = arith.constant 0 : index
    %10 = vector.load %arg4[%c0_8, %c0_9] : memref<16x16xf32, #tpu.memory_space<vmem>>, vector<16x16xf32>
    tpu.vector_store %arg4[%c0_8, %c0_9], %9 {strides = array<i32>} : memref<16x16xf32, #tpu.memory_space<vmem>>, vector<16x16xf32>,
    return
  }
}

module attributes {stable_mosaic.version = 11 : i64} {
  func.func @_conv_bias_kernel(%arg0: memref<16x432xf32, #tpu.memory_space<vmem>>, %arg1: memref<432x128xf32, #tpu.memory_space<vmem>>, %arg2: memref<1x128xf32, #tpu.memory_space<vmem>>, %arg3: memref<16x128xf32, #tpu.memory_space<vmem>>) attributes {dimension_semantics = [], scalar_prefetch = 0 : i64, scratch_operands = 0 : i64, tpu.core_type = #tpu.core_type<tc>} {
    %c0 = arith.constant 0 : index
    %c0_0 = arith.constant 0 : index
    %0 = vector.load %arg0[%c0, %c0_0] : memref<16x432xf32, #tpu.memory_space<vmem>>, vector<16x432xf32>
    %c0_1 = arith.constant 0 : index
    %c0_2 = arith.constant 0 : index
    %1 = vector.load %arg1[%c0_1, %c0_2] : memref<432x128xf32, #tpu.memory_space<vmem>>, vector<432x128xf32>
    %cst = arith.constant dense<0.000000e+00> : vector<16x128xf32>
    %2 = tpu.matmul %0, %1, %cst {dimension_numbers = #tpu.dot_dimension_numbers<[1], [0], [0], [1], [0, 0, 1, 1], [], []>} : vector<16x432xf32>, vector<432x128xf32>, vector<16x128xf32> -> vector<16x128xf32>
    %c0_3 = arith.constant 0 : index
    %c0_4 = arith.constant 0 : index
    %3 = vector.load %arg2[%c0_3, %c0_4] : memref<1x128xf32, #tpu.memory_space<vmem>>, vector<1x128xf32>
    %4 = vector.broadcast %3 : vector<1x128xf32> to vector<16x128xf32>
    %5 = arith.addf %2, %4 : vector<16x128xf32>
    %c0_5 = arith.constant 0 : index
    %c0_6 = arith.constant 0 : index
    %6 = vector.load %arg3[%c0_5, %c0_6] : memref<16x128xf32, #tpu.memory_space<vmem>>, vector<16x128xf32>
    tpu.vector_store %arg3[%c0_5, %c0_6], %5 {strides = array<i32>} : memref<16x128xf32, #tpu.memory_space<vmem>>, vector<16x128xf32>,
    return
  }
}

module attributes {stable_mosaic.version = 11 : i64} {
  func.func @kernel(%arg0: memref<2x64x16xf32, #tpu.memory_space<vmem>>, %arg1: memref<2x64x8xf32, #tpu.memory_space<vmem>>, %arg2: memref<8x16xf32, #tpu.memory_space<vmem>>, %arg3: memref<1x16xf32, #tpu.memory_space<vmem>>, %arg4: memref<16x4xf32, #tpu.memory_space<vmem>>, %arg5: memref<4x16xf32, #tpu.memory_space<vmem>>, %arg6: memref<1x16xf32, #tpu.memory_space<vmem>>, %arg7: memref<1x16xf32, #tpu.memory_space<vmem>>, %arg8: memref<2x64x16xf32, #tpu.memory_space<vmem>>, %arg9: memref<2x64x16xf32, #tpu.memory_space<vmem>>) attributes {dimension_semantics = [], scalar_prefetch = 0 : i64, scratch_operands = 0 : i64, tpu.core_type = #tpu.core_type<tc>} {
    %c0 = arith.constant 0 : index
    %c0_0 = arith.constant 0 : index
    %c0_1 = arith.constant 0 : index
    %0 = vector.load %arg0[%c0, %c0_0, %c0_1] : memref<2x64x16xf32, #tpu.memory_space<vmem>>, vector<1x64x16xf32>
    %1 = vector.shape_cast %0 : vector<1x64x16xf32> to vector<64x16xf32>
    %c0_2 = arith.constant 0 : index
    %c0_3 = arith.constant 0 : index
    %c0_4 = arith.constant 0 : index
    %2 = vector.load %arg1[%c0_2, %c0_3, %c0_4] : memref<2x64x8xf32, #tpu.memory_space<vmem>>, vector<1x64x8xf32>
    %3 = vector.shape_cast %2 : vector<1x64x8xf32> to vector<64x8xf32>
    %c0_5 = arith.constant 0 : index
    %c0_6 = arith.constant 0 : index
    %4 = vector.load %arg2[%c0_5, %c0_6] : memref<8x16xf32, #tpu.memory_space<vmem>>, vector<8x16xf32>
    %cst = arith.constant dense<0.000000e+00> : vector<64x16xf32>
    %5 = tpu.matmul %3, %4, %cst {dimension_numbers = #tpu.dot_dimension_numbers<[1], [0], [0], [1], [0, 0, 1, 1], [], []>} : vector<64x8xf32>, vector<8x16xf32>, vector<64x16xf32> -> vector<64x16xf32>
    %c0_7 = arith.constant 0 : index
    %c0_8 = arith.constant 0 : index
    %6 = vector.load %arg3[%c0_7, %c0_8] : memref<1x16xf32, #tpu.memory_space<vmem>>, vector<1x16xf32>
    %7 = vector.broadcast %6 : vector<1x16xf32> to vector<64x16xf32>
    %8 = arith.addf %5, %7 : vector<64x16xf32>
    %9 = arith.addf %1, %8 : vector<64x16xf32>
    %cst_9 = arith.constant 0.707106769 : f32
    %10 = vector.broadcast %cst_9 : f32 to vector<64x16xf32>
    %11 = arith.mulf %9, %10 : vector<64x16xf32>
    %c0_10 = arith.constant 0 : index
    %c0_11 = arith.constant 0 : index
    %c0_12 = arith.constant 0 : index
    %12 = vector.load %arg8[%c0_10, %c0_11, %c0_12] : memref<2x64x16xf32, #tpu.memory_space<vmem>>, vector<1x64x16xf32>
    %13 = vector.shape_cast %12 : vector<1x64x16xf32> to vector<64x16xf32>
    %14 = vector.shape_cast %11 : vector<64x16xf32> to vector<1x64x16xf32>
    tpu.vector_store %arg8[%c0_10, %c0_11, %c0_12], %14 {strides = array<i32>} : memref<2x64x16xf32, #tpu.memory_space<vmem>>, vector<1x64x16xf32>,
    %c0_13 = arith.constant 0 : index
    %c0_14 = arith.constant 0 : index
    %15 = vector.load %arg4[%c0_13, %c0_14] : memref<16x4xf32, #tpu.memory_space<vmem>>, vector<16x4xf32>
    %c0_15 = arith.constant 0 : index
    %c0_16 = arith.constant 0 : index
    %16 = vector.load %arg5[%c0_15, %c0_16] : memref<4x16xf32, #tpu.memory_space<vmem>>, vector<4x16xf32>
    %c0_17 = arith.constant 0 : index
    %c0_18 = arith.constant 0 : index
    %17 = vector.load %arg6[%c0_17, %c0_18] : memref<1x16xf32, #tpu.memory_space<vmem>>, vector<1x16xf32>
    %c0_19 = arith.constant 0 : index
    %c0_20 = arith.constant 0 : index
    %18 = vector.load %arg7[%c0_19, %c0_20] : memref<1x16xf32, #tpu.memory_space<vmem>>, vector<1x16xf32>
    %cst_21 = arith.constant dense<0.000000e+00> : vector<16xf32>
    %19 = vector.multi_reduction <add>, %11, %cst_21 [0] : vector<64x16xf32> to vector<16xf32>
    %20 = vector.shape_cast %19 : vector<16xf32> to vector<1x16xf32>
    %21 = arith.mulf %11, %11 : vector<64x16xf32>
    %cst_22 = arith.constant dense<0.000000e+00> : vector<16xf32>
    %22 = vector.multi_reduction <add>, %21, %cst_22 [0] : vector<64x16xf32> to vector<16xf32>
    %23 = vector.shape_cast %22 : vector<16xf32> to vector<1x16xf32>
    %cst_23 = arith.constant dense<0.000000e+00> : vector<1x4xf32>
    %24 = tpu.matmul %20, %15, %cst_23 {dimension_numbers = #tpu.dot_dimension_numbers<[1], [0], [0], [1], [0, 0, 1, 1], [], []>} : vector<1x16xf32>, vector<16x4xf32>, vector<1x4xf32> -> vector<1x4xf32>
    %cst_24 = arith.constant 2.560000e+02 : f32
    %25 = vector.broadcast %cst_24 : f32 to vector<1x4xf32>
    %26 = arith.divf %24, %25 : vector<1x4xf32>
    %cst_25 = arith.constant dense<0.000000e+00> : vector<1x4xf32>
    %27 = tpu.matmul %23, %15, %cst_25 {dimension_numbers = #tpu.dot_dimension_numbers<[1], [0], [0], [1], [0, 0, 1, 1], [], []>} : vector<1x16xf32>, vector<16x4xf32>, vector<1x4xf32> -> vector<1x4xf32>
    %cst_26 = arith.constant 2.560000e+02 : f32
    %28 = vector.broadcast %cst_26 : f32 to vector<1x4xf32>
    %29 = arith.divf %27, %28 : vector<1x4xf32>
    %30 = arith.mulf %26, %26 : vector<1x4xf32>
    %31 = arith.subf %29, %30 : vector<1x4xf32>
    %cst_27 = arith.constant 9.99999974E-6 : f32
    %32 = vector.broadcast %cst_27 : f32 to vector<1x4xf32>
    %33 = arith.addf %31, %32 : vector<1x4xf32>
    %34 = math.rsqrt %33 : vector<1x4xf32>
    %cst_28 = arith.constant dense<0.000000e+00> : vector<1x16xf32>
    %35 = tpu.matmul %26, %16, %cst_28 {dimension_numbers = #tpu.dot_dimension_numbers<[1], [0], [0], [1], [0, 0, 1, 1], [], []>} : vector<1x4xf32>, vector<4x16xf32>, vector<1x16xf32> -> vector<1x16xf32>
    %cst_29 = arith.constant dense<0.000000e+00> : vector<1x16xf32>
    %36 = tpu.matmul %34, %16, %cst_29 {dimension_numbers = #tpu.dot_dimension_numbers<[1], [0], [0], [1], [0, 0, 1, 1], [], []>} : vector<1x4xf32>, vector<4x16xf32>, vector<1x16xf32> -> vector<1x16xf32>
    %37 = vector.broadcast %35 : vector<1x16xf32> to vector<64x16xf32>
    %38 = arith.subf %11, %37 : vector<64x16xf32>
    %39 = vector.broadcast %36 : vector<1x16xf32> to vector<64x16xf32>
    %40 = arith.mulf %38, %39 : vector<64x16xf32>
    %41 = vector.broadcast %17 : vector<1x16xf32> to vector<64x16xf32>
    %42 = arith.mulf %40, %41 : vector<64x16xf32>
    %43 = vector.broadcast %18 : vector<1x16xf32> to vector<64x16xf32>
    %44 = arith.addf %42, %43 : vector<64x16xf32>
    %45 = arith.negf %44 : vector<64x16xf32>
    %46 = math.exp %45 : vector<64x16xf32>
    %cst_30 = arith.constant 1.000000e+00 : f32
    %47 = vector.broadcast %cst_30 : f32 to vector<64x16xf32>
    %48 = arith.addf %47, %46 : vector<64x16xf32>
    %49 = arith.divf %47, %48 : vector<64x16xf32>
    %50 = arith.mulf %44, %49 : vector<64x16xf32>
    %c0_31 = arith.constant 0 : index
    %c0_32 = arith.constant 0 : index
    %c0_33 = arith.constant 0 : index
    %51 = vector.load %arg9[%c0_31, %c0_32, %c0_33] : memref<2x64x16xf32, #tpu.memory_space<vmem>>, vector<1x64x16xf32>
    %52 = vector.shape_cast %51 : vector<1x64x16xf32> to vector<64x16xf32>
    %53 = vector.shape_cast %50 : vector<64x16xf32> to vector<1x64x16xf32>
    tpu.vector_store %arg9[%c0_31, %c0_32, %c0_33], %53 {strides = array<i32>} : memref<2x64x16xf32, #tpu.memory_space<vmem>>, vector<1x64x16xf32>,
    %c1 = arith.constant 1 : index
    %c0_34 = arith.constant 0 : index
    %c0_35 = arith.constant 0 : index
    %54 = vector.load %arg0[%c1, %c0_34, %c0_35] : memref<2x64x16xf32, #tpu.memory_space<vmem>>, vector<1x64x16xf32>
    %55 = vector.shape_cast %54 : vector<1x64x16xf32> to vector<64x16xf32>
    %c1_36 = arith.constant 1 : index
    %c0_37 = arith.constant 0 : index
    %c0_38 = arith.constant 0 : index
    %56 = vector.load %arg1[%c1_36, %c0_37, %c0_38] : memref<2x64x8xf32, #tpu.memory_space<vmem>>, vector<1x64x8xf32>
    %57 = vector.shape_cast %56 : vector<1x64x8xf32> to vector<64x8xf32>
    %c0_39 = arith.constant 0 : index
    %c0_40 = arith.constant 0 : index
    %58 = vector.load %arg2[%c0_39, %c0_40] : memref<8x16xf32, #tpu.memory_space<vmem>>, vector<8x16xf32>
    %cst_41 = arith.constant dense<0.000000e+00> : vector<64x16xf32>
    %59 = tpu.matmul %57, %58, %cst_41 {dimension_numbers = #tpu.dot_dimension_numbers<[1], [0], [0], [1], [0, 0, 1, 1], [], []>} : vector<64x8xf32>, vector<8x16xf32>, vector<64x16xf32> -> vector<64x16xf32>
    %c0_42 = arith.constant 0 : index
    %c0_43 = arith.constant 0 : index
    %60 = vector.load %arg3[%c0_42, %c0_43] : memref<1x16xf32, #tpu.memory_space<vmem>>, vector<1x16xf32>
    %61 = vector.broadcast %60 : vector<1x16xf32> to vector<64x16xf32>
    %62 = arith.addf %59, %61 : vector<64x16xf32>
    %63 = arith.addf %55, %62 : vector<64x16xf32>
    %cst_44 = arith.constant 0.707106769 : f32
    %64 = vector.broadcast %cst_44 : f32 to vector<64x16xf32>
    %65 = arith.mulf %63, %64 : vector<64x16xf32>
    %c1_45 = arith.constant 1 : index
    %c0_46 = arith.constant 0 : index
    %c0_47 = arith.constant 0 : index
    %66 = vector.load %arg8[%c1_45, %c0_46, %c0_47] : memref<2x64x16xf32, #tpu.memory_space<vmem>>, vector<1x64x16xf32>
    %67 = vector.shape_cast %66 : vector<1x64x16xf32> to vector<64x16xf32>
    %68 = vector.shape_cast %65 : vector<64x16xf32> to vector<1x64x16xf32>
    tpu.vector_store %arg8[%c1_45, %c0_46, %c0_47], %68 {strides = array<i32>} : memref<2x64x16xf32, #tpu.memory_space<vmem>>, vector<1x64x16xf32>,
    %c0_48 = arith.constant 0 : index
    %c0_49 = arith.constant 0 : index
    %69 = vector.load %arg4[%c0_48, %c0_49] : memref<16x4xf32, #tpu.memory_space<vmem>>, vector<16x4xf32>
    %c0_50 = arith.constant 0 : index
    %c0_51 = arith.constant 0 : index
    %70 = vector.load %arg5[%c0_50, %c0_51] : memref<4x16xf32, #tpu.memory_space<vmem>>, vector<4x16xf32>
    %c0_52 = arith.constant 0 : index
    %c0_53 = arith.constant 0 : index
    %71 = vector.load %arg6[%c0_52, %c0_53] : memref<1x16xf32, #tpu.memory_space<vmem>>, vector<1x16xf32>
    %c0_54 = arith.constant 0 : index
    %c0_55 = arith.constant 0 : index
    %72 = vector.load %arg7[%c0_54, %c0_55] : memref<1x16xf32, #tpu.memory_space<vmem>>, vector<1x16xf32>
    %cst_56 = arith.constant dense<0.000000e+00> : vector<16xf32>
    %73 = vector.multi_reduction <add>, %65, %cst_56 [0] : vector<64x16xf32> to vector<16xf32>
    %74 = vector.shape_cast %73 : vector<16xf32> to vector<1x16xf32>
    %75 = arith.mulf %65, %65 : vector<64x16xf32>
    %cst_57 = arith.constant dense<0.000000e+00> : vector<16xf32>
    %76 = vector.multi_reduction <add>, %75, %cst_57 [0] : vector<64x16xf32> to vector<16xf32>
    %77 = vector.shape_cast %76 : vector<16xf32> to vector<1x16xf32>
    %cst_58 = arith.constant dense<0.000000e+00> : vector<1x4xf32>
    %78 = tpu.matmul %74, %69, %cst_58 {dimension_numbers = #tpu.dot_dimension_numbers<[1], [0], [0], [1], [0, 0, 1, 1], [], []>} : vector<1x16xf32>, vector<16x4xf32>, vector<1x4xf32> -> vector<1x4xf32>
    %cst_59 = arith.constant 2.560000e+02 : f32
    %79 = vector.broadcast %cst_59 : f32 to vector<1x4xf32>
    %80 = arith.divf %78, %79 : vector<1x4xf32>
    %cst_60 = arith.constant dense<0.000000e+00> : vector<1x4xf32>
    %81 = tpu.matmul %77, %69, %cst_60 {dimension_numbers = #tpu.dot_dimension_numbers<[1], [0], [0], [1], [0, 0, 1, 1], [], []>} : vector<1x16xf32>, vector<16x4xf32>, vector<1x4xf32> -> vector<1x4xf32>
    %cst_61 = arith.constant 2.560000e+02 : f32
    %82 = vector.broadcast %cst_61 : f32 to vector<1x4xf32>
    %83 = arith.divf %81, %82 : vector<1x4xf32>
    %84 = arith.mulf %80, %80 : vector<1x4xf32>
    %85 = arith.subf %83, %84 : vector<1x4xf32>
    %cst_62 = arith.constant 9.99999974E-6 : f32
    %86 = vector.broadcast %cst_62 : f32 to vector<1x4xf32>
    %87 = arith.addf %85, %86 : vector<1x4xf32>
    %88 = math.rsqrt %87 : vector<1x4xf32>
    %cst_63 = arith.constant dense<0.000000e+00> : vector<1x16xf32>
    %89 = tpu.matmul %80, %70, %cst_63 {dimension_numbers = #tpu.dot_dimension_numbers<[1], [0], [0], [1], [0, 0, 1, 1], [], []>} : vector<1x4xf32>, vector<4x16xf32>, vector<1x16xf32> -> vector<1x16xf32>
    %cst_64 = arith.constant dense<0.000000e+00> : vector<1x16xf32>
    %90 = tpu.matmul %88, %70, %cst_64 {dimension_numbers = #tpu.dot_dimension_numbers<[1], [0], [0], [1], [0, 0, 1, 1], [], []>} : vector<1x4xf32>, vector<4x16xf32>, vector<1x16xf32> -> vector<1x16xf32>
    %91 = vector.broadcast %89 : vector<1x16xf32> to vector<64x16xf32>
    %92 = arith.subf %65, %91 : vector<64x16xf32>
    %93 = vector.broadcast %90 : vector<1x16xf32> to vector<64x16xf32>
    %94 = arith.mulf %92, %93 : vector<64x16xf32>
    %95 = vector.broadcast %71 : vector<1x16xf32> to vector<64x16xf32>
    %96 = arith.mulf %94, %95 : vector<64x16xf32>
    %97 = vector.broadcast %72 : vector<1x16xf32> to vector<64x16xf32>
    %98 = arith.addf %96, %97 : vector<64x16xf32>
    %99 = arith.negf %98 : vector<64x16xf32>
    %100 = math.exp %99 : vector<64x16xf32>
    %cst_65 = arith.constant 1.000000e+00 : f32
    %101 = vector.broadcast %cst_65 : f32 to vector<64x16xf32>
    %102 = arith.addf %101, %100 : vector<64x16xf32>
    %103 = arith.divf %101, %102 : vector<64x16xf32>
    %104 = arith.mulf %98, %103 : vector<64x16xf32>
    %c1_66 = arith.constant 1 : index
    %c0_67 = arith.constant 0 : index
    %c0_68 = arith.constant 0 : index
    %105 = vector.load %arg9[%c1_66, %c0_67, %c0_68] : memref<2x64x16xf32, #tpu.memory_space<vmem>>, vector<1x64x16xf32>
    %106 = vector.shape_cast %105 : vector<1x64x16xf32> to vector<64x16xf32>
    %107 = vector.shape_cast %104 : vector<64x16xf32> to vector<1x64x16xf32>
    tpu.vector_store %arg9[%c1_66, %c0_67, %c0_68], %107 {strides = array<i32>} : memref<2x64x16xf32, #tpu.memory_space<vmem>>, vector<1x64x16xf32>,
    return
  }
}

module attributes {stable_mosaic.version = 11 : i64} {
  func.func @_conv_film_gn_kernel(%arg0: memref<2x64x432xf32, #tpu.memory_space<vmem>>, %arg1: memref<432x8xf32, #tpu.memory_space<vmem>>, %arg2: memref<1x8xf32, #tpu.memory_space<vmem>>, %arg3: memref<2x1x8xf32, #tpu.memory_space<vmem>>, %arg4: memref<2x1x8xf32, #tpu.memory_space<vmem>>, %arg5: memref<8x2xf32, #tpu.memory_space<vmem>>, %arg6: memref<2x8xf32, #tpu.memory_space<vmem>>, %arg7: memref<1x8xf32, #tpu.memory_space<vmem>>, %arg8: memref<1x8xf32, #tpu.memory_space<vmem>>, %arg9: memref<2x64x8xf32, #tpu.memory_space<vmem>>) attributes {dimension_semantics = [], scalar_prefetch = 0 : i64, scratch_operands = 0 : i64, tpu.core_type = #tpu.core_type<tc>} {
    %c0 = arith.constant 0 : index
    %c0_0 = arith.constant 0 : index
    %0 = vector.load %arg1[%c0, %c0_0] : memref<432x8xf32, #tpu.memory_space<vmem>>, vector<432x8xf32>
    %c0_1 = arith.constant 0 : index
    %c0_2 = arith.constant 0 : index
    %1 = vector.load %arg2[%c0_1, %c0_2] : memref<1x8xf32, #tpu.memory_space<vmem>>, vector<1x8xf32>
    %c0_3 = arith.constant 0 : index
    %c0_4 = arith.constant 0 : index
    %2 = vector.load %arg5[%c0_3, %c0_4] : memref<8x2xf32, #tpu.memory_space<vmem>>, vector<8x2xf32>
    %c0_5 = arith.constant 0 : index
    %c0_6 = arith.constant 0 : index
    %3 = vector.load %arg6[%c0_5, %c0_6] : memref<2x8xf32, #tpu.memory_space<vmem>>, vector<2x8xf32>
    %c0_7 = arith.constant 0 : index
    %c0_8 = arith.constant 0 : index
    %4 = vector.load %arg7[%c0_7, %c0_8] : memref<1x8xf32, #tpu.memory_space<vmem>>, vector<1x8xf32>
    %c0_9 = arith.constant 0 : index
    %c0_10 = arith.constant 0 : index
    %5 = vector.load %arg8[%c0_9, %c0_10] : memref<1x8xf32, #tpu.memory_space<vmem>>, vector<1x8xf32>
    %c0_11 = arith.constant 0 : index
    %c0_12 = arith.constant 0 : index
    %c0_13 = arith.constant 0 : index
    %6 = vector.load %arg0[%c0_11, %c0_12, %c0_13] : memref<2x64x432xf32, #tpu.memory_space<vmem>>, vector<1x64x432xf32>
    %7 = vector.shape_cast %6 : vector<1x64x432xf32> to vector<64x432xf32>
    %cst = arith.constant dense<0.000000e+00> : vector<64x8xf32>
    %8 = tpu.matmul %7, %0, %cst {dimension_numbers = #tpu.dot_dimension_numbers<[1], [0], [0], [1], [0, 0, 1, 1], [], []>} : vector<64x432xf32>, vector<432x8xf32>, vector<64x8xf32> -> vector<64x8xf32>
    %9 = vector.broadcast %1 : vector<1x8xf32> to vector<64x8xf32>
    %10 = arith.addf %8, %9 : vector<64x8xf32>
    %c0_14 = arith.constant 0 : index
    %c0_15 = arith.constant 0 : index
    %c0_16 = arith.constant 0 : index
    %11 = vector.load %arg3[%c0_14, %c0_15, %c0_16] : memref<2x1x8xf32, #tpu.memory_space<vmem>>, vector<1x1x8xf32>
    %12 = vector.shape_cast %11 : vector<1x1x8xf32> to vector<1x8xf32>
    %cst_17 = arith.constant 1.000000e+00 : f32
    %13 = vector.broadcast %cst_17 : f32 to vector<1x8xf32>
    %14 = arith.addf %12, %13 : vector<1x8xf32>
    %15 = vector.broadcast %14 : vector<1x8xf32> to vector<64x8xf32>
    %16 = arith.mulf %10, %15 : vector<64x8xf32>
    %c0_18 = arith.constant 0 : index
    %c0_19 = arith.constant 0 : index
    %c0_20 = arith.constant 0 : index
    %17 = vector.load %arg4[%c0_18, %c0_19, %c0_20] : memref<2x1x8xf32, #tpu.memory_space<vmem>>, vector<1x1x8xf32>
    %18 = vector.shape_cast %17 : vector<1x1x8xf32> to vector<1x8xf32>
    %19 = vector.broadcast %18 : vector<1x8xf32> to vector<64x8xf32>
    %20 = arith.addf %16, %19 : vector<64x8xf32>
    %cst_21 = arith.constant dense<0.000000e+00> : vector<8xf32>
    %21 = vector.multi_reduction <add>, %20, %cst_21 [0] : vector<64x8xf32> to vector<8xf32>
    %22 = vector.shape_cast %21 : vector<8xf32> to vector<1x8xf32>
    %23 = arith.mulf %20, %20 : vector<64x8xf32>
    %cst_22 = arith.constant dense<0.000000e+00> : vector<8xf32>
    %24 = vector.multi_reduction <add>, %23, %cst_22 [0] : vector<64x8xf32> to vector<8xf32>
    %25 = vector.shape_cast %24 : vector<8xf32> to vector<1x8xf32>
    %cst_23 = arith.constant dense<0.000000e+00> : vector<1x2xf32>
    %26 = tpu.matmul %22, %2, %cst_23 {dimension_numbers = #tpu.dot_dimension_numbers<[1], [0], [0], [1], [0, 0, 1, 1], [], []>} : vector<1x8xf32>, vector<8x2xf32>, vector<1x2xf32> -> vector<1x2xf32>
    %cst_24 = arith.constant 2.560000e+02 : f32
    %27 = vector.broadcast %cst_24 : f32 to vector<1x2xf32>
    %28 = arith.divf %26, %27 : vector<1x2xf32>
    %cst_25 = arith.constant dense<0.000000e+00> : vector<1x2xf32>
    %29 = tpu.matmul %25, %2, %cst_25 {dimension_numbers = #tpu.dot_dimension_numbers<[1], [0], [0], [1], [0, 0, 1, 1], [], []>} : vector<1x8xf32>, vector<8x2xf32>, vector<1x2xf32> -> vector<1x2xf32>
    %cst_26 = arith.constant 2.560000e+02 : f32
    %30 = vector.broadcast %cst_26 : f32 to vector<1x2xf32>
    %31 = arith.divf %29, %30 : vector<1x2xf32>
    %32 = arith.mulf %28, %28 : vector<1x2xf32>
    %33 = arith.subf %31, %32 : vector<1x2xf32>
    %cst_27 = arith.constant 9.99999974E-6 : f32
    %34 = vector.broadcast %cst_27 : f32 to vector<1x2xf32>
    %35 = arith.addf %33, %34 : vector<1x2xf32>
    %36 = math.rsqrt %35 : vector<1x2xf32>
    %cst_28 = arith.constant dense<0.000000e+00> : vector<1x8xf32>
    %37 = tpu.matmul %28, %3, %cst_28 {dimension_numbers = #tpu.dot_dimension_numbers<[1], [0], [0], [1], [0, 0, 1, 1], [], []>} : vector<1x2xf32>, vector<2x8xf32>, vector<1x8xf32> -> vector<1x8xf32>
    %cst_29 = arith.constant dense<0.000000e+00> : vector<1x8xf32>
    %38 = tpu.matmul %36, %3, %cst_29 {dimension_numbers = #tpu.dot_dimension_numbers<[1], [0], [0], [1], [0, 0, 1, 1], [], []>} : vector<1x2xf32>, vector<2x8xf32>, vector<1x8xf32> -> vector<1x8xf32>
    %39 = vector.broadcast %37 : vector<1x8xf32> to vector<64x8xf32>
    %40 = arith.subf %20, %39 : vector<64x8xf32>
    %41 = vector.broadcast %38 : vector<1x8xf32> to vector<64x8xf32>
    %42 = arith.mulf %40, %41 : vector<64x8xf32>
    %43 = vector.broadcast %4 : vector<1x8xf32> to vector<64x8xf32>
    %44 = arith.mulf %42, %43 : vector<64x8xf32>
    %45 = vector.broadcast %5 : vector<1x8xf32> to vector<64x8xf32>
    %46 = arith.addf %44, %45 : vector<64x8xf32>
    %47 = arith.negf %46 : vector<64x8xf32>
    %48 = math.exp %47 : vector<64x8xf32>
    %cst_30 = arith.constant 1.000000e+00 : f32
    %49 = vector.broadcast %cst_30 : f32 to vector<64x8xf32>
    %50 = arith.addf %49, %48 : vector<64x8xf32>
    %51 = arith.divf %49, %50 : vector<64x8xf32>
    %52 = arith.mulf %46, %51 : vector<64x8xf32>
    %c0_31 = arith.constant 0 : index
    %c0_32 = arith.constant 0 : index
    %c0_33 = arith.constant 0 : index
    %53 = vector.load %arg9[%c0_31, %c0_32, %c0_33] : memref<2x64x8xf32, #tpu.memory_space<vmem>>, vector<1x64x8xf32>
    %54 = vector.shape_cast %53 : vector<1x64x8xf32> to vector<64x8xf32>
    %55 = vector.shape_cast %52 : vector<64x8xf32> to vector<1x64x8xf32>
    tpu.vector_store %arg9[%c0_31, %c0_32, %c0_33], %55 {strides = array<i32>} : memref<2x64x8xf32, #tpu.memory_space<vmem>>, vector<1x64x8xf32>,
    %c1 = arith.constant 1 : index
    %c0_34 = arith.constant 0 : index
    %c0_35 = arith.constant 0 : index
    %56 = vector.load %arg0[%c1, %c0_34, %c0_35] : memref<2x64x432xf32, #tpu.memory_space<vmem>>, vector<1x64x432xf32>
    %57 = vector.shape_cast %56 : vector<1x64x432xf32> to vector<64x432xf32>
    %cst_36 = arith.constant dense<0.000000e+00> : vector<64x8xf32>
    %58 = tpu.matmul %57, %0, %cst_36 {dimension_numbers = #tpu.dot_dimension_numbers<[1], [0], [0], [1], [0, 0, 1, 1], [], []>} : vector<64x432xf32>, vector<432x8xf32>, vector<64x8xf32> -> vector<64x8xf32>
    %59 = vector.broadcast %1 : vector<1x8xf32> to vector<64x8xf32>
    %60 = arith.addf %58, %59 : vector<64x8xf32>
    %c1_37 = arith.constant 1 : index
    %c0_38 = arith.constant 0 : index
    %c0_39 = arith.constant 0 : index
    %61 = vector.load %arg3[%c1_37, %c0_38, %c0_39] : memref<2x1x8xf32, #tpu.memory_space<vmem>>, vector<1x1x8xf32>
    %62 = vector.shape_cast %61 : vector<1x1x8xf32> to vector<1x8xf32>
    %cst_40 = arith.constant 1.000000e+00 : f32
    %63 = vector.broadcast %cst_40 : f32 to vector<1x8xf32>
    %64 = arith.addf %62, %63 : vector<1x8xf32>
    %65 = vector.broadcast %64 : vector<1x8xf32> to vector<64x8xf32>
    %66 = arith.mulf %60, %65 : vector<64x8xf32>
    %c1_41 = arith.constant 1 : index
    %c0_42 = arith.constant 0 : index
    %c0_43 = arith.constant 0 : index
    %67 = vector.load %arg4[%c1_41, %c0_42, %c0_43] : memref<2x1x8xf32, #tpu.memory_space<vmem>>, vector<1x1x8xf32>
    %68 = vector.shape_cast %67 : vector<1x1x8xf32> to vector<1x8xf32>
    %69 = vector.broadcast %68 : vector<1x8xf32> to vector<64x8xf32>
    %70 = arith.addf %66, %69 : vector<64x8xf32>
    %cst_44 = arith.constant dense<0.000000e+00> : vector<8xf32>
    %71 = vector.multi_reduction <add>, %70, %cst_44 [0] : vector<64x8xf32> to vector<8xf32>
    %72 = vector.shape_cast %71 : vector<8xf32> to vector<1x8xf32>
    %73 = arith.mulf %70, %70 : vector<64x8xf32>
    %cst_45 = arith.constant dense<0.000000e+00> : vector<8xf32>
    %74 = vector.multi_reduction <add>, %73, %cst_45 [0] : vector<64x8xf32> to vector<8xf32>
    %75 = vector.shape_cast %74 : vector<8xf32> to vector<1x8xf32>
    %cst_46 = arith.constant dense<0.000000e+00> : vector<1x2xf32>
    %76 = tpu.matmul %72, %2, %cst_46 {dimension_numbers = #tpu.dot_dimension_numbers<[1], [0], [0], [1], [0, 0, 1, 1], [], []>} : vector<1x8xf32>, vector<8x2xf32>, vector<1x2xf32> -> vector<1x2xf32>
    %cst_47 = arith.constant 2.560000e+02 : f32
    %77 = vector.broadcast %cst_47 : f32 to vector<1x2xf32>
    %78 = arith.divf %76, %77 : vector<1x2xf32>
    %cst_48 = arith.constant dense<0.000000e+00> : vector<1x2xf32>
    %79 = tpu.matmul %75, %2, %cst_48 {dimension_numbers = #tpu.dot_dimension_numbers<[1], [0], [0], [1], [0, 0, 1, 1], [], []>} : vector<1x8xf32>, vector<8x2xf32>, vector<1x2xf32> -> vector<1x2xf32>
    %cst_49 = arith.constant 2.560000e+02 : f32
    %80 = vector.broadcast %cst_49 : f32 to vector<1x2xf32>
    %81 = arith.divf %79, %80 : vector<1x2xf32>
    %82 = arith.mulf %78, %78 : vector<1x2xf32>
    %83 = arith.subf %81, %82 : vector<1x2xf32>
    %cst_50 = arith.constant 9.99999974E-6 : f32
    %84 = vector.broadcast %cst_50 : f32 to vector<1x2xf32>
    %85 = arith.addf %83, %84 : vector<1x2xf32>
    %86 = math.rsqrt %85 : vector<1x2xf32>
    %cst_51 = arith.constant dense<0.000000e+00> : vector<1x8xf32>
    %87 = tpu.matmul %78, %3, %cst_51 {dimension_numbers = #tpu.dot_dimension_numbers<[1], [0], [0], [1], [0, 0, 1, 1], [], []>} : vector<1x2xf32>, vector<2x8xf32>, vector<1x8xf32> -> vector<1x8xf32>
    %cst_52 = arith.constant dense<0.000000e+00> : vector<1x8xf32>
    %88 = tpu.matmul %86, %3, %cst_52 {dimension_numbers = #tpu.dot_dimension_numbers<[1], [0], [0], [1], [0, 0, 1, 1], [], []>} : vector<1x2xf32>, vector<2x8xf32>, vector<1x8xf32> -> vector<1x8xf32>
    %89 = vector.broadcast %87 : vector<1x8xf32> to vector<64x8xf32>
    %90 = arith.subf %70, %89 : vector<64x8xf32>
    %91 = vector.broadcast %88 : vector<1x8xf32> to vector<64x8xf32>
    %92 = arith.mulf %90, %91 : vector<64x8xf32>
    %93 = vector.broadcast %4 : vector<1x8xf32> to vector<64x8xf32>
    %94 = arith.mulf %92, %93 : vector<64x8xf32>
    %95 = vector.broadcast %5 : vector<1x8xf32> to vector<64x8xf32>
    %96 = arith.addf %94, %95 : vector<64x8xf32>
    %97 = arith.negf %96 : vector<64x8xf32>
    %98 = math.exp %97 : vector<64x8xf32>
    %cst_53 = arith.constant 1.000000e+00 : f32
    %99 = vector.broadcast %cst_53 : f32 to vector<64x8xf32>
    %100 = arith.addf %99, %98 : vector<64x8xf32>
    %101 = arith.divf %99, %100 : vector<64x8xf32>
    %102 = arith.mulf %96, %101 : vector<64x8xf32>
    %c1_54 = arith.constant 1 : index
    %c0_55 = arith.constant 0 : index
    %c0_56 = arith.constant 0 : index
    %103 = vector.load %arg9[%c1_54, %c0_55, %c0_56] : memref<2x64x8xf32, #tpu.memory_space<vmem>>, vector<1x64x8xf32>
    %104 = vector.shape_cast %103 : vector<1x64x8xf32> to vector<64x8xf32>
    %105 = vector.shape_cast %102 : vector<64x8xf32> to vector<1x64x8xf32>
    tpu.vector_store %arg9[%c1_54, %c0_55, %c0_56], %105 {strides = array<i32>} : memref<2x64x8xf32, #tpu.memory_space<vmem>>, vector<1x64x8xf32>,
    return
  }
}

module attributes {stable_mosaic.version = 11 : i64} {
  func.func @kernel(%arg0: memref<128x216xf32, #tpu.memory_space<vmem>>, %arg1: memref<216x8xf32, #tpu.memory_space<vmem>>, %arg2: memref<1x8xf32, #tpu.memory_space<vmem>>, %arg3: memref<128x16xf32, #tpu.memory_space<vmem>>, %arg4: memref<16x8xf32, #tpu.memory_space<vmem>>, %arg5: memref<1x8xf32, #tpu.memory_space<vmem>>, %arg6: memref<128x8xf32, #tpu.memory_space<vmem>>) attributes {dimension_semantics = [], scalar_prefetch = 0 : i64, scratch_operands = 0 : i64, tpu.core_type = #tpu.core_type<tc>} {
    %c0 = arith.constant 0 : index
    %c0_0 = arith.constant 0 : index
    %0 = vector.load %arg0[%c0, %c0_0] : memref<128x216xf32, #tpu.memory_space<vmem>>, vector<128x216xf32>
    %c0_1 = arith.constant 0 : index
    %c0_2 = arith.constant 0 : index
    %1 = vector.load %arg1[%c0_1, %c0_2] : memref<216x8xf32, #tpu.memory_space<vmem>>, vector<216x8xf32>
    %cst = arith.constant dense<0.000000e+00> : vector<128x8xf32>
    %2 = tpu.matmul %0, %1, %cst {dimension_numbers = #tpu.dot_dimension_numbers<[1], [0], [0], [1], [0, 0, 1, 1], [], []>} : vector<128x216xf32>, vector<216x8xf32>, vector<128x8xf32> -> vector<128x8xf32>
    %c0_3 = arith.constant 0 : index
    %c0_4 = arith.constant 0 : index
    %3 = vector.load %arg2[%c0_3, %c0_4] : memref<1x8xf32, #tpu.memory_space<vmem>>, vector<1x8xf32>
    %4 = vector.broadcast %3 : vector<1x8xf32> to vector<128x8xf32>
    %5 = arith.addf %2, %4 : vector<128x8xf32>
    %c0_5 = arith.constant 0 : index
    %c0_6 = arith.constant 0 : index
    %6 = vector.load %arg3[%c0_5, %c0_6] : memref<128x16xf32, #tpu.memory_space<vmem>>, vector<128x16xf32>
    %c0_7 = arith.constant 0 : index
    %c0_8 = arith.constant 0 : index
    %7 = vector.load %arg4[%c0_7, %c0_8] : memref<16x8xf32, #tpu.memory_space<vmem>>, vector<16x8xf32>
    %cst_9 = arith.constant dense<0.000000e+00> : vector<128x8xf32>
    %8 = tpu.matmul %6, %7, %cst_9 {dimension_numbers = #tpu.dot_dimension_numbers<[1], [0], [0], [1], [0, 0, 1, 1], [], []>} : vector<128x16xf32>, vector<16x8xf32>, vector<128x8xf32> -> vector<128x8xf32>
    %c0_10 = arith.constant 0 : index
    %c0_11 = arith.constant 0 : index
    %9 = vector.load %arg5[%c0_10, %c0_11] : memref<1x8xf32, #tpu.memory_space<vmem>>, vector<1x8xf32>
    %10 = vector.broadcast %9 : vector<1x8xf32> to vector<128x8xf32>
    %11 = arith.addf %8, %10 : vector<128x8xf32>
    %12 = arith.addf %5, %11 : vector<128x8xf32>
    %cst_12 = arith.constant 0.707106769 : f32
    %13 = vector.broadcast %cst_12 : f32 to vector<128x8xf32>
    %14 = arith.mulf %12, %13 : vector<128x8xf32>
    %c0_13 = arith.constant 0 : index
    %c0_14 = arith.constant 0 : index
    %15 = vector.load %arg6[%c0_13, %c0_14] : memref<128x8xf32, #tpu.memory_space<vmem>>, vector<128x8xf32>
    tpu.vector_store %arg6[%c0_13, %c0_14], %14 {strides = array<i32>} : memref<128x8xf32, #tpu.memory_space<vmem>>, vector<128x8xf32>,
    return
  }
}

module attributes {stable_mosaic.version = 11 : i64} {
  func.func @_conv_bias_kernel(%arg0: memref<128x216xf32, #tpu.memory_space<vmem>>, %arg1: memref<216x64xf32, #tpu.memory_space<vmem>>, %arg2: memref<1x64xf32, #tpu.memory_space<vmem>>, %arg3: memref<128x64xf32, #tpu.memory_space<vmem>>) attributes {dimension_semantics = [], scalar_prefetch = 0 : i64, scratch_operands = 0 : i64, tpu.core_type = #tpu.core_type<tc>} {
    %c0 = arith.constant 0 : index
    %c0_0 = arith.constant 0 : index
    %0 = vector.load %arg0[%c0, %c0_0] : memref<128x216xf32, #tpu.memory_space<vmem>>, vector<128x216xf32>
    %c0_1 = arith.constant 0 : index
    %c0_2 = arith.constant 0 : index
    %1 = vector.load %arg1[%c0_1, %c0_2] : memref<216x64xf32, #tpu.memory_space<vmem>>, vector<216x64xf32>
    %cst = arith.constant dense<0.000000e+00> : vector<128x64xf32>
    %2 = tpu.matmul %0, %1, %cst {dimension_numbers = #tpu.dot_dimension_numbers<[1], [0], [0], [1], [0, 0, 1, 1], [], []>} : vector<128x216xf32>, vector<216x64xf32>, vector<128x64xf32> -> vector<128x64xf32>
    %c0_3 = arith.constant 0 : index
    %c0_4 = arith.constant 0 : index
    %3 = vector.load %arg2[%c0_3, %c0_4] : memref<1x64xf32, #tpu.memory_space<vmem>>, vector<1x64xf32>
    %4 = vector.broadcast %3 : vector<1x64xf32> to vector<128x64xf32>
    %5 = arith.addf %2, %4 : vector<128x64xf32>
    %c0_5 = arith.constant 0 : index
    %c0_6 = arith.constant 0 : index
    %6 = vector.load %arg3[%c0_5, %c0_6] : memref<128x64xf32, #tpu.memory_space<vmem>>, vector<128x64xf32>
    tpu.vector_store %arg3[%c0_5, %c0_6], %5 {strides = array<i32>} : memref<128x64xf32, #tpu.memory_space<vmem>>, vector<128x64xf32>,
    return
  }
}

module attributes {stable_mosaic.version = 11 : i64} {
  func.func @kernel(%arg0: memref<2x512x8xf32, #tpu.memory_space<vmem>>, %arg1: memref<2x512x8xf32, #tpu.memory_space<vmem>>, %arg2: memref<2x512x8xf32, #tpu.memory_space<vmem>>) attributes {dimension_semantics = [], scalar_prefetch = 0 : i64, scratch_operands = 0 : i64, tpu.core_type = #tpu.core_type<tc>} {
    %c0 = arith.constant 0 : index
    %c0_0 = arith.constant 0 : index
    %c0_1 = arith.constant 0 : index
    %0 = vector.load %arg0[%c0, %c0_0, %c0_1] : memref<2x512x8xf32, #tpu.memory_space<vmem>>, vector<1x512x8xf32>
    %1 = vector.shape_cast %0 : vector<1x512x8xf32> to vector<512x8xf32>
    %c0_2 = arith.constant 0 : index
    %c0_3 = arith.constant 0 : index
    %c0_4 = arith.constant 0 : index
    %2 = vector.load %arg1[%c0_2, %c0_3, %c0_4] : memref<2x512x8xf32, #tpu.memory_space<vmem>>, vector<1x512x8xf32>
    %3 = vector.shape_cast %2 : vector<1x512x8xf32> to vector<512x8xf32>
    %4 = arith.addf %1, %3 : vector<512x8xf32>
    %cst = arith.constant 0.707106769 : f32
    %5 = vector.broadcast %cst : f32 to vector<512x8xf32>
    %6 = arith.mulf %4, %5 : vector<512x8xf32>
    %c0_5 = arith.constant 0 : index
    %c0_6 = arith.constant 0 : index
    %c0_7 = arith.constant 0 : index
    %7 = vector.load %arg2[%c0_5, %c0_6, %c0_7] : memref<2x512x8xf32, #tpu.memory_space<vmem>>, vector<1x512x8xf32>
    %8 = vector.shape_cast %7 : vector<1x512x8xf32> to vector<512x8xf32>
    %9 = vector.shape_cast %6 : vector<512x8xf32> to vector<1x512x8xf32>
    tpu.vector_store %arg2[%c0_5, %c0_6, %c0_7], %9 {strides = array<i32>} : memref<2x512x8xf32, #tpu.memory_space<vmem>>, vector<1x512x8xf32>,
    %c1 = arith.constant 1 : index
    %c0_8 = arith.constant 0 : index
    %c0_9 = arith.constant 0 : index
    %10 = vector.load %arg0[%c1, %c0_8, %c0_9] : memref<2x512x8xf32, #tpu.memory_space<vmem>>, vector<1x512x8xf32>
    %11 = vector.shape_cast %10 : vector<1x512x8xf32> to vector<512x8xf32>
    %c1_10 = arith.constant 1 : index
    %c0_11 = arith.constant 0 : index
    %c0_12 = arith.constant 0 : index
    %12 = vector.load %arg1[%c1_10, %c0_11, %c0_12] : memref<2x512x8xf32, #tpu.memory_space<vmem>>, vector<1x512x8xf32>
    %13 = vector.shape_cast %12 : vector<1x512x8xf32> to vector<512x8xf32>
    %14 = arith.addf %11, %13 : vector<512x8xf32>
    %cst_13 = arith.constant 0.707106769 : f32
    %15 = vector.broadcast %cst_13 : f32 to vector<512x8xf32>
    %16 = arith.mulf %14, %15 : vector<512x8xf32>
    %c1_14 = arith.constant 1 : index
    %c0_15 = arith.constant 0 : index
    %c0_16 = arith.constant 0 : index
    %17 = vector.load %arg2[%c1_14, %c0_15, %c0_16] : memref<2x512x8xf32, #tpu.memory_space<vmem>>, vector<1x512x8xf32>
    %18 = vector.shape_cast %17 : vector<1x512x8xf32> to vector<512x8xf32>
    %19 = vector.shape_cast %16 : vector<512x8xf32> to vector<1x512x8xf32>
    tpu.vector_store %arg2[%c1_14, %c0_15, %c0_16], %19 {strides = array<i32>} : memref<2x512x8xf32, #tpu.memory_space<vmem>>, vector<1x512x8xf32>,
    return
  }
}

module attributes {stable_mosaic.version = 11 : i64} {
  func.func @_conv_bias_kernel(%arg0: memref<1024x216xf32, #tpu.memory_space<vmem>>, %arg1: memref<216x8xf32, #tpu.memory_space<vmem>>, %arg2: memref<1x8xf32, #tpu.memory_space<vmem>>, %arg3: memref<1024x8xf32, #tpu.memory_space<vmem>>) attributes {dimension_semantics = [], scalar_prefetch = 0 : i64, scratch_operands = 0 : i64, tpu.core_type = #tpu.core_type<tc>} {
    %c0 = arith.constant 0 : index
    %c0_0 = arith.constant 0 : index
    %0 = vector.load %arg0[%c0, %c0_0] : memref<1024x216xf32, #tpu.memory_space<vmem>>, vector<1024x216xf32>
    %c0_1 = arith.constant 0 : index
    %c0_2 = arith.constant 0 : index
    %1 = vector.load %arg1[%c0_1, %c0_2] : memref<216x8xf32, #tpu.memory_space<vmem>>, vector<216x8xf32>
    %cst = arith.constant dense<0.000000e+00> : vector<1024x8xf32>
    %2 = tpu.matmul %0, %1, %cst {dimension_numbers = #tpu.dot_dimension_numbers<[1], [0], [0], [1], [0, 0, 1, 1], [], []>} : vector<1024x216xf32>, vector<216x8xf32>, vector<1024x8xf32> -> vector<1024x8xf32>
    %c0_3 = arith.constant 0 : index
    %c0_4 = arith.constant 0 : index
    %3 = vector.load %arg2[%c0_3, %c0_4] : memref<1x8xf32, #tpu.memory_space<vmem>>, vector<1x8xf32>
    %4 = vector.broadcast %3 : vector<1x8xf32> to vector<1024x8xf32>
    %5 = arith.addf %2, %4 : vector<1024x8xf32>
    %c0_5 = arith.constant 0 : index
    %c0_6 = arith.constant 0 : index
    %6 = vector.load %arg3[%c0_5, %c0_6] : memref<1024x8xf32, #tpu.memory_space<vmem>>, vector<1024x8xf32>
    tpu.vector_store %arg3[%c0_5, %c0_6], %5 {strides = array<i32>} : memref<1024x8xf32, #tpu.memory_space<vmem>>, vector<1024x8xf32>,
    return
  }
}

</mosaic_0001>

<bundles_post_ra>
// kernel: ustack_forward.10
= control target key start
LH: loop header
LB: loop body
LE: loop exit
PB: predicated region body
PF: predicated region fallthrough
CT: control target
= control target key end

     0   :  { %v874_v0 = vmov 0.0|0.0   ;;  %vm875_vm0 = vmmov 0   ;;  %v876_v5 = vmov 0.0   ;;  %vm29_vm1 = vcmask 130048   ;;  %s1019_s2 = inlined_call_operand.vmem [shape: f32[16,4], index: 2, kind: input, shape index: {}]   ;;  %s1020_s0 = inlined_call_operand.vmem [shape: f32[2,8,16], index: 0, kind: input, shape index: {}]   ;;  %s1021_s1 = inlined_call_operand.vmem [shape: f32[2,8,16], index: 1, kind: input, shape index: {}]   ;;  %s1022_s6 = inlined_call_operand.vmem [shape: f32[2,8,16], index: 6, kind: output, shape index: {0}]   ;;  %s1023_s3 = inlined_call_operand.vmem [shape: f32[4,16], index: 3, kind: input, shape index: {}]   ;;  %s1024_s4 = inlined_call_operand.vmem [shape: f32[1,16], index: 4, kind: input, shape index: {}]   ;;  %s1025_s5 = inlined_call_operand.vmem [shape: f32[1,16], index: 5, kind: input, shape index: {}]   ;;  %s1026_s7 = inlined_call_operand.vmem [shape: f32[2,8,16], index: 7, kind: output, shape index: {1}]  }
   0x1   :  { %847 = vmatprep.subr.bf16.mxu0 %v874_v0  ;;  %v31_v1 = vld [vmem:[%s1019_s2] sm:$0xff]  ;;  %v32_v2 = vld [vmem:[%s1019_s2 + $0x8] sm:$0xff]  ;;  %850 = vmatprep.subr.bf16.mxu1 %v874_v0  ;;  %vm208_vm2 = vcmask 1043456   ;;  %vm204_vm3 = vcmask 31744   ;;  %v355_v57 = vlaneseq }
   0x2   :  { %v25_v3 = vld [vmem:[%s1020_s0] sm:$0xff]  ;;  %v926_v4 = vpack.c.bf16 %v32_v2, %v31_v1  ;;  %803 = vmatprep.mubr.msk.f32.mxu0 %vm875_vm0, %v876_v5  ;;  %v766_v7 = vld [vmem:[%s1020_s0 + $0x8] sm:$0xff]  ;;  %810 = vmatprep.mubr.msk.f32.mxu1 %vm875_vm0, %v876_v5 }
   0x3   :  { %v26_v6 = vld [vmem:[%s1021_s1] sm:$0xff]  ;;  %v767_v8 = vld [vmem:[%s1021_s1 + $0x8] sm:$0xff]  ;;  %v356_v61 = vshrl.u32 %v355_v57, 7 }
   0x4   :  { %v27_v9 = vadd.f32 %v26_v6, %v25_v3  ;;  %v391_v10 = vadd.f32 %v767_v8, %v766_v7  ;;  %849 = vmatpush3.bf16.msra.mxu0 %v926_v4  ;;  %852 = vmatpush3.bf16.msra.mxu1 %v926_v4  ;;  %v33_v27 = vld [vmem:[%s1023_s3] sm:$0xf] }
   0x5   :  { %813 = vmatprep.subr.mxu0 %v876_v5  ;;  %818 = vmatprep.subr.mxu1 %v876_v5  ;;  %v397_v54 = vld [vmem:[%s1023_s3] sm:$0xf]  ;;  %v357_v62 = vsub.s32 0, %v356_v61 }
   0x6   :  { %v943_v11 = vmul.f32 0.70710677, %v27_v9  ;;  %v968_v28 = vmul.f32 0.70710677, %v391_v10  ;;  %v764_v7 = vld [vmem:[%s1025_s5] ss:$0 sm:$0xff] }
   0x8   :  { %30 = vst.msk [vmem:[%s1022_s6] sm:$0xff] %vm29_vm1, %v943_v11  ;;  %v36_v12 = vsel %vm29_vm1, %v943_v11, 0.0  ;;  %v43_v13 = vmul.f32 %v943_v11, %v943_v11  ;;  %768 = vst.msk [vmem:[%s1022_s6 + $0x8] sm:$0xff] %vm29_vm1, %v968_v28  ;;  %v400_v29 = vsel %vm29_vm1, %v968_v28, 0.0  ;;  %v407_v33 = vmul.f32 %v968_v28, %v968_v28 }
   0x9   :  { %v37_v14 = vrot.slane %v36_v12, 4  ;;  %v401_v30 = vrot.slane %v400_v29, 4 }
   0xa   :  { %v44_v15 = vsel %vm29_vm1, %v43_v13, 0.0  ;;  %v408_v35 = vsel %vm29_vm1, %v407_v33, 0.0 }
   0xb   :  { %v38_v16 = vadd.f32 %v37_v14, %v36_v12  ;;  %v45_v17 = vrot.slane %v44_v15, 4  ;;  %v402_v31 = vadd.f32 %v401_v30, %v400_v29  ;;  %v409_v38 = vrot.slane %v408_v35, 4 }
   0xd   :  { %v39_v18 = vrot.slane %v38_v16, 2  ;;  %v46_v19 = vadd.f32 %v45_v17, %v44_v15  ;;  %v403_v32 = vrot.slane %v402_v31, 2  ;;  %v410_v46 = vadd.f32 %v409_v38, %v408_v35 }
   0xf   :  { %v40_v20 = vadd.f32 %v39_v18, %v38_v16  ;;  %v47_v21 = vrot.slane %v46_v19, 2  ;;  %v404_v34 = vadd.f32 %v403_v32, %v402_v31  ;;  %v411_v49 = vrot.slane %v410_v46, 2 }
  0x11   :  { %v41_v22 = vrot.slane %v40_v20, 1  ;;  %v48_v23 = vadd.f32 %v47_v21, %v46_v19  ;;  %v405_v36 = vrot.slane %v404_v34, 1  ;;  %v412_v50 = vadd.f32 %v411_v49, %v410_v46 }
  0x13   :  { %v42_v24 = vadd.f32 %v41_v22, %v40_v20  ;;  %v49_v25 = vrot.slane %v48_v23, 1  ;;  %v406_v45 = vadd.f32 %v405_v36, %v404_v34  ;;  %v413_v51 = vrot.slane %v412_v50, 1 }
  0x15   :  { %804 = vmatmul.mubr.msk.f32.vlgmr.msra.gmra.mrb[0].mxu0 %vm29_vm1, %v42_v24  ;;  %v50_v26 = vadd.f32 %v49_v25, %v48_v23  ;;  %v414_v53 = vadd.f32 %v413_v51, %v412_v50 }
  0x16   :  { %815 = vmatprep.mubr.msk.f32.mxu0 %vm875_vm0, %v876_v5  ;;  %814 = vmatpush3.msk.msra.mxu0 %vm208_vm2, %v33_v27 }
  0x17   :  { %811 = vmatmul.mubr.msk.f32.vlgmr.msra.gmra.mrb[0].mxu1 %vm29_vm1, %v50_v26  ;;  %853 = vmatprep.subr.bf16.mxu0 %v874_v0 }
  0x18   :  { %820 = vmatprep.mubr.msk.f32.mxu1 %vm875_vm0, %v876_v5  ;;  %819 = vmatpush3.msk.msra.mxu1 %vm208_vm2, %v33_v27 }
  0x19   :  { %856 = vmatprep.subr.bf16.mxu1 %v874_v0 }
  0xe8   :  { %v120_v37 = vpop.f32.mrb[0].mxu0 }
  0xe9   :  { %v125_v39 = vmul.f32 0.03125, %v120_v37  ;;  %v805_v40 = vpop.f32.mrb[1].mxu0 }
  0xea   :  { %v195_v41 = vpop.f32.mrb[0].mxu1 }
  0xeb   :  { %v200_v42 = vmul.f32 %v125_v39, %v125_v39  ;;  %v199_v43 = vmul.f32 0.03125, %v195_v41  ;;  %v812_v44 = vpop.f32.mrb[1].mxu1  ;;  %816 = vmatmul.mubr.msk.f32.vlgmr.msra.gmra.mrb[2].mxu0 %vm204_vm3, %v125_v39 }
  0xec   :  { %855 = vmatpush3.bf16.msra.mxu0 %v926_v4  ;;  %827 = vmatprep.mubr.msk.f32.mxu0 %vm875_vm0, %v876_v5 }
  0xed   :  { %v201_v47 = vsub.f32 %v199_v43, %v200_v42  ;;  %837 = vmatprep.subr.mxu0 %v876_v5 }
  0xef   :  { %v202_v48 = vadd.f32 1e-05, %v201_v47  ;;  %828 = vmatmul.mubr.msk.f32.vlgmr.msra.gmra.mrb[4].mxu0 %vm29_vm1, %v406_v45 }
  0xf0   :  { %839 = vmatprep.mubr.msk.f32.mxu0 %vm875_vm0, %v876_v5  ;;  %838 = vmatpush3.msk.msra.mxu0 %vm208_vm2, %v397_v54 }
  0xf1   :  { %862 = vrsqrt.f32 %v202_v48 }
  0xfb   :  { %v863_v52 = vpop.eup %862 }
  0xfc   :  { %821 = vmatmul.mubr.msk.f32.vlgmr.msra.gmra.mrb[2].mxu1 %vm204_vm3, %v863_v52 }
  0xfd   :  { %858 = vmatpush3.bf16.msra.mxu1 %v926_v4  ;;  %834 = vmatprep.mubr.msk.f32.mxu1 %vm875_vm0, %v876_v5  ;;  %v763_v4 = vld [vmem:[%s1024_s4] ss:$0 sm:$0xff] }
  0xfe   :  { %842 = vmatprep.subr.mxu1 %v876_v5 }
 0x100   :  { %835 = vmatmul.mubr.msk.f32.vlgmr.msra.gmra.mrb[4].mxu1 %vm29_vm1, %v414_v53 }
 0x101   :  { %844 = vmatprep.mubr.msk.f32.mxu1 %vm875_vm0, %v876_v5  ;;  %843 = vmatpush3.msk.msra.mxu1 %vm208_vm2, %v397_v54 }
 0x1be   :  { %v278_v55 = vpop.f32.mrb[2].mxu0 }
 0x1bf   :  { %v817_v56 = vpop.f32.mrb[3].mxu0  ;;  %v358_v63 = vrot.slane %v278_v55, %v357_v62 }
 0x1c1   :  { %v359_v1 = vsub.f32 %v943_v11, %v358_v63 }
 0x1c2   :  { %v484_v58 = vpop.f32.mrb[4].mxu0 }
 0x1c3   :  { %v488_v59 = vmul.f32 0.03125, %v484_v58  ;;  %v829_v60 = vpop.f32.mrb[5].mxu0 }
 0x1c5   :  { %840 = vmatmul.mubr.msk.f32.vlgmr.msra.gmra.mrb[6].mxu0 %vm204_vm3, %v488_v59  ;;  %v563_v6 = vmul.f32 %v488_v59, %v488_v59 }
 0x1cf   :  { %v351_v0 = vpop.f32.mrb[2].mxu1 }
 0x1d0   :  { %v363_v2 = vrot.slane %v351_v0, %v357_v62  ;;  %v822_v3 = vpop.f32.mrb[3].mxu1 }
 0x1d2   :  { %v364_v5 = vmul.f32 %v363_v2, %v359_v1 }
 0x1d3   :  { %v558_v8 = vpop.f32.mrb[4].mxu1 }
 0x1d4   :  { %v371_v9 = vmul.f32 %v763_v4, %v364_v5  ;;  %v562_v10 = vmul.f32 0.03125, %v558_v8  ;;  %v836_v12 = vpop.f32.mrb[5].mxu1 }
 0x1d6   :  { %v378_v13 = vadd.f32 %v764_v7, %v371_v9  ;;  %v564_v14 = vsub.f32 %v562_v10, %v563_v6 }
 0x1d8   :  { %v765_v15 = vmul.f32 -1.442695, %v378_v13  ;;  %v565_v11 = vadd.f32 1e-05, %v564_v14 }
 0x1da   :  { %864 = vpow2.f32 %v765_v15 }
 0x1db   :  { %866 = vrsqrt.f32 %v565_v11 }
 0x1e4   :  { %v865_v16 = vpop.eup %864 }
 0x1e5   :  { %v867_v17 = vpop.eup %866  ;;  %v382_v18 = vadd.f32 1.0, %v865_v16 }
 0x1e6   :  { %845 = vmatmul.mubr.msk.f32.vlgmr.msra.gmra.mrb[6].mxu1 %vm204_vm3, %v867_v17 }
 0x1e7   :  { %868 = vrcp.f32 %v382_v18 }
 0x1f1   :  { %v869_v19 = vpop.eup %868 }
 0x1f2   :  { %v385_v20 = vmul.f32 %v869_v19, %v378_v13 }
 0x1f4   :  { %386 = vst.msk [vmem:[%s1026_s7] sm:$0xff] %vm29_vm1, %v385_v20 }
 0x298   :  { %v639_v21 = vpop.f32.mrb[6].mxu0 }
 0x299   :  { %v841_v22 = vpop.f32.mrb[7].mxu0  ;;  %v719_v23 = vrot.slane %v639_v21, %v357_v62 }
 0x29b   :  { %v720_v25 = vsub.f32 %v968_v28, %v719_v23 }
 0x2b9   :  { %v712_v24 = vpop.f32.mrb[6].mxu1 }
 0x2ba   :  { %v724_v26 = vrot.slane %v712_v24, %v357_v62  ;;  %v846_v27 = vpop.f32.mrb[7].mxu1 }
 0x2bc   :  { %v725_v29 = vmul.f32 %v724_v26, %v720_v25 }
 0x2be   :  { %v732_v30 = vmul.f32 %v763_v4, %v725_v29 }
 0x2c0   :  { %v739_v31 = vadd.f32 %v764_v7, %v732_v30 }
 0x2c2   :  { %v777_v32 = vmul.f32 -1.442695, %v739_v31 }
 0x2c4   :  { %870 = vpow2.f32 %v777_v32 }
 0x2ce   :  { %v871_v33 = vpop.eup %870 }
 0x2cf   :  { %v743_v34 = vadd.f32 1.0, %v871_v33 }
 0x2d1   :  { %872 = vrcp.f32 %v743_v34 }
 0x2db   :  { %v873_v35 = vpop.eup %872 }
 0x2dc   :  { %v746_v36 = vmul.f32 %v873_v35, %v739_v31 }
 0x2de   :  { %778 = vst.msk [vmem:[%s1026_s7 + $0x8] sm:$0xff] %vm29_vm1, %v746_v36 }

// kernel: ustack_forward.13
= control target key start
LH: loop header
LB: loop body
LE: loop exit
PB: predicated region body
PF: predicated region fallthrough
CT: control target
= control target key end

     0   :  { %v353_v0 = vmov 0.0|0.0   ;;  %vm83_vm0 = vcmask 392192   ;;  %s582_s1 = inlined_call_operand.vmem [shape: f32[432,128], index: 1, kind: input, shape index: {}]   ;;  %s583_s0 = inlined_call_operand.vmem [shape: f32[16,432], index: 0, kind: input, shape index: {}]   ;;  %s584_s2 = inlined_call_operand.vmem [shape: f32[1,128], index: 2, kind: input, shape index: {}]   ;;  %s585_s3 = inlined_call_operand.vmem [shape: f32[16,128], index: 3, kind: output, shape index: {}]  }
   0x1   :  { %319 = vmatprep.subr.bf16.mxu1 %v353_v0  ;;  %v54_v1 = vld [vmem:[%s582_s1 + $0x100] sm:$0xff]  ;;  %v55_v2 = vld [vmem:[%s582_s1 + $0x108] sm:$0xff]  ;;  %v56_v3 = vld [vmem:[%s582_s1 + $0x110] sm:$0xff] }
   0x2   :  { %v320_v4 = vpack.c.bf16 %v55_v2, %v54_v1  ;;  %v57_v5 = vld [vmem:[%s582_s1 + $0x118] sm:$0xff]  ;;  %v38_v6 = vld [vmem:[%s582_s1 + $0x80] sm:$0xff]  ;;  %v39_v7 = vld [vmem:[%s582_s1 + $0x88] sm:$0xff] }
   0x3   :  { %v287_v8 = vpack.c.bf16 %v39_v7, %v38_v6  ;;  %v22_v9 = vld [vmem:[%s582_s1] sm:$0xff]  ;;  %v23_v10 = vld [vmem:[%s582_s1 + $0x8] sm:$0xff]  ;;  %v323_v11 = vpack.c.bf16 %v57_v5, %v56_v3  ;;  %v40_v14 = vld [vmem:[%s582_s1 + $0x90] sm:$0xff] }
   0x4   :  { %321 = vmatpush1.bf16.msra.mxu1 %v320_v4  ;;  %v289_v12 = vpack.c.bf16 %v23_v10, %v22_v9  ;;  %v58_v13 = vld [vmem:[%s582_s1 + $0x120] sm:$0xff]  ;;  %v41_v15 = vld [vmem:[%s582_s1 + $0x98] sm:$0xff]  ;;  %v59_v16 = vld [vmem:[%s582_s1 + $0x128] sm:$0xff] }
   0x5   :  { %322 = vmatprep.subr.bf16.mxu1 %v353_v0  ;;  %288 = vmatprep.subr.bf16.mxu0 %v287_v8  ;;  %v291_v17 = vpack.c.bf16 %v41_v15, %v40_v14  ;;  %v24_v18 = vld [vmem:[%s582_s1 + $0x10] sm:$0xff]  ;;  %v25_v19 = vld [vmem:[%s582_s1 + $0x18] sm:$0xff]  ;;  %v42_v21 = vld [vmem:[%s582_s1 + $0xa0] sm:$0xff]  ;;  %v326_v26 = vpack.c.bf16 %v59_v16, %v58_v13 }
   0x6   :  { %290 = vmatpush3.bf16.msra.mxu0 %v289_v12  ;;  %v293_v20 = vpack.c.bf16 %v25_v19, %v24_v18  ;;  %v43_v22 = vld [vmem:[%s582_s1 + $0xa8] sm:$0xff]  ;;  %v26_v24 = vld [vmem:[%s582_s1 + $0x20] sm:$0xff]  ;;  %v44_v27 = vld [vmem:[%s582_s1 + $0xb0] sm:$0xff] }
   0x7   :  { %292 = vmatprep.subr.bf16.mxu0 %v291_v17  ;;  %v295_v23 = vpack.c.bf16 %v43_v22, %v42_v21  ;;  %v27_v25 = vld [vmem:[%s582_s1 + $0x28] sm:$0xff]  ;;  %v45_v28 = vld [vmem:[%s582_s1 + $0xb8] sm:$0xff]  ;;  %v60_v29 = vld [vmem:[%s582_s1 + $0x130] sm:$0xff] }
   0x8   :  { %324 = vmatpush1.bf16.msra.mxu1 %v323_v11  ;;  %v61_v30 = vld [vmem:[%s582_s1 + $0x138] sm:$0xff]  ;;  %v297_v31 = vpack.c.bf16 %v27_v25, %v26_v24  ;;  %v299_v32 = vpack.c.bf16 %v45_v28, %v44_v27  ;;  %v28_v33 = vld [vmem:[%s582_s1 + $0x30] sm:$0xff]  ;;  %v46_v36 = vld [vmem:[%s582_s1 + $0xc0] sm:$0xff] }
   0x9   :  { %325 = vmatprep.subr.bf16.mxu1 %v353_v0  ;;  %v29_v34 = vld [vmem:[%s582_s1 + $0x38] sm:$0xff]  ;;  %v329_v35 = vpack.c.bf16 %v61_v30, %v60_v29  ;;  %v47_v37 = vld [vmem:[%s582_s1 + $0xc8] sm:$0xff]  ;;  %v62_v38 = vld [vmem:[%s582_s1 + $0x140] sm:$0xff] }
   0xa   :  { %294 = vmatpush3.bf16.msra.mxu0 %v293_v20  ;;  %v63_v39 = vld [vmem:[%s582_s1 + $0x148] sm:$0xff]  ;;  %v301_v40 = vpack.c.bf16 %v29_v34, %v28_v33  ;;  %v303_v41 = vpack.c.bf16 %v47_v37, %v46_v36  ;;  %v30_v42 = vld [vmem:[%s582_s1 + $0x40] sm:$0xff]  ;;  %v48_v45 = vld [vmem:[%s582_s1 + $0xd0] sm:$0xff] }
   0xb   :  { %296 = vmatprep.subr.bf16.mxu0 %v295_v23  ;;  %v31_v43 = vld [vmem:[%s582_s1 + $0x48] sm:$0xff]  ;;  %v332_v44 = vpack.c.bf16 %v63_v39, %v62_v38  ;;  %v49_v46 = vld [vmem:[%s582_s1 + $0xd8] sm:$0xff]  ;;  %v64_v47 = vld [vmem:[%s582_s1 + $0x150] sm:$0xff] }
   0xc   :  { %327 = vmatpush1.bf16.msra.mxu1 %v326_v26  ;;  %v65_v48 = vld [vmem:[%s582_s1 + $0x158] sm:$0xff]  ;;  %v15_v49 = vld [vmem:[%s583_s0 + $0x8] sm:$0xff]  ;;  %v305_v50 = vpack.c.bf16 %v31_v43, %v30_v42  ;;  %v307_v51 = vpack.c.bf16 %v49_v46, %v48_v45  ;;  %v32_v52 = vld [vmem:[%s582_s1 + $0x50] sm:$0xff] }
   0xd   :  { %328 = vmatprep.subr.bf16.mxu1 %v353_v0  ;;  %154 = vmatprep.mubr.f32.mxu0 %v15_v49  ;;  %v33_v53 = vld [vmem:[%s582_s1 + $0x58] sm:$0xff]  ;;  %v335_v54 = vpack.c.bf16 %v65_v48, %v64_v47  ;;  %v50_v55 = vld [vmem:[%s582_s1 + $0xe0] sm:$0xff]  ;;  %v51_v56 = vld [vmem:[%s582_s1 + $0xe8] sm:$0xff] }
   0xe   :  { %298 = vmatpush3.bf16.msra.mxu0 %v297_v31  ;;  %v17_v57 = vld [vmem:[%s583_s0 + $0x18] sm:$0xff]  ;;  %v66_v58 = vld [vmem:[%s582_s1 + $0x160] sm:$0xff]  ;;  %v67_v59 = vld [vmem:[%s582_s1 + $0x168] sm:$0xff]  ;;  %v309_v60 = vpack.c.bf16 %v33_v53, %v32_v52  ;;  %v311_v61 = vpack.c.bf16 %v51_v56, %v50_v55 }
   0xf   :  { %300 = vmatprep.subr.bf16.mxu0 %v299_v32  ;;  %247 = vmatprep.mubr.msk.f32.mxu1 %vm83_vm0, %v17_v57  ;;  %v34_v62 = vld [vmem:[%s582_s1 + $0x60] sm:$0xff]  ;;  %v35_v63 = vld [vmem:[%s582_s1 + $0x68] sm:$0xff]  ;;  %v338_v1 = vpack.c.bf16 %v67_v59, %v66_v58  ;;  %v52_v2 = vld [vmem:[%s582_s1 + $0xf0] sm:$0xff] }
  0x10   :  { %330 = vmatpush1.bf16.msra.mxu1 %v329_v35  ;;  %v53_v3 = vld [vmem:[%s582_s1 + $0xf8] sm:$0xff]  ;;  %v68_v4 = vld [vmem:[%s582_s1 + $0x170] sm:$0xff]  ;;  %v313_v6 = vpack.c.bf16 %v35_v63, %v34_v62  ;;  %v70_v11 = vld [vmem:[%s582_s1 + $0x180] sm:$0xff] }
  0x11   :  { %331 = vmatprep.subr.bf16.mxu1 %v353_v0  ;;  %v69_v5 = vld [vmem:[%s582_s1 + $0x178] sm:$0xff]  ;;  %v315_v7 = vpack.c.bf16 %v53_v3, %v52_v2  ;;  %v36_v8 = vld [vmem:[%s582_s1 + $0x70] sm:$0xff]  ;;  %v71_v12 = vld [vmem:[%s582_s1 + $0x188] sm:$0xff] }
  0x12   :  { %302 = vmatpush3.bf16.msra.mxu0 %v301_v40  ;;  %v37_v9 = vld [vmem:[%s582_s1 + $0x78] sm:$0xff]  ;;  %v341_v10 = vpack.c.bf16 %v69_v5, %v68_v4  ;;  %v344_v14 = vpack.c.bf16 %v71_v12, %v70_v11  ;;  %v72_v15 = vld [vmem:[%s582_s1 + $0x190] sm:$0xff]  ;;  %v14_v17 = vld [vmem:[%s583_s0] sm:$0xff] }
  0x13   :  { %304 = vmatprep.subr.bf16.mxu0 %v303_v41  ;;  %v317_v13 = vpack.c.bf16 %v37_v9, %v36_v8  ;;  %v73_v16 = vld [vmem:[%s582_s1 + $0x198] sm:$0xff]  ;;  %v19_v18 = vld [vmem:[%s583_s0 + $0x28] sm:$0xff]  ;;  %v74_v20 = vld [vmem:[%s582_s1 + $0x1a0] sm:$0xff] }
  0x14   :  { %333 = vmatpush1.bf16.msra.mxu1 %v332_v44  ;;  %v347_v19 = vpack.c.bf16 %v73_v16, %v72_v15  ;;  %v75_v21 = vld [vmem:[%s582_s1 + $0x1a8] sm:$0xff]  ;;  %v18_v22 = vld [vmem:[%s583_s0 + $0x20] sm:$0xff]  ;;  %v16_v24 = vld [vmem:[%s583_s0 + $0x10] sm:$0xff] }
  0x15   :  { %334 = vmatprep.subr.bf16.mxu1 %v353_v0  ;;  %v350_v23 = vpack.c.bf16 %v75_v21, %v74_v20  ;;  %v21_v25 = vld [vmem:[%s583_s0 + $0x38] sm:$0xff]  ;;  %v20_v26 = vld [vmem:[%s583_s0 + $0x30] sm:$0xff]  ;;  %v246_v30 = vld [vmem:[%s584_s2] ss:$0 sm:$0xff] }
  0x16   :  { %306 = vmatpush3.bf16.msra.mxu0 %v305_v50 }
  0x17   :  { %308 = vmatprep.subr.bf16.mxu0 %v307_v51 }
  0x18   :  { %336 = vmatpush1.bf16.msra.mxu1 %v335_v54 }
  0x19   :  { %337 = vmatprep.subr.bf16.mxu1 %v353_v0 }
  0x1a   :  { %310 = vmatpush3.bf16.msra.mxu0 %v309_v60 }
  0x1b   :  { %312 = vmatprep.subr.bf16.mxu0 %v311_v61 }
  0x1c   :  { %339 = vmatpush1.bf16.msra.mxu1 %v338_v1 }
  0x1d   :  { %340 = vmatprep.subr.bf16.mxu1 %v353_v0 }
  0x1e   :  { %314 = vmatpush3.bf16.msra.mxu0 %v313_v6 }
  0x1f   :  { %316 = vmatprep.subr.bf16.mxu0 %v315_v7 }
  0x20   :  { %342 = vmatpush1.bf16.msra.mxu1 %v341_v10 }
  0x21   :  { %343 = vmatprep.subr.bf16.mxu1 %v353_v0 }
  0x22   :  { %318 = vmatpush3.bf16.msra.mxu0 %v317_v13 }
  0x24   :  { %345 = vmatpush1.bf16.msra.mxu1 %v344_v14 }
  0x25   :  { %346 = vmatprep.subr.bf16.mxu1 %v353_v0  ;;  %155 = vmatmul.mubr.f32.vlgmr.msra.gmra.mrb[0].mxu0 %v14_v17 }
  0x26   :  { %159 = vmatprep.mubr.f32.mxu0 %v19_v18 }
  0x28   :  { %348 = vmatpush1.bf16.msra.mxu1 %v347_v19 }
  0x29   :  { %349 = vmatprep.subr.bf16.mxu1 %v353_v0  ;;  %160 = vmatmul.mubr.f32.gmra.mrb[2].mxu0 %v18_v22 }
  0x2c   :  { %351 = vmatpush1.bf16.msra.mxu1 %v350_v23 }
  0x2f   :  { %230 = vmatmul.mubr.f32.vlgmr.msra.gmra.mrb[0].mxu1 %v16_v24 }
  0x30   :  { %248 = vmatprep.mubr.msk.f32.mxu1 %vm83_vm0, %v21_v25 }
  0x33   :  { %235 = vmatmul.mubr.f32.gmra.mrb[2].mxu1 %v20_v26 }
  0xf8   :  { %v281_v27 = vpop.f32.mrb[0].mxu0 }
  0xf9   :  { %v282_v0 = vpop.f32.mrb[1].mxu0 }
  0xfa   :  { %v283_v28 = vadd.f32 %v282_v0, %v281_v27 }
  0xfc   :  { %v284_v29 = vpop.f32.mrb[2].mxu0  ;;  %v157_v33 = vadd.f32 %v283_v28, %v246_v30 }
  0xfd   :  { %v285_v31 = vpop.f32.mrb[3].mxu0 }
  0xfe   :  { %v286_v32 = vadd.f32 %v285_v31, %v284_v29 }
 0x100   :  { %v162_v37 = vadd.f32 %v286_v32, %v246_v30 }
 0x102   :  { %v231_v34 = vpop.f32.mrb[0].mxu1 }
 0x103   :  { %v232_v35 = vadd.f32 %v231_v34, %v157_v33  ;;  %v233_v36 = vpop.f32.mrb[1].mxu1 }
 0x105   :  { %240 = vst [vmem:[%s585_s3] sm:$0xff] %v232_v35 }
 0x106   :  { %v236_v38 = vpop.f32.mrb[2].mxu1 }
 0x107   :  { %v237_v39 = vadd.f32 %v236_v38, %v162_v37  ;;  %v238_v40 = vpop.f32.mrb[3].mxu1 }
 0x109   :  { %241 = vst [vmem:[%s585_s3 + $0x8] sm:$0xff] %v237_v39 }

// kernel: ustack_forward.12
= control target key start
LH: loop header
LB: loop body
LE: loop exit
PB: predicated region body
PF: predicated region fallthrough
CT: control target
= control target key end

     0   :  { %v363_v0 = vmov 0.0|0.0   ;;  %vm86_vm0 = vcmask 392192   ;;  %vm249_vm1 = vcmask 130048   ;;  %s603_s1 = inlined_call_operand.vmem [shape: f32[432,16], index: 1, kind: input, shape index: {}]   ;;  %s604_s0 = inlined_call_operand.vmem [shape: f32[16,432], index: 0, kind: input, shape index: {}]   ;;  %s605_s2 = inlined_call_operand.vmem [shape: f32[1,16], index: 2, kind: input, shape index: {}]   ;;  %s606_s3 = inlined_call_operand.vmem [shape: f32[16,16], index: 3, kind: input, shape index: {}]   ;;  %s607_s4 = inlined_call_operand.vmem [shape: f32[16,16], index: 4, kind: output, shape index: {}]  }
   0x1   :  { %329 = vmatprep.subr.bf16.mxu1 %v363_v0  ;;  %v57_v1 = vld [vmem:[%s603_s1 + $0x100] sm:$0xff]  ;;  %v58_v2 = vld [vmem:[%s603_s1 + $0x108] sm:$0xff]  ;;  %v59_v3 = vld [vmem:[%s603_s1 + $0x110] sm:$0xff] }
   0x2   :  { %v330_v4 = vpack.c.bf16 %v58_v2, %v57_v1  ;;  %v60_v5 = vld [vmem:[%s603_s1 + $0x118] sm:$0xff]  ;;  %v41_v6 = vld [vmem:[%s603_s1 + $0x80] sm:$0xff]  ;;  %v42_v7 = vld [vmem:[%s603_s1 + $0x88] sm:$0xff] }
   0x3   :  { %v297_v8 = vpack.c.bf16 %v42_v7, %v41_v6  ;;  %v25_v9 = vld [vmem:[%s603_s1] sm:$0xff]  ;;  %v26_v10 = vld [vmem:[%s603_s1 + $0x8] sm:$0xff]  ;;  %v333_v11 = vpack.c.bf16 %v60_v5, %v59_v3  ;;  %v43_v14 = vld [vmem:[%s603_s1 + $0x90] sm:$0xff] }
   0x4   :  { %331 = vmatpush1.bf16.msra.mxu1 %v330_v4  ;;  %v299_v12 = vpack.c.bf16 %v26_v10, %v25_v9  ;;  %v61_v13 = vld [vmem:[%s603_s1 + $0x120] sm:$0xff]  ;;  %v44_v15 = vld [vmem:[%s603_s1 + $0x98] sm:$0xff]  ;;  %v62_v16 = vld [vmem:[%s603_s1 + $0x128] sm:$0xff] }
   0x5   :  { %332 = vmatprep.subr.bf16.mxu1 %v363_v0  ;;  %298 = vmatprep.subr.bf16.mxu0 %v297_v8  ;;  %v301_v17 = vpack.c.bf16 %v44_v15, %v43_v14  ;;  %v27_v18 = vld [vmem:[%s603_s1 + $0x10] sm:$0xff]  ;;  %v28_v19 = vld [vmem:[%s603_s1 + $0x18] sm:$0xff]  ;;  %v45_v21 = vld [vmem:[%s603_s1 + $0xa0] sm:$0xff]  ;;  %v336_v26 = vpack.c.bf16 %v62_v16, %v61_v13 }
   0x6   :  { %300 = vmatpush3.bf16.msra.mxu0 %v299_v12  ;;  %v303_v20 = vpack.c.bf16 %v28_v19, %v27_v18  ;;  %v46_v22 = vld [vmem:[%s603_s1 + $0xa8] sm:$0xff]  ;;  %v29_v24 = vld [vmem:[%s603_s1 + $0x20] sm:$0xff]  ;;  %v47_v27 = vld [vmem:[%s603_s1 + $0xb0] sm:$0xff] }
   0x7   :  { %302 = vmatprep.subr.bf16.mxu0 %v301_v17  ;;  %v305_v23 = vpack.c.bf16 %v46_v22, %v45_v21  ;;  %v30_v25 = vld [vmem:[%s603_s1 + $0x28] sm:$0xff]  ;;  %v48_v28 = vld [vmem:[%s603_s1 + $0xb8] sm:$0xff]  ;;  %v63_v29 = vld [vmem:[%s603_s1 + $0x130] sm:$0xff] }
   0x8   :  { %334 = vmatpush1.bf16.msra.mxu1 %v333_v11  ;;  %v64_v30 = vld [vmem:[%s603_s1 + $0x138] sm:$0xff]  ;;  %v307_v31 = vpack.c.bf16 %v30_v25, %v29_v24  ;;  %v309_v32 = vpack.c.bf16 %v48_v28, %v47_v27  ;;  %v31_v33 = vld [vmem:[%s603_s1 + $0x30] sm:$0xff]  ;;  %v49_v36 = vld [vmem:[%s603_s1 + $0xc0] sm:$0xff] }
   0x9   :  { %335 = vmatprep.subr.bf16.mxu1 %v363_v0  ;;  %v32_v34 = vld [vmem:[%s603_s1 + $0x38] sm:$0xff]  ;;  %v339_v35 = vpack.c.bf16 %v64_v30, %v63_v29  ;;  %v50_v37 = vld [vmem:[%s603_s1 + $0xc8] sm:$0xff]  ;;  %v65_v38 = vld [vmem:[%s603_s1 + $0x140] sm:$0xff] }
   0xa   :  { %304 = vmatpush3.bf16.msra.mxu0 %v303_v20  ;;  %v66_v39 = vld [vmem:[%s603_s1 + $0x148] sm:$0xff]  ;;  %v311_v40 = vpack.c.bf16 %v32_v34, %v31_v33  ;;  %v313_v41 = vpack.c.bf16 %v50_v37, %v49_v36  ;;  %v33_v42 = vld [vmem:[%s603_s1 + $0x40] sm:$0xff]  ;;  %v51_v45 = vld [vmem:[%s603_s1 + $0xd0] sm:$0xff] }
   0xb   :  { %306 = vmatprep.subr.bf16.mxu0 %v305_v23  ;;  %v34_v43 = vld [vmem:[%s603_s1 + $0x48] sm:$0xff]  ;;  %v342_v44 = vpack.c.bf16 %v66_v39, %v65_v38  ;;  %v52_v46 = vld [vmem:[%s603_s1 + $0xd8] sm:$0xff]  ;;  %v67_v47 = vld [vmem:[%s603_s1 + $0x150] sm:$0xff] }
   0xc   :  { %337 = vmatpush1.bf16.msra.mxu1 %v336_v26  ;;  %v68_v48 = vld [vmem:[%s603_s1 + $0x158] sm:$0xff]  ;;  %v18_v49 = vld [vmem:[%s604_s0 + $0x8] sm:$0xff]  ;;  %v315_v50 = vpack.c.bf16 %v34_v43, %v33_v42  ;;  %v317_v51 = vpack.c.bf16 %v52_v46, %v51_v45  ;;  %v35_v52 = vld [vmem:[%s603_s1 + $0x50] sm:$0xff] }
   0xd   :  { %338 = vmatprep.subr.bf16.mxu1 %v363_v0  ;;  %157 = vmatprep.mubr.f32.mxu0 %v18_v49  ;;  %v36_v53 = vld [vmem:[%s603_s1 + $0x58] sm:$0xff]  ;;  %v345_v54 = vpack.c.bf16 %v68_v48, %v67_v47  ;;  %v53_v55 = vld [vmem:[%s603_s1 + $0xe0] sm:$0xff]  ;;  %v54_v56 = vld [vmem:[%s603_s1 + $0xe8] sm:$0xff] }
   0xe   :  { %308 = vmatpush3.bf16.msra.mxu0 %v307_v31  ;;  %v20_v57 = vld [vmem:[%s604_s0 + $0x18] sm:$0xff]  ;;  %v69_v58 = vld [vmem:[%s603_s1 + $0x160] sm:$0xff]  ;;  %v70_v59 = vld [vmem:[%s603_s1 + $0x168] sm:$0xff]  ;;  %v319_v60 = vpack.c.bf16 %v36_v53, %v35_v52  ;;  %v321_v61 = vpack.c.bf16 %v54_v56, %v53_v55 }
   0xf   :  { %310 = vmatprep.subr.bf16.mxu0 %v309_v32  ;;  %257 = vmatprep.mubr.msk.f32.mxu1 %vm86_vm0, %v20_v57  ;;  %v37_v62 = vld [vmem:[%s603_s1 + $0x60] sm:$0xff]  ;;  %v38_v63 = vld [vmem:[%s603_s1 + $0x68] sm:$0xff]  ;;  %v348_v1 = vpack.c.bf16 %v70_v59, %v69_v58  ;;  %v55_v2 = vld [vmem:[%s603_s1 + $0xf0] sm:$0xff] }
  0x10   :  { %340 = vmatpush1.bf16.msra.mxu1 %v339_v35  ;;  %v56_v3 = vld [vmem:[%s603_s1 + $0xf8] sm:$0xff]  ;;  %v71_v4 = vld [vmem:[%s603_s1 + $0x170] sm:$0xff]  ;;  %v323_v6 = vpack.c.bf16 %v38_v63, %v37_v62  ;;  %v73_v11 = vld [vmem:[%s603_s1 + $0x180] sm:$0xff] }
  0x11   :  { %341 = vmatprep.subr.bf16.mxu1 %v363_v0  ;;  %v72_v5 = vld [vmem:[%s603_s1 + $0x178] sm:$0xff]  ;;  %v325_v7 = vpack.c.bf16 %v56_v3, %v55_v2  ;;  %v39_v8 = vld [vmem:[%s603_s1 + $0x70] sm:$0xff]  ;;  %v74_v12 = vld [vmem:[%s603_s1 + $0x188] sm:$0xff] }
  0x12   :  { %312 = vmatpush3.bf16.msra.mxu0 %v311_v40  ;;  %v40_v9 = vld [vmem:[%s603_s1 + $0x78] sm:$0xff]  ;;  %v351_v10 = vpack.c.bf16 %v72_v5, %v71_v4  ;;  %v354_v14 = vpack.c.bf16 %v74_v12, %v73_v11  ;;  %v75_v15 = vld [vmem:[%s603_s1 + $0x190] sm:$0xff]  ;;  %v17_v17 = vld [vmem:[%s604_s0] sm:$0xff] }
  0x13   :  { %314 = vmatprep.subr.bf16.mxu0 %v313_v41  ;;  %v327_v13 = vpack.c.bf16 %v40_v9, %v39_v8  ;;  %v76_v16 = vld [vmem:[%s603_s1 + $0x198] sm:$0xff]  ;;  %v22_v18 = vld [vmem:[%s604_s0 + $0x28] sm:$0xff]  ;;  %v77_v20 = vld [vmem:[%s603_s1 + $0x1a0] sm:$0xff] }
  0x14   :  { %343 = vmatpush1.bf16.msra.mxu1 %v342_v44  ;;  %v357_v19 = vpack.c.bf16 %v76_v16, %v75_v15  ;;  %v78_v21 = vld [vmem:[%s603_s1 + $0x1a8] sm:$0xff]  ;;  %v21_v22 = vld [vmem:[%s604_s0 + $0x20] sm:$0xff]  ;;  %v19_v24 = vld [vmem:[%s604_s0 + $0x10] sm:$0xff] }
  0x15   :  { %344 = vmatprep.subr.bf16.mxu1 %v363_v0  ;;  %v360_v23 = vpack.c.bf16 %v78_v21, %v77_v20  ;;  %v24_v25 = vld [vmem:[%s604_s0 + $0x38] sm:$0xff]  ;;  %v23_v26 = vld [vmem:[%s604_s0 + $0x30] sm:$0xff]  ;;  %v256_v30 = vld [vmem:[%s605_s2] ss:$0 sm:$0xff] }
  0x16   :  { %316 = vmatpush3.bf16.msra.mxu0 %v315_v50  ;;  %v243_v35 = vld [vmem:[%s606_s3] sm:$0xff]  ;;  %v244_v41 = vld [vmem:[%s606_s3 + $0x8] sm:$0xff] }
  0x17   :  { %318 = vmatprep.subr.bf16.mxu0 %v317_v51 }
  0x18   :  { %346 = vmatpush1.bf16.msra.mxu1 %v345_v54 }
  0x19   :  { %347 = vmatprep.subr.bf16.mxu1 %v363_v0 }
  0x1a   :  { %320 = vmatpush3.bf16.msra.mxu0 %v319_v60 }
  0x1b   :  { %322 = vmatprep.subr.bf16.mxu0 %v321_v61 }
  0x1c   :  { %349 = vmatpush1.bf16.msra.mxu1 %v348_v1 }
  0x1d   :  { %350 = vmatprep.subr.bf16.mxu1 %v363_v0 }
  0x1e   :  { %324 = vmatpush3.bf16.msra.mxu0 %v323_v6 }
  0x1f   :  { %326 = vmatprep.subr.bf16.mxu0 %v325_v7 }
  0x20   :  { %352 = vmatpush1.bf16.msra.mxu1 %v351_v10 }
  0x21   :  { %353 = vmatprep.subr.bf16.mxu1 %v363_v0 }
  0x22   :  { %328 = vmatpush3.bf16.msra.mxu0 %v327_v13 }
  0x24   :  { %355 = vmatpush1.bf16.msra.mxu1 %v354_v14 }
  0x25   :  { %356 = vmatprep.subr.bf16.mxu1 %v363_v0  ;;  %158 = vmatmul.mubr.f32.vlgmr.msra.gmra.mrb[0].mxu0 %v17_v17 }
  0x26   :  { %162 = vmatprep.mubr.f32.mxu0 %v22_v18 }
  0x28   :  { %358 = vmatpush1.bf16.msra.mxu1 %v357_v19 }
  0x29   :  { %359 = vmatprep.subr.bf16.mxu1 %v363_v0  ;;  %163 = vmatmul.mubr.f32.gmra.mrb[2].mxu0 %v21_v22 }
  0x2c   :  { %361 = vmatpush1.bf16.msra.mxu1 %v360_v23 }
  0x2f   :  { %233 = vmatmul.mubr.f32.vlgmr.msra.gmra.mrb[0].mxu1 %v19_v24 }
  0x30   :  { %258 = vmatprep.mubr.msk.f32.mxu1 %vm86_vm0, %v24_v25 }
  0x33   :  { %238 = vmatmul.mubr.f32.gmra.mrb[2].mxu1 %v23_v26 }
  0xf8   :  { %v291_v27 = vpop.f32.mrb[0].mxu0 }
  0xf9   :  { %v292_v0 = vpop.f32.mrb[1].mxu0 }
  0xfa   :  { %v293_v28 = vadd.f32 %v292_v0, %v291_v27 }
  0xfc   :  { %v294_v29 = vpop.f32.mrb[2].mxu0  ;;  %v160_v33 = vadd.f32 %v293_v28, %v256_v30 }
  0xfd   :  { %v295_v31 = vpop.f32.mrb[3].mxu0 }
  0xfe   :  { %v296_v32 = vadd.f32 %v295_v31, %v294_v29 }
 0x100   :  { %v165_v38 = vadd.f32 %v296_v32, %v256_v30 }
 0x102   :  { %v234_v34 = vpop.f32.mrb[0].mxu1 }
 0x103   :  { %v235_v36 = vadd.f32 %v234_v34, %v160_v33  ;;  %v236_v37 = vpop.f32.mrb[1].mxu1 }
 0x105   :  { %v245_v39 = vadd.f32 %v243_v35, %v235_v36 }
 0x106   :  { %v239_v40 = vpop.f32.mrb[2].mxu1 }
 0x107   :  { %v247_v42 = vmul.f32 0.70710677, %v245_v39  ;;  %v240_v43 = vadd.f32 %v239_v40, %v165_v38  ;;  %v241_v44 = vpop.f32.mrb[3].mxu1 }
 0x109   :  { %250 = vst.msk [vmem:[%s607_s4] sm:$0xff] %vm249_vm1, %v247_v42  ;;  %v246_v45 = vadd.f32 %v244_v41, %v240_v43 }
 0x10b   :  { %v248_v46 = vmul.f32 0.70710677, %v246_v45 }
 0x10d   :  { %251 = vst.msk [vmem:[%s607_s4 + $0x8] sm:$0xff] %vm249_vm1, %v248_v46 }

// kernel: ustack_forward.11
= control target key start
LH: loop header
LB: loop body
LE: loop exit
PB: predicated region body
PF: predicated region fallthrough
CT: control target
= control target key end

     0   :  { %v1443_v0 = vmov 0.0|0.0   ;;  %vm102_vm0 = vcmask 392192   ;;  %vm1444_vm1 = vmmov 0   ;;  %vm263_vm2 = vcmask 130048   ;;  %s1910_s1 = inlined_call_operand.vmem [shape: f32[432,16], index: 1, kind: input, shape index: {}]   ;;  %s1911_s0 = inlined_call_operand.vmem [shape: f32[2,8,432], index: 0, kind: input, shape index: {}]   ;;  %s1912_s5 = inlined_call_operand.vmem [shape: f32[16,4], index: 5, kind: input, shape index: {}]   ;;  %s1913_s3 = inlined_call_operand.vmem [shape: f32[2,1,16], index: 3, kind: input, shape index: {}]   ;;  %s1914_s2 = inlined_call_operand.vmem [shape: f32[1,16], index: 2, kind: input, shape index: {}]   ;;  %s1915_s4 = inlined_call_operand.vmem [shape: f32[2,1,16], index: 4, kind: input, shape index: {}]   ;;  %s1916_s6 = inlined_call_operand.vmem [shape: f32[4,16], index: 6, kind: input, shape index: {}]   ;;  %s1917_s7 = inlined_call_operand.vmem [shape: f32[1,16], index: 7, kind: input, shape index: {}]   ;;  %s1918_s8 = inlined_call_operand.vmem [shape: f32[1,16], index: 8, kind: input, shape index: {}]   ;;  %s1919_s9 = inlined_call_operand.vmem [shape: f32[2,8,16], index: 9, kind: output, shape index: {}]  }
   0x1   :  { %1318 = vmatprep.subr.bf16.mxu1 %v1443_v0  ;;  %v64_v1 = vld [vmem:[%s1910_s1 + $0x100] sm:$0xff]  ;;  %v65_v2 = vld [vmem:[%s1910_s1 + $0x108] sm:$0xff]  ;;  %v66_v3 = vld [vmem:[%s1910_s1 + $0x110] sm:$0xff]  ;;  %vm436_vm3 = vcmask 1043456   ;;  %vm432_vm4 = vcmask 31744  }
   0x2   :  { %v1506_v4 = vpack.c.bf16 %v65_v2, %v64_v1  ;;  %v67_v5 = vld [vmem:[%s1910_s1 + $0x118] sm:$0xff]  ;;  %v48_v6 = vld [vmem:[%s1910_s1 + $0x80] sm:$0xff]  ;;  %v49_v7 = vld [vmem:[%s1910_s1 + $0x88] sm:$0xff] }
   0x3   :  { %v1517_v8 = vpack.c.bf16 %v49_v7, %v48_v6  ;;  %v32_v9 = vld [vmem:[%s1910_s1] sm:$0xff]  ;;  %v33_v10 = vld [vmem:[%s1910_s1 + $0x8] sm:$0xff]  ;;  %v1526_v11 = vpack.c.bf16 %v67_v5, %v66_v3  ;;  %v50_v14 = vld [vmem:[%s1910_s1 + $0x90] sm:$0xff] }
   0x4   :  { %1320 = vmatpush1.bf16.msra.mxu1 %v1506_v4  ;;  %v1528_v12 = vpack.c.bf16 %v33_v10, %v32_v9  ;;  %v68_v13 = vld [vmem:[%s1910_s1 + $0x120] sm:$0xff]  ;;  %v51_v15 = vld [vmem:[%s1910_s1 + $0x98] sm:$0xff]  ;;  %v69_v16 = vld [vmem:[%s1910_s1 + $0x128] sm:$0xff] }
   0x5   :  { %1321 = vmatprep.subr.bf16.mxu1 %v1443_v0  ;;  %1287 = vmatprep.subr.bf16.mxu0 %v1517_v8  ;;  %v1544_v17 = vpack.c.bf16 %v51_v15, %v50_v14  ;;  %v34_v18 = vld [vmem:[%s1910_s1 + $0x10] sm:$0xff]  ;;  %v35_v19 = vld [vmem:[%s1910_s1 + $0x18] sm:$0xff]  ;;  %v52_v21 = vld [vmem:[%s1910_s1 + $0xa0] sm:$0xff]  ;;  %v1571_v26 = vpack.c.bf16 %v69_v16, %v68_v13 }
   0x6   :  { %1289 = vmatpush3.bf16.msra.mxu0 %v1528_v12  ;;  %v1553_v20 = vpack.c.bf16 %v35_v19, %v34_v18  ;;  %v53_v22 = vld [vmem:[%s1910_s1 + $0xa8] sm:$0xff]  ;;  %v36_v24 = vld [vmem:[%s1910_s1 + $0x20] sm:$0xff]  ;;  %v54_v27 = vld [vmem:[%s1910_s1 + $0xb0] sm:$0xff] }
   0x7   :  { %1291 = vmatprep.subr.bf16.mxu0 %v1544_v17  ;;  %v1562_v23 = vpack.c.bf16 %v53_v22, %v52_v21  ;;  %v37_v25 = vld [vmem:[%s1910_s1 + $0x28] sm:$0xff]  ;;  %v55_v28 = vld [vmem:[%s1910_s1 + $0xb8] sm:$0xff]  ;;  %v70_v29 = vld [vmem:[%s1910_s1 + $0x130] sm:$0xff] }
   0x8   :  { %1323 = vmatpush1.bf16.msra.mxu1 %v1526_v11  ;;  %v71_v30 = vld [vmem:[%s1910_s1 + $0x138] sm:$0xff]  ;;  %v1587_v31 = vpack.c.bf16 %v37_v25, %v36_v24  ;;  %v1590_v32 = vpack.c.bf16 %v55_v28, %v54_v27  ;;  %v38_v33 = vld [vmem:[%s1910_s1 + $0x30] sm:$0xff]  ;;  %v56_v36 = vld [vmem:[%s1910_s1 + $0xc0] sm:$0xff] }
   0x9   :  { %1324 = vmatprep.subr.bf16.mxu1 %v1443_v0  ;;  %v39_v34 = vld [vmem:[%s1910_s1 + $0x38] sm:$0xff]  ;;  %v1599_v35 = vpack.c.bf16 %v71_v30, %v70_v29  ;;  %v57_v37 = vld [vmem:[%s1910_s1 + $0xc8] sm:$0xff]  ;;  %v72_v38 = vld [vmem:[%s1910_s1 + $0x140] sm:$0xff] }
   0xa   :  { %1293 = vmatpush3.bf16.msra.mxu0 %v1553_v20  ;;  %v73_v39 = vld [vmem:[%s1910_s1 + $0x148] sm:$0xff]  ;;  %v1615_v40 = vpack.c.bf16 %v39_v34, %v38_v33  ;;  %v1618_v41 = vpack.c.bf16 %v57_v37, %v56_v36  ;;  %v40_v42 = vld [vmem:[%s1910_s1 + $0x40] sm:$0xff]  ;;  %v58_v45 = vld [vmem:[%s1910_s1 + $0xd0] sm:$0xff] }
   0xb   :  { %1295 = vmatprep.subr.bf16.mxu0 %v1562_v23  ;;  %v41_v43 = vld [vmem:[%s1910_s1 + $0x48] sm:$0xff]  ;;  %v1627_v44 = vpack.c.bf16 %v73_v39, %v72_v38  ;;  %v59_v46 = vld [vmem:[%s1910_s1 + $0xd8] sm:$0xff]  ;;  %v74_v47 = vld [vmem:[%s1910_s1 + $0x150] sm:$0xff] }
   0xc   :  { %1326 = vmatpush1.bf16.msra.mxu1 %v1571_v26  ;;  %v75_v48 = vld [vmem:[%s1910_s1 + $0x158] sm:$0xff]  ;;  %v93_v49 = vld [vmem:[%s1911_s0 + $0x8] sm:$0xff]  ;;  %v1646_v50 = vpack.c.bf16 %v41_v43, %v40_v42  ;;  %v1649_v51 = vpack.c.bf16 %v59_v46, %v58_v45  ;;  %v42_v52 = vld [vmem:[%s1910_s1 + $0x50] sm:$0xff] }
   0xd   :  { %1327 = vmatprep.subr.bf16.mxu1 %v1443_v0  ;;  %170 = vmatprep.mubr.f32.mxu0 %v93_v49  ;;  %v43_v53 = vld [vmem:[%s1910_s1 + $0x58] sm:$0xff]  ;;  %v1661_v55 = vpack.c.bf16 %v75_v48, %v74_v47  ;;  %v60_v56 = vld [vmem:[%s1910_s1 + $0xe0] sm:$0xff]  ;;  %v61_v57 = vld [vmem:[%s1910_s1 + $0xe8] sm:$0xff] }
   0xe   :  { %1297 = vmatpush3.bf16.msra.mxu0 %v1587_v31  ;;  %v95_v54 = vld [vmem:[%s1911_s0 + $0x18] sm:$0xff]  ;;  %v76_v58 = vld [vmem:[%s1910_s1 + $0x160] sm:$0xff]  ;;  %v77_v59 = vld [vmem:[%s1910_s1 + $0x168] sm:$0xff]  ;;  %v1308_v60 = vpack.c.bf16 %v43_v53, %v42_v52  ;;  %v1310_v61 = vpack.c.bf16 %v61_v57, %v60_v56 }
   0xf   :  { %1299 = vmatprep.subr.bf16.mxu0 %v1590_v32  ;;  %1121 = vmatprep.mubr.msk.f32.mxu1 %vm102_vm0, %v95_v54  ;;  %v44_v62 = vld [vmem:[%s1910_s1 + $0x60] sm:$0xff]  ;;  %v45_v63 = vld [vmem:[%s1910_s1 + $0x68] sm:$0xff]  ;;  %v1686_v1 = vpack.c.bf16 %v77_v59, %v76_v58  ;;  %v62_v2 = vld [vmem:[%s1910_s1 + $0xf0] sm:$0xff] }
  0x10   :  { %1329 = vmatpush1.bf16.msra.mxu1 %v1599_v35  ;;  %v63_v3 = vld [vmem:[%s1910_s1 + $0xf8] sm:$0xff]  ;;  %v78_v5 = vld [vmem:[%s1910_s1 + $0x170] sm:$0xff]  ;;  %v1312_v7 = vpack.c.bf16 %v45_v63, %v44_v62  ;;  %v80_v15 = vld [vmem:[%s1910_s1 + $0x180] sm:$0xff] }
  0x11   :  { %1330 = vmatprep.subr.bf16.mxu1 %v1443_v0  ;;  %v79_v6 = vld [vmem:[%s1910_s1 + $0x178] sm:$0xff]  ;;  %v1314_v9 = vpack.c.bf16 %v63_v3, %v62_v2  ;;  %v46_v10 = vld [vmem:[%s1910_s1 + $0x70] sm:$0xff]  ;;  %v81_v16 = vld [vmem:[%s1910_s1 + $0x188] sm:$0xff] }
  0x12   :  { %1301 = vmatpush3.bf16.msra.mxu0 %v1615_v40  ;;  %v47_v13 = vld [vmem:[%s1910_s1 + $0x78] sm:$0xff]  ;;  %v1708_v14 = vpack.c.bf16 %v79_v6, %v78_v5  ;;  %v1718_v19 = vpack.c.bf16 %v81_v16, %v80_v15  ;;  %v82_v21 = vld [vmem:[%s1910_s1 + $0x190] sm:$0xff]  ;;  %v92_v24 = vld [vmem:[%s1911_s0] sm:$0xff] }
  0x13   :  { %1303 = vmatprep.subr.bf16.mxu0 %v1618_v41  ;;  %v1316_v18 = vpack.c.bf16 %v47_v13, %v46_v10  ;;  %v83_v22 = vld [vmem:[%s1910_s1 + $0x198] sm:$0xff]  ;;  %v84_v27 = vld [vmem:[%s1910_s1 + $0x1a0] sm:$0xff]  ;;  %v85_v28 = vld [vmem:[%s1910_s1 + $0x1a8] sm:$0xff] }
  0x14   :  { %1332 = vmatpush1.bf16.msra.mxu1 %v1627_v44  ;;  %v1732_v25 = vpack.c.bf16 %v83_v22, %v82_v21  ;;  %v1742_v29 = vpack.c.bf16 %v85_v28, %v84_v27  ;;  %v94_v30 = vld [vmem:[%s1911_s0 + $0x10] sm:$0xff]  ;;  %v246_v36 = vld [vmem:[%s1913_s3] sm:$0x1]  ;;  %v1133_v5 = vld [vmem:[%s1911_s0 + $0x28] sm:$0xff] }
  0x15   :  { %1333 = vmatprep.subr.bf16.mxu1 %v1443_v0  ;;  %v1779_v37 = vld [vmem:[%s1914_s2] ss:$0 sm:$0xff]  ;;  %v247_v38 = vadd.f32 1.0, %v246_v36  ;;  %v1137_v36 = vld [vmem:[%s1913_s3 + $0x1] sm:$0x1] }
  0x16   :  { %1305 = vmatpush3.bf16.msra.mxu0 %v1646_v50  ;;  %v1122_v46 = vld [vmem:[%s1915_s4] ss:$0 sm:$0xff] }
  0x17   :  { %1307 = vmatprep.subr.bf16.mxu0 %v1649_v51  ;;  %v1806_v3 = vld [vmem:[%s1916_s6] sm:$0xf] }
  0x18   :  { %1335 = vmatpush1.bf16.msra.mxu1 %v1661_v55  ;;  %v1132_v6 = vld [vmem:[%s1911_s0 + $0x20] sm:$0xff] }
  0x19   :  { %1336 = vmatprep.subr.bf16.mxu1 %v1443_v0  ;;  %v1862_v28 = vld [vmem:[%s1917_s7] ss:$0 sm:$0xff] }
  0x1a   :  { %1309 = vmatpush3.bf16.msra.mxu0 %v1308_v60 }
  0x1b   :  { %1311 = vmatprep.subr.bf16.mxu0 %v1310_v61 }
  0x1c   :  { %1338 = vmatpush1.bf16.msra.mxu1 %v1686_v1 }
  0x1d   :  { %1339 = vmatprep.subr.bf16.mxu1 %v1443_v0 }
  0x1e   :  { %1313 = vmatpush3.bf16.msra.mxu0 %v1312_v7 }
  0x1f   :  { %1315 = vmatprep.subr.bf16.mxu0 %v1314_v9 }
  0x20   :  { %1341 = vmatpush1.bf16.msra.mxu1 %v1708_v14 }
  0x21   :  { %1342 = vmatprep.subr.bf16.mxu1 %v1443_v0 }
  0x22   :  { %1317 = vmatpush3.bf16.msra.mxu0 %v1316_v18 }
  0x23   :  { %1351 = vmatprep.subr.bf16.mxu0 %v1443_v0 }
  0x24   :  { %1344 = vmatpush1.bf16.msra.mxu1 %v1718_v19 }
  0x25   :  { %1345 = vmatprep.subr.bf16.mxu1 %v1443_v0  ;;  %171 = vmatmul.mubr.f32.vlgmr.msra.gmra.mrb[0].mxu0 %v92_v24  ;;  %v1135_v24 = vld [vmem:[%s1911_s0 + $0x38] sm:$0xff] }
  0x28   :  { %1347 = vmatpush1.bf16.msra.mxu1 %v1732_v25 }
  0x29   :  { %1348 = vmatprep.subr.bf16.mxu1 %v1443_v0 }
  0x2c   :  { %1350 = vmatpush1.bf16.msra.mxu1 %v1742_v29 }
  0x2d   :  { %1358 = vmatprep.subr.bf16.mxu1 %v1517_v8  ;;  %v87_v8 = vld [vmem:[%s1912_s5] sm:$0xff] }
  0x2f   :  { %241 = vmatmul.mubr.f32.vlgmr.msra.gmra.mrb[0].mxu1 %v94_v30  ;;  %v1867_v30 = vld [vmem:[%s1918_s8] ss:$0 sm:$0xff] }
  0x30   :  { %1360 = vmatpush3.bf16.msra.mxu1 %v1528_v12  ;;  %v88_v12 = vld [vmem:[%s1912_s5 + $0x8] sm:$0xff]  ;;  %687 = vmatprep.mubr.f32.mxu1 %v1133_v5 }
  0x31   :  { %1362 = vmatprep.subr.bf16.mxu1 %v1544_v17  ;;  %v1767_v17 = vpack.c.bf16 %v88_v12, %v87_v8 }
  0x33   :  { %1353 = vmatpush3.bf16.msra.mxu0 %v1767_v17 }
  0x34   :  { %1364 = vmatpush3.bf16.msra.mxu1 %v1553_v20  ;;  %v1445_v20 = vmov 0.0   ;;  %1354 = vmatprep.subr.bf16.mxu0 %v1443_v0 }
  0x35   :  { %1366 = vmatprep.subr.bf16.mxu1 %v1562_v23  ;;  %1242 = vmatprep.mubr.msk.f32.mxu0 %vm1444_vm1, %v1445_v20  ;;  %v249_v23 = vlaneseq }
  0x37   :  { %v250_v33 = vshrl.u32 %v249_v23, 7 }
  0x38   :  { %1368 = vmatpush3.bf16.msra.mxu1 %v1587_v31 }
  0x39   :  { %1370 = vmatprep.subr.bf16.mxu1 %v1590_v32  ;;  %v1781_v39 = vsub.s32 0, %v250_v33 }
  0x3c   :  { %1372 = vmatpush3.bf16.msra.mxu1 %v1615_v40 }
  0x3d   :  { %1374 = vmatprep.subr.bf16.mxu1 %v1618_v41  ;;  %v252_v41 = vrot.slane %v247_v38, %v1781_v39  ;;  %v765_v38 = vadd.f32 1.0, %v1137_v36 }
  0x40   :  { %1376 = vmatpush3.bf16.msra.mxu1 %v1646_v50 }
  0x41   :  { %1378 = vmatprep.subr.bf16.mxu1 %v1649_v51 }
  0x44   :  { %1380 = vmatpush3.bf16.msra.mxu1 %v1308_v60 }
  0x45   :  { %1382 = vmatprep.subr.bf16.mxu1 %v1310_v61 }
  0x48   :  { %1384 = vmatpush3.bf16.msra.mxu1 %v1312_v7 }
  0x49   :  { %1386 = vmatprep.subr.bf16.mxu1 %v1314_v9 }
  0x4c   :  { %1388 = vmatpush3.bf16.msra.mxu1 %v1316_v18 }
  0x4d   :  { %1422 = vmatprep.subr.bf16.mxu1 %v1443_v0 }
  0x4f   :  { %688 = vmatmul.mubr.f32.vlgmr.msra.gmra.mrb[2].mxu1 %v1132_v6 }
  0x50   :  { %1424 = vmatpush3.bf16.msra.mxu1 %v1767_v17  ;;  %1266 = vmatprep.mubr.msk.f32.mxu1 %vm1444_vm1, %v1445_v20 }
  0x51   :  { %1425 = vmatprep.subr.bf16.mxu1 %v1443_v0 }
  0xf8   :  { %v1180_v31 = vpop.f32.mrb[0].mxu0 }
  0xf9   :  { %v1181_v32 = vpop.f32.mrb[1].mxu0 }
  0xfa   :  { %v1182_v34 = vadd.f32 %v1181_v32, %v1180_v31 }
  0xfc   :  { %v173_v40 = vadd.f32 %v1182_v34, %v1779_v37 }
 0x102   :  { %v242_v42 = vpop.f32.mrb[0].mxu1 }
 0x103   :  { %v243_v43 = vadd.f32 %v242_v42, %v173_v40  ;;  %v244_v45 = vpop.f32.mrb[1].mxu1 }
 0x105   :  { %v254_v47 = vmul.f32 %v252_v41, %v243_v43  ;;  %v770_v41 = vrot.slane %v765_v38, %v1781_v39 }
 0x107   :  { %v1788_v48 = vadd.f32 %v1122_v46, %v254_v47  ;;  %v1139_v46 = vld [vmem:[%s1915_s4 + $0x1] ss:$0 sm:$0xff] }
 0x109   :  { %v264_v49 = vsel %vm263_vm2, %v1788_v48, 0.0  ;;  %v271_v50 = vmul.f32 %v1788_v48, %v1788_v48 }
 0x10a   :  { %v265_v51 = vrot.slane %v264_v49, 4 }
 0x10b   :  { %v272_v52 = vsel %vm263_vm2, %v271_v50, 0.0 }
 0x10c   :  { %v266_v53 = vadd.f32 %v265_v51, %v264_v49  ;;  %v273_v54 = vrot.slane %v272_v52, 4 }
 0x10e   :  { %v267_v56 = vrot.slane %v266_v53, 2  ;;  %v274_v57 = vadd.f32 %v273_v54, %v272_v52 }
 0x110   :  { %v268_v58 = vadd.f32 %v267_v56, %v266_v53  ;;  %v275_v59 = vrot.slane %v274_v57, 2 }
 0x112   :  { %v269_v60 = vrot.slane %v268_v58, 1  ;;  %v276_v61 = vadd.f32 %v275_v59, %v274_v57 }
 0x114   :  { %v270_v62 = vadd.f32 %v269_v60, %v268_v58  ;;  %v277_v63 = vrot.slane %v276_v61, 1 }
 0x116   :  { %1243 = vmatmul.mubr.msk.f32.vlgmr.msra.gmra.mrb[2].mxu0 %vm263_vm2, %v270_v62  ;;  %v278_v2 = vadd.f32 %v277_v63, %v276_v61 }
 0x117   :  { %1356 = vmatpush3.bf16.msra.mxu0 %v1767_v17  ;;  %1249 = vmatprep.mubr.msk.f32.mxu0 %vm1444_vm1, %v1445_v20 }
 0x118   :  { %1252 = vmatprep.subr.mxu0 %v1445_v20 }
 0x11a   :  { %1250 = vmatmul.mubr.msk.f32.vlgmr.msra.gmra.mrb[4].mxu0 %vm263_vm2, %v278_v2 }
 0x11b   :  { %1254 = vmatprep.mubr.msk.f32.mxu0 %vm1444_vm1, %v1445_v20  ;;  %1253 = vmatpush3.msk.msra.mxu0 %vm436_vm3, %v1806_v3 }
 0x11c   :  { %1257 = vmatprep.subr.mxu0 %v1445_v20 }
 0x1e9   :  { %v348_v7 = vpop.f32.mrb[2].mxu0 }
 0x1ea   :  { %v353_v9 = vmul.f32 0.03125, %v348_v7  ;;  %v1244_v10 = vpop.f32.mrb[3].mxu0 }
 0x1ec   :  { %1255 = vmatmul.mubr.msk.f32.vlgmr.msra.gmra.mrb[6].mxu0 %vm432_vm4, %v353_v9  ;;  %v428_v15 = vmul.f32 %v353_v9, %v353_v9 }
 0x1ed   :  { %v423_v13 = vpop.f32.mrb[4].mxu0  ;;  %1258 = vmatpush3.msk.msra.mxu0 %vm436_vm3, %v1806_v3  ;;  %1259 = vmatprep.mubr.msk.f32.mxu0 %vm1444_vm1, %v1445_v20 }
 0x1ee   :  { %v427_v16 = vmul.f32 0.03125, %v423_v13  ;;  %v1251_v18 = vpop.f32.mrb[5].mxu0  ;;  %1389 = vmatprep.subr.bf16.mxu0 %v1443_v0 }
 0x1f0   :  { %v429_v21 = vsub.f32 %v427_v16, %v428_v15 }
 0x1f2   :  { %v430_v22 = vadd.f32 1e-05, %v429_v21 }
 0x1f4   :  { %1431 = vrsqrt.f32 %v430_v22 }
 0x1fe   :  { %v1432_v27 = vpop.eup %1431 }
 0x1ff   :  { %1260 = vmatmul.mubr.msk.f32.vlgmr.msra.gmra.mrb[8].mxu0 %vm432_vm4, %v1432_v27 }
 0x200   :  { %1391 = vmatpush1.bf16.msra.mxu0 %v1506_v4  ;;  %1136 = vmatprep.mubr.msk.f32.mxu0 %vm102_vm0, %v1135_v24  ;;  %v1134_v4 = vld [vmem:[%s1911_s0 + $0x30] sm:$0xff] }
 0x201   :  { %1392 = vmatprep.subr.bf16.mxu0 %v1443_v0 }
 0x204   :  { %1394 = vmatpush1.bf16.msra.mxu0 %v1526_v11  ;;  %v1225_v11 = vpop.f32.mrb[2].mxu1 }
 0x205   :  { %1395 = vmatprep.subr.bf16.mxu0 %v1443_v0 }
 0x208   :  { %1397 = vmatpush1.bf16.msra.mxu0 %v1571_v26  ;;  %v1226_v26 = vpop.f32.mrb[3].mxu1 }
 0x209   :  { %1398 = vmatprep.subr.bf16.mxu0 %v1443_v0 }
 0x20c   :  { %1400 = vmatpush1.bf16.msra.mxu0 %v1599_v35  ;;  %v1227_v35 = vadd.f32 %v1226_v26, %v1225_v11 }
 0x20d   :  { %1401 = vmatprep.subr.bf16.mxu0 %v1443_v0 }
 0x20e   :  { %v690_v40 = vadd.f32 %v1227_v35, %v1779_v37 }
 0x210   :  { %1403 = vmatpush1.bf16.msra.mxu0 %v1627_v44 }
 0x211   :  { %1404 = vmatprep.subr.bf16.mxu0 %v1443_v0 }
 0x214   :  { %1406 = vmatpush1.bf16.msra.mxu0 %v1661_v55 }
 0x215   :  { %1407 = vmatprep.subr.bf16.mxu0 %v1443_v0 }
 0x218   :  { %1409 = vmatpush1.bf16.msra.mxu0 %v1686_v1 }
 0x219   :  { %1410 = vmatprep.subr.bf16.mxu0 %v1443_v0 }
 0x21c   :  { %1412 = vmatpush1.bf16.msra.mxu0 %v1708_v14 }
 0x21d   :  { %1413 = vmatprep.subr.bf16.mxu0 %v1443_v0 }
 0x220   :  { %1415 = vmatpush1.bf16.msra.mxu0 %v1718_v19 }
 0x221   :  { %1416 = vmatprep.subr.bf16.mxu0 %v1443_v0 }
 0x224   :  { %1418 = vmatpush1.bf16.msra.mxu0 %v1732_v25 }
 0x225   :  { %1419 = vmatprep.subr.bf16.mxu0 %v1443_v0 }
 0x228   :  { %1421 = vmatpush1.bf16.msra.mxu0 %v1742_v29 }
 0x22b   :  { %758 = vmatmul.mubr.f32.vlgmr.msra.gmra.mrb[10].mxu0 %v1134_v4 }
 0x2bf   :  { %v506_v44 = vpop.f32.mrb[6].mxu0 }
 0x2c0   :  { %v1256_v55 = vpop.f32.mrb[7].mxu0  ;;  %v586_v1 = vrot.slane %v506_v44, %v1781_v39 }
 0x2c2   :  { %v587_v19 = vsub.f32 %v1788_v48, %v586_v1 }
 0x2d2   :  { %v579_v14 = vpop.f32.mrb[8].mxu0 }
 0x2d3   :  { %v591_v25 = vrot.slane %v579_v14, %v1781_v39  ;;  %v1261_v0 = vpop.f32.mrb[9].mxu0 }
 0x2d5   :  { %v592_v29 = vmul.f32 %v591_v25, %v587_v19 }
 0x2d7   :  { %v599_v8 = vmul.f32 %v1862_v28, %v592_v29 }
 0x2d9   :  { %v606_v12 = vadd.f32 %v1867_v30, %v599_v8 }
 0x2db   :  { %v1131_v23 = vmul.f32 -1.442695, %v606_v12 }
 0x2dd   :  { %1433 = vpow2.f32 %v1131_v23 }
 0x2e7   :  { %v1434_v31 = vpop.eup %1433 }
 0x2e8   :  { %v610_v32 = vadd.f32 1.0, %v1434_v31 }
 0x2ea   :  { %1435 = vrcp.f32 %v610_v32 }
 0x2f4   :  { %v1436_v33 = vpop.eup %1435 }
 0x2f5   :  { %v613_v34 = vmul.f32 %v1436_v33, %v606_v12 }
 0x2f7   :  { %614 = vst.msk [vmem:[%s1919_s9] sm:$0xff] %vm263_vm2, %v613_v34 }
 0x2fe   :  { %v759_v42 = vpop.f32.mrb[10].mxu0 }
 0x2ff   :  { %v760_v43 = vadd.f32 %v759_v42, %v690_v40  ;;  %v761_v45 = vpop.f32.mrb[11].mxu0 }
 0x301   :  { %v772_v47 = vmul.f32 %v770_v41, %v760_v43 }
 0x303   :  { %v781_v48 = vadd.f32 %v1139_v46, %v772_v47 }
 0x305   :  { %v782_v49 = vsel %vm263_vm2, %v781_v48, 0.0  ;;  %v789_v50 = vmul.f32 %v781_v48, %v781_v48 }
 0x306   :  { %v783_v51 = vrot.slane %v782_v49, 4 }
 0x307   :  { %v790_v52 = vsel %vm263_vm2, %v789_v50, 0.0 }
 0x308   :  { %v784_v53 = vadd.f32 %v783_v51, %v782_v49  ;;  %v791_v54 = vrot.slane %v790_v52, 4 }
 0x30a   :  { %v785_v37 = vrot.slane %v784_v53, 2  ;;  %v792_v56 = vadd.f32 %v791_v54, %v790_v52 }
 0x30c   :  { %v786_v57 = vadd.f32 %v785_v37, %v784_v53  ;;  %v793_v58 = vrot.slane %v792_v56, 2 }
 0x30e   :  { %v787_v59 = vrot.slane %v786_v57, 1  ;;  %v794_v60 = vadd.f32 %v793_v58, %v792_v56 }
 0x310   :  { %v788_v61 = vadd.f32 %v787_v59, %v786_v57  ;;  %v795_v62 = vrot.slane %v794_v60, 1 }
 0x312   :  { %1267 = vmatmul.mubr.msk.f32.vlgmr.msra.gmra.mrb[4].mxu1 %vm263_vm2, %v788_v61  ;;  %v796_v63 = vadd.f32 %v795_v62, %v794_v60 }
 0x313   :  { %1427 = vmatpush3.bf16.msra.mxu1 %v1767_v17  ;;  %1273 = vmatprep.mubr.msk.f32.mxu1 %vm1444_vm1, %v1445_v20 }
 0x314   :  { %1276 = vmatprep.subr.mxu1 %v1445_v20 }
 0x316   :  { %1274 = vmatmul.mubr.msk.f32.vlgmr.msra.gmra.mrb[6].mxu1 %vm263_vm2, %v796_v63 }
 0x317   :  { %1277 = vmatpush3.msk.msra.mxu1 %vm436_vm3, %v1806_v3  ;;  %1278 = vmatprep.mubr.msk.f32.mxu1 %vm1444_vm1, %v1445_v20 }
 0x318   :  { %1281 = vmatprep.subr.mxu1 %v1445_v20 }
 0x3e5   :  { %v866_v2 = vpop.f32.mrb[4].mxu1 }
 0x3e6   :  { %v870_v5 = vmul.f32 0.03125, %v866_v2  ;;  %v1268_v6 = vpop.f32.mrb[5].mxu1 }
 0x3e8   :  { %1279 = vmatmul.mubr.msk.f32.vlgmr.msra.gmra.mrb[8].mxu1 %vm432_vm4, %v870_v5  ;;  %v945_v7 = vmul.f32 %v870_v5, %v870_v5 }
 0x3e9   :  { %v940_v17 = vpop.f32.mrb[6].mxu1  ;;  %1282 = vmatpush3.msk.msra.mxu1 %vm436_vm3, %v1806_v3  ;;  %1283 = vmatprep.mubr.msk.f32.mxu1 %vm1444_vm1, %v1445_v20 }
 0x3ea   :  { %v944_v9 = vmul.f32 0.03125, %v940_v17  ;;  %v1275_v10 = vpop.f32.mrb[7].mxu1 }
 0x3ec   :  { %v946_v13 = vsub.f32 %v944_v9, %v945_v7 }
 0x3ee   :  { %v947_v15 = vadd.f32 1e-05, %v946_v13 }
 0x3f0   :  { %1437 = vrsqrt.f32 %v947_v15 }
 0x3fa   :  { %v1438_v16 = vpop.eup %1437 }
 0x3fb   :  { %1284 = vmatmul.mubr.msk.f32.vlgmr.msra.gmra.mrb[10].mxu1 %vm432_vm4, %v1438_v16 }
 0x4bb   :  { %v1018_v18 = vpop.f32.mrb[8].mxu1 }
 0x4bc   :  { %v1280_v21 = vpop.f32.mrb[9].mxu1  ;;  %v1098_v22 = vrot.slane %v1018_v18, %v1781_v39 }
 0x4be   :  { %v1099_v27 = vsub.f32 %v781_v48, %v1098_v22 }
 0x4ce   :  { %v1091_v24 = vpop.f32.mrb[10].mxu1 }
 0x4cf   :  { %v1103_v3 = vrot.slane %v1091_v24, %v1781_v39  ;;  %v1285_v4 = vpop.f32.mrb[11].mxu1 }
 0x4d1   :  { %v1104_v11 = vmul.f32 %v1103_v3, %v1099_v27 }
 0x4d3   :  { %v1105_v20 = vmul.f32 %v1862_v28, %v1104_v11 }
 0x4d5   :  { %v1106_v26 = vadd.f32 %v1867_v30, %v1105_v20 }
 0x4d7   :  { %v1146_v35 = vmul.f32 -1.442695, %v1106_v26 }
 0x4d9   :  { %1439 = vpow2.f32 %v1146_v35 }
 0x4e3   :  { %v1440_v44 = vpop.eup %1439 }
 0x4e4   :  { %v1110_v55 = vadd.f32 1.0, %v1440_v44 }
 0x4e6   :  { %1441 = vrcp.f32 %v1110_v55 }
 0x4f0   :  { %v1442_v1 = vpop.eup %1441 }
 0x4f1   :  { %v1113_v14 = vmul.f32 %v1442_v1, %v1106_v26 }
 0x4f3   :  { %1147 = vst.msk [vmem:[%s1919_s9 + $0x8] sm:$0xff] %vm263_vm2, %v1113_v14 }

// kernel: ustack_forward.14
= control target key start
LH: loop header
LB: loop body
LE: loop exit
PB: predicated region body
PF: predicated region fallthrough
CT: control target
= control target key end

     0   :  { %vm55_vm0 = vcmask 64512   ;;  %v1625_v16 = vmov 0.0|0.0   ;;  %vm1626_vm1 = vmmov 0   ;;  %v1627_v21 = vmov 0.0   ;;  %s2224_s2 = inlined_call_operand.vmem [shape: f32[8,16], index: 2, kind: input, shape index: {}]   ;;  %s2225_s1 = inlined_call_operand.vmem [shape: f32[2,64,8], index: 1, kind: input, shape index: {}]   ;;  %s2226_s4 = inlined_call_operand.vmem [shape: f32[16,4], index: 4, kind: input, shape index: {}]   ;;  %s2227_s3 = inlined_call_operand.vmem [shape: f32[1,16], index: 3, kind: input, shape index: {}]   ;;  %s2228_s0 = inlined_call_operand.vmem [shape: f32[2,64,16], index: 0, kind: input, shape index: {}]   ;;  %s2229_s8 = inlined_call_operand.vmem [shape: f32[2,64,16], index: 8, kind: output, shape index: {0}]   ;;  %s2230_s5 = inlined_call_operand.vmem [shape: f32[4,16], index: 5, kind: input, shape index: {}]   ;;  %s2231_s6 = inlined_call_operand.vmem [shape: f32[1,16], index: 6, kind: input, shape index: {}]   ;;  %s2232_s7 = inlined_call_operand.vmem [shape: f32[1,16], index: 7, kind: input, shape index: {}]   ;;  %s2233_s9 = inlined_call_operand.vmem [shape: f32[2,64,16], index: 9, kind: output, shape index: {1}]  }
   0x1   :  { %v47_v0 = vld [vmem:[%s2224_s2] sm:$0xff]  ;;  %v40_v2 = vld [vmem:[%s2225_s1 + $0x8] sm:$0xff]  ;;  %v41_v3 = vld [vmem:[%s2225_s1 + $0x10] sm:$0xff]  ;;  %1542 = vmatprep.subr.bf16.mxu1 %v1625_v16  ;;  %1484 = vmatprep.mubr.msk.f32.mxu1 %vm1626_vm1, %v1627_v21  ;;  %vm201_vm2 = vcmask 130048   ;;  %vm422_vm3 = vcmask 1043456   ;;  %vm418_vm4 = vcmask 31744  }
   0x2   :  { %v39_v1 = vld [vmem:[%s2225_s1] sm:$0xff]  ;;  %1466 = vmatprep.subr.mxu0 %v47_v0  ;;  %v42_v4 = vld [vmem:[%s2225_s1 + $0x18] sm:$0xff]  ;;  %v44_v6 = vld [vmem:[%s2225_s1 + $0x28] sm:$0xff] }
   0x3   :  { %1468 = vmatprep.mubr.msk.f32.mxu0 %vm55_vm0, %v39_v1  ;;  %1467 = vmatpush3.msra.mxu0 %v47_v0  ;;  %v43_v5 = vld [vmem:[%s2225_s1 + $0x20] sm:$0xff]  ;;  %v45_v7 = vld [vmem:[%s2225_s1 + $0x30] sm:$0xff]  ;;  %v46_v8 = vld [vmem:[%s2225_s1 + $0x38] sm:$0xff] }
   0x4   :  { %1469 = vmatmul.mubr.msk.f32.vlgmr.msra.gmra.mrb[0].mxu0 %vm55_vm0, %v40_v2  ;;  %1504 = vmatprep.subr.mxu0 %v47_v0  ;;  %v1379_v9 = vld [vmem:[%s2225_s1 + $0x40] sm:$0xff]  ;;  %v1380_v10 = vld [vmem:[%s2225_s1 + $0x48] sm:$0xff]  ;;  %v1381_v11 = vld [vmem:[%s2225_s1 + $0x50] sm:$0xff] }
   0x5   :  { %1471 = vmatprep.mubr.msk.f32.mxu0 %vm55_vm0, %v41_v3  ;;  %1505 = vmatpush3.msra.mxu0 %v47_v0  ;;  %v1382_v12 = vld [vmem:[%s2225_s1 + $0x58] sm:$0xff]  ;;  %v1383_v13 = vld [vmem:[%s2225_s1 + $0x60] sm:$0xff]  ;;  %v1384_v14 = vld [vmem:[%s2225_s1 + $0x68] sm:$0xff] }
   0x6   :  { %v1385_v15 = vld [vmem:[%s2225_s1 + $0x70] sm:$0xff]  ;;  %v210_v17 = vld [vmem:[%s2226_s4] sm:$0xff]  ;;  %v211_v18 = vld [vmem:[%s2226_s4 + $0x8] sm:$0xff] }
   0x7   :  { %v1386_v19 = vld [vmem:[%s2225_s1 + $0x78] sm:$0xff]  ;;  %v1751_v20 = vpack.c.bf16 %v211_v18, %v210_v17  ;;  %v1761_v22 = vld [vmem:[%s2227_s3] ss:$0 sm:$0xff]  ;;  %v32_v23 = vld [vmem:[%s2228_s0 + $0x8] sm:$0xff] }
   0x8   :  { %1472 = vmatmul.mubr.msk.f32.gmra.mrb[2].mxu0 %vm55_vm0, %v42_v4  ;;  %v31_v26 = vld [vmem:[%s2228_s0] sm:$0xff]  ;;  %v34_v31 = vld [vmem:[%s2228_s0 + $0x18] sm:$0xff]  ;;  %v33_v35 = vld [vmem:[%s2228_s0 + $0x10] sm:$0xff] }
   0x9   :  { %1474 = vmatprep.mubr.msk.f32.mxu0 %vm55_vm0, %v43_v5  ;;  %1544 = vmatpush3.bf16.msra.mxu1 %v1751_v20  ;;  %v36_v45 = vld [vmem:[%s2228_s0 + $0x28] sm:$0xff]  ;;  %v35_v49 = vld [vmem:[%s2228_s0 + $0x20] sm:$0xff]  ;;  %v38_v1 = vld [vmem:[%s2228_s0 + $0x38] sm:$0xff] }
   0xa   :  { %1545 = vmatprep.subr.bf16.mxu1 %v1625_v16  ;;  %v37_v3 = vld [vmem:[%s2228_s0 + $0x30] sm:$0xff] }
   0xc   :  { %1475 = vmatmul.mubr.msk.f32.gmra.mrb[4].mxu0 %vm55_vm0, %v44_v6 }
   0xd   :  { %1477 = vmatprep.mubr.msk.f32.mxu0 %vm55_vm0, %v45_v7 }
  0x10   :  { %1478 = vmatmul.mubr.msk.f32.gmra.mrb[6].mxu0 %vm55_vm0, %v46_v8 }
  0x11   :  { %1506 = vmatprep.mubr.msk.f32.mxu0 %vm55_vm0, %v1379_v9 }
  0x14   :  { %1507 = vmatmul.mubr.msk.f32.vlgmr.msra.gmra.mrb[8].mxu0 %vm55_vm0, %v1380_v10 }
  0x15   :  { %1509 = vmatprep.mubr.msk.f32.mxu0 %vm55_vm0, %v1381_v11 }
  0x18   :  { %1510 = vmatmul.mubr.msk.f32.gmra.mrb[10].mxu0 %vm55_vm0, %v1382_v12 }
  0x19   :  { %1512 = vmatprep.mubr.msk.f32.mxu0 %vm55_vm0, %v1383_v13 }
  0x1c   :  { %1513 = vmatmul.mubr.msk.f32.gmra.mrb[12].mxu0 %vm55_vm0, %v1384_v14 }
  0x1d   :  { %1515 = vmatprep.mubr.msk.f32.mxu0 %vm55_vm0, %v1385_v15 }
  0x20   :  { %1516 = vmatmul.mubr.msk.f32.gmra.mrb[14].mxu0 %vm55_vm0, %v1386_v19 }
  0xd7   :  { %v1470_v24 = vpop.f32.mrb[0].mxu0 }
  0xd8   :  { %v152_v25 = vadd.f32 %v1470_v24, %v1761_v22  ;;  %v146_v27 = vpop.f32.mrb[1].mxu0 }
  0xd9   :  { %v147_v28 = vadd.f32 %v1761_v22, %v146_v27 }
  0xda   :  { %v186_v29 = vadd.f32 %v152_v25, %v32_v23 }
  0xdb   :  { %v185_v30 = vadd.f32 %v147_v28, %v31_v26  ;;  %v1473_v32 = vpop.f32.mrb[2].mxu0 }
  0xdc   :  { %v1774_v33 = vmul.f32 0.70710677, %v186_v29  ;;  %v162_v34 = vadd.f32 %v1473_v32, %v1761_v22  ;;  %v156_v36 = vpop.f32.mrb[3].mxu0 }
  0xdd   :  { %v1780_v37 = vmul.f32 0.70710677, %v185_v30  ;;  %v157_v38 = vadd.f32 %v1761_v22, %v156_v36 }
  0xde   :  { %203 = vst.msk [vmem:[%s2229_s8 + $0x8] sm:$0xff] %vm201_vm2, %v1774_v33  ;;  %v237_v39 = vmul.f32 %v1774_v33, %v1774_v33  ;;  %v188_v40 = vadd.f32 %v162_v34, %v34_v31  ;;  %v216_v41 = vsel %vm201_vm2, %v1774_v33, 0.0 }
  0xdf   :  { %202 = vst.msk [vmem:[%s2229_s8] sm:$0xff] %vm201_vm2, %v1780_v37  ;;  %v215_v42 = vsel %vm201_vm2, %v1780_v37, 0.0  ;;  %v236_v43 = vmul.f32 %v1780_v37, %v1780_v37  ;;  %v187_v44 = vadd.f32 %v157_v38, %v33_v35  ;;  %v1476_v46 = vpop.f32.mrb[4].mxu0 }
  0xe0   :  { %v1804_v47 = vmul.f32 0.70710677, %v188_v40  ;;  %v172_v48 = vadd.f32 %v1476_v46, %v1761_v22  ;;  %v166_v50 = vpop.f32.mrb[5].mxu0  ;;  %v245_v51 = vsel %vm201_vm2, %v237_v39, 0.0  ;;  %v217_v55 = vadd.f32 %v216_v41, %v215_v42 }
  0xe1   :  { %v244_v52 = vsel %vm201_vm2, %v236_v43, 0.0  ;;  %v1812_v53 = vmul.f32 0.70710677, %v187_v44  ;;  %v167_v54 = vadd.f32 %v1761_v22, %v166_v50 }
  0xe2   :  { %205 = vst.msk [vmem:[%s2229_s8 + $0x18] sm:$0xff] %vm201_vm2, %v1804_v47  ;;  %v239_v56 = vmul.f32 %v1804_v47, %v1804_v47  ;;  %v190_v57 = vadd.f32 %v172_v48, %v36_v45  ;;  %v246_v62 = vadd.f32 %v245_v51, %v244_v52  ;;  %v220_v5 = vsel %vm201_vm2, %v1804_v47, 0.0 }
  0xe3   :  { %204 = vst.msk [vmem:[%s2229_s8 + $0x10] sm:$0xff] %vm201_vm2, %v1812_v53  ;;  %v218_v58 = vsel %vm201_vm2, %v1812_v53, 0.0  ;;  %v238_v59 = vmul.f32 %v1812_v53, %v1812_v53  ;;  %v189_v60 = vadd.f32 %v167_v54, %v35_v49  ;;  %v1479_v61 = vpop.f32.mrb[6].mxu0 }
  0xe4   :  { %v219_v63 = vadd.f32 %v218_v58, %v217_v55  ;;  %v1831_v0 = vmul.f32 0.70710677, %v190_v57  ;;  %v182_v2 = vadd.f32 %v1479_v61, %v1761_v22  ;;  %v176_v4 = vpop.f32.mrb[7].mxu0  ;;  %v249_v9 = vsel %vm201_vm2, %v239_v56, 0.0  ;;  %v1372_v57 = vld [vmem:[%s2228_s0 + $0x48] sm:$0xff] }
  0xe5   :  { %v247_v6 = vsel %vm201_vm2, %v238_v59, 0.0  ;;  %v1843_v7 = vmul.f32 0.70710677, %v189_v60  ;;  %v177_v8 = vadd.f32 %v1761_v22, %v176_v4  ;;  %v1371_v60 = vld [vmem:[%s2228_s0 + $0x40] sm:$0xff] }
  0xe6   :  { %v248_v10 = vadd.f32 %v247_v6, %v246_v62  ;;  %207 = vst.msk [vmem:[%s2229_s8 + $0x28] sm:$0xff] %vm201_vm2, %v1831_v0  ;;  %v241_v11 = vmul.f32 %v1831_v0, %v1831_v0  ;;  %v221_v12 = vadd.f32 %v220_v5, %v219_v63  ;;  %v192_v15 = vadd.f32 %v182_v2, %v38_v1  ;;  %v1374_v2 = vld [vmem:[%s2228_s0 + $0x58] sm:$0xff]  ;;  %v1373_v6 = vld [vmem:[%s2228_s0 + $0x50] sm:$0xff] }
  0xe7   :  { %206 = vst.msk [vmem:[%s2229_s8 + $0x20] sm:$0xff] %vm201_vm2, %v1843_v7  ;;  %v222_v13 = vsel %vm201_vm2, %v1843_v7, 0.0  ;;  %v240_v14 = vmul.f32 %v1843_v7, %v1843_v7  ;;  %v191_v17 = vadd.f32 %v177_v8, %v37_v3  ;;  %v224_v23 = vsel %vm201_vm2, %v1831_v0, 0.0  ;;  %v1508_v58 = vpop.f32.mrb[8].mxu0 }
  0xe8   :  { %v223_v18 = vadd.f32 %v222_v13, %v221_v12  ;;  %v250_v19 = vadd.f32 %v249_v9, %v248_v10  ;;  %v1866_v25 = vmul.f32 0.70710677, %v192_v15  ;;  %v253_v29 = vsel %vm201_vm2, %v241_v11, 0.0  ;;  %v801_v61 = vpop.f32.mrb[9].mxu0  ;;  %v1376_v13 = vld [vmem:[%s2228_s0 + $0x68] sm:$0xff] }
  0xe9   :  { %v251_v24 = vsel %vm201_vm2, %v240_v14, 0.0  ;;  %v1868_v26 = vmul.f32 0.70710677, %v191_v17  ;;  %v807_v59 = vadd.f32 %v1508_v58, %v1761_v22  ;;  %v802_v62 = vadd.f32 %v1761_v22, %v801_v61 }
  0xea   :  { %v252_v27 = vadd.f32 %v251_v24, %v250_v19  ;;  %v225_v28 = vadd.f32 %v224_v23, %v223_v18  ;;  %209 = vst.msk [vmem:[%s2229_s8 + $0x38] sm:$0xff] %vm201_vm2, %v1866_v25  ;;  %v243_v30 = vmul.f32 %v1866_v25, %v1866_v25  ;;  %v228_v36 = vsel %vm201_vm2, %v1866_v25, 0.0  ;;  %v1375_v18 = vld [vmem:[%s2228_s0 + $0x60] sm:$0xff] }
  0xeb   :  { %208 = vst.msk [vmem:[%s2229_s8 + $0x30] sm:$0xff] %vm201_vm2, %v1868_v26  ;;  %v226_v31 = vsel %vm201_vm2, %v1868_v26, 0.0  ;;  %v242_v32 = vmul.f32 %v1868_v26, %v1868_v26  ;;  %v841_v63 = vadd.f32 %v1372_v57, %v807_v59  ;;  %v840_v1 = vadd.f32 %v1371_v60, %v802_v62  ;;  %v1511_v3 = vpop.f32.mrb[10].mxu0 }
  0xec   :  { %v227_v34 = vadd.f32 %v226_v31, %v225_v28  ;;  %v254_v35 = vadd.f32 %v253_v29, %v252_v27  ;;  %v257_v41 = vsel %vm201_vm2, %v243_v30, 0.0  ;;  %v817_v5 = vadd.f32 %v1511_v3, %v1761_v22  ;;  %v811_v8 = vpop.f32.mrb[11].mxu0  ;;  %v1378_v31 = vld [vmem:[%s2228_s0 + $0x78] sm:$0xff] }
  0xed   :  { %v255_v38 = vsel %vm201_vm2, %v242_v32, 0.0  ;;  %v1910_v4 = vmul.f32 0.70710677, %v841_v63  ;;  %v1916_v9 = vmul.f32 0.70710677, %v840_v1  ;;  %v812_v10 = vadd.f32 %v1761_v22, %v811_v8 }
  0xee   :  { %v256_v39 = vadd.f32 %v255_v38, %v254_v35  ;;  %v229_v40 = vadd.f32 %v228_v36, %v227_v34  ;;  %v843_v11 = vadd.f32 %v1374_v2, %v817_v5  ;;  %v1377_v34 = vld [vmem:[%s2228_s0 + $0x70] sm:$0xff] }
  0xef   :  { %1397 = vst.msk [vmem:[%s2229_s8 + $0x48] sm:$0xff] %vm201_vm2, %v1910_v4  ;;  %1396 = vst.msk [vmem:[%s2229_s8 + $0x40] sm:$0xff] %vm201_vm2, %v1916_v9  ;;  %v842_v12 = vadd.f32 %v1373_v6, %v812_v10  ;;  %v1514_v14 = vpop.f32.mrb[12].mxu0 }
  0xf0   :  { %v258_v42 = vadd.f32 %v257_v41, %v256_v39  ;;  %v230_v43 = vrot.slane %v229_v40, 4  ;;  %v1932_v15 = vmul.f32 0.70710677, %v843_v11  ;;  %v827_v17 = vadd.f32 %v1514_v14, %v1761_v22  ;;  %v821_v19 = vpop.f32.mrb[13].mxu0 }
  0xf1   :  { %v1938_v23 = vmul.f32 0.70710677, %v842_v12  ;;  %v822_v24 = vadd.f32 %v1761_v22, %v821_v19 }
  0xf2   :  { %v231_v44 = vadd.f32 %v230_v43, %v229_v40  ;;  %v259_v45 = vrot.slane %v258_v42, 4  ;;  %1399 = vst.msk [vmem:[%s2229_s8 + $0x58] sm:$0xff] %vm201_vm2, %v1932_v15  ;;  %v845_v27 = vadd.f32 %v1376_v13, %v827_v17  ;;  %v871_v43 = vsel %vm201_vm2, %v1910_v4, 0.0 }
  0xf3   :  { %1398 = vst.msk [vmem:[%s2229_s8 + $0x50] sm:$0xff] %vm201_vm2, %v1938_v23  ;;  %v844_v28 = vadd.f32 %v1375_v18, %v822_v24  ;;  %v1517_v29 = vpop.f32.mrb[14].mxu0  ;;  %v894_v57 = vmul.f32 %v1932_v15, %v1932_v15 }
  0xf4   :  { %v232_v46 = vrot.slane %v231_v44, 2  ;;  %v260_v48 = vadd.f32 %v259_v45, %v258_v42  ;;  %v1951_v30 = vmul.f32 0.70710677, %v845_v27  ;;  %v837_v32 = vadd.f32 %v1517_v29, %v1761_v22  ;;  %v831_v35 = vpop.f32.mrb[15].mxu0 }
  0xf5   :  { %v1960_v36 = vmul.f32 0.70710677, %v844_v28  ;;  %v832_v38 = vadd.f32 %v1761_v22, %v831_v35  ;;  %v212_v22 = vld [vmem:[%s2230_s5] sm:$0xf]  ;;  %v870_v45 = vsel %vm201_vm2, %v1916_v9, 0.0  ;;  %v904_v61 = vsel %vm201_vm2, %v894_v57, 0.0 }
  0xf6   :  { %v233_v49 = vadd.f32 %v232_v46, %v231_v44  ;;  %v261_v50 = vrot.slane %v260_v48, 2  ;;  %1401 = vst.msk [vmem:[%s2229_s8 + $0x68] sm:$0xff] %vm201_vm2, %v1951_v30  ;;  %v847_v39 = vadd.f32 %v1378_v31, %v837_v32  ;;  %v892_v44 = vmul.f32 %v1910_v4, %v1910_v4 }
  0xf7   :  { %1400 = vst.msk [vmem:[%s2229_s8 + $0x60] sm:$0xff] %vm201_vm2, %v1960_v36  ;;  %v846_v40 = vadd.f32 %v1377_v34, %v832_v38  ;;  %v891_v46 = vmul.f32 %v1916_v9, %v1916_v9  ;;  %v877_v62 = vsel %vm201_vm2, %v1960_v36, 0.0  ;;  %v895_v63 = vmul.f32 %v1960_v36, %v1960_v36 }
  0xf8   :  { %v234_v51 = vrot.slane %v233_v49, 1  ;;  %v262_v52 = vadd.f32 %v261_v50, %v260_v48  ;;  %v1973_v41 = vmul.f32 0.70710677, %v847_v39  ;;  %v872_v48 = vadd.f32 %v871_v43, %v870_v45 }
  0xf9   :  { %v1975_v42 = vmul.f32 0.70710677, %v846_v40  ;;  %v899_v50 = vsel %vm201_vm2, %v891_v46, 0.0  ;;  %v879_v3 = vsel %vm201_vm2, %v1951_v30, 0.0  ;;  %v896_v5 = vmul.f32 %v1951_v30, %v1951_v30 }
  0xfa   :  { %v235_v54 = vadd.f32 %v234_v51, %v233_v49  ;;  %v263_v55 = vrot.slane %v262_v52, 1  ;;  %1403 = vst.msk [vmem:[%s2229_s8 + $0x78] sm:$0xff] %vm201_vm2, %v1973_v41  ;;  %v900_v49 = vsel %vm201_vm2, %v892_v44, 0.0  ;;  %v873_v51 = vsel %vm201_vm2, %v1938_v23, 0.0 }
  0xfb   :  { %1402 = vst.msk [vmem:[%s2229_s8 + $0x70] sm:$0xff] %vm201_vm2, %v1975_v42  ;;  %v906_v6 = vsel %vm201_vm2, %v895_v63, 0.0  ;;  %v908_v11 = vsel %vm201_vm2, %v896_v5, 0.0  ;;  %v881_v12 = vsel %vm201_vm2, %v1975_v42, 0.0  ;;  %v897_v13 = vmul.f32 %v1975_v42, %v1975_v42 }
  0xfc   :  { %1485 = vmatmul.mubr.msk.f32.vlgmr.msra.gmra.mrb[0].mxu1 %vm201_vm2, %v235_v54  ;;  %v264_v56 = vadd.f32 %v263_v55, %v262_v52  ;;  %v893_v52 = vmul.f32 %v1938_v23, %v1938_v23  ;;  %v901_v54 = vadd.f32 %v900_v49, %v899_v50  ;;  %v874_v55 = vadd.f32 %v873_v51, %v872_v48 }
  0xfd   :  { %1547 = vmatpush3.bf16.msra.mxu1 %v1751_v20  ;;  %1491 = vmatprep.mubr.msk.f32.mxu1 %vm1626_vm1, %v1627_v21  ;;  %v883_v18 = vsel %vm201_vm2, %v1973_v41, 0.0  ;;  %v898_v19 = vmul.f32 %v1973_v41, %v1973_v41  ;;  %v910_v24 = vsel %vm201_vm2, %v897_v13, 0.0 }
  0xfe   :  { %1494 = vmatprep.subr.mxu1 %v1627_v21  ;;  %v902_v58 = vsel %vm201_vm2, %v893_v52, 0.0 }
  0xff   :  { %v903_v59 = vadd.f32 %v902_v58, %v901_v54  ;;  %v912_v31 = vsel %vm201_vm2, %v898_v19, 0.0  ;;  %v2078_v19 = vld [vmem:[%s2232_s7] ss:$0 sm:$0xff] }
 0x100   :  { %1492 = vmatmul.mubr.msk.f32.vlgmr.msra.gmra.mrb[2].mxu1 %vm201_vm2, %v264_v56  ;;  %v875_v56 = vsel %vm201_vm2, %v1932_v15, 0.0 }
 0x101   :  { %1496 = vmatprep.mubr.msk.f32.mxu1 %vm1626_vm1, %v1627_v21  ;;  %1495 = vmatpush3.msk.msra.mxu1 %vm422_vm3, %v212_v22  ;;  %v876_v60 = vadd.f32 %v875_v56, %v874_v55  ;;  %v905_v2 = vadd.f32 %v904_v61, %v903_v59  ;;  %v569_v61 = vlaneseq }
 0x102   :  { %1499 = vmatprep.subr.mxu1 %v1627_v21 }
 0x103   :  { %v878_v1 = vadd.f32 %v877_v62, %v876_v60  ;;  %v907_v8 = vadd.f32 %v906_v6, %v905_v2  ;;  %v570_v62 = vshrl.u32 %v569_v61, 7 }
 0x105   :  { %v880_v10 = vadd.f32 %v879_v3, %v878_v1  ;;  %v909_v17 = vadd.f32 %v908_v11, %v907_v8  ;;  %v2058_v63 = vsub.s32 0, %v570_v62 }
 0x107   :  { %v882_v14 = vadd.f32 %v881_v12, %v880_v10  ;;  %v911_v28 = vadd.f32 %v910_v24, %v909_v17 }
 0x109   :  { %v884_v27 = vadd.f32 %v883_v18, %v882_v14  ;;  %v913_v38 = vadd.f32 %v912_v31, %v911_v28 }
 0x10b   :  { %v885_v35 = vrot.slane %v884_v27, 4  ;;  %v914_v48 = vrot.slane %v913_v38, 4 }
 0x10d   :  { %v886_v46 = vadd.f32 %v885_v35, %v884_v27  ;;  %v915_v51 = vadd.f32 %v914_v48, %v913_v38 }
 0x10f   :  { %v887_v50 = vrot.slane %v886_v46, 2  ;;  %v916_v54 = vrot.slane %v915_v51, 2 }
 0x111   :  { %v888_v52 = vadd.f32 %v887_v50, %v886_v46  ;;  %v917_v56 = vadd.f32 %v916_v54, %v915_v51 }
 0x113   :  { %v889_v55 = vrot.slane %v888_v52, 1  ;;  %v918_v58 = vrot.slane %v917_v56, 1 }
 0x115   :  { %v890_v57 = vadd.f32 %v889_v55, %v888_v52  ;;  %v919_v59 = vadd.f32 %v918_v58, %v917_v56 }
 0x1cf   :  { %v334_v29 = vpop.f32.mrb[0].mxu1 }
 0x1d0   :  { %v339_v32 = vmul.f32 0.00390625, %v334_v29  ;;  %v1486_v34 = vpop.f32.mrb[1].mxu1 }
 0x1d2   :  { %1497 = vmatmul.mubr.msk.f32.vlgmr.msra.gmra.mrb[4].mxu1 %vm418_vm4, %v339_v32  ;;  %v414_v40 = vmul.f32 %v339_v32, %v339_v32 }
 0x1d3   :  { %v409_v39 = vpop.f32.mrb[2].mxu1  ;;  %1500 = vmatpush3.msk.msra.mxu1 %vm422_vm3, %v212_v22  ;;  %1501 = vmatprep.mubr.msk.f32.mxu1 %vm1626_vm1, %v1627_v21 }
 0x1d4   :  { %v413_v43 = vmul.f32 0.00390625, %v409_v39  ;;  %v1493_v44 = vpop.f32.mrb[3].mxu1  ;;  %1548 = vmatprep.subr.bf16.mxu1 %v1625_v16 }
 0x1d6   :  { %v415_v45 = vsub.f32 %v413_v43, %v414_v40 }
 0x1d8   :  { %v416_v49 = vadd.f32 1e-05, %v415_v45 }
 0x1da   :  { %1557 = vrsqrt.f32 %v416_v49 }
 0x1e4   :  { %v1558_v22 = vpop.eup %1557 }
 0x1e5   :  { %1502 = vmatmul.mubr.msk.f32.vlgmr.msra.gmra.mrb[6].mxu1 %vm418_vm4, %v1558_v22 }
 0x1e6   :  { %1550 = vmatpush3.bf16.msra.mxu1 %v1751_v20  ;;  %1522 = vmatprep.mubr.msk.f32.mxu1 %vm1626_vm1, %v1627_v21 }
 0x1e7   :  { %1551 = vmatprep.subr.bf16.mxu1 %v1625_v16  ;;  %v2053_v16 = vld [vmem:[%s2230_s5] sm:$0xf] }
 0x1e9   :  { %1523 = vmatmul.mubr.msk.f32.vlgmr.msra.gmra.mrb[8].mxu1 %vm201_vm2, %v890_v57 }
 0x1ea   :  { %1553 = vmatpush3.bf16.msra.mxu1 %v1751_v20  ;;  %1529 = vmatprep.mubr.msk.f32.mxu1 %vm1626_vm1, %v1627_v21 }
 0x1eb   :  { %1532 = vmatprep.subr.mxu1 %v1627_v21 }
 0x1ed   :  { %1530 = vmatmul.mubr.msk.f32.vlgmr.msra.gmra.mrb[10].mxu1 %vm201_vm2, %v919_v59 }
 0x1ee   :  { %1534 = vmatprep.mubr.msk.f32.mxu1 %vm1626_vm1, %v1627_v21  ;;  %1533 = vmatpush3.msk.msra.mxu1 %vm422_vm3, %v2053_v16 }
 0x1ef   :  { %1537 = vmatprep.subr.mxu1 %v1627_v21 }
 0x2a5   :  { %v492_v20 = vpop.f32.mrb[4].mxu1 }
 0x2a6   :  { %v1498_v60 = vpop.f32.mrb[5].mxu1  ;;  %v572_v1 = vrot.slane %v492_v20, %v2058_v63 }
 0x2a8   :  { %v573_v2 = vsub.f32 %v1780_v37, %v572_v1  ;;  %v574_v5 = vsub.f32 %v1774_v33, %v572_v1  ;;  %v575_v6 = vsub.f32 %v1812_v53, %v572_v1  ;;  %v576_v8 = vsub.f32 %v1804_v47, %v572_v1  ;;  %v2073_v37 = vld [vmem:[%s2231_s6] ss:$0 sm:$0xff] }
 0x2a9   :  { %v577_v12 = vsub.f32 %v1843_v7, %v572_v1  ;;  %v578_v13 = vsub.f32 %v1831_v0, %v572_v1  ;;  %v579_v14 = vsub.f32 %v1868_v26, %v572_v1  ;;  %v580_v17 = vsub.f32 %v1866_v25, %v572_v1 }
 0x2b8   :  { %v565_v3 = vpop.f32.mrb[6].mxu1 }
 0x2b9   :  { %v584_v10 = vrot.slane %v565_v3, %v2058_v63  ;;  %v1503_v11 = vpop.f32.mrb[7].mxu1 }
 0x2bb   :  { %v585_v33 = vmul.f32 %v584_v10, %v573_v2  ;;  %v586_v53 = vmul.f32 %v584_v10, %v574_v5  ;;  %v587_v18 = vmul.f32 %v584_v10, %v575_v6  ;;  %v588_v47 = vmul.f32 %v584_v10, %v576_v8 }
 0x2bc   :  { %v589_v7 = vmul.f32 %v584_v10, %v577_v12  ;;  %v590_v0 = vmul.f32 %v584_v10, %v578_v13  ;;  %v591_v24 = vmul.f32 %v584_v10, %v579_v14  ;;  %v592_v26 = vmul.f32 %v584_v10, %v580_v17  ;;  %v989_v27 = vpop.f32.mrb[8].mxu1 }
 0x2bd   :  { %v599_v25 = vmul.f32 %v2073_v37, %v585_v33  ;;  %v600_v28 = vmul.f32 %v2073_v37, %v586_v53  ;;  %v601_v29 = vmul.f32 %v2073_v37, %v587_v18  ;;  %v602_v31 = vmul.f32 %v2073_v37, %v588_v47  ;;  %v1524_v32 = vpop.f32.mrb[9].mxu1 }
 0x2be   :  { %v603_v34 = vmul.f32 %v2073_v37, %v589_v7  ;;  %v604_v35 = vmul.f32 %v2073_v37, %v590_v0  ;;  %v605_v38 = vmul.f32 %v2073_v37, %v591_v24  ;;  %v606_v39 = vmul.f32 %v2073_v37, %v592_v26 }
 0x2bf   :  { %v2089_v40 = vadd.f32 %v2078_v19, %v599_v25  ;;  %v2092_v43 = vadd.f32 %v2078_v19, %v600_v28  ;;  %v2095_v44 = vadd.f32 %v2078_v19, %v601_v29  ;;  %v2098_v45 = vadd.f32 %v2078_v19, %v602_v31 }
 0x2c0   :  { %v2101_v46 = vadd.f32 %v2078_v19, %v603_v34  ;;  %v2104_v48 = vadd.f32 %v2078_v19, %v604_v35  ;;  %v1063_v49 = vpop.f32.mrb[10].mxu1  ;;  %v2107_v50 = vadd.f32 %v2078_v19, %v605_v38  ;;  %v2113_v55 = vadd.f32 %v2078_v19, %v606_v39 }
 0x2c1   :  { %v1363_v51 = vmul.f32 -1.442695, %v2089_v40  ;;  %v1364_v52 = vmul.f32 -1.442695, %v2092_v43  ;;  %v1365_v54 = vmul.f32 -1.442695, %v2095_v44 }
 0x2c2   :  { %v1366_v56 = vmul.f32 -1.442695, %v2098_v45  ;;  %v1367_v22 = vmul.f32 -1.442695, %v2101_v46  ;;  %v993_v57 = vmul.f32 0.00390625, %v989_v27  ;;  %v1531_v58 = vpop.f32.mrb[11].mxu1 }
 0x2c3   :  { %1559 = vpow2.f32 %v1363_v51  ;;  %v1368_v59 = vmul.f32 -1.442695, %v2104_v48  ;;  %v1067_v20 = vmul.f32 0.00390625, %v1063_v49  ;;  %v1369_v60 = vmul.f32 -1.442695, %v2107_v50 }
 0x2c4   :  { %1561 = vpow2.f32 %v1364_v52  ;;  %v1068_v61 = vmul.f32 %v993_v57, %v993_v57  ;;  %1535 = vmatmul.mubr.msk.f32.vlgmr.msra.gmra.mrb[12].mxu1 %vm418_vm4, %v993_v57  ;;  %v1370_v62 = vmul.f32 -1.442695, %v2113_v55 }
 0x2c5   :  { %1563 = vpow2.f32 %v1365_v54  ;;  %1538 = vmatpush3.msk.msra.mxu1 %vm422_vm3, %v2053_v16  ;;  %1539 = vmatprep.mubr.msk.f32.mxu1 %vm1626_vm1, %v1627_v21 }
 0x2c6   :  { %1565 = vpow2.f32 %v1366_v56  ;;  %v1069_v1 = vsub.f32 %v1067_v20, %v1068_v61 }
 0x2c7   :  { %1567 = vpow2.f32 %v1367_v22 }
 0x2c8   :  { %1569 = vpow2.f32 %v1368_v59  ;;  %v1070_v2 = vadd.f32 1e-05, %v1069_v1 }
 0x2c9   :  { %1571 = vpow2.f32 %v1369_v60 }
 0x2ca   :  { %1573 = vpow2.f32 %v1370_v62 }
 0x2cb   :  { %1575 = vrsqrt.f32 %v1070_v2 }
 0x2cd   :  { %v1560_v3 = vpop.eup %1559 }
 0x2ce   :  { %v1562_v5 = vpop.eup %1561  ;;  %v645_v6 = vadd.f32 1.0, %v1560_v3 }
 0x2cf   :  { %v1564_v8 = vpop.eup %1563  ;;  %v646_v10 = vadd.f32 1.0, %v1562_v5 }
 0x2d0   :  { %v1566_v11 = vpop.eup %1565  ;;  %v647_v12 = vadd.f32 1.0, %v1564_v8  ;;  %1577 = vrcp.f32 %v645_v6 }
 0x2d1   :  { %v1568_v13 = vpop.eup %1567  ;;  %v648_v16 = vadd.f32 1.0, %v1566_v11  ;;  %1579 = vrcp.f32 %v646_v10 }
 0x2d2   :  { %v1570_v14 = vpop.eup %1569  ;;  %v649_v21 = vadd.f32 1.0, %v1568_v13  ;;  %1581 = vrcp.f32 %v647_v12 }
 0x2d3   :  { %v1572_v17 = vpop.eup %1571  ;;  %v650_v33 = vadd.f32 1.0, %v1570_v14  ;;  %1583 = vrcp.f32 %v648_v16 }
 0x2d4   :  { %v1574_v53 = vpop.eup %1573  ;;  %v651_v18 = vadd.f32 1.0, %v1572_v17  ;;  %1585 = vrcp.f32 %v649_v21 }
 0x2d5   :  { %v1576_v47 = vpop.eup %1575  ;;  %v652_v7 = vadd.f32 1.0, %v1574_v53  ;;  %1587 = vrcp.f32 %v650_v33 }
 0x2d6   :  { %1589 = vrcp.f32 %v651_v18  ;;  %1540 = vmatmul.mubr.msk.f32.vlgmr.msra.gmra.mrb[14].mxu1 %vm418_vm4, %v1576_v47 }
 0x2d7   :  { %1591 = vrcp.f32 %v652_v7 }
 0x2da   :  { %v1578_v0 = vpop.eup %1577 }
 0x2db   :  { %v1580_v24 = vpop.eup %1579  ;;  %v669_v26 = vmul.f32 %v1578_v0, %v2089_v40 }
 0x2dc   :  { %v1582_v27 = vpop.eup %1581  ;;  %v670_v25 = vmul.f32 %v1580_v24, %v2092_v43 }
 0x2dd   :  { %v1584_v28 = vpop.eup %1583  ;;  %v671_v29 = vmul.f32 %v1582_v27, %v2095_v44  ;;  %677 = vst.msk [vmem:[%s2233_s9] sm:$0xff] %vm201_vm2, %v669_v26 }
 0x2de   :  { %v1586_v31 = vpop.eup %1585  ;;  %v672_v32 = vmul.f32 %v1584_v28, %v2098_v45  ;;  %678 = vst.msk [vmem:[%s2233_s9 + $0x8] sm:$0xff] %vm201_vm2, %v670_v25 }
 0x2df   :  { %v1588_v34 = vpop.eup %1587  ;;  %v673_v35 = vmul.f32 %v1586_v31, %v2101_v46  ;;  %679 = vst.msk [vmem:[%s2233_s9 + $0x10] sm:$0xff] %vm201_vm2, %v671_v29 }
 0x2e0   :  { %v1590_v38 = vpop.eup %1589  ;;  %v674_v39 = vmul.f32 %v1588_v34, %v2104_v48  ;;  %680 = vst.msk [vmem:[%s2233_s9 + $0x18] sm:$0xff] %vm201_vm2, %v672_v32 }
 0x2e1   :  { %v1592_v40 = vpop.eup %1591  ;;  %v675_v43 = vmul.f32 %v1590_v38, %v2107_v50  ;;  %681 = vst.msk [vmem:[%s2233_s9 + $0x20] sm:$0xff] %vm201_vm2, %v673_v35 }
 0x2e2   :  { %v676_v44 = vmul.f32 %v1592_v40, %v2113_v55  ;;  %682 = vst.msk [vmem:[%s2233_s9 + $0x28] sm:$0xff] %vm201_vm2, %v674_v39 }
 0x2e3   :  { %683 = vst.msk [vmem:[%s2233_s9 + $0x30] sm:$0xff] %vm201_vm2, %v675_v43 }
 0x2e4   :  { %684 = vst.msk [vmem:[%s2233_s9 + $0x38] sm:$0xff] %vm201_vm2, %v676_v44 }
 0x397   :  { %v1144_v45 = vpop.f32.mrb[12].mxu1 }
 0x398   :  { %v1536_v46 = vpop.f32.mrb[13].mxu1  ;;  %v1224_v48 = vrot.slane %v1144_v45, %v2058_v63 }
 0x39a   :  { %v1225_v49 = vsub.f32 %v1916_v9, %v1224_v48  ;;  %v1226_v51 = vsub.f32 %v1910_v4, %v1224_v48  ;;  %v1227_v52 = vsub.f32 %v1938_v23, %v1224_v48  ;;  %v1228_v54 = vsub.f32 %v1932_v15, %v1224_v48 }
 0x39b   :  { %v1229_v22 = vsub.f32 %v1960_v36, %v1224_v48  ;;  %v1230_v57 = vsub.f32 %v1951_v30, %v1224_v48  ;;  %v1231_v58 = vsub.f32 %v1975_v42, %v1224_v48  ;;  %v1232_v59 = vsub.f32 %v1973_v41, %v1224_v48 }
 0x3a9   :  { %v1217_v50 = vpop.f32.mrb[14].mxu1 }
 0x3aa   :  { %v1236_v55 = vrot.slane %v1217_v50, %v2058_v63  ;;  %v1541_v56 = vpop.f32.mrb[15].mxu1 }
 0x3ac   :  { %v1237_v20 = vmul.f32 %v1236_v55, %v1225_v49  ;;  %v1238_v9 = vmul.f32 %v1236_v55, %v1226_v51  ;;  %v1239_v60 = vmul.f32 %v1236_v55, %v1227_v52  ;;  %v1240_v61 = vmul.f32 %v1236_v55, %v1228_v54 }
 0x3ad   :  { %v1241_v4 = vmul.f32 %v1236_v55, %v1229_v22  ;;  %v1242_v62 = vmul.f32 %v1236_v55, %v1230_v57  ;;  %v1243_v23 = vmul.f32 %v1236_v55, %v1231_v58  ;;  %v1244_v1 = vmul.f32 %v1236_v55, %v1232_v59 }
 0x3ae   :  { %v1251_v15 = vmul.f32 %v2073_v37, %v1237_v20  ;;  %v1252_v63 = vmul.f32 %v2073_v37, %v1238_v9  ;;  %v1253_v36 = vmul.f32 %v2073_v37, %v1239_v60  ;;  %v1254_v30 = vmul.f32 %v2073_v37, %v1240_v61 }
 0x3af   :  { %v1255_v42 = vmul.f32 %v2073_v37, %v1241_v4  ;;  %v1256_v41 = vmul.f32 %v2073_v37, %v1242_v62  ;;  %v1257_v2 = vmul.f32 %v2073_v37, %v1243_v23  ;;  %v1258_v3 = vmul.f32 %v2073_v37, %v1244_v1 }
 0x3b0   :  { %v1265_v5 = vadd.f32 %v2078_v19, %v1251_v15  ;;  %v1266_v6 = vadd.f32 %v2078_v19, %v1252_v63  ;;  %v1267_v8 = vadd.f32 %v2078_v19, %v1253_v36  ;;  %v1268_v10 = vadd.f32 %v2078_v19, %v1254_v30 }
 0x3b1   :  { %v1269_v11 = vadd.f32 %v2078_v19, %v1255_v42  ;;  %v1270_v12 = vadd.f32 %v2078_v19, %v1256_v41  ;;  %v1271_v13 = vadd.f32 %v2078_v19, %v1257_v2  ;;  %v1272_v17 = vadd.f32 %v2078_v19, %v1258_v3 }
 0x3b2   :  { %v1412_v16 = vmul.f32 -1.442695, %v1265_v5  ;;  %v1413_v14 = vmul.f32 -1.442695, %v1266_v6  ;;  %v1414_v21 = vmul.f32 -1.442695, %v1267_v8 }
 0x3b3   :  { %v1415_v37 = vmul.f32 -1.442695, %v1268_v10  ;;  %v1416_v33 = vmul.f32 -1.442695, %v1269_v11  ;;  %v1417_v53 = vmul.f32 -1.442695, %v1270_v12 }
 0x3b4   :  { %1593 = vpow2.f32 %v1412_v16  ;;  %v1418_v18 = vmul.f32 -1.442695, %v1271_v13  ;;  %v1419_v47 = vmul.f32 -1.442695, %v1272_v17 }
 0x3b5   :  { %1595 = vpow2.f32 %v1413_v14 }
 0x3b6   :  { %1597 = vpow2.f32 %v1414_v21 }
 0x3b7   :  { %1599 = vpow2.f32 %v1415_v37 }
 0x3b8   :  { %1601 = vpow2.f32 %v1416_v33 }
 0x3b9   :  { %1603 = vpow2.f32 %v1417_v53 }
 0x3ba   :  { %1605 = vpow2.f32 %v1418_v18 }
 0x3bb   :  { %1607 = vpow2.f32 %v1419_v47 }
 0x3be   :  { %v1594_v7 = vpop.eup %1593 }
 0x3bf   :  { %v1596_v0 = vpop.eup %1595  ;;  %v1297_v24 = vadd.f32 1.0, %v1594_v7 }
 0x3c0   :  { %v1598_v26 = vpop.eup %1597  ;;  %v1298_v27 = vadd.f32 1.0, %v1596_v0 }
 0x3c1   :  { %v1600_v25 = vpop.eup %1599  ;;  %v1299_v19 = vadd.f32 1.0, %v1598_v26  ;;  %1609 = vrcp.f32 %v1297_v24 }
 0x3c2   :  { %v1602_v28 = vpop.eup %1601  ;;  %v1300_v29 = vadd.f32 1.0, %v1600_v25  ;;  %1611 = vrcp.f32 %v1298_v27 }
 0x3c3   :  { %v1604_v31 = vpop.eup %1603  ;;  %v1301_v32 = vadd.f32 1.0, %v1602_v28  ;;  %1613 = vrcp.f32 %v1299_v19 }
 0x3c4   :  { %v1606_v34 = vpop.eup %1605  ;;  %v1302_v35 = vadd.f32 1.0, %v1604_v31  ;;  %1615 = vrcp.f32 %v1300_v29 }
 0x3c5   :  { %v1608_v38 = vpop.eup %1607  ;;  %v1303_v39 = vadd.f32 1.0, %v1606_v34  ;;  %1617 = vrcp.f32 %v1301_v32 }
 0x3c6   :  { %v1304_v40 = vadd.f32 1.0, %v1608_v38  ;;  %1619 = vrcp.f32 %v1302_v35 }
 0x3c7   :  { %1621 = vrcp.f32 %v1303_v39 }
 0x3c8   :  { %1623 = vrcp.f32 %v1304_v40 }
 0x3cb   :  { %v1610_v43 = vpop.eup %1609 }
 0x3cc   :  { %v1612_v44 = vpop.eup %1611  ;;  %v1321_v45 = vmul.f32 %v1610_v43, %v1265_v5 }
 0x3cd   :  { %v1614_v46 = vpop.eup %1613  ;;  %v1322_v48 = vmul.f32 %v1612_v44, %v1266_v6 }
 0x3ce   :  { %v1616_v49 = vpop.eup %1615  ;;  %v1323_v50 = vmul.f32 %v1614_v46, %v1267_v8  ;;  %1420 = vst.msk [vmem:[%s2233_s9 + $0x40] sm:$0xff] %vm201_vm2, %v1321_v45 }
 0x3cf   :  { %v1618_v51 = vpop.eup %1617  ;;  %v1324_v52 = vmul.f32 %v1616_v49, %v1268_v10  ;;  %1421 = vst.msk [vmem:[%s2233_s9 + $0x48] sm:$0xff] %vm201_vm2, %v1322_v48 }
 0x3d0   :  { %v1620_v54 = vpop.eup %1619  ;;  %v1325_v55 = vmul.f32 %v1618_v51, %v1269_v11  ;;  %1422 = vst.msk [vmem:[%s2233_s9 + $0x50] sm:$0xff] %vm201_vm2, %v1323_v50 }
 0x3d1   :  { %v1622_v56 = vpop.eup %1621  ;;  %v1326_v22 = vmul.f32 %v1620_v54, %v1270_v12  ;;  %1423 = vst.msk [vmem:[%s2233_s9 + $0x58] sm:$0xff] %vm201_vm2, %v1324_v52 }
 0x3d2   :  { %v1624_v57 = vpop.eup %1623  ;;  %v1327_v58 = vmul.f32 %v1622_v56, %v1271_v13  ;;  %1424 = vst.msk [vmem:[%s2233_s9 + $0x60] sm:$0xff] %vm201_vm2, %v1325_v55 }
 0x3d3   :  { %v1328_v59 = vmul.f32 %v1624_v57, %v1272_v17  ;;  %1425 = vst.msk [vmem:[%s2233_s9 + $0x68] sm:$0xff] %vm201_vm2, %v1326_v22 }
 0x3d4   :  { %1426 = vst.msk [vmem:[%s2233_s9 + $0x70] sm:$0xff] %vm201_vm2, %v1327_v58 }
 0x3d5   :  { %1427 = vst.msk [vmem:[%s2233_s9 + $0x78] sm:$0xff] %vm201_vm2, %v1328_v59 }

// kernel: ustack_forward.15
= control target key start
LH: loop header
LB: loop body
LE: loop exit
PB: predicated region body
PF: predicated region fallthrough
CT: control target
= control target key end

     0   :  { %v2105_v0 = vmov 0.0|0.0   ;;  %vm129_vm0 = vcmask 392192   ;;  %vm2107_vm1 = vmmov 0   ;;  %vm395_vm2 = vcmask 64512   ;;  %s3053_s1 = inlined_call_operand.vmem [shape: f32[432,8], index: 1, kind: input, shape index: {}]   ;;  %s3054_s0 = inlined_call_operand.vmem [shape: f32[2,64,432], index: 0, kind: input, shape index: {}]   ;;  %s3055_s5 = inlined_call_operand.vmem [shape: f32[8,2], index: 5, kind: input, shape index: {}]   ;;  %s3056_s2 = inlined_call_operand.vmem [shape: f32[1,8], index: 2, kind: input, shape index: {}]   ;;  %s3057_s3 = inlined_call_operand.vmem [shape: f32[2,1,8], index: 3, kind: input, shape index: {}]   ;;  %s3058_s4 = inlined_call_operand.vmem [shape: f32[2,1,8], index: 4, kind: input, shape index: {}]   ;;  %s3059_s6 = inlined_call_operand.vmem [shape: f32[2,8], index: 6, kind: input, shape index: {}]   ;;  %s3060_s7 = inlined_call_operand.vmem [shape: f32[1,8], index: 7, kind: input, shape index: {}]   ;;  %s3061_s8 = inlined_call_operand.vmem [shape: f32[1,8], index: 8, kind: input, shape index: {}]   ;;  %s3062_s9 = inlined_call_operand.vmem [shape: f32[2,64,8], index: 9, kind: output, shape index: {}]  }
   0x1   :  { %1914 = vmatprep.subr.bf16.mxu1 %v2105_v0  ;;  %v64_v1 = vld [vmem:[%s3053_s1 + $0x100] sm:$0xff]  ;;  %v65_v2 = vld [vmem:[%s3053_s1 + $0x108] sm:$0xff]  ;;  %v66_v3 = vld [vmem:[%s3053_s1 + $0x110] sm:$0xff]  ;;  %vm603_vm3 = vcmask 1041408   ;;  %vm599_vm4 = vcmask 15360  }
   0x2   :  { %v2168_v4 = vpack.c.bf16 %v65_v2, %v64_v1  ;;  %v67_v5 = vld [vmem:[%s3053_s1 + $0x118] sm:$0xff]  ;;  %v48_v6 = vld [vmem:[%s3053_s1 + $0x80] sm:$0xff]  ;;  %v49_v7 = vld [vmem:[%s3053_s1 + $0x88] sm:$0xff] }
   0x3   :  { %v2179_v8 = vpack.c.bf16 %v49_v7, %v48_v6  ;;  %v32_v9 = vld [vmem:[%s3053_s1] sm:$0xff]  ;;  %v33_v10 = vld [vmem:[%s3053_s1 + $0x8] sm:$0xff]  ;;  %v2188_v11 = vpack.c.bf16 %v67_v5, %v66_v3  ;;  %v50_v14 = vld [vmem:[%s3053_s1 + $0x90] sm:$0xff] }
   0x4   :  { %1916 = vmatpush1.bf16.msra.mxu1 %v2168_v4  ;;  %v2190_v12 = vpack.c.bf16 %v33_v10, %v32_v9  ;;  %v68_v13 = vld [vmem:[%s3053_s1 + $0x120] sm:$0xff]  ;;  %v51_v15 = vld [vmem:[%s3053_s1 + $0x98] sm:$0xff]  ;;  %v69_v16 = vld [vmem:[%s3053_s1 + $0x128] sm:$0xff] }
   0x5   :  { %1917 = vmatprep.subr.bf16.mxu1 %v2105_v0  ;;  %1883 = vmatprep.subr.bf16.mxu0 %v2179_v8  ;;  %v2206_v17 = vpack.c.bf16 %v51_v15, %v50_v14  ;;  %v34_v18 = vld [vmem:[%s3053_s1 + $0x10] sm:$0xff]  ;;  %v35_v19 = vld [vmem:[%s3053_s1 + $0x18] sm:$0xff]  ;;  %v52_v21 = vld [vmem:[%s3053_s1 + $0xa0] sm:$0xff]  ;;  %v2233_v26 = vpack.c.bf16 %v69_v16, %v68_v13 }
   0x6   :  { %1885 = vmatpush3.bf16.msra.mxu0 %v2190_v12  ;;  %v2215_v20 = vpack.c.bf16 %v35_v19, %v34_v18  ;;  %v53_v22 = vld [vmem:[%s3053_s1 + $0xa8] sm:$0xff]  ;;  %v36_v24 = vld [vmem:[%s3053_s1 + $0x20] sm:$0xff]  ;;  %v54_v27 = vld [vmem:[%s3053_s1 + $0xb0] sm:$0xff] }
   0x7   :  { %1887 = vmatprep.subr.bf16.mxu0 %v2206_v17  ;;  %v2224_v23 = vpack.c.bf16 %v53_v22, %v52_v21  ;;  %v37_v25 = vld [vmem:[%s3053_s1 + $0x28] sm:$0xff]  ;;  %v55_v28 = vld [vmem:[%s3053_s1 + $0xb8] sm:$0xff]  ;;  %v70_v29 = vld [vmem:[%s3053_s1 + $0x130] sm:$0xff] }
   0x8   :  { %1919 = vmatpush1.bf16.msra.mxu1 %v2188_v11  ;;  %v71_v30 = vld [vmem:[%s3053_s1 + $0x138] sm:$0xff]  ;;  %v2249_v31 = vpack.c.bf16 %v37_v25, %v36_v24  ;;  %v2252_v32 = vpack.c.bf16 %v55_v28, %v54_v27  ;;  %v38_v33 = vld [vmem:[%s3053_s1 + $0x30] sm:$0xff]  ;;  %v56_v36 = vld [vmem:[%s3053_s1 + $0xc0] sm:$0xff] }
   0x9   :  { %1920 = vmatprep.subr.bf16.mxu1 %v2105_v0  ;;  %v39_v34 = vld [vmem:[%s3053_s1 + $0x38] sm:$0xff]  ;;  %v2261_v35 = vpack.c.bf16 %v71_v30, %v70_v29  ;;  %v57_v37 = vld [vmem:[%s3053_s1 + $0xc8] sm:$0xff]  ;;  %v72_v38 = vld [vmem:[%s3053_s1 + $0x140] sm:$0xff] }
   0xa   :  { %1889 = vmatpush3.bf16.msra.mxu0 %v2215_v20  ;;  %v73_v39 = vld [vmem:[%s3053_s1 + $0x148] sm:$0xff]  ;;  %v2277_v40 = vpack.c.bf16 %v39_v34, %v38_v33  ;;  %v2280_v41 = vpack.c.bf16 %v57_v37, %v56_v36  ;;  %v40_v42 = vld [vmem:[%s3053_s1 + $0x40] sm:$0xff]  ;;  %v58_v45 = vld [vmem:[%s3053_s1 + $0xd0] sm:$0xff] }
   0xb   :  { %1891 = vmatprep.subr.bf16.mxu0 %v2224_v23  ;;  %v41_v43 = vld [vmem:[%s3053_s1 + $0x48] sm:$0xff]  ;;  %v2289_v44 = vpack.c.bf16 %v73_v39, %v72_v38  ;;  %v59_v46 = vld [vmem:[%s3053_s1 + $0xd8] sm:$0xff]  ;;  %v74_v47 = vld [vmem:[%s3053_s1 + $0x150] sm:$0xff] }
   0xc   :  { %1922 = vmatpush1.bf16.msra.mxu1 %v2233_v26  ;;  %v75_v48 = vld [vmem:[%s3053_s1 + $0x158] sm:$0xff]  ;;  %v92_v49 = vld [vmem:[%s3054_s0 + $0x8] sm:$0xff]  ;;  %v2308_v50 = vpack.c.bf16 %v41_v43, %v40_v42  ;;  %v2311_v51 = vpack.c.bf16 %v59_v46, %v58_v45  ;;  %v42_v52 = vld [vmem:[%s3053_s1 + $0x50] sm:$0xff] }
   0xd   :  { %1923 = vmatprep.subr.bf16.mxu1 %v2105_v0  ;;  %218 = vmatprep.mubr.f32.mxu0 %v92_v49  ;;  %v43_v53 = vld [vmem:[%s3053_s1 + $0x58] sm:$0xff]  ;;  %v2320_v54 = vpack.c.bf16 %v75_v48, %v74_v47  ;;  %v60_v55 = vld [vmem:[%s3053_s1 + $0xe0] sm:$0xff]  ;;  %v61_v56 = vld [vmem:[%s3053_s1 + $0xe8] sm:$0xff] }
   0xe   :  { %1893 = vmatpush3.bf16.msra.mxu0 %v2249_v31  ;;  %v94_v57 = vld [vmem:[%s3054_s0 + $0x18] sm:$0xff]  ;;  %v76_v58 = vld [vmem:[%s3053_s1 + $0x160] sm:$0xff]  ;;  %v77_v59 = vld [vmem:[%s3053_s1 + $0x168] sm:$0xff]  ;;  %v2340_v60 = vpack.c.bf16 %v43_v53, %v42_v52  ;;  %v2343_v61 = vpack.c.bf16 %v61_v56, %v60_v55 }
   0xf   :  { %1895 = vmatprep.subr.bf16.mxu0 %v2252_v32  ;;  %1624 = vmatprep.mubr.msk.f32.mxu1 %vm129_vm0, %v94_v57  ;;  %v44_v62 = vld [vmem:[%s3053_s1 + $0x60] sm:$0xff]  ;;  %v45_v63 = vld [vmem:[%s3053_s1 + $0x68] sm:$0xff]  ;;  %v2352_v1 = vpack.c.bf16 %v77_v59, %v76_v58  ;;  %v62_v2 = vld [vmem:[%s3053_s1 + $0xf0] sm:$0xff]  ;;  %v2106_v57 = vmov 0.0  }
  0x10   :  { %1925 = vmatpush1.bf16.msra.mxu1 %v2261_v35  ;;  %v63_v3 = vld [vmem:[%s3053_s1 + $0xf8] sm:$0xff]  ;;  %v78_v5 = vld [vmem:[%s3053_s1 + $0x170] sm:$0xff]  ;;  %v2368_v7 = vpack.c.bf16 %v45_v63, %v44_v62  ;;  %v80_v15 = vld [vmem:[%s3053_s1 + $0x180] sm:$0xff] }
  0x11   :  { %1926 = vmatprep.subr.bf16.mxu1 %v2105_v0  ;;  %v79_v6 = vld [vmem:[%s3053_s1 + $0x178] sm:$0xff]  ;;  %v2371_v9 = vpack.c.bf16 %v63_v3, %v62_v2  ;;  %v46_v10 = vld [vmem:[%s3053_s1 + $0x70] sm:$0xff]  ;;  %v81_v16 = vld [vmem:[%s3053_s1 + $0x188] sm:$0xff] }
  0x12   :  { %1897 = vmatpush3.bf16.msra.mxu0 %v2277_v40  ;;  %v47_v13 = vld [vmem:[%s3053_s1 + $0x78] sm:$0xff]  ;;  %v2380_v14 = vpack.c.bf16 %v79_v6, %v78_v5  ;;  %v2394_v19 = vpack.c.bf16 %v81_v16, %v80_v15  ;;  %v82_v21 = vld [vmem:[%s3053_s1 + $0x190] sm:$0xff]  ;;  %v91_v24 = vld [vmem:[%s3054_s0] sm:$0xff]  ;;  %v367_v5 = vlaneseq }
  0x13   :  { %1899 = vmatprep.subr.bf16.mxu0 %v2280_v41  ;;  %v2390_v18 = vpack.c.bf16 %v47_v13, %v46_v10  ;;  %v83_v22 = vld [vmem:[%s3053_s1 + $0x198] sm:$0xff]  ;;  %v96_v25 = vld [vmem:[%s3054_s0 + $0x28] sm:$0xff]  ;;  %v84_v28 = vld [vmem:[%s3053_s1 + $0x1a0] sm:$0xff] }
  0x14   :  { %1928 = vmatpush1.bf16.msra.mxu1 %v2289_v44  ;;  %v2411_v27 = vpack.c.bf16 %v83_v22, %v82_v21  ;;  %v85_v29 = vld [vmem:[%s3053_s1 + $0x1a8] sm:$0xff]  ;;  %v95_v30 = vld [vmem:[%s3054_s0 + $0x20] sm:$0xff]  ;;  %v93_v38 = vld [vmem:[%s3054_s0 + $0x10] sm:$0xff]  ;;  %v368_v13 = vshrl.u32 %v367_v5, 7 }
  0x15   :  { %1929 = vmatprep.subr.bf16.mxu1 %v2105_v0  ;;  %v100_v33 = vld [vmem:[%s3054_s0 + $0x48] sm:$0xff]  ;;  %v2427_v34 = vpack.c.bf16 %v85_v29, %v84_v28  ;;  %v99_v36 = vld [vmem:[%s3054_s0 + $0x40] sm:$0xff]  ;;  %v98_v39 = vld [vmem:[%s3054_s0 + $0x38] sm:$0xff] }
  0x16   :  { %1901 = vmatpush3.bf16.msra.mxu0 %v2308_v50  ;;  %v104_v37 = vld [vmem:[%s3054_s0 + $0x68] sm:$0xff]  ;;  %v103_v42 = vld [vmem:[%s3054_s0 + $0x60] sm:$0xff]  ;;  %v97_v45 = vld [vmem:[%s3054_s0 + $0x30] sm:$0xff]  ;;  %v2553_v29 = vsub.s32 0, %v368_v13 }
  0x17   :  { %1903 = vmatprep.subr.bf16.mxu0 %v2311_v51  ;;  %v108_v43 = vld [vmem:[%s3054_s0 + $0x88] sm:$0xff]  ;;  %v107_v46 = vld [vmem:[%s3054_s0 + $0x80] sm:$0xff]  ;;  %v113_v56 = vld [vmem:[%s3054_s0 + $0xb0] sm:$0xff] }
  0x18   :  { %1931 = vmatpush1.bf16.msra.mxu1 %v2320_v54  ;;  %v112_v47 = vld [vmem:[%s3054_s0 + $0xa8] sm:$0xff]  ;;  %v111_v48 = vld [vmem:[%s3054_s0 + $0xa0] sm:$0xff] }
  0x19   :  { %1932 = vmatprep.subr.bf16.mxu1 %v2105_v0  ;;  %v116_v49 = vld [vmem:[%s3054_s0 + $0xc8] sm:$0xff]  ;;  %v115_v52 = vld [vmem:[%s3054_s0 + $0xc0] sm:$0xff] }
  0x1a   :  { %1905 = vmatpush3.bf16.msra.mxu0 %v2340_v60  ;;  %v120_v53 = vld [vmem:[%s3054_s0 + $0xe8] sm:$0xff]  ;;  %v119_v55 = vld [vmem:[%s3054_s0 + $0xe0] sm:$0xff] }
  0x1b   :  { %1907 = vmatprep.subr.bf16.mxu0 %v2343_v61  ;;  %v2537_v58 = vld [vmem:[%s3055_s5] sm:$0xff] }
  0x1c   :  { %1934 = vmatpush1.bf16.msra.mxu1 %v2352_v1  ;;  %v2546_v63 = vld [vmem:[%s3056_s2] ss:$0 sm:$0xff] }
  0x1d   :  { %1935 = vmatprep.subr.bf16.mxu1 %v2105_v0 }
  0x1e   :  { %1909 = vmatpush3.bf16.msra.mxu0 %v2368_v7 }
  0x1f   :  { %1911 = vmatprep.subr.bf16.mxu0 %v2371_v9 }
  0x20   :  { %1937 = vmatpush1.bf16.msra.mxu1 %v2380_v14 }
  0x21   :  { %1938 = vmatprep.subr.bf16.mxu1 %v2105_v0 }
  0x22   :  { %1913 = vmatpush3.bf16.msra.mxu0 %v2390_v18 }
  0x23   :  { %1842 = vmatprep.subr.mxu0 %v2106_v57 }
  0x24   :  { %1940 = vmatpush1.bf16.msra.mxu1 %v2394_v19 }
  0x25   :  { %1941 = vmatprep.subr.bf16.mxu1 %v2105_v0  ;;  %219 = vmatmul.mubr.f32.vlgmr.msra.gmra.mrb[0].mxu0 %v91_v24 }
  0x26   :  { %223 = vmatprep.mubr.f32.mxu0 %v96_v25  ;;  %1843 = vmatpush3.msra.mxu0 %v2537_v58 }
  0x27   :  { %1847 = vmatprep.subr.mxu0 %v2106_v57 }
  0x28   :  { %1943 = vmatpush1.bf16.msra.mxu1 %v2411_v27 }
  0x29   :  { %1944 = vmatprep.subr.bf16.mxu1 %v2105_v0  ;;  %224 = vmatmul.mubr.f32.gmra.mrb[2].mxu0 %v95_v30 }
  0x2a   :  { %228 = vmatprep.mubr.f32.mxu0 %v100_v33 }
  0x2c   :  { %1946 = vmatpush1.bf16.msra.mxu1 %v2427_v34 }
  0x2d   :  { %229 = vmatmul.mubr.f32.gmra.mrb[4].mxu0 %v99_v36  ;;  %1948 = vmatprep.subr.bf16.mxu1 %v2179_v8  ;;  %v102_v8 = vld [vmem:[%s3054_s0 + $0x58] sm:$0xff] }
  0x2e   :  { %233 = vmatprep.mubr.f32.mxu0 %v104_v37 }
  0x2f   :  { %324 = vmatmul.mubr.f32.vlgmr.msra.gmra.mrb[0].mxu1 %v93_v38 }
  0x30   :  { %1625 = vmatprep.mubr.msk.f32.mxu1 %vm129_vm0, %v98_v39  ;;  %1950 = vmatpush3.bf16.msra.mxu1 %v2190_v12  ;;  %v101_v12 = vld [vmem:[%s3054_s0 + $0x50] sm:$0xff] }
  0x31   :  { %234 = vmatmul.mubr.f32.gmra.mrb[6].mxu0 %v103_v42  ;;  %1952 = vmatprep.subr.bf16.mxu1 %v2206_v17  ;;  %v106_v17 = vld [vmem:[%s3054_s0 + $0x78] sm:$0xff] }
  0x32   :  { %238 = vmatprep.mubr.f32.mxu0 %v108_v43 }
  0x33   :  { %329 = vmatmul.mubr.f32.gmra.mrb[2].mxu1 %v97_v45 }
  0x34   :  { %1626 = vmatprep.mubr.msk.f32.mxu1 %vm129_vm0, %v102_v8  ;;  %1954 = vmatpush3.bf16.msra.mxu1 %v2215_v20  ;;  %v105_v20 = vld [vmem:[%s3054_s0 + $0x70] sm:$0xff] }
  0x35   :  { %239 = vmatmul.mubr.f32.gmra.mrb[8].mxu0 %v107_v46  ;;  %1956 = vmatprep.subr.bf16.mxu1 %v2224_v23  ;;  %v110_v23 = vld [vmem:[%s3054_s0 + $0x98] sm:$0xff] }
  0x36   :  { %243 = vmatprep.mubr.f32.mxu0 %v112_v47 }
  0x37   :  { %334 = vmatmul.mubr.f32.gmra.mrb[4].mxu1 %v101_v12 }
  0x38   :  { %1627 = vmatprep.mubr.msk.f32.mxu1 %vm129_vm0, %v106_v17  ;;  %1958 = vmatpush3.bf16.msra.mxu1 %v2249_v31  ;;  %v109_v31 = vld [vmem:[%s3054_s0 + $0x90] sm:$0xff] }
  0x39   :  { %244 = vmatmul.mubr.f32.gmra.mrb[10].mxu0 %v111_v48  ;;  %1960 = vmatprep.subr.bf16.mxu1 %v2252_v32  ;;  %v114_v32 = vld [vmem:[%s3054_s0 + $0xb8] sm:$0xff] }
  0x3a   :  { %248 = vmatprep.mubr.f32.mxu0 %v116_v49 }
  0x3b   :  { %339 = vmatmul.mubr.f32.gmra.mrb[6].mxu1 %v105_v20 }
  0x3c   :  { %1628 = vmatprep.mubr.msk.f32.mxu1 %vm129_vm0, %v110_v23  ;;  %1962 = vmatpush3.bf16.msra.mxu1 %v2277_v40  ;;  %v118_v40 = vld [vmem:[%s3054_s0 + $0xd8] sm:$0xff] }
  0x3d   :  { %249 = vmatmul.mubr.f32.gmra.mrb[12].mxu0 %v115_v52  ;;  %1964 = vmatprep.subr.bf16.mxu1 %v2280_v41  ;;  %v117_v41 = vld [vmem:[%s3054_s0 + $0xd0] sm:$0xff] }
  0x3e   :  { %253 = vmatprep.mubr.f32.mxu0 %v120_v53 }
  0x3f   :  { %344 = vmatmul.mubr.f32.gmra.mrb[8].mxu1 %v109_v31  ;;  %v2566_v31 = vld [vmem:[%s3058_s4] ss:$0 sm:$0xff] }
  0x40   :  { %1629 = vmatprep.mubr.msk.f32.mxu1 %vm129_vm0, %v114_v32  ;;  %1966 = vmatpush3.bf16.msra.mxu1 %v2308_v50  ;;  %v122_v50 = vld [vmem:[%s3054_s0 + $0xf8] sm:$0xff] }
  0x41   :  { %254 = vmatmul.mubr.f32.gmra.mrb[14].mxu0 %v119_v55  ;;  %1968 = vmatprep.subr.bf16.mxu1 %v2311_v51  ;;  %v121_v51 = vld [vmem:[%s3054_s0 + $0xf0] sm:$0xff] }
  0x42   :  { %1844 = vmatprep.mubr.msk.f32.mxu0 %vm2107_vm1, %v2106_v57 }
  0x43   :  { %349 = vmatmul.mubr.f32.gmra.mrb[10].mxu1 %v113_v56 }
  0x44   :  { %1630 = vmatprep.mubr.msk.f32.mxu1 %vm129_vm0, %v118_v40  ;;  %1970 = vmatpush3.bf16.msra.mxu1 %v2340_v60 }
  0x45   :  { %1972 = vmatprep.subr.bf16.mxu1 %v2343_v61 }
  0x47   :  { %354 = vmatmul.mubr.f32.gmra.mrb[12].mxu1 %v117_v41 }
  0x48   :  { %1631 = vmatprep.mubr.msk.f32.mxu1 %vm129_vm0, %v122_v50  ;;  %1974 = vmatpush3.bf16.msra.mxu1 %v2368_v7 }
  0x49   :  { %1976 = vmatprep.subr.bf16.mxu1 %v2371_v9 }
  0x4b   :  { %359 = vmatmul.mubr.f32.gmra.mrb[14].mxu1 %v121_v51 }
  0x4c   :  { %1978 = vmatpush3.bf16.msra.mxu1 %v2390_v18  ;;  %v364_v18 = vld [vmem:[%s3057_s3] sm:$0x1] }
  0x4d   :  { %2012 = vmatprep.subr.bf16.mxu1 %v2105_v0  ;;  %v365_v28 = vadd.f32 1.0, %v364_v18 }
  0x4f   :  { %v2557_v43 = vrot.slane %v365_v28, %v2553_v29 }
  0xf8   :  { %v1746_v59 = vpop.f32.mrb[0].mxu0 }
  0xf9   :  { %v1747_v60 = vpop.f32.mrb[1].mxu0 }
  0xfa   :  { %v1748_v61 = vadd.f32 %v1747_v60, %v1746_v59 }
  0xfc   :  { %v1749_v62 = vpop.f32.mrb[2].mxu0  ;;  %v221_v6 = vadd.f32 %v1748_v61, %v2546_v63 }
  0xfd   :  { %v1750_v2 = vpop.f32.mrb[3].mxu0 }
  0xfe   :  { %v1751_v3 = vadd.f32 %v1750_v2, %v1749_v62 }
 0x100   :  { %v1752_v7 = vpop.f32.mrb[4].mxu0  ;;  %v226_v22 = vadd.f32 %v1751_v3, %v2546_v63 }
 0x101   :  { %v1753_v9 = vpop.f32.mrb[5].mxu0 }
 0x102   :  { %v325_v10 = vpop.f32.mrb[0].mxu1  ;;  %v1754_v15 = vadd.f32 %v1753_v9, %v1752_v7 }
 0x103   :  { %v326_v16 = vadd.f32 %v325_v10, %v221_v6  ;;  %v327_v21 = vpop.f32.mrb[1].mxu1 }
 0x104   :  { %v1755_v24 = vpop.f32.mrb[6].mxu0  ;;  %v231_v38 = vadd.f32 %v1754_v15, %v2546_v63 }
 0x105   :  { %v1756_v25 = vpop.f32.mrb[7].mxu0  ;;  %v372_v20 = vmul.f32 %v2557_v43, %v326_v16 }
 0x106   :  { %v330_v30 = vpop.f32.mrb[2].mxu1  ;;  %v1757_v33 = vadd.f32 %v1756_v25, %v1755_v24 }
 0x107   :  { %v331_v36 = vadd.f32 %v330_v30, %v226_v22  ;;  %v332_v37 = vpop.f32.mrb[3].mxu1  ;;  %v2574_v59 = vadd.f32 %v2566_v31, %v372_v20 }
 0x108   :  { %v1758_v39 = vpop.f32.mrb[8].mxu0  ;;  %v236_v12 = vadd.f32 %v1757_v33, %v2546_v63 }
 0x109   :  { %v1759_v42 = vpop.f32.mrb[9].mxu0  ;;  %v373_v48 = vmul.f32 %v2557_v43, %v331_v36  ;;  %v417_v15 = vmul.f32 %v2574_v59, %v2574_v59  ;;  %v396_v33 = vsel %vm395_vm2, %v2574_v59, 0.0 }
 0x10a   :  { %v335_v45 = vpop.f32.mrb[4].mxu1  ;;  %v1760_v8 = vadd.f32 %v1759_v42, %v1758_v39 }
 0x10b   :  { %v336_v46 = vadd.f32 %v335_v45, %v231_v38  ;;  %v337_v47 = vpop.f32.mrb[5].mxu1  ;;  %v2570_v41 = vadd.f32 %v2566_v31, %v373_v48  ;;  %v425_v42 = vsel %vm395_vm2, %v417_v15, 0.0 }
 0x10c   :  { %v1761_v17 = vpop.f32.mrb[10].mxu0  ;;  %v241_v56 = vadd.f32 %v1760_v8, %v2546_v63 }
 0x10d   :  { %v1762_v49 = vpop.f32.mrb[11].mxu0  ;;  %v374_v23 = vmul.f32 %v2557_v43, %v336_v46  ;;  %v418_v7 = vmul.f32 %v2570_v41, %v2570_v41  ;;  %v397_v22 = vsel %vm395_vm2, %v2570_v41, 0.0 }
 0x10e   :  { %v340_v52 = vpop.f32.mrb[6].mxu1  ;;  %v1763_v53 = vadd.f32 %v1762_v49, %v1761_v17  ;;  %v398_v45 = vadd.f32 %v397_v22, %v396_v33 }
 0x10f   :  { %v341_v32 = vadd.f32 %v340_v52, %v236_v12  ;;  %v342_v55 = vpop.f32.mrb[7].mxu1  ;;  %v2577_v60 = vadd.f32 %v2566_v31, %v374_v23  ;;  %v426_v36 = vsel %vm395_vm2, %v418_v7, 0.0 }
 0x110   :  { %v1764_v40 = vpop.f32.mrb[12].mxu0  ;;  %v246_v5 = vadd.f32 %v1763_v53, %v2546_v63  ;;  %v427_v23 = vadd.f32 %v426_v36, %v425_v42 }
 0x111   :  { %v375_v50 = vmul.f32 %v2557_v43, %v341_v32  ;;  %v1765_v51 = vpop.f32.mrb[13].mxu0  ;;  %v419_v16 = vmul.f32 %v2577_v60, %v2577_v60  ;;  %v399_v37 = vsel %vm395_vm2, %v2577_v60, 0.0 }
 0x112   :  { %v345_v61 = vpop.f32.mrb[8].mxu1  ;;  %v1766_v62 = vadd.f32 %v1765_v51, %v1764_v40  ;;  %v400_v52 = vadd.f32 %v399_v37, %v398_v45 }
 0x113   :  { %v346_v2 = vadd.f32 %v345_v61, %v241_v56  ;;  %v347_v3 = vpop.f32.mrb[9].mxu1  ;;  %v2583_v9 = vadd.f32 %v2566_v31, %v375_v50  ;;  %v428_v8 = vsel %vm395_vm2, %v419_v16, 0.0 }
 0x114   :  { %v1767_v6 = vpop.f32.mrb[14].mxu0  ;;  %v251_v30 = vadd.f32 %v1766_v62, %v2546_v63  ;;  %v429_v40 = vadd.f32 %v428_v8, %v427_v23 }
 0x115   :  { %v376_v10 = vmul.f32 %v2557_v43, %v346_v2  ;;  %v1768_v13 = vpop.f32.mrb[15].mxu0  ;;  %v420_v38 = vmul.f32 %v2583_v9, %v2583_v9  ;;  %v401_v46 = vsel %vm395_vm2, %v2583_v9, 0.0 }
 0x116   :  { %v350_v18 = vpop.f32.mrb[10].mxu1  ;;  %v1769_v21 = vadd.f32 %v1768_v13, %v1767_v6  ;;  %v402_v50 = vadd.f32 %v401_v46, %v400_v52 }
 0x117   :  { %v2593_v24 = vadd.f32 %v2566_v31, %v376_v10  ;;  %v351_v25 = vadd.f32 %v350_v18, %v246_v5  ;;  %v352_v28 = vpop.f32.mrb[11].mxu1  ;;  %v430_v53 = vsel %vm395_vm2, %v420_v38, 0.0 }
 0x118   :  { %v256_v20 = vadd.f32 %v1769_v21, %v2546_v63  ;;  %v431_v6 = vadd.f32 %v430_v53, %v429_v40  ;;  %v2652_v53 = vld [vmem:[%s3059_s6] sm:$0x3] }
 0x119   :  { %v377_v39 = vmul.f32 %v2557_v43, %v351_v25  ;;  %v421_v12 = vmul.f32 %v2593_v24, %v2593_v24  ;;  %v403_v32 = vsel %vm395_vm2, %v2593_v24, 0.0  ;;  %v1653_v40 = vld [vmem:[%s3054_s0 + $0x120] sm:$0xff] }
 0x11a   :  { %v355_v47 = vpop.f32.mrb[12].mxu1  ;;  %v404_v7 = vadd.f32 %v403_v32, %v402_v50  ;;  %v1650_v32 = vld [vmem:[%s3054_s0 + $0x108] sm:$0xff] }
 0x11b   :  { %v2611_v17 = vadd.f32 %v2566_v31, %v377_v39  ;;  %v356_v48 = vadd.f32 %v355_v47, %v251_v30  ;;  %v357_v49 = vpop.f32.mrb[13].mxu1  ;;  %v432_v61 = vsel %vm395_vm2, %v421_v12, 0.0  ;;  %987 = vmatprep.mubr.f32.mxu1 %v1650_v32  ;;  %v1658_v50 = vld [vmem:[%s3054_s0 + $0x148] sm:$0xff] }
 0x11c   :  { %v433_v18 = vadd.f32 %v432_v61, %v431_v6  ;;  %v1662_v61 = vld [vmem:[%s3054_s0 + $0x168] sm:$0xff] }
 0x11d   :  { %v422_v55 = vmul.f32 %v2611_v17, %v2611_v17  ;;  %v378_v56 = vmul.f32 %v2557_v43, %v356_v48  ;;  %v405_v62 = vsel %vm395_vm2, %v2611_v17, 0.0  ;;  %v1670_v6 = vld [vmem:[%s3054_s0 + $0x1a8] sm:$0xff] }
 0x11e   :  { %v360_v51 = vpop.f32.mrb[14].mxu1  ;;  %v406_v21 = vadd.f32 %v405_v62, %v404_v7  ;;  %v1661_v62 = vld [vmem:[%s3054_s0 + $0x160] sm:$0xff] }
 0x11f   :  { %v2624_v2 = vadd.f32 %v2566_v31, %v378_v56  ;;  %v361_v3 = vadd.f32 %v360_v51, %v256_v20  ;;  %v362_v5 = vpop.f32.mrb[15].mxu1  ;;  %v434_v10 = vsel %vm395_vm2, %v422_v55, 0.0  ;;  %v1649_v55 = vld [vmem:[%s3054_s0 + $0x100] sm:$0xff]  ;;  %v1654_v56 = vld [vmem:[%s3054_s0 + $0x128] sm:$0xff] }
 0x120   :  { %v435_v28 = vadd.f32 %v434_v10, %v433_v18  ;;  %988 = vmatmul.mubr.f32.vlgmr.msra.gmra.mrb[16].mxu1 %v1649_v55  ;;  %v1657_v51 = vld [vmem:[%s3054_s0 + $0x140] sm:$0xff]  ;;  %v1674_v10 = vld [vmem:[%s3054_s0 + $0x1c8] sm:$0xff]  ;;  %v1676_v18 = vld [vmem:[%s3054_s0 + $0x1d8] sm:$0xff] }
 0x121   :  { %v407_v13 = vsel %vm395_vm2, %v2624_v2, 0.0  ;;  %v423_v15 = vmul.f32 %v2624_v2, %v2624_v2  ;;  %v379_v16 = vmul.f32 %v2557_v43, %v361_v3  ;;  %2023 = vmatpush1.bf16.msra.mxu1 %v2168_v4  ;;  %992 = vmatprep.mubr.f32.mxu1 %v1654_v56  ;;  %v1666_v3 = vld [vmem:[%s3054_s0 + $0x188] sm:$0xff]  ;;  %v1665_v5 = vld [vmem:[%s3054_s0 + $0x180] sm:$0xff] }
 0x122   :  { %v408_v30 = vadd.f32 %v407_v13, %v406_v21  ;;  %2013 = vmatprep.subr.bf16.mxu1 %v2105_v0  ;;  %v1669_v7 = vld [vmem:[%s3054_s0 + $0x1a0] sm:$0xff]  ;;  %v1675_v21 = vld [vmem:[%s3054_s0 + $0x1d0] sm:$0xff] }
 0x123   :  { %v436_v22 = vsel %vm395_vm2, %v423_v15, 0.0  ;;  %v2634_v25 = vadd.f32 %v2566_v31, %v379_v16  ;;  %v1673_v13 = vld [vmem:[%s3054_s0 + $0x1c0] sm:$0xff]  ;;  %v1678_v15 = vld [vmem:[%s3054_s0 + $0x1e8] sm:$0xff] }
 0x124   :  { %v437_v37 = vadd.f32 %v436_v22, %v435_v28  ;;  %993 = vmatmul.mubr.f32.gmra.mrb[18].mxu1 %v1653_v40  ;;  %v1677_v16 = vld [vmem:[%s3054_s0 + $0x1e0] sm:$0xff]  ;;  %v1680_v22 = vld [vmem:[%s3054_s0 + $0x1f8] sm:$0xff]  ;;  %v1679_v28 = vld [vmem:[%s3054_s0 + $0x1f0] sm:$0xff] }
 0x125   :  { %v409_v33 = vsel %vm395_vm2, %v2634_v25, 0.0  ;;  %v424_v36 = vmul.f32 %v2634_v25, %v2634_v25  ;;  %2024 = vmatpush1.bf16.msra.mxu1 %v2188_v11  ;;  %997 = vmatprep.mubr.f32.mxu1 %v1658_v50 }
 0x126   :  { %v410_v38 = vadd.f32 %v409_v33, %v408_v30  ;;  %2014 = vmatprep.subr.bf16.mxu1 %v2105_v0 }
 0x127   :  { %v438_v39 = vsel %vm395_vm2, %v424_v36, 0.0 }
 0x128   :  { %v411_v43 = vrot.slane %v410_v38, 4  ;;  %v439_v42 = vadd.f32 %v438_v39, %v437_v37  ;;  %998 = vmatmul.mubr.f32.gmra.mrb[20].mxu1 %v1657_v51 }
 0x129   :  { %2025 = vmatpush1.bf16.msra.mxu1 %v2233_v26  ;;  %1002 = vmatprep.mubr.f32.mxu1 %v1662_v61 }
 0x12a   :  { %v412_v45 = vadd.f32 %v411_v43, %v410_v38  ;;  %v440_v8 = vrot.slane %v439_v42, 4  ;;  %2015 = vmatprep.subr.bf16.mxu1 %v2105_v0 }
 0x12c   :  { %v413_v46 = vrot.slane %v412_v45, 2  ;;  %v441_v47 = vadd.f32 %v440_v8, %v439_v42  ;;  %1003 = vmatmul.mubr.f32.gmra.mrb[22].mxu1 %v1661_v62  ;;  %v1652_v8 = vld [vmem:[%s3054_s0 + $0x118] sm:$0xff] }
 0x12d   :  { %2026 = vmatpush1.bf16.msra.mxu1 %v2261_v35  ;;  %1007 = vmatprep.mubr.f32.mxu1 %v1666_v3 }
 0x12e   :  { %v414_v31 = vadd.f32 %v413_v46, %v412_v45  ;;  %v442_v12 = vrot.slane %v441_v47, 2  ;;  %2016 = vmatprep.subr.bf16.mxu1 %v2105_v0 }
 0x130   :  { %v415_v48 = vrot.slane %v414_v31, 1  ;;  %v443_v49 = vadd.f32 %v442_v12, %v441_v47  ;;  %1008 = vmatmul.mubr.f32.gmra.mrb[24].mxu1 %v1665_v5 }
 0x131   :  { %2027 = vmatpush1.bf16.msra.mxu1 %v2289_v44  ;;  %1012 = vmatprep.mubr.f32.mxu1 %v1670_v6 }
 0x132   :  { %v416_v20 = vadd.f32 %v415_v48, %v414_v31  ;;  %v444_v23 = vrot.slane %v443_v49, 1  ;;  %2017 = vmatprep.subr.bf16.mxu1 %v2105_v0 }
 0x134   :  { %1845 = vmatmul.mubr.msk.f32.vlgmr.msra.gmra.mrb[16].mxu0 %vm395_vm2, %v416_v20  ;;  %v445_v52 = vadd.f32 %v444_v23, %v443_v49  ;;  %1013 = vmatmul.mubr.f32.gmra.mrb[26].mxu1 %v1669_v7 }
 0x135   :  { %1848 = vmatpush3.msra.mxu0 %v2537_v58  ;;  %1849 = vmatprep.mubr.msk.f32.mxu0 %vm2107_vm1, %v2106_v57 }
 0x136   :  { %1852 = vmatprep.subr.mxu0 %v2106_v57  ;;  %2028 = vmatpush1.bf16.msra.mxu1 %v2320_v54 }
 0x137   :  { %2018 = vmatprep.subr.bf16.mxu1 %v2105_v0  ;;  %1017 = vmatprep.mubr.f32.mxu1 %v1674_v10 }
 0x138   :  { %1850 = vmatmul.mubr.msk.f32.vlgmr.msra.gmra.mrb[18].mxu0 %vm395_vm2, %v445_v52  ;;  %1018 = vmatmul.mubr.f32.gmra.mrb[28].mxu1 %v1673_v13 }
 0x139   :  { %1854 = vmatprep.mubr.msk.f32.mxu0 %vm2107_vm1, %v2106_v57  ;;  %1853 = vmatpush3.msk.msra.mxu0 %vm603_vm3, %v2652_v53 }
 0x13a   :  { %1857 = vmatprep.subr.mxu0 %v2106_v57  ;;  %2029 = vmatpush1.bf16.msra.mxu1 %v2352_v1 }
 0x13b   :  { %2019 = vmatprep.subr.bf16.mxu1 %v2105_v0  ;;  %1022 = vmatprep.mubr.f32.mxu1 %v1678_v15 }
 0x13c   :  { %1023 = vmatmul.mubr.f32.gmra.mrb[30].mxu1 %v1677_v16 }
 0x13d   :  { %1687 = vmatprep.mubr.msk.f32.mxu1 %vm129_vm0, %v1676_v18 }
 0x13e   :  { %2030 = vmatpush1.bf16.msra.mxu1 %v2380_v14 }
 0x13f   :  { %2020 = vmatprep.subr.bf16.mxu1 %v2105_v0 }
 0x142   :  { %2031 = vmatpush1.bf16.msra.mxu1 %v2394_v19 }
 0x143   :  { %2021 = vmatprep.subr.bf16.mxu1 %v2105_v0 }
 0x146   :  { %2032 = vmatpush1.bf16.msra.mxu1 %v2411_v27 }
 0x147   :  { %2022 = vmatprep.subr.bf16.mxu1 %v2105_v0 }
 0x14a   :  { %2033 = vmatpush1.bf16.msra.mxu1 %v2427_v34 }
 0x14b   :  { %1862 = vmatprep.subr.mxu1 %v2106_v57 }
 0x14d   :  { %1123 = vmatmul.mubr.f32.vlgmr.msra.gmra.mrb[32].mxu1 %v1675_v21 }
 0x14e   :  { %1863 = vmatpush3.msra.mxu1 %v2537_v58  ;;  %1688 = vmatprep.mubr.msk.f32.mxu1 %vm129_vm0, %v1680_v22 }
 0x14f   :  { %1867 = vmatprep.subr.mxu1 %v2106_v57 }
 0x151   :  { %1128 = vmatmul.mubr.f32.gmra.mrb[34].mxu1 %v1679_v28 }
 0x152   :  { %1864 = vmatprep.mubr.msk.f32.mxu1 %vm2107_vm1, %v2106_v57 }
 0x207   :  { %v515_v30 = vpop.f32.mrb[16].mxu0 }
 0x208   :  { %v520_v33 = vmul.f32 0.00390625, %v515_v30  ;;  %v1846_v36 = vpop.f32.mrb[17].mxu0 }
 0x20a   :  { %1855 = vmatmul.mubr.msk.f32.vlgmr.msra.gmra.mrb[20].mxu0 %vm599_vm4, %v520_v33  ;;  %v595_v38 = vmul.f32 %v520_v33, %v520_v33 }
 0x20b   :  { %v590_v37 = vpop.f32.mrb[18].mxu0  ;;  %1858 = vmatpush3.msk.msra.mxu0 %vm603_vm3, %v2652_v53  ;;  %1859 = vmatprep.mubr.msk.f32.mxu0 %vm2107_vm1, %v2106_v57 }
 0x20c   :  { %v594_v39 = vmul.f32 0.00390625, %v590_v37  ;;  %v1851_v43 = vpop.f32.mrb[19].mxu0  ;;  %1979 = vmatprep.subr.bf16.mxu0 %v2105_v0 }
 0x20e   :  { %v596_v42 = vsub.f32 %v594_v39, %v595_v38 }
 0x210   :  { %v597_v45 = vadd.f32 1e-05, %v596_v42 }
 0x212   :  { %2037 = vrsqrt.f32 %v597_v45 }
 0x21c   :  { %v2038_v46 = vpop.eup %2037 }
 0x21d   :  { %1860 = vmatmul.mubr.msk.f32.vlgmr.msra.gmra.mrb[22].mxu0 %vm599_vm4, %v2038_v46 }
 0x21e   :  { %1981 = vmatpush1.bf16.msra.mxu0 %v2168_v4  ;;  %1681 = vmatprep.mubr.msk.f32.mxu0 %vm129_vm0, %v1652_v8  ;;  %v1651_v4 = vld [vmem:[%s3054_s0 + $0x110] sm:$0xff] }
 0x21f   :  { %1982 = vmatprep.subr.bf16.mxu0 %v2105_v0 }
 0x222   :  { %1984 = vmatpush1.bf16.msra.mxu0 %v2188_v11  ;;  %v1656_v11 = vld [vmem:[%s3054_s0 + $0x138] sm:$0xff] }
 0x223   :  { %1985 = vmatprep.subr.bf16.mxu0 %v2105_v0 }
 0x226   :  { %1987 = vmatpush1.bf16.msra.mxu0 %v2233_v26  ;;  %v1655_v26 = vld [vmem:[%s3054_s0 + $0x130] sm:$0xff] }
 0x227   :  { %1988 = vmatprep.subr.bf16.mxu0 %v2105_v0 }
 0x22a   :  { %1990 = vmatpush1.bf16.msra.mxu0 %v2261_v35  ;;  %v1659_v35 = vld [vmem:[%s3054_s0 + $0x150] sm:$0xff] }
 0x22b   :  { %1991 = vmatprep.subr.bf16.mxu0 %v2105_v0 }
 0x22e   :  { %1993 = vmatpush1.bf16.msra.mxu0 %v2289_v44  ;;  %v1664_v44 = vld [vmem:[%s3054_s0 + $0x178] sm:$0xff] }
 0x22f   :  { %1994 = vmatprep.subr.bf16.mxu0 %v2105_v0 }
 0x232   :  { %1996 = vmatpush1.bf16.msra.mxu0 %v2320_v54  ;;  %v1663_v54 = vld [vmem:[%s3054_s0 + $0x170] sm:$0xff] }
 0x233   :  { %1997 = vmatprep.subr.bf16.mxu0 %v2105_v0 }
 0x236   :  { %1999 = vmatpush1.bf16.msra.mxu0 %v2352_v1  ;;  %v1668_v1 = vld [vmem:[%s3054_s0 + $0x198] sm:$0xff] }
 0x237   :  { %2000 = vmatprep.subr.bf16.mxu0 %v2105_v0 }
 0x23a   :  { %2002 = vmatpush1.bf16.msra.mxu0 %v2380_v14  ;;  %v1667_v14 = vld [vmem:[%s3054_s0 + $0x190] sm:$0xff] }
 0x23b   :  { %2003 = vmatprep.subr.bf16.mxu0 %v2105_v0 }
 0x23e   :  { %2005 = vmatpush1.bf16.msra.mxu0 %v2394_v19  ;;  %v1672_v19 = vld [vmem:[%s3054_s0 + $0x1b8] sm:$0xff] }
 0x23f   :  { %2006 = vmatprep.subr.bf16.mxu0 %v2105_v0 }
 0x242   :  { %2008 = vmatpush1.bf16.msra.mxu0 %v2411_v27  ;;  %v1671_v27 = vld [vmem:[%s3054_s0 + $0x1b0] sm:$0xff] }
 0x243   :  { %2009 = vmatprep.subr.bf16.mxu0 %v2105_v0  ;;  %v1660_v0 = vld [vmem:[%s3054_s0 + $0x158] sm:$0xff] }
 0x246   :  { %2011 = vmatpush1.bf16.msra.mxu0 %v2427_v34  ;;  %v1810_v34 = vpop.f32.mrb[16].mxu1 }
 0x247   :  { %v1811_v47 = vpop.f32.mrb[17].mxu1 }
 0x248   :  { %v2815_v31 = vadd.f32 %v1811_v47, %v1810_v34  ;;  %v1813_v12 = vpop.f32.mrb[18].mxu1 }
 0x249   :  { %1093 = vmatmul.mubr.f32.vlgmr.msra.gmra.mrb[24].mxu0 %v1651_v4  ;;  %v1814_v48 = vpop.f32.mrb[19].mxu1 }
 0x24a   :  { %1682 = vmatprep.mubr.msk.f32.mxu0 %vm129_vm0, %v1656_v11  ;;  %v2817_v49 = vadd.f32 %v1814_v48, %v1813_v12  ;;  %v1816_v20 = vpop.f32.mrb[20].mxu1 }
 0x24b   :  { %v1817_v23 = vpop.f32.mrb[21].mxu1 }
 0x24c   :  { %v2819_v52 = vadd.f32 %v1817_v23, %v1816_v20  ;;  %v1819_v32 = vpop.f32.mrb[22].mxu1 }
 0x24d   :  { %1098 = vmatmul.mubr.f32.gmra.mrb[26].mxu0 %v1655_v26  ;;  %v1820_v55 = vpop.f32.mrb[23].mxu1 }
 0x24e   :  { %1683 = vmatprep.mubr.msk.f32.mxu0 %vm129_vm0, %v1660_v0  ;;  %v2821_v56 = vadd.f32 %v1820_v55, %v1819_v32  ;;  %v1822_v40 = vpop.f32.mrb[24].mxu1 }
 0x24f   :  { %v1823_v50 = vpop.f32.mrb[25].mxu1 }
 0x250   :  { %v2823_v51 = vadd.f32 %v1823_v50, %v1822_v40  ;;  %v1825_v61 = vpop.f32.mrb[26].mxu1 }
 0x251   :  { %1103 = vmatmul.mubr.f32.gmra.mrb[28].mxu0 %v1659_v35  ;;  %v1826_v62 = vpop.f32.mrb[27].mxu1 }
 0x252   :  { %1684 = vmatprep.mubr.msk.f32.mxu0 %vm129_vm0, %v1664_v44  ;;  %v2825_v3 = vadd.f32 %v1826_v62, %v1825_v61  ;;  %v1828_v5 = vpop.f32.mrb[28].mxu1 }
 0x253   :  { %v1829_v6 = vpop.f32.mrb[29].mxu1 }
 0x254   :  { %v1830_v7 = vadd.f32 %v1829_v6, %v1828_v5  ;;  %v1831_v10 = vpop.f32.mrb[30].mxu1 }
 0x255   :  { %1108 = vmatmul.mubr.f32.gmra.mrb[30].mxu0 %v1663_v54  ;;  %v1832_v13 = vpop.f32.mrb[31].mxu1 }
 0x256   :  { %1685 = vmatprep.mubr.msk.f32.mxu0 %vm129_vm0, %v1668_v1  ;;  %v1020_v15 = vadd.f32 %v1830_v7, %v2546_v63  ;;  %v1833_v16 = vadd.f32 %v1832_v13, %v1831_v10  ;;  %v1124_v18 = vpop.f32.mrb[32].mxu1  ;;  %v2851_v1 = vld [vmem:[%s3061_s8] ss:$0 sm:$0xff] }
 0x257   :  { %v1126_v22 = vpop.f32.mrb[33].mxu1 }
 0x258   :  { %v2828_v21 = vadd.f32 %v1124_v18, %v1020_v15  ;;  %v1025_v28 = vadd.f32 %v1833_v16, %v2546_v63  ;;  %v1129_v30 = vpop.f32.mrb[34].mxu1 }
 0x259   :  { %1113 = vmatmul.mubr.f32.gmra.mrb[32].mxu0 %v1667_v14  ;;  %v1131_v36 = vpop.f32.mrb[35].mxu1 }
 0x25a   :  { %1686 = vmatprep.mubr.msk.f32.mxu0 %vm129_vm0, %v1672_v19  ;;  %v2831_v33 = vadd.f32 %v1129_v30, %v1025_v28 }
 0x25d   :  { %1118 = vmatmul.mubr.f32.gmra.mrb[34].mxu0 %v1671_v27 }
 0x2dd   :  { %v673_v37 = vpop.f32.mrb[20].mxu0 }
 0x2de   :  { %v1856_v38 = vpop.f32.mrb[21].mxu0  ;;  %v753_v39 = vrot.slane %v673_v37, %v2553_v29 }
 0x2e0   :  { %v754_v43 = vsub.f32 %v2574_v59, %v753_v39  ;;  %v755_v45 = vsub.f32 %v2570_v41, %v753_v39  ;;  %v756_v8 = vsub.f32 %v2577_v60, %v753_v39  ;;  %v757_v46 = vsub.f32 %v2583_v9, %v753_v39  ;;  %v2846_v59 = vld [vmem:[%s3060_s7] ss:$0 sm:$0xff] }
 0x2e1   :  { %v758_v26 = vsub.f32 %v2593_v24, %v753_v39  ;;  %v759_v0 = vsub.f32 %v2611_v17, %v753_v39  ;;  %v760_v35 = vsub.f32 %v2624_v2, %v753_v39  ;;  %v761_v44 = vsub.f32 %v2634_v25, %v753_v39 }
 0x2f0   :  { %v746_v42 = vpop.f32.mrb[22].mxu0 }
 0x2f1   :  { %v765_v4 = vrot.slane %v746_v42, %v2553_v29  ;;  %v1861_v11 = vpop.f32.mrb[23].mxu0 }
 0x2f3   :  { %v766_v41 = vmul.f32 %v765_v4, %v754_v43  ;;  %v767_v60 = vmul.f32 %v765_v4, %v755_v45  ;;  %v768_v54 = vmul.f32 %v765_v4, %v756_v8  ;;  %v769_v9 = vmul.f32 %v765_v4, %v757_v46 }
 0x2f4   :  { %v770_v24 = vmul.f32 %v765_v4, %v758_v26  ;;  %v771_v17 = vmul.f32 %v765_v4, %v759_v0  ;;  %v772_v14 = vmul.f32 %v765_v4, %v760_v35  ;;  %v773_v2 = vmul.f32 %v765_v4, %v761_v44 }
 0x2f5   :  { %v780_v25 = vmul.f32 %v2846_v59, %v766_v41  ;;  %v781_v19 = vmul.f32 %v2846_v59, %v767_v60  ;;  %v782_v27 = vmul.f32 %v2846_v59, %v768_v54  ;;  %v783_v34 = vmul.f32 %v2846_v59, %v769_v9 }
 0x2f6   :  { %v784_v47 = vmul.f32 %v2846_v59, %v770_v24  ;;  %v785_v12 = vmul.f32 %v2846_v59, %v771_v17  ;;  %v786_v48 = vmul.f32 %v2846_v59, %v772_v14  ;;  %v787_v20 = vmul.f32 %v2846_v59, %v773_v2 }
 0x2f7   :  { %v794_v23 = vadd.f32 %v2851_v1, %v780_v25  ;;  %v795_v32 = vadd.f32 %v2851_v1, %v781_v19  ;;  %v796_v55 = vadd.f32 %v2851_v1, %v782_v27  ;;  %v797_v40 = vadd.f32 %v2851_v1, %v783_v34 }
 0x2f8   :  { %v798_v50 = vadd.f32 %v2851_v1, %v784_v47  ;;  %v799_v61 = vadd.f32 %v2851_v1, %v785_v12  ;;  %v800_v62 = vadd.f32 %v2851_v1, %v786_v48  ;;  %v801_v10 = vadd.f32 %v2851_v1, %v787_v20  ;;  %v1689_v48 = vld [vmem:[%s3057_s3 + $0x1] sm:$0x1] }
 0x2f9   :  { %v1641_v5 = vmul.f32 -1.442695, %v794_v23  ;;  %v1642_v6 = vmul.f32 -1.442695, %v795_v32  ;;  %v1643_v7 = vmul.f32 -1.442695, %v796_v55 }
 0x2fa   :  { %v1644_v13 = vmul.f32 -1.442695, %v797_v40  ;;  %v1645_v15 = vmul.f32 -1.442695, %v798_v50  ;;  %v1646_v16 = vmul.f32 -1.442695, %v799_v61 }
 0x2fb   :  { %2039 = vpow2.f32 %v1641_v5  ;;  %v1647_v18 = vmul.f32 -1.442695, %v800_v62  ;;  %v1648_v22 = vmul.f32 -1.442695, %v801_v10 }
 0x2fc   :  { %2041 = vpow2.f32 %v1642_v6 }
 0x2fd   :  { %2043 = vpow2.f32 %v1643_v7 }
 0x2fe   :  { %2045 = vpow2.f32 %v1644_v13 }
 0x2ff   :  { %2047 = vpow2.f32 %v1645_v15 }
 0x300   :  { %2049 = vpow2.f32 %v1646_v16  ;;  %v1691_v16 = vld [vmem:[%s3058_s4 + $0x1] ss:$0 sm:$0xff] }
 0x301   :  { %2051 = vpow2.f32 %v1647_v18 }
 0x302   :  { %2053 = vpow2.f32 %v1648_v22 }
 0x305   :  { %v2040_v28 = vpop.eup %2039 }
 0x306   :  { %v2042_v30 = vpop.eup %2041  ;;  %v826_v36 = vadd.f32 1.0, %v2040_v28 }
 0x307   :  { %v2044_v37 = vpop.eup %2043  ;;  %v827_v38 = vadd.f32 1.0, %v2042_v30  ;;  %v1005_v30 = vadd.f32 %v2821_v56, %v2546_v63 }
 0x308   :  { %v2046_v39 = vpop.eup %2045  ;;  %v828_v43 = vadd.f32 1.0, %v2044_v37  ;;  %2055 = vrcp.f32 %v826_v36 }
 0x309   :  { %v2048_v42 = vpop.eup %2047  ;;  %v829_v45 = vadd.f32 1.0, %v2046_v39  ;;  %2057 = vrcp.f32 %v827_v38 }
 0x30a   :  { %v2050_v8 = vpop.eup %2049  ;;  %v830_v46 = vadd.f32 1.0, %v2048_v42  ;;  %2059 = vrcp.f32 %v828_v43 }
 0x30b   :  { %v2052_v4 = vpop.eup %2051  ;;  %v831_v11 = vadd.f32 1.0, %v2050_v8  ;;  %2061 = vrcp.f32 %v829_v45  ;;  %v1010_v45 = vadd.f32 %v2823_v51, %v2546_v63  ;;  %v1015_v51 = vadd.f32 %v2825_v3, %v2546_v63 }
 0x30c   :  { %v2054_v26 = vpop.eup %2053  ;;  %v832_v0 = vadd.f32 1.0, %v2052_v4  ;;  %2063 = vrcp.f32 %v830_v46 }
 0x30d   :  { %v833_v35 = vadd.f32 1.0, %v2054_v26  ;;  %2065 = vrcp.f32 %v831_v11 }
 0x30e   :  { %2067 = vrcp.f32 %v832_v0 }
 0x30f   :  { %2069 = vrcp.f32 %v833_v35 }
 0x312   :  { %v2056_v44 = vpop.eup %2055 }
 0x313   :  { %v2058_v41 = vpop.eup %2057  ;;  %v850_v60 = vmul.f32 %v2056_v44, %v794_v23  ;;  %v990_v23 = vadd.f32 %v2815_v31, %v2546_v63  ;;  %v1000_v31 = vadd.f32 %v2819_v52, %v2546_v63 }
 0x314   :  { %v2060_v54 = vpop.eup %2059  ;;  %v851_v9 = vmul.f32 %v2058_v41, %v795_v32 }
 0x315   :  { %v2062_v24 = vpop.eup %2061  ;;  %v852_v17 = vmul.f32 %v2060_v54, %v796_v55  ;;  %858 = vst.msk [vmem:[%s3062_s9] sm:$0xff] %vm395_vm2, %v850_v60  ;;  %v1135_v55 = vadd.f32 1.0, %v1689_v48 }
 0x316   :  { %v2064_v14 = vpop.eup %2063  ;;  %v853_v2 = vmul.f32 %v2062_v24, %v797_v40  ;;  %859 = vst.msk [vmem:[%s3062_s9 + $0x8] sm:$0xff] %vm395_vm2, %v851_v9 }
 0x317   :  { %v2066_v25 = vpop.eup %2065  ;;  %v854_v19 = vmul.f32 %v2064_v14, %v798_v50  ;;  %860 = vst.msk [vmem:[%s3062_s9 + $0x10] sm:$0xff] %vm395_vm2, %v852_v17 }
 0x318   :  { %v2068_v27 = vpop.eup %2067  ;;  %v855_v34 = vmul.f32 %v2066_v25, %v799_v61  ;;  %861 = vst.msk [vmem:[%s3062_s9 + $0x18] sm:$0xff] %vm395_vm2, %v853_v2  ;;  %v995_v61 = vadd.f32 %v2817_v49, %v2546_v63 }
 0x319   :  { %v2070_v47 = vpop.eup %2069  ;;  %v856_v12 = vmul.f32 %v2068_v27, %v800_v62  ;;  %862 = vst.msk [vmem:[%s3062_s9 + $0x20] sm:$0xff] %vm395_vm2, %v854_v19  ;;  %v1140_v62 = vrot.slane %v1135_v55, %v2553_v29 }
 0x31a   :  { %v857_v20 = vmul.f32 %v2070_v47, %v801_v10  ;;  %863 = vst.msk [vmem:[%s3062_s9 + $0x28] sm:$0xff] %vm395_vm2, %v855_v34 }
 0x31b   :  { %864 = vst.msk [vmem:[%s3062_s9 + $0x30] sm:$0xff] %vm395_vm2, %v856_v12  ;;  %v1148_v44 = vmul.f32 %v1140_v62, %v2828_v21  ;;  %v1149_v2 = vmul.f32 %v1140_v62, %v2831_v33 }
 0x31c   :  { %865 = vst.msk [vmem:[%s3062_s9 + $0x38] sm:$0xff] %vm395_vm2, %v857_v20  ;;  %v1094_v32 = vpop.f32.mrb[24].mxu0 }
 0x31d   :  { %v1095_v40 = vadd.f32 %v1094_v32, %v990_v23  ;;  %v1096_v50 = vpop.f32.mrb[25].mxu0  ;;  %v2951_v47 = vadd.f32 %v1691_v16, %v1148_v44 }
 0x31e   :  { %v2961_v50 = vadd.f32 %v1691_v16, %v1149_v2 }
 0x31f   :  { %v1142_v13 = vmul.f32 %v1140_v62, %v1095_v40 }
 0x320   :  { %v1099_v5 = vpop.f32.mrb[26].mxu0 }
 0x321   :  { %v1100_v6 = vadd.f32 %v1099_v5, %v995_v61  ;;  %v1101_v7 = vpop.f32.mrb[27].mxu0  ;;  %v2918_v36 = vadd.f32 %v1691_v16, %v1142_v13  ;;  %v1177_v13 = vsel %vm395_vm2, %v2951_v47, 0.0 }
 0x323   :  { %v1143_v10 = vmul.f32 %v1140_v62, %v1100_v6  ;;  %v1187_v8 = vmul.f32 %v2918_v36, %v2918_v36  ;;  %v1166_v35 = vsel %vm395_vm2, %v2918_v36, 0.0  ;;  %v1193_v6 = vmul.f32 %v2951_v47, %v2951_v47 }
 0x324   :  { %v1104_v15 = vpop.f32.mrb[28].mxu0 }
 0x325   :  { %v1105_v18 = vadd.f32 %v1104_v15, %v1000_v31  ;;  %v1106_v22 = vpop.f32.mrb[29].mxu0  ;;  %v2914_v28 = vadd.f32 %v1691_v16, %v1143_v10  ;;  %v1195_v24 = vsel %vm395_vm2, %v1187_v8, 0.0 }
 0x327   :  { %v1144_v49 = vmul.f32 %v1140_v62, %v1105_v18  ;;  %v1188_v43 = vmul.f32 %v2914_v28, %v2914_v28  ;;  %v1167_v56 = vsel %vm395_vm2, %v2914_v28, 0.0 }
 0x328   :  { %v1109_v37 = vpop.f32.mrb[30].mxu0  ;;  %v1168_v17 = vadd.f32 %v1167_v56, %v1166_v35 }
 0x329   :  { %v2920_v38 = vadd.f32 %v1691_v16, %v1144_v49  ;;  %v1110_v52 = vadd.f32 %v1109_v37, %v1005_v30  ;;  %v1111_v39 = vpop.f32.mrb[31].mxu0  ;;  %v1196_v41 = vsel %vm395_vm2, %v1188_v43, 0.0  ;;  %v1206_v49 = vsel %vm395_vm2, %v1193_v6, 0.0 }
 0x32a   :  { %v1197_v27 = vadd.f32 %v1196_v41, %v1195_v24  ;;  %v1179_v30 = vsel %vm395_vm2, %v2961_v50, 0.0 }
 0x32b   :  { %v1145_v42 = vmul.f32 %v1140_v62, %v1110_v52  ;;  %v1189_v4 = vmul.f32 %v2920_v38, %v2920_v38  ;;  %v1169_v60 = vsel %vm395_vm2, %v2920_v38, 0.0 }
 0x32c   :  { %v1114_v46 = vpop.f32.mrb[32].mxu0  ;;  %v1170_v34 = vadd.f32 %v1169_v60, %v1168_v17 }
 0x32d   :  { %v2932_v11 = vadd.f32 %v1691_v16, %v1145_v42  ;;  %v1115_v26 = vadd.f32 %v1114_v46, %v1010_v45  ;;  %v1116_v0 = vpop.f32.mrb[33].mxu0  ;;  %v1198_v21 = vsel %vm395_vm2, %v1189_v4, 0.0 }
 0x32e   :  { %v1199_v23 = vadd.f32 %v1198_v21, %v1197_v27 }
 0x32f   :  { %v1190_v54 = vmul.f32 %v2932_v11, %v2932_v11  ;;  %v1146_v9 = vmul.f32 %v1140_v62, %v1115_v26  ;;  %v1171_v63 = vsel %vm395_vm2, %v2932_v11, 0.0 }
 0x330   :  { %v1119_v14 = vpop.f32.mrb[34].mxu0  ;;  %v1172_v32 = vadd.f32 %v1171_v63, %v1170_v34 }
 0x331   :  { %v2949_v3 = vadd.f32 %v1691_v16, %v1146_v9  ;;  %v1120_v25 = vadd.f32 %v1119_v14, %v1015_v51  ;;  %v1121_v19 = vpop.f32.mrb[35].mxu0  ;;  %v1200_v12 = vsel %vm395_vm2, %v1190_v54, 0.0 }
 0x332   :  { %v1201_v61 = vadd.f32 %v1200_v12, %v1199_v23 }
 0x333   :  { %v1173_v48 = vsel %vm395_vm2, %v2949_v3, 0.0  ;;  %v1191_v33 = vmul.f32 %v2949_v3, %v2949_v3  ;;  %v1147_v20 = vmul.f32 %v1140_v62, %v1120_v25 }
 0x334   :  { %v1174_v5 = vadd.f32 %v1173_v48, %v1172_v32 }
 0x335   :  { %v1202_v55 = vsel %vm395_vm2, %v1191_v33, 0.0  ;;  %v2959_v40 = vadd.f32 %v1691_v16, %v1147_v20  ;;  %v1194_v16 = vmul.f32 %v2961_v50, %v2961_v50 }
 0x336   :  { %v1203_v62 = vadd.f32 %v1202_v55, %v1201_v61 }
 0x337   :  { %v1175_v7 = vsel %vm395_vm2, %v2959_v40, 0.0  ;;  %v1192_v10 = vmul.f32 %v2959_v40, %v2959_v40  ;;  %v1208_v39 = vsel %vm395_vm2, %v1194_v16, 0.0 }
 0x338   :  { %v1176_v31 = vadd.f32 %v1175_v7, %v1174_v5 }
 0x339   :  { %v1204_v15 = vsel %vm395_vm2, %v1192_v10, 0.0 }
 0x33a   :  { %v1205_v18 = vadd.f32 %v1204_v15, %v1203_v62  ;;  %v1178_v22 = vadd.f32 %v1177_v13, %v1176_v31 }
 0x33c   :  { %v1180_v37 = vadd.f32 %v1179_v30, %v1178_v22  ;;  %v1207_v52 = vadd.f32 %v1206_v49, %v1205_v18 }
 0x33e   :  { %v1181_v43 = vrot.slane %v1180_v37, 4  ;;  %v1209_v42 = vadd.f32 %v1208_v39, %v1207_v52 }
 0x340   :  { %v1182_v45 = vadd.f32 %v1181_v43, %v1180_v37  ;;  %v1210_v8 = vrot.slane %v1209_v42, 4 }
 0x342   :  { %v1183_v46 = vrot.slane %v1182_v45, 2  ;;  %v1211_v56 = vadd.f32 %v1210_v8, %v1209_v42 }
 0x344   :  { %v1184_v4 = vadd.f32 %v1183_v46, %v1182_v45  ;;  %v1212_v26 = vrot.slane %v1211_v56, 2 }
 0x346   :  { %v1185_v0 = vrot.slane %v1184_v4, 1  ;;  %v1213_v35 = vadd.f32 %v1212_v26, %v1211_v56 }
 0x348   :  { %v1186_v44 = vadd.f32 %v1185_v0, %v1184_v4  ;;  %v1214_v51 = vrot.slane %v1213_v35, 1 }
 0x34a   :  { %1865 = vmatmul.mubr.msk.f32.vlgmr.msra.gmra.mrb[36].mxu1 %vm395_vm2, %v1186_v44  ;;  %v1215_v41 = vadd.f32 %v1214_v51, %v1213_v35 }
 0x34b   :  { %1868 = vmatpush3.msra.mxu1 %v2537_v58  ;;  %1869 = vmatprep.mubr.msk.f32.mxu1 %vm2107_vm1, %v2106_v57 }
 0x34c   :  { %1872 = vmatprep.subr.mxu1 %v2106_v57 }
 0x34e   :  { %1870 = vmatmul.mubr.msk.f32.vlgmr.msra.gmra.mrb[38].mxu1 %vm395_vm2, %v1215_v41 }
 0x34f   :  { %1873 = vmatpush3.msk.msra.mxu1 %vm603_vm3, %v2652_v53  ;;  %1874 = vmatprep.mubr.msk.f32.mxu1 %vm2107_vm1, %v2106_v57 }
 0x350   :  { %1877 = vmatprep.subr.mxu1 %v2106_v57 }
 0x41d   :  { %v1285_v60 = vpop.f32.mrb[36].mxu1 }
 0x41e   :  { %v1289_v54 = vmul.f32 0.00390625, %v1285_v60  ;;  %v1866_v9 = vpop.f32.mrb[37].mxu1 }
 0x420   :  { %1875 = vmatmul.mubr.msk.f32.vlgmr.msra.gmra.mrb[40].mxu1 %vm599_vm4, %v1289_v54  ;;  %v1364_v24 = vmul.f32 %v1289_v54, %v1289_v54 }
 0x421   :  { %v1359_v58 = vpop.f32.mrb[38].mxu1  ;;  %1878 = vmatpush3.msk.msra.mxu1 %vm603_vm3, %v2652_v53  ;;  %1879 = vmatprep.mubr.msk.f32.mxu1 %vm2107_vm1, %v2106_v57 }
 0x422   :  { %v1363_v17 = vmul.f32 0.00390625, %v1359_v58  ;;  %v1871_v14 = vpop.f32.mrb[39].mxu1 }
 0x424   :  { %v1365_v2 = vsub.f32 %v1363_v17, %v1364_v24 }
 0x426   :  { %v1366_v21 = vadd.f32 1e-05, %v1365_v2 }
 0x428   :  { %2071 = vrsqrt.f32 %v1366_v21 }
 0x432   :  { %v2072_v63 = vpop.eup %2071 }
 0x433   :  { %1880 = vmatmul.mubr.msk.f32.vlgmr.msra.gmra.mrb[42].mxu1 %vm599_vm4, %v2072_v63 }
 0x4f3   :  { %v1437_v25 = vpop.f32.mrb[40].mxu1 }
 0x4f4   :  { %v1876_v19 = vpop.f32.mrb[41].mxu1  ;;  %v1517_v27 = vrot.slane %v1437_v25, %v2553_v29 }
 0x4f6   :  { %v1518_v34 = vsub.f32 %v2918_v36, %v1517_v27  ;;  %v1519_v53 = vsub.f32 %v2914_v28, %v1517_v27  ;;  %v1520_v57 = vsub.f32 %v2920_v38, %v1517_v27  ;;  %v1521_v48 = vsub.f32 %v2932_v11, %v1517_v27 }
 0x4f7   :  { %v1522_v23 = vsub.f32 %v2949_v3, %v1517_v27  ;;  %v1523_v32 = vsub.f32 %v2959_v40, %v1517_v27  ;;  %v1524_v55 = vsub.f32 %v2951_v47, %v1517_v27  ;;  %v1525_v61 = vsub.f32 %v2961_v50, %v1517_v27 }
 0x506   :  { %v1510_v12 = vpop.f32.mrb[42].mxu1 }
 0x507   :  { %v1529_v33 = vrot.slane %v1510_v12, %v2553_v29  ;;  %v1881_v20 = vpop.f32.mrb[43].mxu1 }
 0x509   :  { %v1530_v5 = vmul.f32 %v1529_v33, %v1518_v34  ;;  %v1531_v36 = vmul.f32 %v1529_v33, %v1519_v53  ;;  %v1532_v6 = vmul.f32 %v1529_v33, %v1520_v57  ;;  %v1533_v7 = vmul.f32 %v1529_v33, %v1521_v48 }
 0x50a   :  { %v1534_v28 = vmul.f32 %v1529_v33, %v1522_v23  ;;  %v1535_v10 = vmul.f32 %v1529_v33, %v1523_v32  ;;  %v1536_v38 = vmul.f32 %v1529_v33, %v1524_v55  ;;  %v1537_v62 = vmul.f32 %v1529_v33, %v1525_v61 }
 0x50b   :  { %v1538_v11 = vmul.f32 %v2846_v59, %v1530_v5  ;;  %v1539_v29 = vmul.f32 %v2846_v59, %v1531_v36  ;;  %v1540_v3 = vmul.f32 %v2846_v59, %v1532_v6  ;;  %v1541_v40 = vmul.f32 %v2846_v59, %v1533_v7 }
 0x50c   :  { %v1542_v47 = vmul.f32 %v2846_v59, %v1534_v28  ;;  %v1543_v50 = vmul.f32 %v2846_v59, %v1535_v10  ;;  %v1544_v31 = vmul.f32 %v2846_v59, %v1536_v38  ;;  %v1545_v13 = vmul.f32 %v2846_v59, %v1537_v62 }
 0x50d   :  { %v1546_v15 = vadd.f32 %v2851_v1, %v1538_v11  ;;  %v1547_v16 = vadd.f32 %v2851_v1, %v1539_v29  ;;  %v1548_v18 = vadd.f32 %v2851_v1, %v1540_v3  ;;  %v1549_v22 = vadd.f32 %v2851_v1, %v1541_v40 }
 0x50e   :  { %v1550_v49 = vadd.f32 %v2851_v1, %v1542_v47  ;;  %v1551_v30 = vadd.f32 %v2851_v1, %v1543_v50  ;;  %v1552_v37 = vadd.f32 %v2851_v1, %v1544_v31  ;;  %v1553_v42 = vadd.f32 %v2851_v1, %v1545_v13 }
 0x50f   :  { %v1698_v52 = vmul.f32 -1.442695, %v1546_v15  ;;  %v1699_v39 = vmul.f32 -1.442695, %v1547_v16  ;;  %v1700_v43 = vmul.f32 -1.442695, %v1548_v18 }
 0x510   :  { %v1701_v59 = vmul.f32 -1.442695, %v1549_v22  ;;  %v1702_v45 = vmul.f32 -1.442695, %v1550_v49  ;;  %v1703_v8 = vmul.f32 -1.442695, %v1551_v30 }
 0x511   :  { %2073 = vpow2.f32 %v1698_v52  ;;  %v1704_v46 = vmul.f32 -1.442695, %v1552_v37  ;;  %v1705_v56 = vmul.f32 -1.442695, %v1553_v42 }
 0x512   :  { %2075 = vpow2.f32 %v1699_v39 }
 0x513   :  { %2077 = vpow2.f32 %v1700_v43 }
 0x514   :  { %2079 = vpow2.f32 %v1701_v59 }
 0x515   :  { %2081 = vpow2.f32 %v1702_v45 }
 0x516   :  { %2083 = vpow2.f32 %v1703_v8 }
 0x517   :  { %2085 = vpow2.f32 %v1704_v46 }
 0x518   :  { %2087 = vpow2.f32 %v1705_v56 }
 0x51b   :  { %v2074_v4 = vpop.eup %2073 }
 0x51c   :  { %v2076_v26 = vpop.eup %2075  ;;  %v1578_v0 = vadd.f32 1.0, %v2074_v4 }
 0x51d   :  { %v2078_v35 = vpop.eup %2077  ;;  %v1579_v44 = vadd.f32 1.0, %v2076_v26 }
 0x51e   :  { %v2080_v51 = vpop.eup %2079  ;;  %v1580_v1 = vadd.f32 1.0, %v2078_v35  ;;  %2089 = vrcp.f32 %v1578_v0 }
 0x51f   :  { %v2082_v41 = vpop.eup %2081  ;;  %v1581_v60 = vadd.f32 1.0, %v2080_v51  ;;  %2091 = vrcp.f32 %v1579_v44 }
 0x520   :  { %v2084_v54 = vpop.eup %2083  ;;  %v1582_v9 = vadd.f32 1.0, %v2082_v41  ;;  %2093 = vrcp.f32 %v1580_v1 }
 0x521   :  { %v2086_v58 = vpop.eup %2085  ;;  %v1583_v24 = vadd.f32 1.0, %v2084_v54  ;;  %2095 = vrcp.f32 %v1581_v60 }
 0x522   :  { %v2088_v17 = vpop.eup %2087  ;;  %v1584_v14 = vadd.f32 1.0, %v2086_v58  ;;  %2097 = vrcp.f32 %v1582_v9 }
 0x523   :  { %v1585_v2 = vadd.f32 1.0, %v2088_v17  ;;  %2099 = vrcp.f32 %v1583_v24 }
 0x524   :  { %2101 = vrcp.f32 %v1584_v14 }
 0x525   :  { %2103 = vrcp.f32 %v1585_v2 }
 0x528   :  { %v2090_v21 = vpop.eup %2089 }
 0x529   :  { %v2092_v63 = vpop.eup %2091  ;;  %v1602_v25 = vmul.f32 %v2090_v21, %v1546_v15 }
 0x52a   :  { %v2094_v19 = vpop.eup %2093  ;;  %v1603_v27 = vmul.f32 %v2092_v63, %v1547_v16 }
 0x52b   :  { %v2096_v34 = vpop.eup %2095  ;;  %v1604_v12 = vmul.f32 %v2094_v19, %v1548_v18  ;;  %1706 = vst.msk [vmem:[%s3062_s9 + $0x40] sm:$0xff] %vm395_vm2, %v1602_v25 }
 0x52c   :  { %v2098_v53 = vpop.eup %2097  ;;  %v1605_v57 = vmul.f32 %v2096_v34, %v1549_v22  ;;  %1707 = vst.msk [vmem:[%s3062_s9 + $0x48] sm:$0xff] %vm395_vm2, %v1603_v27 }
 0x52d   :  { %v2100_v48 = vpop.eup %2099  ;;  %v1606_v33 = vmul.f32 %v2098_v53, %v1550_v49  ;;  %1708 = vst.msk [vmem:[%s3062_s9 + $0x50] sm:$0xff] %vm395_vm2, %v1604_v12 }
 0x52e   :  { %v2102_v20 = vpop.eup %2101  ;;  %v1607_v23 = vmul.f32 %v2100_v48, %v1551_v30  ;;  %1709 = vst.msk [vmem:[%s3062_s9 + $0x58] sm:$0xff] %vm395_vm2, %v1605_v57 }
 0x52f   :  { %v2104_v32 = vpop.eup %2103  ;;  %v1608_v55 = vmul.f32 %v2102_v20, %v1552_v37  ;;  %1710 = vst.msk [vmem:[%s3062_s9 + $0x60] sm:$0xff] %vm395_vm2, %v1606_v33 }
 0x530   :  { %v1609_v61 = vmul.f32 %v2104_v32, %v1553_v42  ;;  %1711 = vst.msk [vmem:[%s3062_s9 + $0x68] sm:$0xff] %vm395_vm2, %v1607_v23 }
 0x531   :  { %1712 = vst.msk [vmem:[%s3062_s9 + $0x70] sm:$0xff] %vm395_vm2, %v1608_v55 }
 0x532   :  { %1713 = vst.msk [vmem:[%s3062_s9 + $0x78] sm:$0xff] %vm395_vm2, %v1609_v61 }

// kernel: ustack_forward.16
= control target key start
LH: loop header
LB: loop body
LE: loop exit
PB: predicated region body
PF: predicated region fallthrough
CT: control target
= control target key end

     0   :  { %v708_v0 = vmov 0.0|0.0   ;;  %vm89_vm0 = vcmask 719872   ;;  %v709_v44 = vmov 0.0   ;;  %vm308_vm1 = vcmask 130048   ;;  %s1152_s1 = inlined_call_operand.vmem [shape: f32[216,8], index: 1, kind: input, shape index: {}]   ;;  %s1153_s0 = inlined_call_operand.vmem [shape: f32[128,216], index: 0, kind: input, shape index: {}]   ;;  %s1154_s4 = inlined_call_operand.vmem [shape: f32[16,8], index: 4, kind: input, shape index: {}]   ;;  %s1155_s3 = inlined_call_operand.vmem [shape: f32[128,16], index: 3, kind: input, shape index: {}]   ;;  %s1156_s5 = inlined_call_operand.vmem [shape: f32[1,8], index: 5, kind: input, shape index: {}]   ;;  %s1157_s2 = inlined_call_operand.vmem [shape: f32[1,8], index: 2, kind: input, shape index: {}]   ;;  %s1158_s6 = inlined_call_operand.vmem [shape: f32[128,8], index: 6, kind: output, shape index: {}]  }
   0x1   :  { %635 = vmatprep.subr.bf16.mxu0 %v708_v0  ;;  %678 = vmatprep.subr.bf16.mxu1 %v708_v0  ;;  %v55_v1 = vld [vmem:[%s1152_s1] sm:$0xff]  ;;  %v56_v2 = vld [vmem:[%s1152_s1 + $0x8] sm:$0xff]  ;;  %v57_v3 = vld [vmem:[%s1152_s1 + $0x10] sm:$0xff]  ;;  %vm534_vm2 = vcmask 64512  }
   0x2   :  { %v636_v4 = vpack.c.bf16 %v56_v2, %v55_v1  ;;  %v58_v5 = vld [vmem:[%s1152_s1 + $0x18] sm:$0xff]  ;;  %v59_v7 = vld [vmem:[%s1152_s1 + $0x20] sm:$0xff]  ;;  %v60_v8 = vld [vmem:[%s1152_s1 + $0x28] sm:$0xff] }
   0x3   :  { %v639_v6 = vpack.c.bf16 %v58_v5, %v57_v3  ;;  %v642_v9 = vpack.c.bf16 %v60_v8, %v59_v7  ;;  %v61_v10 = vld [vmem:[%s1152_s1 + $0x30] sm:$0xff]  ;;  %v62_v11 = vld [vmem:[%s1152_s1 + $0x38] sm:$0xff]  ;;  %v24_v12 = vld [vmem:[%s1153_s0 + $0x8] sm:$0xff] }
   0x4   :  { %637 = vmatpush1.bf16.msra.mxu0 %v636_v4  ;;  %692 = vmatpush1.bf16.msra.mxu1 %v636_v4  ;;  %v48_v13 = vld [vmem:[%s1153_s0 + $0xc8] sm:$0xff]  ;;  %v645_v14 = vpack.c.bf16 %v62_v11, %v61_v10  ;;  %v63_v15 = vld [vmem:[%s1152_s1 + $0x40] sm:$0xff]  ;;  %v65_v18 = vld [vmem:[%s1152_s1 + $0x50] sm:$0xff] }
   0x5   :  { %638 = vmatprep.subr.bf16.mxu0 %v708_v0  ;;  %679 = vmatprep.subr.bf16.mxu1 %v708_v0  ;;  %v64_v16 = vld [vmem:[%s1152_s1 + $0x48] sm:$0xff]  ;;  %v66_v19 = vld [vmem:[%s1152_s1 + $0x58] sm:$0xff]  ;;  %v67_v21 = vld [vmem:[%s1152_s1 + $0x60] sm:$0xff] }
   0x6   :  { %556 = vmatprep.mubr.msk.f32.mxu0 %vm89_vm0, %v24_v12  ;;  %568 = vmatprep.mubr.msk.f32.mxu1 %vm89_vm0, %v48_v13  ;;  %v648_v17 = vpack.c.bf16 %v64_v16, %v63_v15  ;;  %v651_v20 = vpack.c.bf16 %v66_v19, %v65_v18  ;;  %v68_v22 = vld [vmem:[%s1152_s1 + $0x68] sm:$0xff]  ;;  %v69_v24 = vld [vmem:[%s1152_s1 + $0x70] sm:$0xff]  ;;  %v70_v25 = vld [vmem:[%s1152_s1 + $0x78] sm:$0xff] }
   0x7   :  { %v654_v23 = vpack.c.bf16 %v68_v22, %v67_v21  ;;  %v657_v26 = vpack.c.bf16 %v70_v25, %v69_v24  ;;  %v71_v27 = vld [vmem:[%s1152_s1 + $0x80] sm:$0xff]  ;;  %v72_v28 = vld [vmem:[%s1152_s1 + $0x88] sm:$0xff]  ;;  %v73_v30 = vld [vmem:[%s1152_s1 + $0x90] sm:$0xff] }
   0x8   :  { %640 = vmatpush1.bf16.msra.mxu0 %v639_v6  ;;  %693 = vmatpush1.bf16.msra.mxu1 %v639_v6  ;;  %v660_v29 = vpack.c.bf16 %v72_v28, %v71_v27  ;;  %v74_v31 = vld [vmem:[%s1152_s1 + $0x98] sm:$0xff]  ;;  %v75_v33 = vld [vmem:[%s1152_s1 + $0xa0] sm:$0xff]  ;;  %v76_v34 = vld [vmem:[%s1152_s1 + $0xa8] sm:$0xff] }
   0x9   :  { %641 = vmatprep.subr.bf16.mxu0 %v708_v0  ;;  %680 = vmatprep.subr.bf16.mxu1 %v708_v0  ;;  %v663_v32 = vpack.c.bf16 %v74_v31, %v73_v30  ;;  %v666_v35 = vpack.c.bf16 %v76_v34, %v75_v33  ;;  %v77_v36 = vld [vmem:[%s1152_s1 + $0xb0] sm:$0xff]  ;;  %v78_v37 = vld [vmem:[%s1152_s1 + $0xb8] sm:$0xff]  ;;  %v79_v39 = vld [vmem:[%s1152_s1 + $0xc0] sm:$0xff] }
   0xa   :  { %v669_v38 = vpack.c.bf16 %v78_v37, %v77_v36  ;;  %v80_v40 = vld [vmem:[%s1152_s1 + $0xc8] sm:$0xff]  ;;  %v299_v42 = vld [vmem:[%s1154_s4] sm:$0xff]  ;;  %v81_v45 = vld [vmem:[%s1152_s1 + $0xd0] sm:$0xff] }
   0xb   :  { %v672_v41 = vpack.c.bf16 %v80_v40, %v79_v39  ;;  %v300_v43 = vld [vmem:[%s1154_s4 + $0x8] sm:$0xff]  ;;  %v23_v46 = vld [vmem:[%s1153_s0] sm:$0xff]  ;;  %v26_v49 = vld [vmem:[%s1153_s0 + $0x18] sm:$0xff] }
   0xc   :  { %643 = vmatpush1.bf16.msra.mxu0 %v642_v9  ;;  %694 = vmatpush1.bf16.msra.mxu1 %v642_v9  ;;  %v47_v47 = vld [vmem:[%s1153_s0 + $0xc0] sm:$0xff]  ;;  %v674_v48 = vpack.c.bf16 %v300_v43, %v299_v42  ;;  %v50_v50 = vld [vmem:[%s1153_s0 + $0xd8] sm:$0xff]  ;;  %v25_v51 = vld [vmem:[%s1153_s0 + $0x10] sm:$0xff] }
   0xd   :  { %644 = vmatprep.subr.bf16.mxu0 %v708_v0  ;;  %681 = vmatprep.subr.bf16.mxu1 %v708_v0  ;;  %v49_v52 = vld [vmem:[%s1153_s0 + $0xd0] sm:$0xff]  ;;  %v28_v53 = vld [vmem:[%s1153_s0 + $0x28] sm:$0xff]  ;;  %v27_v55 = vld [vmem:[%s1153_s0 + $0x20] sm:$0xff] }
   0xe   :  { %v52_v54 = vld [vmem:[%s1153_s0 + $0xe8] sm:$0xff]  ;;  %v51_v56 = vld [vmem:[%s1153_s0 + $0xe0] sm:$0xff]  ;;  %v30_v57 = vld [vmem:[%s1153_s0 + $0x38] sm:$0xff] }
   0xf   :  { %v54_v58 = vld [vmem:[%s1153_s0 + $0xf8] sm:$0xff]  ;;  %v29_v59 = vld [vmem:[%s1153_s0 + $0x30] sm:$0xff]  ;;  %v32_v61 = vld [vmem:[%s1153_s0 + $0x48] sm:$0xff] }
  0x10   :  { %646 = vmatpush1.bf16.msra.mxu0 %v645_v14  ;;  %695 = vmatpush1.bf16.msra.mxu1 %v645_v14  ;;  %v53_v60 = vld [vmem:[%s1153_s0 + $0xf0] sm:$0xff]  ;;  %v283_v62 = vld [vmem:[%s1155_s3] sm:$0xff]  ;;  %v34_v1 = vld [vmem:[%s1153_s0 + $0x58] sm:$0xff] }
  0x11   :  { %647 = vmatprep.subr.bf16.mxu0 %v708_v0  ;;  %682 = vmatprep.subr.bf16.mxu1 %v708_v0  ;;  %v31_v63 = vld [vmem:[%s1153_s0 + $0x40] sm:$0xff]  ;;  %v285_v2 = vld [vmem:[%s1155_s3 + $0x10] sm:$0xff]  ;;  %v286_v4 = vld [vmem:[%s1155_s3 + $0x18] sm:$0xff] }
  0x12   :  { %v33_v3 = vld [vmem:[%s1153_s0 + $0x50] sm:$0xff]  ;;  %v36_v5 = vld [vmem:[%s1153_s0 + $0x68] sm:$0xff]  ;;  %v287_v6 = vld [vmem:[%s1155_s3 + $0x20] sm:$0xff] }
  0x13   :  { %v35_v7 = vld [vmem:[%s1153_s0 + $0x60] sm:$0xff]  ;;  %v288_v8 = vld [vmem:[%s1155_s3 + $0x28] sm:$0xff]  ;;  %v38_v9 = vld [vmem:[%s1153_s0 + $0x78] sm:$0xff] }
  0x14   :  { %649 = vmatpush1.bf16.msra.mxu0 %v648_v17  ;;  %696 = vmatpush1.bf16.msra.mxu1 %v648_v17  ;;  %v289_v10 = vld [vmem:[%s1155_s3 + $0x30] sm:$0xff]  ;;  %v290_v12 = vld [vmem:[%s1155_s3 + $0x38] sm:$0xff]  ;;  %v40_v13 = vld [vmem:[%s1153_s0 + $0x88] sm:$0xff] }
  0x15   :  { %650 = vmatprep.subr.bf16.mxu0 %v708_v0  ;;  %683 = vmatprep.subr.bf16.mxu1 %v708_v0  ;;  %v37_v11 = vld [vmem:[%s1153_s0 + $0x70] sm:$0xff]  ;;  %v291_v14 = vld [vmem:[%s1155_s3 + $0x40] sm:$0xff]  ;;  %v292_v16 = vld [vmem:[%s1155_s3 + $0x48] sm:$0xff] }
  0x16   :  { %v39_v15 = vld [vmem:[%s1153_s0 + $0x80] sm:$0xff]  ;;  %v42_v17 = vld [vmem:[%s1153_s0 + $0x98] sm:$0xff]  ;;  %v293_v18 = vld [vmem:[%s1155_s3 + $0x50] sm:$0xff] }
  0x17   :  { %v41_v19 = vld [vmem:[%s1153_s0 + $0x90] sm:$0xff]  ;;  %v44_v21 = vld [vmem:[%s1153_s0 + $0xa8] sm:$0xff]  ;;  %v295_v22 = vld [vmem:[%s1155_s3 + $0x60] sm:$0xff] }
  0x18   :  { %652 = vmatpush1.bf16.msra.mxu0 %v651_v20  ;;  %697 = vmatpush1.bf16.msra.mxu1 %v651_v20  ;;  %v294_v20 = vld [vmem:[%s1155_s3 + $0x58] sm:$0xff]  ;;  %v296_v24 = vld [vmem:[%s1155_s3 + $0x68] sm:$0xff]  ;;  %v45_v27 = vld [vmem:[%s1153_s0 + $0xb0] sm:$0xff] }
  0x19   :  { %653 = vmatprep.subr.bf16.mxu0 %v708_v0  ;;  %684 = vmatprep.subr.bf16.mxu1 %v708_v0  ;;  %v46_v25 = vld [vmem:[%s1153_s0 + $0xb8] sm:$0xff] }
  0x1a   :  { %v298_v28 = vld [vmem:[%s1155_s3 + $0x78] sm:$0xff] }
  0x1c   :  { %655 = vmatpush1.bf16.msra.mxu0 %v654_v23  ;;  %698 = vmatpush1.bf16.msra.mxu1 %v654_v23  ;;  %v43_v23 = vld [vmem:[%s1153_s0 + $0xa0] sm:$0xff] }
  0x1d   :  { %656 = vmatprep.subr.bf16.mxu0 %v708_v0  ;;  %685 = vmatprep.subr.bf16.mxu1 %v708_v0 }
  0x20   :  { %658 = vmatpush1.bf16.msra.mxu0 %v657_v26  ;;  %699 = vmatpush1.bf16.msra.mxu1 %v657_v26  ;;  %v297_v26 = vld [vmem:[%s1155_s3 + $0x70] sm:$0xff] }
  0x21   :  { %659 = vmatprep.subr.bf16.mxu0 %v708_v0  ;;  %686 = vmatprep.subr.bf16.mxu1 %v708_v0 }
  0x24   :  { %661 = vmatpush1.bf16.msra.mxu0 %v660_v29  ;;  %700 = vmatpush1.bf16.msra.mxu1 %v660_v29 }
  0x25   :  { %662 = vmatprep.subr.bf16.mxu0 %v708_v0  ;;  %687 = vmatprep.subr.bf16.mxu1 %v708_v0 }
  0x28   :  { %664 = vmatpush1.bf16.msra.mxu0 %v663_v32  ;;  %701 = vmatpush1.bf16.msra.mxu1 %v663_v32 }
  0x29   :  { %665 = vmatprep.subr.bf16.mxu0 %v708_v0  ;;  %688 = vmatprep.subr.bf16.mxu1 %v708_v0 }
  0x2c   :  { %667 = vmatpush1.bf16.msra.mxu0 %v666_v35  ;;  %702 = vmatpush1.bf16.msra.mxu1 %v666_v35 }
  0x2d   :  { %668 = vmatprep.subr.bf16.mxu0 %v708_v0  ;;  %689 = vmatprep.subr.bf16.mxu1 %v708_v0 }
  0x30   :  { %670 = vmatpush1.bf16.msra.mxu0 %v669_v38  ;;  %703 = vmatpush1.bf16.msra.mxu1 %v669_v38 }
  0x31   :  { %671 = vmatprep.subr.bf16.mxu0 %v708_v0  ;;  %690 = vmatprep.subr.bf16.mxu1 %v708_v0  ;;  %v284_v0 = vld [vmem:[%s1155_s3 + $0x8] sm:$0xff] }
  0x34   :  { %673 = vmatpush1.bf16.msra.mxu0 %v672_v41  ;;  %704 = vmatpush1.bf16.msra.mxu1 %v672_v41 }
  0x35   :  { %190 = vmatprep.subr.mxu0 %v709_v44  ;;  %691 = vmatprep.subr.mxu1 %v709_v44 }
  0x38   :  { %191 = vmatpush1.msra.mxu0 %v81_v45  ;;  %705 = vmatpush1.msra.mxu1 %v81_v45  ;;  %v1045_v45 = vld [vmem:[%s1156_s5] ss:$0 sm:$0xff] }
  0x39   :  { %203 = vmatmul.mubr.f32.vlgmr.msra.gmra.mrb[0].mxu0 %v23_v46  ;;  %263 = vmatmul.mubr.f32.vlgmr.msra.gmra.mrb[0].mxu1 %v47_v47  ;;  %v1050_v46 = vld [vmem:[%s1157_s2] ss:$0 sm:$0xff] }
  0x3a   :  { %675 = vmatprep.subr.bf16.mxu1 %v674_v48  ;;  %557 = vmatprep.mubr.msk.f32.mxu0 %vm89_vm0, %v26_v49 }
  0x3b   :  { %677 = vmatpush3.bf16.msra.mxu1 %v674_v48  ;;  %569 = vmatprep.mubr.msk.f32.mxu1 %vm89_vm0, %v50_v50 }
  0x3d   :  { %208 = vmatmul.mubr.f32.gmra.mrb[2].mxu0 %v25_v51  ;;  %268 = vmatmul.mubr.f32.gmra.mrb[2].mxu1 %v49_v52 }
  0x3e   :  { %558 = vmatprep.mubr.msk.f32.mxu0 %vm89_vm0, %v28_v53  ;;  %570 = vmatprep.mubr.msk.f32.mxu1 %vm89_vm0, %v52_v54 }
  0x41   :  { %213 = vmatmul.mubr.f32.gmra.mrb[4].mxu0 %v27_v55  ;;  %273 = vmatmul.mubr.f32.gmra.mrb[4].mxu1 %v51_v56 }
  0x42   :  { %559 = vmatprep.mubr.msk.f32.mxu0 %vm89_vm0, %v30_v57  ;;  %571 = vmatprep.mubr.msk.f32.mxu1 %vm89_vm0, %v54_v58 }
  0x45   :  { %218 = vmatmul.mubr.f32.gmra.mrb[6].mxu0 %v29_v59  ;;  %278 = vmatmul.mubr.f32.gmra.mrb[6].mxu1 %v53_v60 }
  0x46   :  { %560 = vmatprep.mubr.msk.f32.mxu0 %vm89_vm0, %v32_v61  ;;  %611 = vmatprep.mubr.msk.f32.mxu1 %vm308_vm1, %v283_v62 }
  0x49   :  { %223 = vmatmul.mubr.f32.gmra.mrb[8].mxu0 %v31_v63  ;;  %612 = vmatmul.mubr.msk.f32.vlgmr.msra.gmra.mrb[8].mxu1 %vm308_vm1, %v284_v0 }
  0x4a   :  { %561 = vmatprep.mubr.msk.f32.mxu0 %vm89_vm0, %v34_v1  ;;  %614 = vmatprep.mubr.msk.f32.mxu1 %vm308_vm1, %v285_v2 }
  0x4d   :  { %228 = vmatmul.mubr.f32.gmra.mrb[10].mxu0 %v33_v3  ;;  %615 = vmatmul.mubr.msk.f32.gmra.mrb[10].mxu1 %vm308_vm1, %v286_v4 }
  0x4e   :  { %562 = vmatprep.mubr.msk.f32.mxu0 %vm89_vm0, %v36_v5  ;;  %617 = vmatprep.mubr.msk.f32.mxu1 %vm308_vm1, %v287_v6 }
  0x51   :  { %233 = vmatmul.mubr.f32.gmra.mrb[12].mxu0 %v35_v7  ;;  %618 = vmatmul.mubr.msk.f32.gmra.mrb[12].mxu1 %vm308_vm1, %v288_v8 }
  0x52   :  { %563 = vmatprep.mubr.msk.f32.mxu0 %vm89_vm0, %v38_v9  ;;  %620 = vmatprep.mubr.msk.f32.mxu1 %vm308_vm1, %v289_v10 }
  0x55   :  { %238 = vmatmul.mubr.f32.gmra.mrb[14].mxu0 %v37_v11  ;;  %621 = vmatmul.mubr.msk.f32.gmra.mrb[14].mxu1 %vm308_vm1, %v290_v12 }
  0x56   :  { %564 = vmatprep.mubr.msk.f32.mxu0 %vm89_vm0, %v40_v13  ;;  %623 = vmatprep.mubr.msk.f32.mxu1 %vm308_vm1, %v291_v14 }
  0x59   :  { %243 = vmatmul.mubr.f32.gmra.mrb[16].mxu0 %v39_v15  ;;  %624 = vmatmul.mubr.msk.f32.gmra.mrb[16].mxu1 %vm308_vm1, %v292_v16 }
  0x5a   :  { %565 = vmatprep.mubr.msk.f32.mxu0 %vm89_vm0, %v42_v17  ;;  %626 = vmatprep.mubr.msk.f32.mxu1 %vm308_vm1, %v293_v18 }
  0x5d   :  { %248 = vmatmul.mubr.f32.gmra.mrb[18].mxu0 %v41_v19  ;;  %627 = vmatmul.mubr.msk.f32.gmra.mrb[18].mxu1 %vm308_vm1, %v294_v20 }
  0x5e   :  { %566 = vmatprep.mubr.msk.f32.mxu0 %vm89_vm0, %v44_v21  ;;  %629 = vmatprep.mubr.msk.f32.mxu1 %vm308_vm1, %v295_v22 }
  0x61   :  { %253 = vmatmul.mubr.f32.gmra.mrb[20].mxu0 %v43_v23  ;;  %630 = vmatmul.mubr.msk.f32.gmra.mrb[20].mxu1 %vm308_vm1, %v296_v24 }
  0x62   :  { %567 = vmatprep.mubr.msk.f32.mxu0 %vm89_vm0, %v46_v25  ;;  %632 = vmatprep.mubr.msk.f32.mxu1 %vm308_vm1, %v297_v26 }
  0x65   :  { %258 = vmatmul.mubr.f32.gmra.mrb[22].mxu0 %v45_v27  ;;  %633 = vmatmul.mubr.msk.f32.gmra.mrb[22].mxu1 %vm308_vm1, %v298_v28 }
 0x10c   :  { %v1034_v29 = vpop.f32.mrb[0].mxu1  ;;  %v204_v30 = vpop.f32.mrb[0].mxu0 }
 0x10d   :  { %v266_v31 = vpop.f32.mrb[1].mxu1  ;;  %v206_v32 = vpop.f32.mrb[1].mxu0  ;;  %v205_v53 = vadd.f32 %v1050_v46, %v204_v30 }
 0x110   :  { %v1036_v33 = vpop.f32.mrb[2].mxu1  ;;  %v209_v34 = vpop.f32.mrb[2].mxu0 }
 0x111   :  { %v271_v35 = vpop.f32.mrb[3].mxu1  ;;  %v211_v36 = vpop.f32.mrb[3].mxu0  ;;  %v210_v49 = vadd.f32 %v1050_v46, %v209_v34 }
 0x114   :  { %v1038_v37 = vpop.f32.mrb[4].mxu1  ;;  %v214_v38 = vpop.f32.mrb[4].mxu0 }
 0x115   :  { %v276_v39 = vpop.f32.mrb[5].mxu1  ;;  %v216_v40 = vpop.f32.mrb[5].mxu0  ;;  %v215_v0 = vadd.f32 %v1050_v46, %v214_v38 }
 0x118   :  { %v1040_v41 = vpop.f32.mrb[6].mxu1  ;;  %v219_v42 = vpop.f32.mrb[6].mxu0 }
 0x119   :  { %v281_v43 = vpop.f32.mrb[7].mxu1  ;;  %v221_v44 = vpop.f32.mrb[7].mxu0  ;;  %v220_v59 = vadd.f32 %v1050_v46, %v219_v42 }
 0x11c   :  { %v613_v47 = vpop.f32.mrb[8].mxu1  ;;  %v224_v48 = vpop.f32.mrb[8].mxu0 }
 0x11d   :  { %v429_v50 = vadd.f32 %v613_v47, %v1045_v45  ;;  %v423_v51 = vpop.f32.mrb[9].mxu1  ;;  %v226_v52 = vpop.f32.mrb[9].mxu0  ;;  %v225_v12 = vadd.f32 %v1050_v46, %v224_v48 }
 0x11e   :  { %v424_v54 = vadd.f32 %v1045_v45, %v423_v51  ;;  %v270_v52 = vadd.f32 %v1050_v46, %v1036_v33 }
 0x11f   :  { %v503_v55 = vadd.f32 %v429_v50, %v210_v49 }
 0x120   :  { %v502_v56 = vadd.f32 %v424_v54, %v205_v53  ;;  %v616_v57 = vpop.f32.mrb[10].mxu1  ;;  %v229_v58 = vpop.f32.mrb[10].mxu0 }
 0x121   :  { %v519_v60 = vmul.f32 0.70710677, %v503_v55  ;;  %v439_v61 = vadd.f32 %v616_v57, %v1045_v45  ;;  %v433_v62 = vpop.f32.mrb[11].mxu1  ;;  %v231_v63 = vpop.f32.mrb[11].mxu0  ;;  %v230_v8 = vadd.f32 %v1050_v46, %v229_v58 }
 0x122   :  { %v518_v1 = vmul.f32 0.70710677, %v502_v56  ;;  %v434_v2 = vadd.f32 %v1045_v45, %v433_v62 }
 0x123   :  { %536 = vst.msk [vmem:[%s1158_s6 + $0x8] sm:$0xff] %vm534_vm2, %v519_v60  ;;  %v505_v3 = vadd.f32 %v439_v61, %v220_v59  ;;  %v265_v61 = vadd.f32 %v1050_v46, %v1034_v29 }
 0x124   :  { %535 = vst.msk [vmem:[%s1158_s6] sm:$0xff] %vm534_vm2, %v518_v1  ;;  %v504_v4 = vadd.f32 %v434_v2, %v215_v0  ;;  %v619_v5 = vpop.f32.mrb[12].mxu1  ;;  %v234_v6 = vpop.f32.mrb[12].mxu0  ;;  %v280_v0 = vadd.f32 %v1050_v46, %v1040_v41 }
 0x125   :  { %v521_v7 = vmul.f32 0.70710677, %v505_v3  ;;  %v449_v9 = vadd.f32 %v619_v5, %v1045_v45  ;;  %v443_v10 = vpop.f32.mrb[13].mxu1  ;;  %v236_v11 = vpop.f32.mrb[13].mxu0  ;;  %v235_v24 = vadd.f32 %v1050_v46, %v234_v6 }
 0x126   :  { %v520_v13 = vmul.f32 0.70710677, %v504_v4  ;;  %v444_v14 = vadd.f32 %v1045_v45, %v443_v10  ;;  %v275_v10 = vadd.f32 %v1050_v46, %v1038_v37 }
 0x127   :  { %538 = vst.msk [vmem:[%s1158_s6 + $0x18] sm:$0xff] %vm534_vm2, %v521_v7  ;;  %v507_v15 = vadd.f32 %v449_v9, %v230_v8 }
 0x128   :  { %537 = vst.msk [vmem:[%s1158_s6 + $0x10] sm:$0xff] %vm534_vm2, %v520_v13  ;;  %v506_v16 = vadd.f32 %v444_v14, %v225_v12  ;;  %v622_v17 = vpop.f32.mrb[14].mxu1  ;;  %v239_v18 = vpop.f32.mrb[14].mxu0 }
 0x129   :  { %v523_v19 = vmul.f32 0.70710677, %v507_v15  ;;  %v459_v20 = vadd.f32 %v622_v17, %v1045_v45  ;;  %v240_v21 = vadd.f32 %v1050_v46, %v239_v18  ;;  %v453_v22 = vpop.f32.mrb[15].mxu1  ;;  %v241_v23 = vpop.f32.mrb[15].mxu0 }
 0x12a   :  { %v522_v25 = vmul.f32 0.70710677, %v506_v16  ;;  %v454_v26 = vadd.f32 %v1045_v45, %v453_v22 }
 0x12b   :  { %540 = vst.msk [vmem:[%s1158_s6 + $0x28] sm:$0xff] %vm534_vm2, %v523_v19  ;;  %v509_v27 = vadd.f32 %v459_v20, %v240_v21 }
 0x12c   :  { %539 = vst.msk [vmem:[%s1158_s6 + $0x20] sm:$0xff] %vm534_vm2, %v522_v25  ;;  %v508_v28 = vadd.f32 %v454_v26, %v235_v24  ;;  %v625_v30 = vpop.f32.mrb[16].mxu1  ;;  %v244_v31 = vpop.f32.mrb[16].mxu0 }
 0x12d   :  { %v525_v32 = vmul.f32 0.70710677, %v509_v27  ;;  %v245_v34 = vadd.f32 %v1050_v46, %v244_v31  ;;  %v463_v35 = vpop.f32.mrb[17].mxu1  ;;  %v246_v36 = vpop.f32.mrb[17].mxu0  ;;  %v469_v44 = vadd.f32 %v625_v30, %v1045_v45 }
 0x12e   :  { %v524_v38 = vmul.f32 0.70710677, %v508_v28  ;;  %v464_v39 = vadd.f32 %v1045_v45, %v463_v35 }
 0x12f   :  { %542 = vst.msk [vmem:[%s1158_s6 + $0x38] sm:$0xff] %vm534_vm2, %v525_v32 }
 0x130   :  { %541 = vst.msk [vmem:[%s1158_s6 + $0x30] sm:$0xff] %vm534_vm2, %v524_v38  ;;  %v510_v40 = vadd.f32 %v464_v39, %v245_v34  ;;  %v249_v42 = vpop.f32.mrb[18].mxu0  ;;  %v628_v43 = vpop.f32.mrb[18].mxu1 }
 0x131   :  { %v250_v47 = vadd.f32 %v1050_v46, %v249_v42  ;;  %v473_v48 = vpop.f32.mrb[19].mxu1  ;;  %v251_v49 = vpop.f32.mrb[19].mxu0  ;;  %v479_v1 = vadd.f32 %v628_v43, %v1045_v45 }
 0x132   :  { %v526_v50 = vmul.f32 0.70710677, %v510_v40  ;;  %v474_v56 = vadd.f32 %v1045_v45, %v473_v48 }
 0x133   :  { %v511_v51 = vadd.f32 %v469_v44, %v250_v47 }
 0x134   :  { %543 = vst.msk [vmem:[%s1158_s6 + $0x40] sm:$0xff] %vm534_vm2, %v526_v50  ;;  %v254_v53 = vpop.f32.mrb[20].mxu0  ;;  %v631_v54 = vpop.f32.mrb[20].mxu1 }
 0x135   :  { %v527_v55 = vmul.f32 0.70710677, %v511_v51  ;;  %v255_v57 = vadd.f32 %v1050_v46, %v254_v53  ;;  %v489_v58 = vadd.f32 %v631_v54, %v1045_v45  ;;  %v483_v59 = vpop.f32.mrb[21].mxu1  ;;  %v256_v60 = vpop.f32.mrb[21].mxu0 }
 0x136   :  { %v484_v33 = vadd.f32 %v1045_v45, %v483_v59 }
 0x137   :  { %544 = vst.msk [vmem:[%s1158_s6 + $0x48] sm:$0xff] %vm534_vm2, %v527_v55  ;;  %v512_v62 = vadd.f32 %v474_v56, %v255_v57  ;;  %v515_v63 = vadd.f32 %v489_v58, %v270_v52 }
 0x138   :  { %v514_v2 = vadd.f32 %v484_v33, %v265_v61  ;;  %v259_v3 = vpop.f32.mrb[22].mxu0  ;;  %v634_v4 = vpop.f32.mrb[22].mxu1 }
 0x139   :  { %v528_v5 = vmul.f32 0.70710677, %v512_v62  ;;  %v531_v6 = vmul.f32 0.70710677, %v515_v63  ;;  %v260_v29 = vadd.f32 %v1050_v46, %v259_v3  ;;  %v499_v7 = vadd.f32 %v634_v4, %v1045_v45  ;;  %v493_v8 = vpop.f32.mrb[23].mxu1  ;;  %v261_v9 = vpop.f32.mrb[23].mxu0 }
 0x13a   :  { %v530_v11 = vmul.f32 0.70710677, %v514_v2  ;;  %v494_v12 = vadd.f32 %v1045_v45, %v493_v8 }
 0x13b   :  { %545 = vst.msk [vmem:[%s1158_s6 + $0x50] sm:$0xff] %vm534_vm2, %v528_v5  ;;  %548 = vst.msk [vmem:[%s1158_s6 + $0x68] sm:$0xff] %vm534_vm2, %v531_v6  ;;  %v513_v41 = vadd.f32 %v479_v1, %v260_v29  ;;  %v517_v13 = vadd.f32 %v499_v7, %v280_v0 }
 0x13c   :  { %547 = vst.msk [vmem:[%s1158_s6 + $0x60] sm:$0xff] %vm534_vm2, %v530_v11  ;;  %v516_v37 = vadd.f32 %v494_v12, %v275_v10 }
 0x13d   :  { %v529_v46 = vmul.f32 0.70710677, %v513_v41  ;;  %v533_v45 = vmul.f32 0.70710677, %v517_v13 }
 0x13e   :  { %v532_v14 = vmul.f32 0.70710677, %v516_v37 }
 0x13f   :  { %546 = vst.msk [vmem:[%s1158_s6 + $0x58] sm:$0xff] %vm534_vm2, %v529_v46  ;;  %550 = vst.msk [vmem:[%s1158_s6 + $0x78] sm:$0xff] %vm534_vm2, %v533_v45 }
 0x140   :  { %549 = vst.msk [vmem:[%s1158_s6 + $0x70] sm:$0xff] %vm534_vm2, %v532_v14 }

// kernel: ustack_forward.17
= control target key start
LH: loop header
LB: loop body
LE: loop exit
PB: predicated region body
PF: predicated region fallthrough
CT: control target
= control target key end

     0   :  { %v381_v0 = vmov 0.0|0.0   ;;  %vm80_vm0 = vcmask 719872   ;;  %v382_v42 = vmov 0.0   ;;  %vm274_vm1 = vcmask 523264   ;;  %s689_s1 = inlined_call_operand.vmem [shape: f32[216,64], index: 1, kind: input, shape index: {}]   ;;  %s690_s0 = inlined_call_operand.vmem [shape: f32[128,216], index: 0, kind: input, shape index: {}]   ;;  %s691_s2 = inlined_call_operand.vmem [shape: f32[1,64], index: 2, kind: input, shape index: {}]   ;;  %s692_s3 = inlined_call_operand.vmem [shape: f32[128,64], index: 3, kind: output, shape index: {}]  }
   0x1   :  { %312 = vmatprep.subr.bf16.mxu0 %v381_v0  ;;  %351 = vmatprep.subr.bf16.mxu1 %v381_v0  ;;  %v46_v1 = vld [vmem:[%s689_s1] sm:$0xff]  ;;  %v47_v2 = vld [vmem:[%s689_s1 + $0x8] sm:$0xff]  ;;  %v48_v3 = vld [vmem:[%s689_s1 + $0x10] sm:$0xff] }
   0x2   :  { %v313_v4 = vpack.c.bf16 %v47_v2, %v46_v1  ;;  %v49_v5 = vld [vmem:[%s689_s1 + $0x18] sm:$0xff]  ;;  %v50_v7 = vld [vmem:[%s689_s1 + $0x20] sm:$0xff]  ;;  %v51_v8 = vld [vmem:[%s689_s1 + $0x28] sm:$0xff] }
   0x3   :  { %v316_v6 = vpack.c.bf16 %v49_v5, %v48_v3  ;;  %v319_v9 = vpack.c.bf16 %v51_v8, %v50_v7  ;;  %v52_v10 = vld [vmem:[%s689_s1 + $0x30] sm:$0xff]  ;;  %v53_v11 = vld [vmem:[%s689_s1 + $0x38] sm:$0xff]  ;;  %v15_v12 = vld [vmem:[%s690_s0 + $0x8] sm:$0xff] }
   0x4   :  { %314 = vmatpush1.bf16.msra.mxu0 %v313_v4  ;;  %365 = vmatpush1.bf16.msra.mxu1 %v313_v4  ;;  %v31_v13 = vld [vmem:[%s690_s0 + $0x88] sm:$0xff]  ;;  %v322_v14 = vpack.c.bf16 %v53_v11, %v52_v10  ;;  %v54_v15 = vld [vmem:[%s689_s1 + $0x40] sm:$0xff]  ;;  %v56_v18 = vld [vmem:[%s689_s1 + $0x50] sm:$0xff] }
   0x5   :  { %315 = vmatprep.subr.bf16.mxu0 %v381_v0  ;;  %352 = vmatprep.subr.bf16.mxu1 %v381_v0  ;;  %v55_v16 = vld [vmem:[%s689_s1 + $0x48] sm:$0xff]  ;;  %v57_v19 = vld [vmem:[%s689_s1 + $0x58] sm:$0xff]  ;;  %v58_v21 = vld [vmem:[%s689_s1 + $0x60] sm:$0xff] }
   0x6   :  { %296 = vmatprep.mubr.msk.f32.mxu0 %vm80_vm0, %v15_v12  ;;  %304 = vmatprep.mubr.msk.f32.mxu1 %vm80_vm0, %v31_v13  ;;  %v325_v17 = vpack.c.bf16 %v55_v16, %v54_v15  ;;  %v328_v20 = vpack.c.bf16 %v57_v19, %v56_v18  ;;  %v59_v22 = vld [vmem:[%s689_s1 + $0x68] sm:$0xff]  ;;  %v60_v24 = vld [vmem:[%s689_s1 + $0x70] sm:$0xff]  ;;  %v61_v25 = vld [vmem:[%s689_s1 + $0x78] sm:$0xff] }
   0x7   :  { %v331_v23 = vpack.c.bf16 %v59_v22, %v58_v21  ;;  %v334_v26 = vpack.c.bf16 %v61_v25, %v60_v24  ;;  %v62_v27 = vld [vmem:[%s689_s1 + $0x80] sm:$0xff]  ;;  %v63_v28 = vld [vmem:[%s689_s1 + $0x88] sm:$0xff]  ;;  %v64_v30 = vld [vmem:[%s689_s1 + $0x90] sm:$0xff] }
   0x8   :  { %317 = vmatpush1.bf16.msra.mxu0 %v316_v6  ;;  %366 = vmatpush1.bf16.msra.mxu1 %v316_v6  ;;  %v337_v29 = vpack.c.bf16 %v63_v28, %v62_v27  ;;  %v65_v31 = vld [vmem:[%s689_s1 + $0x98] sm:$0xff]  ;;  %v66_v33 = vld [vmem:[%s689_s1 + $0xa0] sm:$0xff]  ;;  %v67_v34 = vld [vmem:[%s689_s1 + $0xa8] sm:$0xff] }
   0x9   :  { %318 = vmatprep.subr.bf16.mxu0 %v381_v0  ;;  %353 = vmatprep.subr.bf16.mxu1 %v381_v0  ;;  %v340_v32 = vpack.c.bf16 %v65_v31, %v64_v30  ;;  %v343_v35 = vpack.c.bf16 %v67_v34, %v66_v33  ;;  %v68_v36 = vld [vmem:[%s689_s1 + $0xb0] sm:$0xff]  ;;  %v69_v37 = vld [vmem:[%s689_s1 + $0xb8] sm:$0xff]  ;;  %v70_v39 = vld [vmem:[%s689_s1 + $0xc0] sm:$0xff] }
   0xa   :  { %v346_v38 = vpack.c.bf16 %v69_v37, %v68_v36  ;;  %v71_v40 = vld [vmem:[%s689_s1 + $0xc8] sm:$0xff]  ;;  %v72_v43 = vld [vmem:[%s689_s1 + $0xd0] sm:$0xff]  ;;  %v14_v44 = vld [vmem:[%s690_s0] sm:$0xff] }
   0xb   :  { %v349_v41 = vpack.c.bf16 %v71_v40, %v70_v39  ;;  %v30_v45 = vld [vmem:[%s690_s0 + $0x80] sm:$0xff]  ;;  %v17_v46 = vld [vmem:[%s690_s0 + $0x18] sm:$0xff]  ;;  %v16_v48 = vld [vmem:[%s690_s0 + $0x10] sm:$0xff] }
   0xc   :  { %320 = vmatpush1.bf16.msra.mxu0 %v319_v9  ;;  %367 = vmatpush1.bf16.msra.mxu1 %v319_v9  ;;  %v33_v47 = vld [vmem:[%s690_s0 + $0x98] sm:$0xff]  ;;  %v32_v49 = vld [vmem:[%s690_s0 + $0x90] sm:$0xff]  ;;  %v19_v50 = vld [vmem:[%s690_s0 + $0x28] sm:$0xff] }
   0xd   :  { %321 = vmatprep.subr.bf16.mxu0 %v381_v0  ;;  %354 = vmatprep.subr.bf16.mxu1 %v381_v0  ;;  %v35_v51 = vld [vmem:[%s690_s0 + $0xa8] sm:$0xff]  ;;  %v18_v52 = vld [vmem:[%s690_s0 + $0x20] sm:$0xff]  ;;  %v21_v54 = vld [vmem:[%s690_s0 + $0x38] sm:$0xff] }
   0xe   :  { %v34_v53 = vld [vmem:[%s690_s0 + $0xa0] sm:$0xff]  ;;  %v37_v55 = vld [vmem:[%s690_s0 + $0xb8] sm:$0xff]  ;;  %v20_v56 = vld [vmem:[%s690_s0 + $0x30] sm:$0xff] }
   0xf   :  { %v36_v57 = vld [vmem:[%s690_s0 + $0xb0] sm:$0xff]  ;;  %v23_v58 = vld [vmem:[%s690_s0 + $0x48] sm:$0xff]  ;;  %v22_v60 = vld [vmem:[%s690_s0 + $0x40] sm:$0xff] }
  0x10   :  { %323 = vmatpush1.bf16.msra.mxu0 %v322_v14  ;;  %368 = vmatpush1.bf16.msra.mxu1 %v322_v14  ;;  %v39_v59 = vld [vmem:[%s690_s0 + $0xc8] sm:$0xff]  ;;  %v38_v61 = vld [vmem:[%s690_s0 + $0xc0] sm:$0xff]  ;;  %v25_v62 = vld [vmem:[%s690_s0 + $0x58] sm:$0xff] }
  0x11   :  { %324 = vmatprep.subr.bf16.mxu0 %v381_v0  ;;  %355 = vmatprep.subr.bf16.mxu1 %v381_v0  ;;  %v41_v63 = vld [vmem:[%s690_s0 + $0xd8] sm:$0xff]  ;;  %v40_v1 = vld [vmem:[%s690_s0 + $0xd0] sm:$0xff]  ;;  %v27_v2 = vld [vmem:[%s690_s0 + $0x68] sm:$0xff] }
  0x12   :  { %v43_v3 = vld [vmem:[%s690_s0 + $0xe8] sm:$0xff]  ;;  %v26_v4 = vld [vmem:[%s690_s0 + $0x60] sm:$0xff]  ;;  %v29_v6 = vld [vmem:[%s690_s0 + $0x78] sm:$0xff] }
  0x13   :  { %v42_v5 = vld [vmem:[%s690_s0 + $0xe0] sm:$0xff]  ;;  %v45_v7 = vld [vmem:[%s690_s0 + $0xf8] sm:$0xff]  ;;  %v28_v8 = vld [vmem:[%s690_s0 + $0x70] sm:$0xff] }
  0x14   :  { %326 = vmatpush1.bf16.msra.mxu0 %v325_v17  ;;  %369 = vmatpush1.bf16.msra.mxu1 %v325_v17  ;;  %v44_v9 = vld [vmem:[%s690_s0 + $0xf0] sm:$0xff]  ;;  %v295_v10 = vld [vmem:[%s691_s2] ss:$0 sm:$0xff] }
  0x15   :  { %327 = vmatprep.subr.bf16.mxu0 %v381_v0  ;;  %356 = vmatprep.subr.bf16.mxu1 %v381_v0 }
  0x18   :  { %329 = vmatpush1.bf16.msra.mxu0 %v328_v20  ;;  %370 = vmatpush1.bf16.msra.mxu1 %v328_v20 }
  0x19   :  { %330 = vmatprep.subr.bf16.mxu0 %v381_v0  ;;  %357 = vmatprep.subr.bf16.mxu1 %v381_v0 }
  0x1c   :  { %332 = vmatpush1.bf16.msra.mxu0 %v331_v23  ;;  %371 = vmatpush1.bf16.msra.mxu1 %v331_v23 }
  0x1d   :  { %333 = vmatprep.subr.bf16.mxu0 %v381_v0  ;;  %358 = vmatprep.subr.bf16.mxu1 %v381_v0 }
  0x20   :  { %335 = vmatpush1.bf16.msra.mxu0 %v334_v26  ;;  %372 = vmatpush1.bf16.msra.mxu1 %v334_v26 }
  0x21   :  { %336 = vmatprep.subr.bf16.mxu0 %v381_v0  ;;  %359 = vmatprep.subr.bf16.mxu1 %v381_v0 }
  0x24   :  { %338 = vmatpush1.bf16.msra.mxu0 %v337_v29  ;;  %373 = vmatpush1.bf16.msra.mxu1 %v337_v29 }
  0x25   :  { %339 = vmatprep.subr.bf16.mxu0 %v381_v0  ;;  %360 = vmatprep.subr.bf16.mxu1 %v381_v0 }
  0x28   :  { %341 = vmatpush1.bf16.msra.mxu0 %v340_v32  ;;  %374 = vmatpush1.bf16.msra.mxu1 %v340_v32 }
  0x29   :  { %342 = vmatprep.subr.bf16.mxu0 %v381_v0  ;;  %361 = vmatprep.subr.bf16.mxu1 %v381_v0 }
  0x2c   :  { %344 = vmatpush1.bf16.msra.mxu0 %v343_v35  ;;  %375 = vmatpush1.bf16.msra.mxu1 %v343_v35 }
  0x2d   :  { %345 = vmatprep.subr.bf16.mxu0 %v381_v0  ;;  %362 = vmatprep.subr.bf16.mxu1 %v381_v0 }
  0x30   :  { %347 = vmatpush1.bf16.msra.mxu0 %v346_v38  ;;  %376 = vmatpush1.bf16.msra.mxu1 %v346_v38 }
  0x31   :  { %348 = vmatprep.subr.bf16.mxu0 %v381_v0  ;;  %363 = vmatprep.subr.bf16.mxu1 %v381_v0  ;;  %v24_v0 = vld [vmem:[%s690_s0 + $0x50] sm:$0xff] }
  0x34   :  { %350 = vmatpush1.bf16.msra.mxu0 %v349_v41  ;;  %377 = vmatpush1.bf16.msra.mxu1 %v349_v41 }
  0x35   :  { %181 = vmatprep.subr.mxu0 %v382_v42  ;;  %364 = vmatprep.subr.mxu1 %v382_v42 }
  0x38   :  { %182 = vmatpush1.msra.mxu0 %v72_v43  ;;  %378 = vmatpush1.msra.mxu1 %v72_v43 }
  0x39   :  { %194 = vmatmul.mubr.f32.vlgmr.msra.gmra.mrb[0].mxu0 %v14_v44  ;;  %234 = vmatmul.mubr.f32.vlgmr.msra.gmra.mrb[0].mxu1 %v30_v45 }
  0x3a   :  { %297 = vmatprep.mubr.msk.f32.mxu0 %vm80_vm0, %v17_v46  ;;  %305 = vmatprep.mubr.msk.f32.mxu1 %vm80_vm0, %v33_v47 }
  0x3d   :  { %199 = vmatmul.mubr.f32.gmra.mrb[2].mxu0 %v16_v48  ;;  %239 = vmatmul.mubr.f32.gmra.mrb[2].mxu1 %v32_v49 }
  0x3e   :  { %298 = vmatprep.mubr.msk.f32.mxu0 %vm80_vm0, %v19_v50  ;;  %306 = vmatprep.mubr.msk.f32.mxu1 %vm80_vm0, %v35_v51 }
  0x41   :  { %204 = vmatmul.mubr.f32.gmra.mrb[4].mxu0 %v18_v52  ;;  %244 = vmatmul.mubr.f32.gmra.mrb[4].mxu1 %v34_v53 }
  0x42   :  { %299 = vmatprep.mubr.msk.f32.mxu0 %vm80_vm0, %v21_v54  ;;  %307 = vmatprep.mubr.msk.f32.mxu1 %vm80_vm0, %v37_v55 }
  0x45   :  { %209 = vmatmul.mubr.f32.gmra.mrb[6].mxu0 %v20_v56  ;;  %249 = vmatmul.mubr.f32.gmra.mrb[6].mxu1 %v36_v57 }
  0x46   :  { %300 = vmatprep.mubr.msk.f32.mxu0 %vm80_vm0, %v23_v58  ;;  %308 = vmatprep.mubr.msk.f32.mxu1 %vm80_vm0, %v39_v59 }
  0x49   :  { %214 = vmatmul.mubr.f32.gmra.mrb[8].mxu0 %v22_v60  ;;  %254 = vmatmul.mubr.f32.gmra.mrb[8].mxu1 %v38_v61 }
  0x4a   :  { %301 = vmatprep.mubr.msk.f32.mxu0 %vm80_vm0, %v25_v62  ;;  %309 = vmatprep.mubr.msk.f32.mxu1 %vm80_vm0, %v41_v63 }
  0x4d   :  { %219 = vmatmul.mubr.f32.gmra.mrb[10].mxu0 %v24_v0  ;;  %259 = vmatmul.mubr.f32.gmra.mrb[10].mxu1 %v40_v1 }
  0x4e   :  { %302 = vmatprep.mubr.msk.f32.mxu0 %vm80_vm0, %v27_v2  ;;  %310 = vmatprep.mubr.msk.f32.mxu1 %vm80_vm0, %v43_v3 }
  0x51   :  { %224 = vmatmul.mubr.f32.gmra.mrb[12].mxu0 %v26_v4  ;;  %264 = vmatmul.mubr.f32.gmra.mrb[12].mxu1 %v42_v5 }
  0x52   :  { %303 = vmatprep.mubr.msk.f32.mxu0 %vm80_vm0, %v29_v6  ;;  %311 = vmatprep.mubr.msk.f32.mxu1 %vm80_vm0, %v45_v7 }
  0x55   :  { %229 = vmatmul.mubr.f32.gmra.mrb[14].mxu0 %v28_v8  ;;  %269 = vmatmul.mubr.f32.gmra.mrb[14].mxu1 %v44_v9 }
 0x10c   :  { %v195_v11 = vpop.f32.mrb[0].mxu0  ;;  %v235_v12 = vpop.f32.mrb[0].mxu1 }
 0x10d   :  { %v196_v13 = vadd.f32 %v295_v10, %v195_v11  ;;  %v236_v14 = vadd.f32 %v295_v10, %v235_v12  ;;  %v197_v15 = vpop.f32.mrb[1].mxu0  ;;  %v237_v16 = vpop.f32.mrb[1].mxu1 }
 0x10f   :  { %275 = vst.msk [vmem:[%s692_s3] sm:$0xff] %vm274_vm1, %v196_v13  ;;  %283 = vst.msk [vmem:[%s692_s3 + $0x40] sm:$0xff] %vm274_vm1, %v236_v14 }
 0x110   :  { %v200_v17 = vpop.f32.mrb[2].mxu0  ;;  %v240_v18 = vpop.f32.mrb[2].mxu1 }
 0x111   :  { %v201_v19 = vadd.f32 %v295_v10, %v200_v17  ;;  %v241_v20 = vadd.f32 %v295_v10, %v240_v18  ;;  %v202_v21 = vpop.f32.mrb[3].mxu0  ;;  %v242_v22 = vpop.f32.mrb[3].mxu1 }
 0x113   :  { %276 = vst.msk [vmem:[%s692_s3 + $0x8] sm:$0xff] %vm274_vm1, %v201_v19  ;;  %284 = vst.msk [vmem:[%s692_s3 + $0x48] sm:$0xff] %vm274_vm1, %v241_v20 }
 0x114   :  { %v205_v23 = vpop.f32.mrb[4].mxu0  ;;  %v245_v24 = vpop.f32.mrb[4].mxu1 }
 0x115   :  { %v206_v25 = vadd.f32 %v295_v10, %v205_v23  ;;  %v246_v26 = vadd.f32 %v295_v10, %v245_v24  ;;  %v207_v27 = vpop.f32.mrb[5].mxu0  ;;  %v247_v28 = vpop.f32.mrb[5].mxu1 }
 0x117   :  { %277 = vst.msk [vmem:[%s692_s3 + $0x10] sm:$0xff] %vm274_vm1, %v206_v25  ;;  %285 = vst.msk [vmem:[%s692_s3 + $0x50] sm:$0xff] %vm274_vm1, %v246_v26 }
 0x118   :  { %v210_v29 = vpop.f32.mrb[6].mxu0  ;;  %v250_v30 = vpop.f32.mrb[6].mxu1 }
 0x119   :  { %v211_v31 = vadd.f32 %v295_v10, %v210_v29  ;;  %v251_v32 = vadd.f32 %v295_v10, %v250_v30  ;;  %v212_v33 = vpop.f32.mrb[7].mxu0  ;;  %v252_v34 = vpop.f32.mrb[7].mxu1 }
 0x11b   :  { %278 = vst.msk [vmem:[%s692_s3 + $0x18] sm:$0xff] %vm274_vm1, %v211_v31  ;;  %286 = vst.msk [vmem:[%s692_s3 + $0x58] sm:$0xff] %vm274_vm1, %v251_v32 }
 0x11c   :  { %v215_v35 = vpop.f32.mrb[8].mxu0  ;;  %v255_v36 = vpop.f32.mrb[8].mxu1 }
 0x11d   :  { %v216_v37 = vadd.f32 %v295_v10, %v215_v35  ;;  %v256_v38 = vadd.f32 %v295_v10, %v255_v36  ;;  %v217_v39 = vpop.f32.mrb[9].mxu0  ;;  %v257_v40 = vpop.f32.mrb[9].mxu1 }
 0x11f   :  { %279 = vst.msk [vmem:[%s692_s3 + $0x20] sm:$0xff] %vm274_vm1, %v216_v37  ;;  %287 = vst.msk [vmem:[%s692_s3 + $0x60] sm:$0xff] %vm274_vm1, %v256_v38 }
 0x120   :  { %v220_v41 = vpop.f32.mrb[10].mxu0  ;;  %v260_v42 = vpop.f32.mrb[10].mxu1 }
 0x121   :  { %v221_v43 = vadd.f32 %v295_v10, %v220_v41  ;;  %v261_v44 = vadd.f32 %v295_v10, %v260_v42  ;;  %v222_v45 = vpop.f32.mrb[11].mxu0  ;;  %v262_v46 = vpop.f32.mrb[11].mxu1 }
 0x123   :  { %280 = vst.msk [vmem:[%s692_s3 + $0x28] sm:$0xff] %vm274_vm1, %v221_v43  ;;  %288 = vst.msk [vmem:[%s692_s3 + $0x68] sm:$0xff] %vm274_vm1, %v261_v44 }
 0x124   :  { %v225_v47 = vpop.f32.mrb[12].mxu0  ;;  %v265_v48 = vpop.f32.mrb[12].mxu1 }
 0x125   :  { %v226_v49 = vadd.f32 %v295_v10, %v225_v47  ;;  %v266_v50 = vadd.f32 %v295_v10, %v265_v48  ;;  %v227_v51 = vpop.f32.mrb[13].mxu0  ;;  %v267_v52 = vpop.f32.mrb[13].mxu1 }
 0x127   :  { %281 = vst.msk [vmem:[%s692_s3 + $0x30] sm:$0xff] %vm274_vm1, %v226_v49  ;;  %289 = vst.msk [vmem:[%s692_s3 + $0x70] sm:$0xff] %vm274_vm1, %v266_v50 }
 0x128   :  { %v230_v53 = vpop.f32.mrb[14].mxu0  ;;  %v270_v54 = vpop.f32.mrb[14].mxu1 }
 0x129   :  { %v231_v55 = vadd.f32 %v295_v10, %v230_v53  ;;  %v271_v56 = vadd.f32 %v295_v10, %v270_v54  ;;  %v232_v57 = vpop.f32.mrb[15].mxu0  ;;  %v272_v58 = vpop.f32.mrb[15].mxu1 }
 0x12b   :  { %282 = vst.msk [vmem:[%s692_s3 + $0x38] sm:$0xff] %vm274_vm1, %v231_v55  ;;  %290 = vst.msk [vmem:[%s692_s3 + $0x78] sm:$0xff] %vm274_vm1, %v271_v56 }

// kernel: ustack_forward.18
= control target key start
LH: loop header
LB: loop body
LE: loop exit
PB: predicated region body
PF: predicated region fallthrough
CT: control target
= control target key end

     0   :  { %vm267_vm0 = vcmask 64512   ;;  %s2146_s0 = inlined_call_operand.vmem [shape: f32[2,512,8], index: 0, kind: input, shape index: {}]   ;;  %s2147_s1 = inlined_call_operand.vmem [shape: f32[2,512,8], index: 1, kind: input, shape index: {}]   ;;  %s2148_s2 = inlined_call_operand.vmem [shape: f32[2,512,8], index: 2, kind: output, shape index: {}]  }
   0x1   :  { %v11_v0 = vld [vmem:[%s2146_s0] sm:$0xff]  ;;  %v12_v2 = vld [vmem:[%s2146_s0 + $0x8] sm:$0xff]  ;;  %v13_v5 = vld [vmem:[%s2146_s0 + $0x10] sm:$0xff] }
   0x2   :  { %v75_v1 = vld [vmem:[%s2147_s1] sm:$0xff]  ;;  %v76_v4 = vld [vmem:[%s2147_s1 + $0x8] sm:$0xff]  ;;  %v77_v6 = vld [vmem:[%s2147_s1 + $0x10] sm:$0xff] }
   0x3   :  { %v139_v3 = vadd.f32 %v75_v1, %v11_v0  ;;  %v140_v7 = vadd.f32 %v76_v4, %v12_v2  ;;  %v141_v8 = vadd.f32 %v77_v6, %v13_v5  ;;  %v14_v9 = vld [vmem:[%s2146_s0 + $0x18] sm:$0xff]  ;;  %v15_v11 = vld [vmem:[%s2146_s0 + $0x20] sm:$0xff]  ;;  %v16_v15 = vld [vmem:[%s2146_s0 + $0x28] sm:$0xff] }
   0x4   :  { %v78_v10 = vld [vmem:[%s2147_s1 + $0x18] sm:$0xff]  ;;  %v79_v14 = vld [vmem:[%s2147_s1 + $0x20] sm:$0xff]  ;;  %v80_v16 = vld [vmem:[%s2147_s1 + $0x28] sm:$0xff] }
   0x5   :  { %v203_v12 = vmul.f32 0.70710677, %v139_v3  ;;  %v142_v13 = vadd.f32 %v78_v10, %v14_v9  ;;  %v204_v17 = vmul.f32 0.70710677, %v140_v7  ;;  %v205_v18 = vmul.f32 0.70710677, %v141_v8 }
   0x6   :  { %v143_v19 = vadd.f32 %v79_v14, %v15_v11  ;;  %v144_v20 = vadd.f32 %v80_v16, %v16_v15  ;;  %v17_v21 = vld [vmem:[%s2146_s0 + $0x30] sm:$0xff]  ;;  %v18_v25 = vld [vmem:[%s2146_s0 + $0x38] sm:$0xff]  ;;  %v19_v27 = vld [vmem:[%s2146_s0 + $0x40] sm:$0xff] }
   0x7   :  { %v81_v22 = vld [vmem:[%s2147_s1 + $0x30] sm:$0xff]  ;;  %268 = vst.msk [vmem:[%s2148_s2] sm:$0xff] %vm267_vm0, %v203_v12  ;;  %v206_v23 = vmul.f32 0.70710677, %v142_v13  ;;  %v82_v26 = vld [vmem:[%s2147_s1 + $0x38] sm:$0xff]  ;;  %269 = vst.msk [vmem:[%s2148_s2 + $0x8] sm:$0xff] %vm267_vm0, %v204_v17 }
   0x8   :  { %v145_v24 = vadd.f32 %v81_v22, %v17_v21  ;;  %270 = vst.msk [vmem:[%s2148_s2 + $0x10] sm:$0xff] %vm267_vm0, %v205_v18  ;;  %v207_v28 = vmul.f32 0.70710677, %v143_v19  ;;  %v208_v29 = vmul.f32 0.70710677, %v144_v20  ;;  %v146_v30 = vadd.f32 %v82_v26, %v18_v25  ;;  %v83_v31 = vld [vmem:[%s2147_s1 + $0x40] sm:$0xff] }
   0x9   :  { %v20_v32 = vld [vmem:[%s2146_s0 + $0x48] sm:$0xff]  ;;  %271 = vst.msk [vmem:[%s2148_s2 + $0x18] sm:$0xff] %vm267_vm0, %v206_v23  ;;  %v147_v34 = vadd.f32 %v83_v31, %v19_v27  ;;  %v21_v36 = vld [vmem:[%s2146_s0 + $0x50] sm:$0xff]  ;;  %v22_v41 = vld [vmem:[%s2146_s0 + $0x58] sm:$0xff] }
   0xa   :  { %v209_v33 = vmul.f32 0.70710677, %v145_v24  ;;  %v84_v35 = vld [vmem:[%s2147_s1 + $0x48] sm:$0xff]  ;;  %v85_v37 = vld [vmem:[%s2147_s1 + $0x50] sm:$0xff]  ;;  %272 = vst.msk [vmem:[%s2148_s2 + $0x20] sm:$0xff] %vm267_vm0, %v207_v28  ;;  %273 = vst.msk [vmem:[%s2148_s2 + $0x28] sm:$0xff] %vm267_vm0, %v208_v29 }
   0xb   :  { %v210_v38 = vmul.f32 0.70710677, %v146_v30  ;;  %v148_v39 = vadd.f32 %v84_v35, %v20_v32  ;;  %v149_v40 = vadd.f32 %v85_v37, %v21_v36  ;;  %v86_v42 = vld [vmem:[%s2147_s1 + $0x58] sm:$0xff]  ;;  %v23_v43 = vld [vmem:[%s2146_s0 + $0x60] sm:$0xff]  ;;  %v211_v44 = vmul.f32 0.70710677, %v147_v34 }
   0xc   :  { %274 = vst.msk [vmem:[%s2148_s2 + $0x30] sm:$0xff] %vm267_vm0, %v209_v33  ;;  %v150_v45 = vadd.f32 %v86_v42, %v22_v41  ;;  %v87_v46 = vld [vmem:[%s2147_s1 + $0x60] sm:$0xff]  ;;  %v24_v47 = vld [vmem:[%s2146_s0 + $0x68] sm:$0xff]  ;;  %v25_v53 = vld [vmem:[%s2146_s0 + $0x70] sm:$0xff] }
   0xd   :  { %v88_v48 = vld [vmem:[%s2147_s1 + $0x68] sm:$0xff]  ;;  %275 = vst.msk [vmem:[%s2148_s2 + $0x38] sm:$0xff] %vm267_vm0, %v210_v38  ;;  %v212_v49 = vmul.f32 0.70710677, %v148_v39  ;;  %v213_v50 = vmul.f32 0.70710677, %v149_v40  ;;  %v151_v51 = vadd.f32 %v87_v46, %v23_v43 }
   0xe   :  { %v152_v52 = vadd.f32 %v88_v48, %v24_v47  ;;  %v89_v54 = vld [vmem:[%s2147_s1 + $0x70] sm:$0xff]  ;;  %276 = vst.msk [vmem:[%s2148_s2 + $0x40] sm:$0xff] %vm267_vm0, %v211_v44  ;;  %v214_v55 = vmul.f32 0.70710677, %v150_v45  ;;  %v26_v57 = vld [vmem:[%s2146_s0 + $0x78] sm:$0xff]  ;;  %v27_v59 = vld [vmem:[%s2146_s0 + $0x80] sm:$0xff] }
   0xf   :  { %v153_v56 = vadd.f32 %v89_v54, %v25_v53  ;;  %v90_v58 = vld [vmem:[%s2147_s1 + $0x78] sm:$0xff]  ;;  %277 = vst.msk [vmem:[%s2148_s2 + $0x48] sm:$0xff] %vm267_vm0, %v212_v49  ;;  %278 = vst.msk [vmem:[%s2148_s2 + $0x50] sm:$0xff] %vm267_vm0, %v213_v50  ;;  %v215_v60 = vmul.f32 0.70710677, %v151_v51  ;;  %v91_v63 = vld [vmem:[%s2147_s1 + $0x80] sm:$0xff] }
  0x10   :  { %v216_v61 = vmul.f32 0.70710677, %v152_v52  ;;  %v154_v62 = vadd.f32 %v90_v58, %v26_v57  ;;  %v28_v0 = vld [vmem:[%s2146_s0 + $0x88] sm:$0xff]  ;;  %279 = vst.msk [vmem:[%s2148_s2 + $0x58] sm:$0xff] %vm267_vm0, %v214_v55  ;;  %v155_v2 = vadd.f32 %v91_v63, %v27_v59  ;;  %v29_v4 = vld [vmem:[%s2146_s0 + $0x90] sm:$0xff]  ;;  %v30_v9 = vld [vmem:[%s2146_s0 + $0x98] sm:$0xff] }
  0x11   :  { %v217_v1 = vmul.f32 0.70710677, %v153_v56  ;;  %v92_v3 = vld [vmem:[%s2147_s1 + $0x88] sm:$0xff]  ;;  %v93_v5 = vld [vmem:[%s2147_s1 + $0x90] sm:$0xff]  ;;  %280 = vst.msk [vmem:[%s2148_s2 + $0x60] sm:$0xff] %vm267_vm0, %v215_v60  ;;  %v94_v10 = vld [vmem:[%s2147_s1 + $0x98] sm:$0xff] }
  0x12   :  { %281 = vst.msk [vmem:[%s2148_s2 + $0x68] sm:$0xff] %vm267_vm0, %v216_v61  ;;  %v218_v6 = vmul.f32 0.70710677, %v154_v62  ;;  %v156_v7 = vadd.f32 %v92_v3, %v28_v0  ;;  %v157_v8 = vadd.f32 %v93_v5, %v29_v4  ;;  %v31_v11 = vld [vmem:[%s2146_s0 + $0xa0] sm:$0xff]  ;;  %v219_v12 = vmul.f32 0.70710677, %v155_v2 }
  0x13   :  { %282 = vst.msk [vmem:[%s2148_s2 + $0x70] sm:$0xff] %vm267_vm0, %v217_v1  ;;  %v158_v13 = vadd.f32 %v94_v10, %v30_v9  ;;  %v95_v14 = vld [vmem:[%s2147_s1 + $0xa0] sm:$0xff]  ;;  %v32_v15 = vld [vmem:[%s2146_s0 + $0xa8] sm:$0xff]  ;;  %v33_v21 = vld [vmem:[%s2146_s0 + $0xb0] sm:$0xff] }
  0x14   :  { %v96_v16 = vld [vmem:[%s2147_s1 + $0xa8] sm:$0xff]  ;;  %283 = vst.msk [vmem:[%s2148_s2 + $0x78] sm:$0xff] %vm267_vm0, %v218_v6  ;;  %v220_v17 = vmul.f32 0.70710677, %v156_v7  ;;  %v221_v18 = vmul.f32 0.70710677, %v157_v8  ;;  %v159_v19 = vadd.f32 %v95_v14, %v31_v11 }
  0x15   :  { %v160_v20 = vadd.f32 %v96_v16, %v32_v15  ;;  %v97_v22 = vld [vmem:[%s2147_s1 + $0xb0] sm:$0xff]  ;;  %284 = vst.msk [vmem:[%s2148_s2 + $0x80] sm:$0xff] %vm267_vm0, %v219_v12  ;;  %v222_v23 = vmul.f32 0.70710677, %v158_v13  ;;  %v34_v25 = vld [vmem:[%s2146_s0 + $0xb8] sm:$0xff]  ;;  %v35_v27 = vld [vmem:[%s2146_s0 + $0xc0] sm:$0xff] }
  0x16   :  { %v161_v24 = vadd.f32 %v97_v22, %v33_v21  ;;  %v98_v26 = vld [vmem:[%s2147_s1 + $0xb8] sm:$0xff]  ;;  %285 = vst.msk [vmem:[%s2148_s2 + $0x88] sm:$0xff] %vm267_vm0, %v220_v17  ;;  %286 = vst.msk [vmem:[%s2148_s2 + $0x90] sm:$0xff] %vm267_vm0, %v221_v18  ;;  %v223_v28 = vmul.f32 0.70710677, %v159_v19  ;;  %v99_v31 = vld [vmem:[%s2147_s1 + $0xc0] sm:$0xff] }
  0x17   :  { %v224_v29 = vmul.f32 0.70710677, %v160_v20  ;;  %v162_v30 = vadd.f32 %v98_v26, %v34_v25  ;;  %v36_v32 = vld [vmem:[%s2146_s0 + $0xc8] sm:$0xff]  ;;  %287 = vst.msk [vmem:[%s2148_s2 + $0x98] sm:$0xff] %vm267_vm0, %v222_v23  ;;  %v163_v34 = vadd.f32 %v99_v31, %v35_v27  ;;  %v37_v36 = vld [vmem:[%s2146_s0 + $0xd0] sm:$0xff]  ;;  %v38_v41 = vld [vmem:[%s2146_s0 + $0xd8] sm:$0xff] }
  0x18   :  { %v225_v33 = vmul.f32 0.70710677, %v161_v24  ;;  %v100_v35 = vld [vmem:[%s2147_s1 + $0xc8] sm:$0xff]  ;;  %v101_v37 = vld [vmem:[%s2147_s1 + $0xd0] sm:$0xff]  ;;  %288 = vst.msk [vmem:[%s2148_s2 + $0xa0] sm:$0xff] %vm267_vm0, %v223_v28  ;;  %v102_v42 = vld [vmem:[%s2147_s1 + $0xd8] sm:$0xff] }
  0x19   :  { %289 = vst.msk [vmem:[%s2148_s2 + $0xa8] sm:$0xff] %vm267_vm0, %v224_v29  ;;  %v226_v38 = vmul.f32 0.70710677, %v162_v30  ;;  %v164_v39 = vadd.f32 %v100_v35, %v36_v32  ;;  %v165_v40 = vadd.f32 %v101_v37, %v37_v36  ;;  %v39_v43 = vld [vmem:[%s2146_s0 + $0xe0] sm:$0xff]  ;;  %v227_v44 = vmul.f32 0.70710677, %v163_v34 }
  0x1a   :  { %290 = vst.msk [vmem:[%s2148_s2 + $0xb0] sm:$0xff] %vm267_vm0, %v225_v33  ;;  %v166_v45 = vadd.f32 %v102_v42, %v38_v41  ;;  %v103_v46 = vld [vmem:[%s2147_s1 + $0xe0] sm:$0xff]  ;;  %v40_v47 = vld [vmem:[%s2146_s0 + $0xe8] sm:$0xff]  ;;  %v41_v53 = vld [vmem:[%s2146_s0 + $0xf0] sm:$0xff] }
  0x1b   :  { %v104_v48 = vld [vmem:[%s2147_s1 + $0xe8] sm:$0xff]  ;;  %291 = vst.msk [vmem:[%s2148_s2 + $0xb8] sm:$0xff] %vm267_vm0, %v226_v38  ;;  %v228_v49 = vmul.f32 0.70710677, %v164_v39  ;;  %v229_v50 = vmul.f32 0.70710677, %v165_v40  ;;  %v167_v51 = vadd.f32 %v103_v46, %v39_v43 }
  0x1c   :  { %v168_v52 = vadd.f32 %v104_v48, %v40_v47  ;;  %v105_v54 = vld [vmem:[%s2147_s1 + $0xf0] sm:$0xff]  ;;  %292 = vst.msk [vmem:[%s2148_s2 + $0xc0] sm:$0xff] %vm267_vm0, %v227_v44  ;;  %v230_v55 = vmul.f32 0.70710677, %v166_v45  ;;  %v42_v57 = vld [vmem:[%s2146_s0 + $0xf8] sm:$0xff]  ;;  %v43_v59 = vld [vmem:[%s2146_s0 + $0x100] sm:$0xff] }
  0x1d   :  { %v169_v56 = vadd.f32 %v105_v54, %v41_v53  ;;  %v106_v58 = vld [vmem:[%s2147_s1 + $0xf8] sm:$0xff]  ;;  %293 = vst.msk [vmem:[%s2148_s2 + $0xc8] sm:$0xff] %vm267_vm0, %v228_v49  ;;  %294 = vst.msk [vmem:[%s2148_s2 + $0xd0] sm:$0xff] %vm267_vm0, %v229_v50  ;;  %v231_v60 = vmul.f32 0.70710677, %v167_v51  ;;  %v107_v63 = vld [vmem:[%s2147_s1 + $0x100] sm:$0xff] }
  0x1e   :  { %v232_v61 = vmul.f32 0.70710677, %v168_v52  ;;  %v170_v62 = vadd.f32 %v106_v58, %v42_v57  ;;  %v44_v0 = vld [vmem:[%s2146_s0 + $0x108] sm:$0xff]  ;;  %295 = vst.msk [vmem:[%s2148_s2 + $0xd8] sm:$0xff] %vm267_vm0, %v230_v55  ;;  %v171_v2 = vadd.f32 %v107_v63, %v43_v59  ;;  %v45_v4 = vld [vmem:[%s2146_s0 + $0x110] sm:$0xff]  ;;  %v46_v9 = vld [vmem:[%s2146_s0 + $0x118] sm:$0xff] }
  0x1f   :  { %v233_v1 = vmul.f32 0.70710677, %v169_v56  ;;  %v108_v3 = vld [vmem:[%s2147_s1 + $0x108] sm:$0xff]  ;;  %v109_v5 = vld [vmem:[%s2147_s1 + $0x110] sm:$0xff]  ;;  %296 = vst.msk [vmem:[%s2148_s2 + $0xe0] sm:$0xff] %vm267_vm0, %v231_v60  ;;  %v110_v10 = vld [vmem:[%s2147_s1 + $0x118] sm:$0xff] }
  0x20   :  { %297 = vst.msk [vmem:[%s2148_s2 + $0xe8] sm:$0xff] %vm267_vm0, %v232_v61  ;;  %v234_v6 = vmul.f32 0.70710677, %v170_v62  ;;  %v172_v7 = vadd.f32 %v108_v3, %v44_v0  ;;  %v173_v8 = vadd.f32 %v109_v5, %v45_v4  ;;  %v47_v11 = vld [vmem:[%s2146_s0 + $0x120] sm:$0xff]  ;;  %v235_v12 = vmul.f32 0.70710677, %v171_v2 }
  0x21   :  { %298 = vst.msk [vmem:[%s2148_s2 + $0xf0] sm:$0xff] %vm267_vm0, %v233_v1  ;;  %v174_v13 = vadd.f32 %v110_v10, %v46_v9  ;;  %v111_v14 = vld [vmem:[%s2147_s1 + $0x120] sm:$0xff]  ;;  %v48_v15 = vld [vmem:[%s2146_s0 + $0x128] sm:$0xff]  ;;  %v49_v21 = vld [vmem:[%s2146_s0 + $0x130] sm:$0xff] }
  0x22   :  { %v112_v16 = vld [vmem:[%s2147_s1 + $0x128] sm:$0xff]  ;;  %299 = vst.msk [vmem:[%s2148_s2 + $0xf8] sm:$0xff] %vm267_vm0, %v234_v6  ;;  %v236_v17 = vmul.f32 0.70710677, %v172_v7  ;;  %v237_v18 = vmul.f32 0.70710677, %v173_v8  ;;  %v175_v19 = vadd.f32 %v111_v14, %v47_v11 }
  0x23   :  { %v176_v20 = vadd.f32 %v112_v16, %v48_v15  ;;  %v113_v22 = vld [vmem:[%s2147_s1 + $0x130] sm:$0xff]  ;;  %300 = vst.msk [vmem:[%s2148_s2 + $0x100] sm:$0xff] %vm267_vm0, %v235_v12  ;;  %v238_v23 = vmul.f32 0.70710677, %v174_v13  ;;  %v50_v25 = vld [vmem:[%s2146_s0 + $0x138] sm:$0xff]  ;;  %v51_v27 = vld [vmem:[%s2146_s0 + $0x140] sm:$0xff] }
  0x24   :  { %v177_v24 = vadd.f32 %v113_v22, %v49_v21  ;;  %v114_v26 = vld [vmem:[%s2147_s1 + $0x138] sm:$0xff]  ;;  %301 = vst.msk [vmem:[%s2148_s2 + $0x108] sm:$0xff] %vm267_vm0, %v236_v17  ;;  %302 = vst.msk [vmem:[%s2148_s2 + $0x110] sm:$0xff] %vm267_vm0, %v237_v18  ;;  %v239_v28 = vmul.f32 0.70710677, %v175_v19  ;;  %v115_v31 = vld [vmem:[%s2147_s1 + $0x140] sm:$0xff] }
  0x25   :  { %v240_v29 = vmul.f32 0.70710677, %v176_v20  ;;  %v178_v30 = vadd.f32 %v114_v26, %v50_v25  ;;  %v52_v32 = vld [vmem:[%s2146_s0 + $0x148] sm:$0xff]  ;;  %303 = vst.msk [vmem:[%s2148_s2 + $0x118] sm:$0xff] %vm267_vm0, %v238_v23  ;;  %v179_v34 = vadd.f32 %v115_v31, %v51_v27  ;;  %v53_v36 = vld [vmem:[%s2146_s0 + $0x150] sm:$0xff]  ;;  %v54_v41 = vld [vmem:[%s2146_s0 + $0x158] sm:$0xff] }
  0x26   :  { %v241_v33 = vmul.f32 0.70710677, %v177_v24  ;;  %v116_v35 = vld [vmem:[%s2147_s1 + $0x148] sm:$0xff]  ;;  %v117_v37 = vld [vmem:[%s2147_s1 + $0x150] sm:$0xff]  ;;  %304 = vst.msk [vmem:[%s2148_s2 + $0x120] sm:$0xff] %vm267_vm0, %v239_v28  ;;  %v118_v42 = vld [vmem:[%s2147_s1 + $0x158] sm:$0xff] }
  0x27   :  { %305 = vst.msk [vmem:[%s2148_s2 + $0x128] sm:$0xff] %vm267_vm0, %v240_v29  ;;  %v242_v38 = vmul.f32 0.70710677, %v178_v30  ;;  %v180_v39 = vadd.f32 %v116_v35, %v52_v32  ;;  %v181_v40 = vadd.f32 %v117_v37, %v53_v36  ;;  %v55_v43 = vld [vmem:[%s2146_s0 + $0x160] sm:$0xff]  ;;  %v243_v44 = vmul.f32 0.70710677, %v179_v34 }
  0x28   :  { %306 = vst.msk [vmem:[%s2148_s2 + $0x130] sm:$0xff] %vm267_vm0, %v241_v33  ;;  %v182_v45 = vadd.f32 %v118_v42, %v54_v41  ;;  %v119_v46 = vld [vmem:[%s2147_s1 + $0x160] sm:$0xff]  ;;  %v56_v47 = vld [vmem:[%s2146_s0 + $0x168] sm:$0xff]  ;;  %v57_v53 = vld [vmem:[%s2146_s0 + $0x170] sm:$0xff] }
  0x29   :  { %v120_v48 = vld [vmem:[%s2147_s1 + $0x168] sm:$0xff]  ;;  %307 = vst.msk [vmem:[%s2148_s2 + $0x138] sm:$0xff] %vm267_vm0, %v242_v38  ;;  %v244_v49 = vmul.f32 0.70710677, %v180_v39  ;;  %v245_v50 = vmul.f32 0.70710677, %v181_v40  ;;  %v183_v51 = vadd.f32 %v119_v46, %v55_v43 }
  0x2a   :  { %v184_v52 = vadd.f32 %v120_v48, %v56_v47  ;;  %v121_v54 = vld [vmem:[%s2147_s1 + $0x170] sm:$0xff]  ;;  %308 = vst.msk [vmem:[%s2148_s2 + $0x140] sm:$0xff] %vm267_vm0, %v243_v44  ;;  %v246_v55 = vmul.f32 0.70710677, %v182_v45  ;;  %v58_v57 = vld [vmem:[%s2146_s0 + $0x178] sm:$0xff]  ;;  %v59_v59 = vld [vmem:[%s2146_s0 + $0x180] sm:$0xff] }
  0x2b   :  { %v185_v56 = vadd.f32 %v121_v54, %v57_v53  ;;  %v122_v58 = vld [vmem:[%s2147_s1 + $0x178] sm:$0xff]  ;;  %309 = vst.msk [vmem:[%s2148_s2 + $0x148] sm:$0xff] %vm267_vm0, %v244_v49  ;;  %310 = vst.msk [vmem:[%s2148_s2 + $0x150] sm:$0xff] %vm267_vm0, %v245_v50  ;;  %v247_v60 = vmul.f32 0.70710677, %v183_v51  ;;  %v123_v63 = vld [vmem:[%s2147_s1 + $0x180] sm:$0xff] }
  0x2c   :  { %v248_v61 = vmul.f32 0.70710677, %v184_v52  ;;  %v186_v62 = vadd.f32 %v122_v58, %v58_v57  ;;  %v60_v0 = vld [vmem:[%s2146_s0 + $0x188] sm:$0xff]  ;;  %311 = vst.msk [vmem:[%s2148_s2 + $0x158] sm:$0xff] %vm267_vm0, %v246_v55  ;;  %v187_v2 = vadd.f32 %v123_v63, %v59_v59  ;;  %v61_v4 = vld [vmem:[%s2146_s0 + $0x190] sm:$0xff]  ;;  %v62_v9 = vld [vmem:[%s2146_s0 + $0x198] sm:$0xff] }
  0x2d   :  { %v249_v1 = vmul.f32 0.70710677, %v185_v56  ;;  %v124_v3 = vld [vmem:[%s2147_s1 + $0x188] sm:$0xff]  ;;  %v125_v5 = vld [vmem:[%s2147_s1 + $0x190] sm:$0xff]  ;;  %312 = vst.msk [vmem:[%s2148_s2 + $0x160] sm:$0xff] %vm267_vm0, %v247_v60  ;;  %v126_v10 = vld [vmem:[%s2147_s1 + $0x198] sm:$0xff] }
  0x2e   :  { %313 = vst.msk [vmem:[%s2148_s2 + $0x168] sm:$0xff] %vm267_vm0, %v248_v61  ;;  %v250_v6 = vmul.f32 0.70710677, %v186_v62  ;;  %v188_v7 = vadd.f32 %v124_v3, %v60_v0  ;;  %v189_v8 = vadd.f32 %v125_v5, %v61_v4  ;;  %v63_v11 = vld [vmem:[%s2146_s0 + $0x1a0] sm:$0xff]  ;;  %v251_v12 = vmul.f32 0.70710677, %v187_v2 }
  0x2f   :  { %314 = vst.msk [vmem:[%s2148_s2 + $0x170] sm:$0xff] %vm267_vm0, %v249_v1  ;;  %v190_v13 = vadd.f32 %v126_v10, %v62_v9  ;;  %v127_v14 = vld [vmem:[%s2147_s1 + $0x1a0] sm:$0xff]  ;;  %v64_v15 = vld [vmem:[%s2146_s0 + $0x1a8] sm:$0xff]  ;;  %v65_v21 = vld [vmem:[%s2146_s0 + $0x1b0] sm:$0xff] }
  0x30   :  { %v128_v16 = vld [vmem:[%s2147_s1 + $0x1a8] sm:$0xff]  ;;  %315 = vst.msk [vmem:[%s2148_s2 + $0x178] sm:$0xff] %vm267_vm0, %v250_v6  ;;  %v252_v17 = vmul.f32 0.70710677, %v188_v7  ;;  %v253_v18 = vmul.f32 0.70710677, %v189_v8  ;;  %v191_v19 = vadd.f32 %v127_v14, %v63_v11 }
  0x31   :  { %v192_v20 = vadd.f32 %v128_v16, %v64_v15  ;;  %v129_v22 = vld [vmem:[%s2147_s1 + $0x1b0] sm:$0xff]  ;;  %316 = vst.msk [vmem:[%s2148_s2 + $0x180] sm:$0xff] %vm267_vm0, %v251_v12  ;;  %v254_v23 = vmul.f32 0.70710677, %v190_v13  ;;  %v66_v25 = vld [vmem:[%s2146_s0 + $0x1b8] sm:$0xff]  ;;  %v67_v27 = vld [vmem:[%s2146_s0 + $0x1c0] sm:$0xff] }
  0x32   :  { %v193_v24 = vadd.f32 %v129_v22, %v65_v21  ;;  %v130_v26 = vld [vmem:[%s2147_s1 + $0x1b8] sm:$0xff]  ;;  %317 = vst.msk [vmem:[%s2148_s2 + $0x188] sm:$0xff] %vm267_vm0, %v252_v17  ;;  %318 = vst.msk [vmem:[%s2148_s2 + $0x190] sm:$0xff] %vm267_vm0, %v253_v18  ;;  %v255_v28 = vmul.f32 0.70710677, %v191_v19  ;;  %v131_v31 = vld [vmem:[%s2147_s1 + $0x1c0] sm:$0xff] }
  0x33   :  { %v256_v29 = vmul.f32 0.70710677, %v192_v20  ;;  %v194_v30 = vadd.f32 %v130_v26, %v66_v25  ;;  %v68_v32 = vld [vmem:[%s2146_s0 + $0x1c8] sm:$0xff]  ;;  %319 = vst.msk [vmem:[%s2148_s2 + $0x198] sm:$0xff] %vm267_vm0, %v254_v23  ;;  %v195_v34 = vadd.f32 %v131_v31, %v67_v27  ;;  %v69_v36 = vld [vmem:[%s2146_s0 + $0x1d0] sm:$0xff]  ;;  %v70_v41 = vld [vmem:[%s2146_s0 + $0x1d8] sm:$0xff] }
  0x34   :  { %v257_v33 = vmul.f32 0.70710677, %v193_v24  ;;  %v132_v35 = vld [vmem:[%s2147_s1 + $0x1c8] sm:$0xff]  ;;  %v133_v37 = vld [vmem:[%s2147_s1 + $0x1d0] sm:$0xff]  ;;  %320 = vst.msk [vmem:[%s2148_s2 + $0x1a0] sm:$0xff] %vm267_vm0, %v255_v28  ;;  %v134_v42 = vld [vmem:[%s2147_s1 + $0x1d8] sm:$0xff] }
  0x35   :  { %321 = vst.msk [vmem:[%s2148_s2 + $0x1a8] sm:$0xff] %vm267_vm0, %v256_v29  ;;  %v258_v38 = vmul.f32 0.70710677, %v194_v30  ;;  %v196_v39 = vadd.f32 %v132_v35, %v68_v32  ;;  %v197_v40 = vadd.f32 %v133_v37, %v69_v36  ;;  %v71_v43 = vld [vmem:[%s2146_s0 + $0x1e0] sm:$0xff]  ;;  %v259_v44 = vmul.f32 0.70710677, %v195_v34 }
  0x36   :  { %322 = vst.msk [vmem:[%s2148_s2 + $0x1b0] sm:$0xff] %vm267_vm0, %v257_v33  ;;  %v198_v45 = vadd.f32 %v134_v42, %v70_v41  ;;  %v135_v46 = vld [vmem:[%s2147_s1 + $0x1e0] sm:$0xff]  ;;  %v72_v47 = vld [vmem:[%s2146_s0 + $0x1e8] sm:$0xff]  ;;  %v73_v53 = vld [vmem:[%s2146_s0 + $0x1f0] sm:$0xff] }
  0x37   :  { %v136_v48 = vld [vmem:[%s2147_s1 + $0x1e8] sm:$0xff]  ;;  %323 = vst.msk [vmem:[%s2148_s2 + $0x1b8] sm:$0xff] %vm267_vm0, %v258_v38  ;;  %v260_v49 = vmul.f32 0.70710677, %v196_v39  ;;  %v261_v50 = vmul.f32 0.70710677, %v197_v40  ;;  %v199_v51 = vadd.f32 %v135_v46, %v71_v43 }
  0x38   :  { %v200_v52 = vadd.f32 %v136_v48, %v72_v47  ;;  %v137_v54 = vld [vmem:[%s2147_s1 + $0x1f0] sm:$0xff]  ;;  %324 = vst.msk [vmem:[%s2148_s2 + $0x1c0] sm:$0xff] %vm267_vm0, %v259_v44  ;;  %v262_v55 = vmul.f32 0.70710677, %v198_v45  ;;  %v74_v57 = vld [vmem:[%s2146_s0 + $0x1f8] sm:$0xff]  ;;  %v659_v59 = vld [vmem:[%s2146_s0 + $0x200] sm:$0xff] }
  0x39   :  { %v201_v56 = vadd.f32 %v137_v54, %v73_v53  ;;  %v138_v58 = vld [vmem:[%s2147_s1 + $0x1f8] sm:$0xff]  ;;  %325 = vst.msk [vmem:[%s2148_s2 + $0x1c8] sm:$0xff] %vm267_vm0, %v260_v49  ;;  %326 = vst.msk [vmem:[%s2148_s2 + $0x1d0] sm:$0xff] %vm267_vm0, %v261_v50  ;;  %v263_v60 = vmul.f32 0.70710677, %v199_v51  ;;  %v723_v63 = vld [vmem:[%s2147_s1 + $0x200] sm:$0xff] }
  0x3a   :  { %v264_v61 = vmul.f32 0.70710677, %v200_v52  ;;  %v202_v62 = vadd.f32 %v138_v58, %v74_v57  ;;  %v660_v0 = vld [vmem:[%s2146_s0 + $0x208] sm:$0xff]  ;;  %327 = vst.msk [vmem:[%s2148_s2 + $0x1d8] sm:$0xff] %vm267_vm0, %v262_v55  ;;  %v462_v2 = vadd.f32 %v723_v63, %v659_v59  ;;  %v661_v4 = vld [vmem:[%s2146_s0 + $0x210] sm:$0xff]  ;;  %v662_v9 = vld [vmem:[%s2146_s0 + $0x218] sm:$0xff] }
  0x3b   :  { %v265_v1 = vmul.f32 0.70710677, %v201_v56  ;;  %v724_v3 = vld [vmem:[%s2147_s1 + $0x208] sm:$0xff]  ;;  %v725_v5 = vld [vmem:[%s2147_s1 + $0x210] sm:$0xff]  ;;  %328 = vst.msk [vmem:[%s2148_s2 + $0x1e0] sm:$0xff] %vm267_vm0, %v263_v60  ;;  %v726_v10 = vld [vmem:[%s2147_s1 + $0x218] sm:$0xff] }
  0x3c   :  { %329 = vst.msk [vmem:[%s2148_s2 + $0x1e8] sm:$0xff] %vm267_vm0, %v264_v61  ;;  %v266_v6 = vmul.f32 0.70710677, %v202_v62  ;;  %v463_v7 = vadd.f32 %v724_v3, %v660_v0  ;;  %v464_v8 = vadd.f32 %v725_v5, %v661_v4  ;;  %v663_v11 = vld [vmem:[%s2146_s0 + $0x220] sm:$0xff]  ;;  %v526_v12 = vmul.f32 0.70710677, %v462_v2 }
  0x3d   :  { %330 = vst.msk [vmem:[%s2148_s2 + $0x1f0] sm:$0xff] %vm267_vm0, %v265_v1  ;;  %v465_v13 = vadd.f32 %v726_v10, %v662_v9  ;;  %v727_v14 = vld [vmem:[%s2147_s1 + $0x220] sm:$0xff]  ;;  %v664_v15 = vld [vmem:[%s2146_s0 + $0x228] sm:$0xff]  ;;  %v665_v21 = vld [vmem:[%s2146_s0 + $0x230] sm:$0xff] }
  0x3e   :  { %v728_v16 = vld [vmem:[%s2147_s1 + $0x228] sm:$0xff]  ;;  %331 = vst.msk [vmem:[%s2148_s2 + $0x1f8] sm:$0xff] %vm267_vm0, %v266_v6  ;;  %v527_v17 = vmul.f32 0.70710677, %v463_v7  ;;  %v528_v18 = vmul.f32 0.70710677, %v464_v8  ;;  %v466_v19 = vadd.f32 %v727_v14, %v663_v11 }
  0x3f   :  { %v467_v20 = vadd.f32 %v728_v16, %v664_v15  ;;  %v729_v22 = vld [vmem:[%s2147_s1 + $0x230] sm:$0xff]  ;;  %787 = vst.msk [vmem:[%s2148_s2 + $0x200] sm:$0xff] %vm267_vm0, %v526_v12  ;;  %v529_v23 = vmul.f32 0.70710677, %v465_v13  ;;  %v666_v25 = vld [vmem:[%s2146_s0 + $0x238] sm:$0xff]  ;;  %v667_v27 = vld [vmem:[%s2146_s0 + $0x240] sm:$0xff] }
  0x40   :  { %v468_v24 = vadd.f32 %v729_v22, %v665_v21  ;;  %v730_v26 = vld [vmem:[%s2147_s1 + $0x238] sm:$0xff]  ;;  %788 = vst.msk [vmem:[%s2148_s2 + $0x208] sm:$0xff] %vm267_vm0, %v527_v17  ;;  %789 = vst.msk [vmem:[%s2148_s2 + $0x210] sm:$0xff] %vm267_vm0, %v528_v18  ;;  %v530_v28 = vmul.f32 0.70710677, %v466_v19  ;;  %v731_v31 = vld [vmem:[%s2147_s1 + $0x240] sm:$0xff] }
  0x41   :  { %v531_v29 = vmul.f32 0.70710677, %v467_v20  ;;  %v469_v30 = vadd.f32 %v730_v26, %v666_v25  ;;  %v668_v32 = vld [vmem:[%s2146_s0 + $0x248] sm:$0xff]  ;;  %790 = vst.msk [vmem:[%s2148_s2 + $0x218] sm:$0xff] %vm267_vm0, %v529_v23  ;;  %v470_v34 = vadd.f32 %v731_v31, %v667_v27  ;;  %v669_v36 = vld [vmem:[%s2146_s0 + $0x250] sm:$0xff]  ;;  %v670_v41 = vld [vmem:[%s2146_s0 + $0x258] sm:$0xff] }
  0x42   :  { %v532_v33 = vmul.f32 0.70710677, %v468_v24  ;;  %v732_v35 = vld [vmem:[%s2147_s1 + $0x248] sm:$0xff]  ;;  %v733_v37 = vld [vmem:[%s2147_s1 + $0x250] sm:$0xff]  ;;  %791 = vst.msk [vmem:[%s2148_s2 + $0x220] sm:$0xff] %vm267_vm0, %v530_v28  ;;  %v734_v42 = vld [vmem:[%s2147_s1 + $0x258] sm:$0xff] }
  0x43   :  { %792 = vst.msk [vmem:[%s2148_s2 + $0x228] sm:$0xff] %vm267_vm0, %v531_v29  ;;  %v533_v38 = vmul.f32 0.70710677, %v469_v30  ;;  %v471_v39 = vadd.f32 %v732_v35, %v668_v32  ;;  %v472_v40 = vadd.f32 %v733_v37, %v669_v36  ;;  %v671_v43 = vld [vmem:[%s2146_s0 + $0x260] sm:$0xff]  ;;  %v534_v44 = vmul.f32 0.70710677, %v470_v34 }
  0x44   :  { %793 = vst.msk [vmem:[%s2148_s2 + $0x230] sm:$0xff] %vm267_vm0, %v532_v33  ;;  %v473_v45 = vadd.f32 %v734_v42, %v670_v41  ;;  %v735_v46 = vld [vmem:[%s2147_s1 + $0x260] sm:$0xff]  ;;  %v672_v47 = vld [vmem:[%s2146_s0 + $0x268] sm:$0xff]  ;;  %v673_v53 = vld [vmem:[%s2146_s0 + $0x270] sm:$0xff] }
  0x45   :  { %v736_v48 = vld [vmem:[%s2147_s1 + $0x268] sm:$0xff]  ;;  %794 = vst.msk [vmem:[%s2148_s2 + $0x238] sm:$0xff] %vm267_vm0, %v533_v38  ;;  %v535_v49 = vmul.f32 0.70710677, %v471_v39  ;;  %v536_v50 = vmul.f32 0.70710677, %v472_v40  ;;  %v474_v51 = vadd.f32 %v735_v46, %v671_v43 }
  0x46   :  { %v475_v52 = vadd.f32 %v736_v48, %v672_v47  ;;  %v737_v54 = vld [vmem:[%s2147_s1 + $0x270] sm:$0xff]  ;;  %795 = vst.msk [vmem:[%s2148_s2 + $0x240] sm:$0xff] %vm267_vm0, %v534_v44  ;;  %v537_v55 = vmul.f32 0.70710677, %v473_v45  ;;  %v674_v57 = vld [vmem:[%s2146_s0 + $0x278] sm:$0xff]  ;;  %v675_v59 = vld [vmem:[%s2146_s0 + $0x280] sm:$0xff] }
  0x47   :  { %v476_v56 = vadd.f32 %v737_v54, %v673_v53  ;;  %v738_v58 = vld [vmem:[%s2147_s1 + $0x278] sm:$0xff]  ;;  %796 = vst.msk [vmem:[%s2148_s2 + $0x248] sm:$0xff] %vm267_vm0, %v535_v49  ;;  %797 = vst.msk [vmem:[%s2148_s2 + $0x250] sm:$0xff] %vm267_vm0, %v536_v50  ;;  %v538_v60 = vmul.f32 0.70710677, %v474_v51  ;;  %v739_v63 = vld [vmem:[%s2147_s1 + $0x280] sm:$0xff] }
  0x48   :  { %v539_v61 = vmul.f32 0.70710677, %v475_v52  ;;  %v477_v62 = vadd.f32 %v738_v58, %v674_v57  ;;  %v676_v0 = vld [vmem:[%s2146_s0 + $0x288] sm:$0xff]  ;;  %798 = vst.msk [vmem:[%s2148_s2 + $0x258] sm:$0xff] %vm267_vm0, %v537_v55  ;;  %v478_v2 = vadd.f32 %v739_v63, %v675_v59  ;;  %v677_v4 = vld [vmem:[%s2146_s0 + $0x290] sm:$0xff]  ;;  %v678_v9 = vld [vmem:[%s2146_s0 + $0x298] sm:$0xff] }
  0x49   :  { %v540_v1 = vmul.f32 0.70710677, %v476_v56  ;;  %v740_v3 = vld [vmem:[%s2147_s1 + $0x288] sm:$0xff]  ;;  %v741_v5 = vld [vmem:[%s2147_s1 + $0x290] sm:$0xff]  ;;  %799 = vst.msk [vmem:[%s2148_s2 + $0x260] sm:$0xff] %vm267_vm0, %v538_v60  ;;  %v742_v10 = vld [vmem:[%s2147_s1 + $0x298] sm:$0xff] }
  0x4a   :  { %800 = vst.msk [vmem:[%s2148_s2 + $0x268] sm:$0xff] %vm267_vm0, %v539_v61  ;;  %v541_v6 = vmul.f32 0.70710677, %v477_v62  ;;  %v479_v7 = vadd.f32 %v740_v3, %v676_v0  ;;  %v480_v8 = vadd.f32 %v741_v5, %v677_v4  ;;  %v679_v11 = vld [vmem:[%s2146_s0 + $0x2a0] sm:$0xff]  ;;  %v542_v12 = vmul.f32 0.70710677, %v478_v2 }
  0x4b   :  { %801 = vst.msk [vmem:[%s2148_s2 + $0x270] sm:$0xff] %vm267_vm0, %v540_v1  ;;  %v481_v13 = vadd.f32 %v742_v10, %v678_v9  ;;  %v743_v14 = vld [vmem:[%s2147_s1 + $0x2a0] sm:$0xff]  ;;  %v680_v15 = vld [vmem:[%s2146_s0 + $0x2a8] sm:$0xff]  ;;  %v681_v21 = vld [vmem:[%s2146_s0 + $0x2b0] sm:$0xff] }
  0x4c   :  { %v744_v16 = vld [vmem:[%s2147_s1 + $0x2a8] sm:$0xff]  ;;  %802 = vst.msk [vmem:[%s2148_s2 + $0x278] sm:$0xff] %vm267_vm0, %v541_v6  ;;  %v543_v17 = vmul.f32 0.70710677, %v479_v7  ;;  %v544_v18 = vmul.f32 0.70710677, %v480_v8  ;;  %v482_v19 = vadd.f32 %v743_v14, %v679_v11 }
  0x4d   :  { %v483_v20 = vadd.f32 %v744_v16, %v680_v15  ;;  %v745_v22 = vld [vmem:[%s2147_s1 + $0x2b0] sm:$0xff]  ;;  %803 = vst.msk [vmem:[%s2148_s2 + $0x280] sm:$0xff] %vm267_vm0, %v542_v12  ;;  %v545_v23 = vmul.f32 0.70710677, %v481_v13  ;;  %v682_v25 = vld [vmem:[%s2146_s0 + $0x2b8] sm:$0xff]  ;;  %v683_v27 = vld [vmem:[%s2146_s0 + $0x2c0] sm:$0xff] }
  0x4e   :  { %v484_v24 = vadd.f32 %v745_v22, %v681_v21  ;;  %v746_v26 = vld [vmem:[%s2147_s1 + $0x2b8] sm:$0xff]  ;;  %804 = vst.msk [vmem:[%s2148_s2 + $0x288] sm:$0xff] %vm267_vm0, %v543_v17  ;;  %805 = vst.msk [vmem:[%s2148_s2 + $0x290] sm:$0xff] %vm267_vm0, %v544_v18  ;;  %v546_v28 = vmul.f32 0.70710677, %v482_v19  ;;  %v747_v31 = vld [vmem:[%s2147_s1 + $0x2c0] sm:$0xff] }
  0x4f   :  { %v547_v29 = vmul.f32 0.70710677, %v483_v20  ;;  %v485_v30 = vadd.f32 %v746_v26, %v682_v25  ;;  %v684_v32 = vld [vmem:[%s2146_s0 + $0x2c8] sm:$0xff]  ;;  %806 = vst.msk [vmem:[%s2148_s2 + $0x298] sm:$0xff] %vm267_vm0, %v545_v23  ;;  %v486_v34 = vadd.f32 %v747_v31, %v683_v27  ;;  %v685_v36 = vld [vmem:[%s2146_s0 + $0x2d0] sm:$0xff]  ;;  %v686_v41 = vld [vmem:[%s2146_s0 + $0x2d8] sm:$0xff] }
  0x50   :  { %v548_v33 = vmul.f32 0.70710677, %v484_v24  ;;  %v748_v35 = vld [vmem:[%s2147_s1 + $0x2c8] sm:$0xff]  ;;  %v749_v37 = vld [vmem:[%s2147_s1 + $0x2d0] sm:$0xff]  ;;  %807 = vst.msk [vmem:[%s2148_s2 + $0x2a0] sm:$0xff] %vm267_vm0, %v546_v28  ;;  %v750_v42 = vld [vmem:[%s2147_s1 + $0x2d8] sm:$0xff] }
  0x51   :  { %808 = vst.msk [vmem:[%s2148_s2 + $0x2a8] sm:$0xff] %vm267_vm0, %v547_v29  ;;  %v549_v38 = vmul.f32 0.70710677, %v485_v30  ;;  %v487_v39 = vadd.f32 %v748_v35, %v684_v32  ;;  %v488_v40 = vadd.f32 %v749_v37, %v685_v36  ;;  %v687_v43 = vld [vmem:[%s2146_s0 + $0x2e0] sm:$0xff]  ;;  %v550_v44 = vmul.f32 0.70710677, %v486_v34 }
  0x52   :  { %809 = vst.msk [vmem:[%s2148_s2 + $0x2b0] sm:$0xff] %vm267_vm0, %v548_v33  ;;  %v489_v45 = vadd.f32 %v750_v42, %v686_v41  ;;  %v751_v46 = vld [vmem:[%s2147_s1 + $0x2e0] sm:$0xff]  ;;  %v688_v47 = vld [vmem:[%s2146_s0 + $0x2e8] sm:$0xff]  ;;  %v689_v53 = vld [vmem:[%s2146_s0 + $0x2f0] sm:$0xff] }
  0x53   :  { %v752_v48 = vld [vmem:[%s2147_s1 + $0x2e8] sm:$0xff]  ;;  %810 = vst.msk [vmem:[%s2148_s2 + $0x2b8] sm:$0xff] %vm267_vm0, %v549_v38  ;;  %v551_v49 = vmul.f32 0.70710677, %v487_v39  ;;  %v552_v50 = vmul.f32 0.70710677, %v488_v40  ;;  %v490_v51 = vadd.f32 %v751_v46, %v687_v43 }
  0x54   :  { %v491_v52 = vadd.f32 %v752_v48, %v688_v47  ;;  %v753_v54 = vld [vmem:[%s2147_s1 + $0x2f0] sm:$0xff]  ;;  %811 = vst.msk [vmem:[%s2148_s2 + $0x2c0] sm:$0xff] %vm267_vm0, %v550_v44  ;;  %v553_v55 = vmul.f32 0.70710677, %v489_v45  ;;  %v690_v57 = vld [vmem:[%s2146_s0 + $0x2f8] sm:$0xff]  ;;  %v691_v59 = vld [vmem:[%s2146_s0 + $0x300] sm:$0xff] }
  0x55   :  { %v492_v56 = vadd.f32 %v753_v54, %v689_v53  ;;  %v754_v58 = vld [vmem:[%s2147_s1 + $0x2f8] sm:$0xff]  ;;  %812 = vst.msk [vmem:[%s2148_s2 + $0x2c8] sm:$0xff] %vm267_vm0, %v551_v49  ;;  %813 = vst.msk [vmem:[%s2148_s2 + $0x2d0] sm:$0xff] %vm267_vm0, %v552_v50  ;;  %v554_v60 = vmul.f32 0.70710677, %v490_v51  ;;  %v755_v63 = vld [vmem:[%s2147_s1 + $0x300] sm:$0xff] }
  0x56   :  { %v555_v61 = vmul.f32 0.70710677, %v491_v52  ;;  %v493_v62 = vadd.f32 %v754_v58, %v690_v57  ;;  %v692_v0 = vld [vmem:[%s2146_s0 + $0x308] sm:$0xff]  ;;  %814 = vst.msk [vmem:[%s2148_s2 + $0x2d8] sm:$0xff] %vm267_vm0, %v553_v55  ;;  %v494_v2 = vadd.f32 %v755_v63, %v691_v59  ;;  %v693_v4 = vld [vmem:[%s2146_s0 + $0x310] sm:$0xff]  ;;  %v694_v9 = vld [vmem:[%s2146_s0 + $0x318] sm:$0xff] }
  0x57   :  { %v556_v1 = vmul.f32 0.70710677, %v492_v56  ;;  %v756_v3 = vld [vmem:[%s2147_s1 + $0x308] sm:$0xff]  ;;  %v757_v5 = vld [vmem:[%s2147_s1 + $0x310] sm:$0xff]  ;;  %815 = vst.msk [vmem:[%s2148_s2 + $0x2e0] sm:$0xff] %vm267_vm0, %v554_v60  ;;  %v758_v10 = vld [vmem:[%s2147_s1 + $0x318] sm:$0xff] }
  0x58   :  { %816 = vst.msk [vmem:[%s2148_s2 + $0x2e8] sm:$0xff] %vm267_vm0, %v555_v61  ;;  %v557_v6 = vmul.f32 0.70710677, %v493_v62  ;;  %v495_v7 = vadd.f32 %v756_v3, %v692_v0  ;;  %v496_v8 = vadd.f32 %v757_v5, %v693_v4  ;;  %v695_v11 = vld [vmem:[%s2146_s0 + $0x320] sm:$0xff]  ;;  %v558_v12 = vmul.f32 0.70710677, %v494_v2 }
  0x59   :  { %817 = vst.msk [vmem:[%s2148_s2 + $0x2f0] sm:$0xff] %vm267_vm0, %v556_v1  ;;  %v497_v13 = vadd.f32 %v758_v10, %v694_v9  ;;  %v759_v14 = vld [vmem:[%s2147_s1 + $0x320] sm:$0xff]  ;;  %v696_v15 = vld [vmem:[%s2146_s0 + $0x328] sm:$0xff]  ;;  %v697_v21 = vld [vmem:[%s2146_s0 + $0x330] sm:$0xff] }
  0x5a   :  { %v760_v16 = vld [vmem:[%s2147_s1 + $0x328] sm:$0xff]  ;;  %818 = vst.msk [vmem:[%s2148_s2 + $0x2f8] sm:$0xff] %vm267_vm0, %v557_v6  ;;  %v559_v17 = vmul.f32 0.70710677, %v495_v7  ;;  %v560_v18 = vmul.f32 0.70710677, %v496_v8  ;;  %v498_v19 = vadd.f32 %v759_v14, %v695_v11 }
  0x5b   :  { %v499_v20 = vadd.f32 %v760_v16, %v696_v15  ;;  %v761_v22 = vld [vmem:[%s2147_s1 + $0x330] sm:$0xff]  ;;  %819 = vst.msk [vmem:[%s2148_s2 + $0x300] sm:$0xff] %vm267_vm0, %v558_v12  ;;  %v561_v23 = vmul.f32 0.70710677, %v497_v13  ;;  %v698_v25 = vld [vmem:[%s2146_s0 + $0x338] sm:$0xff]  ;;  %v699_v27 = vld [vmem:[%s2146_s0 + $0x340] sm:$0xff] }
  0x5c   :  { %v500_v24 = vadd.f32 %v761_v22, %v697_v21  ;;  %v762_v26 = vld [vmem:[%s2147_s1 + $0x338] sm:$0xff]  ;;  %820 = vst.msk [vmem:[%s2148_s2 + $0x308] sm:$0xff] %vm267_vm0, %v559_v17  ;;  %821 = vst.msk [vmem:[%s2148_s2 + $0x310] sm:$0xff] %vm267_vm0, %v560_v18  ;;  %v562_v28 = vmul.f32 0.70710677, %v498_v19  ;;  %v763_v31 = vld [vmem:[%s2147_s1 + $0x340] sm:$0xff] }
  0x5d   :  { %v563_v29 = vmul.f32 0.70710677, %v499_v20  ;;  %v501_v30 = vadd.f32 %v762_v26, %v698_v25  ;;  %v700_v32 = vld [vmem:[%s2146_s0 + $0x348] sm:$0xff]  ;;  %822 = vst.msk [vmem:[%s2148_s2 + $0x318] sm:$0xff] %vm267_vm0, %v561_v23  ;;  %v502_v34 = vadd.f32 %v763_v31, %v699_v27  ;;  %v701_v36 = vld [vmem:[%s2146_s0 + $0x350] sm:$0xff]  ;;  %v702_v41 = vld [vmem:[%s2146_s0 + $0x358] sm:$0xff] }
  0x5e   :  { %v564_v33 = vmul.f32 0.70710677, %v500_v24  ;;  %v764_v35 = vld [vmem:[%s2147_s1 + $0x348] sm:$0xff]  ;;  %v765_v37 = vld [vmem:[%s2147_s1 + $0x350] sm:$0xff]  ;;  %823 = vst.msk [vmem:[%s2148_s2 + $0x320] sm:$0xff] %vm267_vm0, %v562_v28  ;;  %v766_v42 = vld [vmem:[%s2147_s1 + $0x358] sm:$0xff] }
  0x5f   :  { %824 = vst.msk [vmem:[%s2148_s2 + $0x328] sm:$0xff] %vm267_vm0, %v563_v29  ;;  %v565_v38 = vmul.f32 0.70710677, %v501_v30  ;;  %v503_v39 = vadd.f32 %v764_v35, %v700_v32  ;;  %v504_v40 = vadd.f32 %v765_v37, %v701_v36  ;;  %v703_v43 = vld [vmem:[%s2146_s0 + $0x360] sm:$0xff]  ;;  %v566_v44 = vmul.f32 0.70710677, %v502_v34 }
  0x60   :  { %825 = vst.msk [vmem:[%s2148_s2 + $0x330] sm:$0xff] %vm267_vm0, %v564_v33  ;;  %v505_v45 = vadd.f32 %v766_v42, %v702_v41  ;;  %v767_v46 = vld [vmem:[%s2147_s1 + $0x360] sm:$0xff]  ;;  %v704_v47 = vld [vmem:[%s2146_s0 + $0x368] sm:$0xff]  ;;  %v705_v53 = vld [vmem:[%s2146_s0 + $0x370] sm:$0xff] }
  0x61   :  { %v768_v48 = vld [vmem:[%s2147_s1 + $0x368] sm:$0xff]  ;;  %826 = vst.msk [vmem:[%s2148_s2 + $0x338] sm:$0xff] %vm267_vm0, %v565_v38  ;;  %v567_v49 = vmul.f32 0.70710677, %v503_v39  ;;  %v568_v50 = vmul.f32 0.70710677, %v504_v40  ;;  %v506_v51 = vadd.f32 %v767_v46, %v703_v43 }
  0x62   :  { %v507_v52 = vadd.f32 %v768_v48, %v704_v47  ;;  %v769_v54 = vld [vmem:[%s2147_s1 + $0x370] sm:$0xff]  ;;  %827 = vst.msk [vmem:[%s2148_s2 + $0x340] sm:$0xff] %vm267_vm0, %v566_v44  ;;  %v569_v55 = vmul.f32 0.70710677, %v505_v45  ;;  %v706_v57 = vld [vmem:[%s2146_s0 + $0x378] sm:$0xff]  ;;  %v707_v59 = vld [vmem:[%s2146_s0 + $0x380] sm:$0xff] }
  0x63   :  { %v508_v56 = vadd.f32 %v769_v54, %v705_v53  ;;  %v770_v58 = vld [vmem:[%s2147_s1 + $0x378] sm:$0xff]  ;;  %828 = vst.msk [vmem:[%s2148_s2 + $0x348] sm:$0xff] %vm267_vm0, %v567_v49  ;;  %829 = vst.msk [vmem:[%s2148_s2 + $0x350] sm:$0xff] %vm267_vm0, %v568_v50  ;;  %v570_v60 = vmul.f32 0.70710677, %v506_v51  ;;  %v771_v63 = vld [vmem:[%s2147_s1 + $0x380] sm:$0xff] }
  0x64   :  { %v571_v61 = vmul.f32 0.70710677, %v507_v52  ;;  %v509_v62 = vadd.f32 %v770_v58, %v706_v57  ;;  %v708_v0 = vld [vmem:[%s2146_s0 + $0x388] sm:$0xff]  ;;  %830 = vst.msk [vmem:[%s2148_s2 + $0x358] sm:$0xff] %vm267_vm0, %v569_v55  ;;  %v510_v2 = vadd.f32 %v771_v63, %v707_v59  ;;  %v709_v4 = vld [vmem:[%s2146_s0 + $0x390] sm:$0xff]  ;;  %v710_v9 = vld [vmem:[%s2146_s0 + $0x398] sm:$0xff] }
  0x65   :  { %v572_v1 = vmul.f32 0.70710677, %v508_v56  ;;  %v772_v3 = vld [vmem:[%s2147_s1 + $0x388] sm:$0xff]  ;;  %v773_v5 = vld [vmem:[%s2147_s1 + $0x390] sm:$0xff]  ;;  %831 = vst.msk [vmem:[%s2148_s2 + $0x360] sm:$0xff] %vm267_vm0, %v570_v60  ;;  %v774_v10 = vld [vmem:[%s2147_s1 + $0x398] sm:$0xff] }
  0x66   :  { %832 = vst.msk [vmem:[%s2148_s2 + $0x368] sm:$0xff] %vm267_vm0, %v571_v61  ;;  %v573_v6 = vmul.f32 0.70710677, %v509_v62  ;;  %v511_v7 = vadd.f32 %v772_v3, %v708_v0  ;;  %v512_v8 = vadd.f32 %v773_v5, %v709_v4  ;;  %v711_v11 = vld [vmem:[%s2146_s0 + $0x3a0] sm:$0xff]  ;;  %v574_v12 = vmul.f32 0.70710677, %v510_v2 }
  0x67   :  { %833 = vst.msk [vmem:[%s2148_s2 + $0x370] sm:$0xff] %vm267_vm0, %v572_v1  ;;  %v513_v13 = vadd.f32 %v774_v10, %v710_v9  ;;  %v775_v14 = vld [vmem:[%s2147_s1 + $0x3a0] sm:$0xff]  ;;  %v712_v15 = vld [vmem:[%s2146_s0 + $0x3a8] sm:$0xff]  ;;  %v713_v21 = vld [vmem:[%s2146_s0 + $0x3b0] sm:$0xff] }
  0x68   :  { %v776_v16 = vld [vmem:[%s2147_s1 + $0x3a8] sm:$0xff]  ;;  %834 = vst.msk [vmem:[%s2148_s2 + $0x378] sm:$0xff] %vm267_vm0, %v573_v6  ;;  %v575_v17 = vmul.f32 0.70710677, %v511_v7  ;;  %v576_v18 = vmul.f32 0.70710677, %v512_v8  ;;  %v514_v19 = vadd.f32 %v775_v14, %v711_v11 }
  0x69   :  { %v515_v20 = vadd.f32 %v776_v16, %v712_v15  ;;  %v777_v22 = vld [vmem:[%s2147_s1 + $0x3b0] sm:$0xff]  ;;  %835 = vst.msk [vmem:[%s2148_s2 + $0x380] sm:$0xff] %vm267_vm0, %v574_v12  ;;  %v577_v23 = vmul.f32 0.70710677, %v513_v13  ;;  %v714_v25 = vld [vmem:[%s2146_s0 + $0x3b8] sm:$0xff]  ;;  %v715_v27 = vld [vmem:[%s2146_s0 + $0x3c0] sm:$0xff] }
  0x6a   :  { %v516_v24 = vadd.f32 %v777_v22, %v713_v21  ;;  %v778_v26 = vld [vmem:[%s2147_s1 + $0x3b8] sm:$0xff]  ;;  %836 = vst.msk [vmem:[%s2148_s2 + $0x388] sm:$0xff] %vm267_vm0, %v575_v17  ;;  %837 = vst.msk [vmem:[%s2148_s2 + $0x390] sm:$0xff] %vm267_vm0, %v576_v18  ;;  %v578_v28 = vmul.f32 0.70710677, %v514_v19  ;;  %v779_v31 = vld [vmem:[%s2147_s1 + $0x3c0] sm:$0xff] }
  0x6b   :  { %v579_v29 = vmul.f32 0.70710677, %v515_v20  ;;  %v517_v30 = vadd.f32 %v778_v26, %v714_v25  ;;  %v716_v32 = vld [vmem:[%s2146_s0 + $0x3c8] sm:$0xff]  ;;  %838 = vst.msk [vmem:[%s2148_s2 + $0x398] sm:$0xff] %vm267_vm0, %v577_v23  ;;  %v518_v34 = vadd.f32 %v779_v31, %v715_v27  ;;  %v717_v36 = vld [vmem:[%s2146_s0 + $0x3d0] sm:$0xff]  ;;  %v718_v41 = vld [vmem:[%s2146_s0 + $0x3d8] sm:$0xff] }
  0x6c   :  { %v580_v33 = vmul.f32 0.70710677, %v516_v24  ;;  %v780_v35 = vld [vmem:[%s2147_s1 + $0x3c8] sm:$0xff]  ;;  %v781_v37 = vld [vmem:[%s2147_s1 + $0x3d0] sm:$0xff]  ;;  %839 = vst.msk [vmem:[%s2148_s2 + $0x3a0] sm:$0xff] %vm267_vm0, %v578_v28  ;;  %v782_v42 = vld [vmem:[%s2147_s1 + $0x3d8] sm:$0xff] }
  0x6d   :  { %840 = vst.msk [vmem:[%s2148_s2 + $0x3a8] sm:$0xff] %vm267_vm0, %v579_v29  ;;  %v581_v38 = vmul.f32 0.70710677, %v517_v30  ;;  %v519_v39 = vadd.f32 %v780_v35, %v716_v32  ;;  %v520_v40 = vadd.f32 %v781_v37, %v717_v36  ;;  %v719_v43 = vld [vmem:[%s2146_s0 + $0x3e0] sm:$0xff]  ;;  %v582_v44 = vmul.f32 0.70710677, %v518_v34 }
  0x6e   :  { %841 = vst.msk [vmem:[%s2148_s2 + $0x3b0] sm:$0xff] %vm267_vm0, %v580_v33  ;;  %v521_v45 = vadd.f32 %v782_v42, %v718_v41  ;;  %v783_v46 = vld [vmem:[%s2147_s1 + $0x3e0] sm:$0xff]  ;;  %v720_v47 = vld [vmem:[%s2146_s0 + $0x3e8] sm:$0xff]  ;;  %v721_v53 = vld [vmem:[%s2146_s0 + $0x3f0] sm:$0xff] }
  0x6f   :  { %v784_v48 = vld [vmem:[%s2147_s1 + $0x3e8] sm:$0xff]  ;;  %842 = vst.msk [vmem:[%s2148_s2 + $0x3b8] sm:$0xff] %vm267_vm0, %v581_v38  ;;  %v583_v49 = vmul.f32 0.70710677, %v519_v39  ;;  %v584_v50 = vmul.f32 0.70710677, %v520_v40  ;;  %v522_v51 = vadd.f32 %v783_v46, %v719_v43 }
  0x70   :  { %v523_v52 = vadd.f32 %v784_v48, %v720_v47  ;;  %v785_v54 = vld [vmem:[%s2147_s1 + $0x3f0] sm:$0xff]  ;;  %843 = vst.msk [vmem:[%s2148_s2 + $0x3c0] sm:$0xff] %vm267_vm0, %v582_v44  ;;  %v585_v55 = vmul.f32 0.70710677, %v521_v45  ;;  %v722_v57 = vld [vmem:[%s2146_s0 + $0x3f8] sm:$0xff] }
  0x71   :  { %v524_v56 = vadd.f32 %v785_v54, %v721_v53  ;;  %v786_v58 = vld [vmem:[%s2147_s1 + $0x3f8] sm:$0xff]  ;;  %844 = vst.msk [vmem:[%s2148_s2 + $0x3c8] sm:$0xff] %vm267_vm0, %v583_v49  ;;  %845 = vst.msk [vmem:[%s2148_s2 + $0x3d0] sm:$0xff] %vm267_vm0, %v584_v50  ;;  %v586_v59 = vmul.f32 0.70710677, %v522_v51 }
  0x72   :  { %v587_v60 = vmul.f32 0.70710677, %v523_v52  ;;  %v525_v61 = vadd.f32 %v786_v58, %v722_v57  ;;  %846 = vst.msk [vmem:[%s2148_s2 + $0x3d8] sm:$0xff] %vm267_vm0, %v585_v55 }
  0x73   :  { %v588_v62 = vmul.f32 0.70710677, %v524_v56  ;;  %847 = vst.msk [vmem:[%s2148_s2 + $0x3e0] sm:$0xff] %vm267_vm0, %v586_v59 }
  0x74   :  { %848 = vst.msk [vmem:[%s2148_s2 + $0x3e8] sm:$0xff] %vm267_vm0, %v587_v60  ;;  %v589_v63 = vmul.f32 0.70710677, %v525_v61 }
  0x75   :  { %849 = vst.msk [vmem:[%s2148_s2 + $0x3f0] sm:$0xff] %vm267_vm0, %v588_v62 }
  0x76   :  { %850 = vst.msk [vmem:[%s2148_s2 + $0x3f8] sm:$0xff] %vm267_vm0, %v589_v63 }

// kernel: ustack_forward.19
= control target key start
LH: loop header
LB: loop body
LE: loop exit
PB: predicated region body
PF: predicated region fallthrough
CT: control target
= control target key end

     0   :  { %v1766_v3 = vmov 0.0|0.0   ;;  %vm305_vm0 = vcmask 719872   ;;  %s3072_s0 = inlined_call_operand.vmem [shape: f32[1024,216], index: 0, kind: input, shape index: {}]   ;;  %s3073_s1 = inlined_call_operand.vmem [shape: f32[216,8], index: 1, kind: input, shape index: {}]   ;;  %s3074_s2 = inlined_call_operand.vmem [shape: f32[1,8], index: 2, kind: input, shape index: {}]   ;;  %s3075_s3 = inlined_call_operand.hbm [shape: f32[1024,8], index: 3, kind: output, shape index: {}]  }
   0x1   :  { %v271_v0 = vld [vmem:[%s3073_s1] sm:$0xff]  ;;  %v272_v1 = vld [vmem:[%s3073_s1 + $0x8] sm:$0xff]  ;;  %v273_v2 = vld [vmem:[%s3073_s1 + $0x10] sm:$0xff]  ;;  %1669 = vmatprep.subr.bf16.mxu0 %v1766_v3  ;;  %1708 = vmatprep.subr.bf16.mxu1 %v1766_v3 }
   0x2   :  { %v1670_v4 = vpack.c.bf16 %v272_v1, %v271_v0  ;;  %v274_v5 = vld [vmem:[%s3073_s1 + $0x18] sm:$0xff]  ;;  %v275_v7 = vld [vmem:[%s3073_s1 + $0x20] sm:$0xff]  ;;  %v276_v8 = vld [vmem:[%s3073_s1 + $0x28] sm:$0xff] }
   0x3   :  { %v1673_v6 = vpack.c.bf16 %v274_v5, %v273_v2  ;;  %v1676_v9 = vpack.c.bf16 %v276_v8, %v275_v7  ;;  %v277_v10 = vld [vmem:[%s3073_s1 + $0x30] sm:$0xff]  ;;  %v278_v11 = vld [vmem:[%s3073_s1 + $0x38] sm:$0xff]  ;;  %v16_v12 = vld [vmem:[%s3072_s0 + $0x8] sm:$0xff] }
   0x4   :  { %1671 = vmatpush1.bf16.msra.mxu0 %v1670_v4  ;;  %1722 = vmatpush1.bf16.msra.mxu1 %v1670_v4  ;;  %v144_v13 = vld [vmem:[%s3072_s0 + $0x408] sm:$0xff]  ;;  %v1679_v14 = vpack.c.bf16 %v278_v11, %v277_v10  ;;  %v279_v15 = vld [vmem:[%s3073_s1 + $0x40] sm:$0xff]  ;;  %v281_v18 = vld [vmem:[%s3073_s1 + $0x50] sm:$0xff] }
   0x5   :  { %1672 = vmatprep.subr.bf16.mxu0 %v1766_v3  ;;  %1709 = vmatprep.subr.bf16.mxu1 %v1766_v3  ;;  %v280_v16 = vld [vmem:[%s3073_s1 + $0x48] sm:$0xff]  ;;  %v282_v19 = vld [vmem:[%s3073_s1 + $0x58] sm:$0xff]  ;;  %v283_v21 = vld [vmem:[%s3073_s1 + $0x60] sm:$0xff] }
   0x6   :  { %1541 = vmatprep.mubr.msk.f32.mxu0 %vm305_vm0, %v16_v12  ;;  %1605 = vmatprep.mubr.msk.f32.mxu1 %vm305_vm0, %v144_v13  ;;  %v1682_v17 = vpack.c.bf16 %v280_v16, %v279_v15  ;;  %v1685_v20 = vpack.c.bf16 %v282_v19, %v281_v18  ;;  %v284_v22 = vld [vmem:[%s3073_s1 + $0x68] sm:$0xff]  ;;  %v285_v24 = vld [vmem:[%s3073_s1 + $0x70] sm:$0xff]  ;;  %v286_v25 = vld [vmem:[%s3073_s1 + $0x78] sm:$0xff] }
   0x7   :  { %v1688_v23 = vpack.c.bf16 %v284_v22, %v283_v21  ;;  %v1691_v26 = vpack.c.bf16 %v286_v25, %v285_v24  ;;  %v287_v27 = vld [vmem:[%s3073_s1 + $0x80] sm:$0xff]  ;;  %v288_v28 = vld [vmem:[%s3073_s1 + $0x88] sm:$0xff]  ;;  %v289_v30 = vld [vmem:[%s3073_s1 + $0x90] sm:$0xff] }
   0x8   :  { %1674 = vmatpush1.bf16.msra.mxu0 %v1673_v6  ;;  %1723 = vmatpush1.bf16.msra.mxu1 %v1673_v6  ;;  %v1694_v29 = vpack.c.bf16 %v288_v28, %v287_v27  ;;  %v290_v31 = vld [vmem:[%s3073_s1 + $0x98] sm:$0xff]  ;;  %v291_v33 = vld [vmem:[%s3073_s1 + $0xa0] sm:$0xff]  ;;  %v292_v34 = vld [vmem:[%s3073_s1 + $0xa8] sm:$0xff] }
   0x9   :  { %1675 = vmatprep.subr.bf16.mxu0 %v1766_v3  ;;  %1710 = vmatprep.subr.bf16.mxu1 %v1766_v3  ;;  %v1697_v32 = vpack.c.bf16 %v290_v31, %v289_v30  ;;  %v1700_v35 = vpack.c.bf16 %v292_v34, %v291_v33  ;;  %v293_v36 = vld [vmem:[%s3073_s1 + $0xb0] sm:$0xff]  ;;  %v294_v37 = vld [vmem:[%s3073_s1 + $0xb8] sm:$0xff]  ;;  %v295_v39 = vld [vmem:[%s3073_s1 + $0xc0] sm:$0xff] }
   0xa   :  { %v1703_v38 = vpack.c.bf16 %v294_v37, %v293_v36  ;;  %v296_v40 = vld [vmem:[%s3073_s1 + $0xc8] sm:$0xff] }
   0xb   :  { %v1706_v41 = vpack.c.bf16 %v296_v40, %v295_v39 }
   0xc   :  { %1677 = vmatpush1.bf16.msra.mxu0 %v1676_v9  ;;  %1724 = vmatpush1.bf16.msra.mxu1 %v1676_v9 }
   0xd   :  { %1678 = vmatprep.subr.bf16.mxu0 %v1766_v3  ;;  %1711 = vmatprep.subr.bf16.mxu1 %v1766_v3 }
  0x10   :  { %1680 = vmatpush1.bf16.msra.mxu0 %v1679_v14  ;;  %1725 = vmatpush1.bf16.msra.mxu1 %v1679_v14 }
  0x11   :  { %1681 = vmatprep.subr.bf16.mxu0 %v1766_v3  ;;  %1712 = vmatprep.subr.bf16.mxu1 %v1766_v3 }
  0x14   :  { %1683 = vmatpush1.bf16.msra.mxu0 %v1682_v17  ;;  %1726 = vmatpush1.bf16.msra.mxu1 %v1682_v17 }
  0x15   :  { %1684 = vmatprep.subr.bf16.mxu0 %v1766_v3  ;;  %1713 = vmatprep.subr.bf16.mxu1 %v1766_v3 }
  0x18   :  { %1686 = vmatpush1.bf16.msra.mxu0 %v1685_v20  ;;  %1727 = vmatpush1.bf16.msra.mxu1 %v1685_v20 }
  0x19   :  { %1687 = vmatprep.subr.bf16.mxu0 %v1766_v3  ;;  %1714 = vmatprep.subr.bf16.mxu1 %v1766_v3 }
  0x1c   :  { %1689 = vmatpush1.bf16.msra.mxu0 %v1688_v23  ;;  %1728 = vmatpush1.bf16.msra.mxu1 %v1688_v23 }
  0x1d   :  { %1690 = vmatprep.subr.bf16.mxu0 %v1766_v3  ;;  %1715 = vmatprep.subr.bf16.mxu1 %v1766_v3 }
  0x20   :  { %1692 = vmatpush1.bf16.msra.mxu0 %v1691_v26  ;;  %1729 = vmatpush1.bf16.msra.mxu1 %v1691_v26 }
  0x21   :  { %1693 = vmatprep.subr.bf16.mxu0 %v1766_v3  ;;  %1716 = vmatprep.subr.bf16.mxu1 %v1766_v3 }
  0x24   :  { %1695 = vmatpush1.bf16.msra.mxu0 %v1694_v29  ;;  %1730 = vmatpush1.bf16.msra.mxu1 %v1694_v29 }
  0x25   :  { %1696 = vmatprep.subr.bf16.mxu0 %v1766_v3  ;;  %1717 = vmatprep.subr.bf16.mxu1 %v1766_v3 }
  0x28   :  { %1698 = vmatpush1.bf16.msra.mxu0 %v1697_v32  ;;  %1731 = vmatpush1.bf16.msra.mxu1 %v1697_v32 }
  0x29   :  { %1699 = vmatprep.subr.bf16.mxu0 %v1766_v3  ;;  %1718 = vmatprep.subr.bf16.mxu1 %v1766_v3 }
  0x2c   :  { %1701 = vmatpush1.bf16.msra.mxu0 %v1700_v35  ;;  %1732 = vmatpush1.bf16.msra.mxu1 %v1700_v35 }
  0x2d   :  { %1702 = vmatprep.subr.bf16.mxu0 %v1766_v3  ;;  %1719 = vmatprep.subr.bf16.mxu1 %v1766_v3 }
  0x30   :  { %1704 = vmatpush1.bf16.msra.mxu0 %v1703_v38  ;;  %1733 = vmatpush1.bf16.msra.mxu1 %v1703_v38 }
  0x31   :  { %1705 = vmatprep.subr.bf16.mxu0 %v1766_v3  ;;  %1720 = vmatprep.subr.bf16.mxu1 %v1766_v3 }
  0x34   :  { %1707 = vmatpush1.bf16.msra.mxu0 %v1706_v41  ;;  %1734 = vmatpush1.bf16.msra.mxu1 %v1706_v41 }
  0x35   :  { %8 = vsyncpa [#allocation3], 0  ;;  %v1767_v42 = vmov 0.0   ;;  %v297_v43 = vld [vmem:[%s3073_s1 + $0xd0] sm:$0xff]  ;;  %v15_v44 = vld [vmem:[%s3072_s0] sm:$0xff]  ;;  %vm1395_vm1 = vcmask 64512  }
  0x36   :  { %742 = vmatprep.subr.mxu0 %v1767_v42  ;;  %1721 = vmatprep.subr.mxu1 %v1767_v42  ;;  %v143_v45 = vld [vmem:[%s3072_s0 + $0x400] sm:$0xff]  ;;  %v18_v46 = vld [vmem:[%s3072_s0 + $0x18] sm:$0xff]  ;;  %v17_v48 = vld [vmem:[%s3072_s0 + $0x10] sm:$0xff] }
  0x37   :  { %v146_v47 = vld [vmem:[%s3072_s0 + $0x418] sm:$0xff]  ;;  %v145_v49 = vld [vmem:[%s3072_s0 + $0x410] sm:$0xff]  ;;  %v20_v50 = vld [vmem:[%s3072_s0 + $0x28] sm:$0xff] }
  0x38   :  { %743 = vmatpush1.msra.mxu0 %v297_v43  ;;  %1735 = vmatpush1.msra.mxu1 %v297_v43  ;;  %v148_v51 = vld [vmem:[%s3072_s0 + $0x428] sm:$0xff]  ;;  %v19_v52 = vld [vmem:[%s3072_s0 + $0x20] sm:$0xff]  ;;  %v22_v54 = vld [vmem:[%s3072_s0 + $0x38] sm:$0xff] }
  0x39   :  { %755 = vmatmul.mubr.f32.vlgmr.msra.gmra.mrb[0].mxu0 %v15_v44  ;;  %1075 = vmatmul.mubr.f32.vlgmr.msra.gmra.mrb[0].mxu1 %v143_v45  ;;  %v147_v53 = vld [vmem:[%s3072_s0 + $0x420] sm:$0xff]  ;;  %v150_v55 = vld [vmem:[%s3072_s0 + $0x438] sm:$0xff]  ;;  %v21_v56 = vld [vmem:[%s3072_s0 + $0x30] sm:$0xff] }
  0x3a   :  { %1542 = vmatprep.mubr.msk.f32.mxu0 %vm305_vm0, %v18_v46  ;;  %1606 = vmatprep.mubr.msk.f32.mxu1 %vm305_vm0, %v146_v47  ;;  %v149_v57 = vld [vmem:[%s3072_s0 + $0x430] sm:$0xff]  ;;  %v24_v58 = vld [vmem:[%s3072_s0 + $0x48] sm:$0xff]  ;;  %v23_v60 = vld [vmem:[%s3072_s0 + $0x40] sm:$0xff] }
  0x3b   :  { %v152_v59 = vld [vmem:[%s3072_s0 + $0x448] sm:$0xff]  ;;  %v151_v61 = vld [vmem:[%s3072_s0 + $0x440] sm:$0xff]  ;;  %v26_v62 = vld [vmem:[%s3072_s0 + $0x58] sm:$0xff] }
  0x3c   :  { %v154_v63 = vld [vmem:[%s3072_s0 + $0x458] sm:$0xff]  ;;  %v25_v0 = vld [vmem:[%s3072_s0 + $0x50] sm:$0xff]  ;;  %v28_v2 = vld [vmem:[%s3072_s0 + $0x68] sm:$0xff] }
  0x3d   :  { %760 = vmatmul.mubr.f32.gmra.mrb[2].mxu0 %v17_v48  ;;  %1080 = vmatmul.mubr.f32.gmra.mrb[2].mxu1 %v145_v49  ;;  %v153_v1 = vld [vmem:[%s3072_s0 + $0x450] sm:$0xff]  ;;  %v156_v3 = vld [vmem:[%s3072_s0 + $0x468] sm:$0xff]  ;;  %v27_v4 = vld [vmem:[%s3072_s0 + $0x60] sm:$0xff] }
  0x3e   :  { %1543 = vmatprep.mubr.msk.f32.mxu0 %vm305_vm0, %v20_v50  ;;  %1607 = vmatprep.mubr.msk.f32.mxu1 %vm305_vm0, %v148_v51  ;;  %v155_v5 = vld [vmem:[%s3072_s0 + $0x460] sm:$0xff]  ;;  %v30_v6 = vld [vmem:[%s3072_s0 + $0x78] sm:$0xff]  ;;  %v29_v8 = vld [vmem:[%s3072_s0 + $0x70] sm:$0xff] }
  0x3f   :  { %v158_v7 = vld [vmem:[%s3072_s0 + $0x478] sm:$0xff]  ;;  %v157_v9 = vld [vmem:[%s3072_s0 + $0x470] sm:$0xff]  ;;  %v32_v10 = vld [vmem:[%s3072_s0 + $0x88] sm:$0xff] }
  0x40   :  { %v160_v11 = vld [vmem:[%s3072_s0 + $0x488] sm:$0xff]  ;;  %v31_v12 = vld [vmem:[%s3072_s0 + $0x80] sm:$0xff]  ;;  %v34_v14 = vld [vmem:[%s3072_s0 + $0x98] sm:$0xff] }
  0x41   :  { %765 = vmatmul.mubr.f32.gmra.mrb[4].mxu0 %v19_v52  ;;  %1085 = vmatmul.mubr.f32.gmra.mrb[4].mxu1 %v147_v53  ;;  %v159_v13 = vld [vmem:[%s3072_s0 + $0x480] sm:$0xff]  ;;  %v162_v15 = vld [vmem:[%s3072_s0 + $0x498] sm:$0xff]  ;;  %v33_v16 = vld [vmem:[%s3072_s0 + $0x90] sm:$0xff] }
  0x42   :  { %1544 = vmatprep.mubr.msk.f32.mxu0 %vm305_vm0, %v22_v54  ;;  %1608 = vmatprep.mubr.msk.f32.mxu1 %vm305_vm0, %v150_v55  ;;  %v161_v17 = vld [vmem:[%s3072_s0 + $0x490] sm:$0xff]  ;;  %v36_v18 = vld [vmem:[%s3072_s0 + $0xa8] sm:$0xff]  ;;  %v35_v20 = vld [vmem:[%s3072_s0 + $0xa0] sm:$0xff] }
  0x43   :  { %v164_v19 = vld [vmem:[%s3072_s0 + $0x4a8] sm:$0xff]  ;;  %v163_v21 = vld [vmem:[%s3072_s0 + $0x4a0] sm:$0xff]  ;;  %v38_v22 = vld [vmem:[%s3072_s0 + $0xb8] sm:$0xff] }
  0x44   :  { %v166_v23 = vld [vmem:[%s3072_s0 + $0x4b8] sm:$0xff]  ;;  %v37_v24 = vld [vmem:[%s3072_s0 + $0xb0] sm:$0xff]  ;;  %v40_v26 = vld [vmem:[%s3072_s0 + $0xc8] sm:$0xff] }
  0x45   :  { %770 = vmatmul.mubr.f32.gmra.mrb[6].mxu0 %v21_v56  ;;  %1090 = vmatmul.mubr.f32.gmra.mrb[6].mxu1 %v149_v57  ;;  %v165_v25 = vld [vmem:[%s3072_s0 + $0x4b0] sm:$0xff]  ;;  %v168_v27 = vld [vmem:[%s3072_s0 + $0x4c8] sm:$0xff]  ;;  %v39_v28 = vld [vmem:[%s3072_s0 + $0xc0] sm:$0xff] }
  0x46   :  { %1545 = vmatprep.mubr.msk.f32.mxu0 %vm305_vm0, %v24_v58  ;;  %1609 = vmatprep.mubr.msk.f32.mxu1 %vm305_vm0, %v152_v59  ;;  %v167_v29 = vld [vmem:[%s3072_s0 + $0x4c0] sm:$0xff]  ;;  %v42_v30 = vld [vmem:[%s3072_s0 + $0xd8] sm:$0xff]  ;;  %v41_v32 = vld [vmem:[%s3072_s0 + $0xd0] sm:$0xff] }
  0x47   :  { %v170_v31 = vld [vmem:[%s3072_s0 + $0x4d8] sm:$0xff]  ;;  %v169_v33 = vld [vmem:[%s3072_s0 + $0x4d0] sm:$0xff]  ;;  %v44_v34 = vld [vmem:[%s3072_s0 + $0xe8] sm:$0xff] }
  0x48   :  { %v172_v35 = vld [vmem:[%s3072_s0 + $0x4e8] sm:$0xff]  ;;  %v43_v36 = vld [vmem:[%s3072_s0 + $0xe0] sm:$0xff]  ;;  %v46_v38 = vld [vmem:[%s3072_s0 + $0xf8] sm:$0xff] }
  0x49   :  { %775 = vmatmul.mubr.f32.gmra.mrb[8].mxu0 %v23_v60  ;;  %1095 = vmatmul.mubr.f32.gmra.mrb[8].mxu1 %v151_v61  ;;  %v171_v37 = vld [vmem:[%s3072_s0 + $0x4e0] sm:$0xff]  ;;  %v174_v39 = vld [vmem:[%s3072_s0 + $0x4f8] sm:$0xff]  ;;  %v45_v40 = vld [vmem:[%s3072_s0 + $0xf0] sm:$0xff] }
  0x4a   :  { %1546 = vmatprep.mubr.msk.f32.mxu0 %vm305_vm0, %v26_v62  ;;  %1610 = vmatprep.mubr.msk.f32.mxu1 %vm305_vm0, %v154_v63  ;;  %v173_v41 = vld [vmem:[%s3072_s0 + $0x4f0] sm:$0xff]  ;;  %v48_v42 = vld [vmem:[%s3072_s0 + $0x108] sm:$0xff]  ;;  %v47_v44 = vld [vmem:[%s3072_s0 + $0x100] sm:$0xff] }
  0x4b   :  { %v176_v43 = vld [vmem:[%s3072_s0 + $0x508] sm:$0xff]  ;;  %v175_v45 = vld [vmem:[%s3072_s0 + $0x500] sm:$0xff]  ;;  %v50_v46 = vld [vmem:[%s3072_s0 + $0x118] sm:$0xff] }
  0x4c   :  { %v178_v47 = vld [vmem:[%s3072_s0 + $0x518] sm:$0xff]  ;;  %v49_v48 = vld [vmem:[%s3072_s0 + $0x110] sm:$0xff]  ;;  %v52_v50 = vld [vmem:[%s3072_s0 + $0x128] sm:$0xff] }
  0x4d   :  { %780 = vmatmul.mubr.f32.gmra.mrb[10].mxu0 %v25_v0  ;;  %1100 = vmatmul.mubr.f32.gmra.mrb[10].mxu1 %v153_v1  ;;  %v177_v49 = vld [vmem:[%s3072_s0 + $0x510] sm:$0xff]  ;;  %v180_v51 = vld [vmem:[%s3072_s0 + $0x528] sm:$0xff]  ;;  %v51_v52 = vld [vmem:[%s3072_s0 + $0x120] sm:$0xff] }
  0x4e   :  { %1547 = vmatprep.mubr.msk.f32.mxu0 %vm305_vm0, %v28_v2  ;;  %1611 = vmatprep.mubr.msk.f32.mxu1 %vm305_vm0, %v156_v3  ;;  %v179_v53 = vld [vmem:[%s3072_s0 + $0x520] sm:$0xff]  ;;  %v54_v54 = vld [vmem:[%s3072_s0 + $0x138] sm:$0xff]  ;;  %v53_v56 = vld [vmem:[%s3072_s0 + $0x130] sm:$0xff] }
  0x4f   :  { %v182_v55 = vld [vmem:[%s3072_s0 + $0x538] sm:$0xff]  ;;  %v181_v57 = vld [vmem:[%s3072_s0 + $0x530] sm:$0xff]  ;;  %v56_v58 = vld [vmem:[%s3072_s0 + $0x148] sm:$0xff] }
  0x50   :  { %v184_v59 = vld [vmem:[%s3072_s0 + $0x548] sm:$0xff]  ;;  %v55_v60 = vld [vmem:[%s3072_s0 + $0x140] sm:$0xff]  ;;  %v58_v62 = vld [vmem:[%s3072_s0 + $0x158] sm:$0xff] }
  0x51   :  { %785 = vmatmul.mubr.f32.gmra.mrb[12].mxu0 %v27_v4  ;;  %1105 = vmatmul.mubr.f32.gmra.mrb[12].mxu1 %v155_v5  ;;  %v183_v61 = vld [vmem:[%s3072_s0 + $0x540] sm:$0xff]  ;;  %v186_v63 = vld [vmem:[%s3072_s0 + $0x558] sm:$0xff]  ;;  %v57_v0 = vld [vmem:[%s3072_s0 + $0x150] sm:$0xff] }
  0x52   :  { %1548 = vmatprep.mubr.msk.f32.mxu0 %vm305_vm0, %v30_v6  ;;  %1612 = vmatprep.mubr.msk.f32.mxu1 %vm305_vm0, %v158_v7  ;;  %v185_v1 = vld [vmem:[%s3072_s0 + $0x550] sm:$0xff]  ;;  %v60_v2 = vld [vmem:[%s3072_s0 + $0x168] sm:$0xff]  ;;  %v59_v4 = vld [vmem:[%s3072_s0 + $0x160] sm:$0xff] }
  0x53   :  { %v188_v3 = vld [vmem:[%s3072_s0 + $0x568] sm:$0xff]  ;;  %v187_v5 = vld [vmem:[%s3072_s0 + $0x560] sm:$0xff]  ;;  %v62_v6 = vld [vmem:[%s3072_s0 + $0x178] sm:$0xff] }
  0x54   :  { %v190_v7 = vld [vmem:[%s3072_s0 + $0x578] sm:$0xff] }
  0x55   :  { %790 = vmatmul.mubr.f32.gmra.mrb[14].mxu0 %v29_v8  ;;  %1110 = vmatmul.mubr.f32.gmra.mrb[14].mxu1 %v157_v9  ;;  %v61_v8 = vld [vmem:[%s3072_s0 + $0x170] sm:$0xff] }
  0x56   :  { %1549 = vmatprep.mubr.msk.f32.mxu0 %vm305_vm0, %v32_v10  ;;  %1613 = vmatprep.mubr.msk.f32.mxu1 %vm305_vm0, %v160_v11  ;;  %v189_v9 = vld [vmem:[%s3072_s0 + $0x570] sm:$0xff]  ;;  %v64_v10 = vld [vmem:[%s3072_s0 + $0x188] sm:$0xff] }
  0x57   :  { %v192_v11 = vld [vmem:[%s3072_s0 + $0x588] sm:$0xff] }
  0x59   :  { %795 = vmatmul.mubr.f32.gmra.mrb[16].mxu0 %v31_v12  ;;  %1115 = vmatmul.mubr.f32.gmra.mrb[16].mxu1 %v159_v13  ;;  %v63_v12 = vld [vmem:[%s3072_s0 + $0x180] sm:$0xff] }
  0x5a   :  { %1550 = vmatprep.mubr.msk.f32.mxu0 %vm305_vm0, %v34_v14  ;;  %1614 = vmatprep.mubr.msk.f32.mxu1 %vm305_vm0, %v162_v15  ;;  %v191_v13 = vld [vmem:[%s3072_s0 + $0x580] sm:$0xff]  ;;  %v66_v14 = vld [vmem:[%s3072_s0 + $0x198] sm:$0xff] }
  0x5b   :  { %v194_v15 = vld [vmem:[%s3072_s0 + $0x598] sm:$0xff] }
  0x5d   :  { %800 = vmatmul.mubr.f32.gmra.mrb[18].mxu0 %v33_v16  ;;  %1120 = vmatmul.mubr.f32.gmra.mrb[18].mxu1 %v161_v17  ;;  %v65_v16 = vld [vmem:[%s3072_s0 + $0x190] sm:$0xff] }
  0x5e   :  { %1551 = vmatprep.mubr.msk.f32.mxu0 %vm305_vm0, %v36_v18  ;;  %1615 = vmatprep.mubr.msk.f32.mxu1 %vm305_vm0, %v164_v19  ;;  %v193_v17 = vld [vmem:[%s3072_s0 + $0x590] sm:$0xff]  ;;  %v68_v18 = vld [vmem:[%s3072_s0 + $0x1a8] sm:$0xff] }
  0x5f   :  { %v196_v19 = vld [vmem:[%s3072_s0 + $0x5a8] sm:$0xff] }
  0x61   :  { %805 = vmatmul.mubr.f32.gmra.mrb[20].mxu0 %v35_v20  ;;  %1125 = vmatmul.mubr.f32.gmra.mrb[20].mxu1 %v163_v21  ;;  %v67_v20 = vld [vmem:[%s3072_s0 + $0x1a0] sm:$0xff] }
  0x62   :  { %1552 = vmatprep.mubr.msk.f32.mxu0 %vm305_vm0, %v38_v22  ;;  %1616 = vmatprep.mubr.msk.f32.mxu1 %vm305_vm0, %v166_v23  ;;  %v195_v21 = vld [vmem:[%s3072_s0 + $0x5a0] sm:$0xff]  ;;  %v70_v22 = vld [vmem:[%s3072_s0 + $0x1b8] sm:$0xff] }
  0x63   :  { %v198_v23 = vld [vmem:[%s3072_s0 + $0x5b8] sm:$0xff] }
  0x65   :  { %810 = vmatmul.mubr.f32.gmra.mrb[22].mxu0 %v37_v24  ;;  %1130 = vmatmul.mubr.f32.gmra.mrb[22].mxu1 %v165_v25  ;;  %v69_v24 = vld [vmem:[%s3072_s0 + $0x1b0] sm:$0xff] }
  0x66   :  { %1553 = vmatprep.mubr.msk.f32.mxu0 %vm305_vm0, %v40_v26  ;;  %1617 = vmatprep.mubr.msk.f32.mxu1 %vm305_vm0, %v168_v27  ;;  %v197_v25 = vld [vmem:[%s3072_s0 + $0x5b0] sm:$0xff]  ;;  %v72_v26 = vld [vmem:[%s3072_s0 + $0x1c8] sm:$0xff] }
  0x67   :  { %v200_v27 = vld [vmem:[%s3072_s0 + $0x5c8] sm:$0xff] }
  0x69   :  { %815 = vmatmul.mubr.f32.gmra.mrb[24].mxu0 %v39_v28  ;;  %1135 = vmatmul.mubr.f32.gmra.mrb[24].mxu1 %v167_v29  ;;  %v71_v28 = vld [vmem:[%s3072_s0 + $0x1c0] sm:$0xff] }
  0x6a   :  { %1554 = vmatprep.mubr.msk.f32.mxu0 %vm305_vm0, %v42_v30  ;;  %1618 = vmatprep.mubr.msk.f32.mxu1 %vm305_vm0, %v170_v31  ;;  %v199_v29 = vld [vmem:[%s3072_s0 + $0x5c0] sm:$0xff]  ;;  %v74_v30 = vld [vmem:[%s3072_s0 + $0x1d8] sm:$0xff] }
  0x6b   :  { %v202_v31 = vld [vmem:[%s3072_s0 + $0x5d8] sm:$0xff] }
  0x6d   :  { %820 = vmatmul.mubr.f32.gmra.mrb[26].mxu0 %v41_v32  ;;  %1140 = vmatmul.mubr.f32.gmra.mrb[26].mxu1 %v169_v33  ;;  %v73_v32 = vld [vmem:[%s3072_s0 + $0x1d0] sm:$0xff] }
  0x6e   :  { %1555 = vmatprep.mubr.msk.f32.mxu0 %vm305_vm0, %v44_v34  ;;  %1619 = vmatprep.mubr.msk.f32.mxu1 %vm305_vm0, %v172_v35  ;;  %v201_v33 = vld [vmem:[%s3072_s0 + $0x5d0] sm:$0xff]  ;;  %v76_v34 = vld [vmem:[%s3072_s0 + $0x1e8] sm:$0xff] }
  0x6f   :  { %v204_v35 = vld [vmem:[%s3072_s0 + $0x5e8] sm:$0xff] }
  0x71   :  { %825 = vmatmul.mubr.f32.gmra.mrb[28].mxu0 %v43_v36  ;;  %1145 = vmatmul.mubr.f32.gmra.mrb[28].mxu1 %v171_v37  ;;  %v75_v36 = vld [vmem:[%s3072_s0 + $0x1e0] sm:$0xff] }
  0x72   :  { %1556 = vmatprep.mubr.msk.f32.mxu0 %vm305_vm0, %v46_v38  ;;  %1620 = vmatprep.mubr.msk.f32.mxu1 %vm305_vm0, %v174_v39  ;;  %v203_v37 = vld [vmem:[%s3072_s0 + $0x5e0] sm:$0xff]  ;;  %v78_v38 = vld [vmem:[%s3072_s0 + $0x1f8] sm:$0xff] }
  0x73   :  { %v206_v39 = vld [vmem:[%s3072_s0 + $0x5f8] sm:$0xff] }
  0x75   :  { %830 = vmatmul.mubr.f32.gmra.mrb[30].mxu0 %v45_v40  ;;  %1150 = vmatmul.mubr.f32.gmra.mrb[30].mxu1 %v173_v41  ;;  %v77_v40 = vld [vmem:[%s3072_s0 + $0x1f0] sm:$0xff] }
  0x76   :  { %1557 = vmatprep.mubr.msk.f32.mxu0 %vm305_vm0, %v48_v42  ;;  %1621 = vmatprep.mubr.msk.f32.mxu1 %vm305_vm0, %v176_v43  ;;  %v205_v41 = vld [vmem:[%s3072_s0 + $0x5f0] sm:$0xff]  ;;  %v80_v42 = vld [vmem:[%s3072_s0 + $0x208] sm:$0xff] }
  0x77   :  { %v208_v43 = vld [vmem:[%s3072_s0 + $0x608] sm:$0xff] }
  0x79   :  { %835 = vmatmul.mubr.f32.gmra.mrb[32].mxu0 %v47_v44  ;;  %1155 = vmatmul.mubr.f32.gmra.mrb[32].mxu1 %v175_v45  ;;  %v79_v44 = vld [vmem:[%s3072_s0 + $0x200] sm:$0xff] }
  0x7a   :  { %1558 = vmatprep.mubr.msk.f32.mxu0 %vm305_vm0, %v50_v46  ;;  %1622 = vmatprep.mubr.msk.f32.mxu1 %vm305_vm0, %v178_v47  ;;  %v207_v45 = vld [vmem:[%s3072_s0 + $0x600] sm:$0xff]  ;;  %v82_v46 = vld [vmem:[%s3072_s0 + $0x218] sm:$0xff] }
  0x7b   :  { %v210_v47 = vld [vmem:[%s3072_s0 + $0x618] sm:$0xff] }
  0x7d   :  { %840 = vmatmul.mubr.f32.gmra.mrb[34].mxu0 %v49_v48  ;;  %1160 = vmatmul.mubr.f32.gmra.mrb[34].mxu1 %v177_v49  ;;  %v81_v48 = vld [vmem:[%s3072_s0 + $0x210] sm:$0xff] }
  0x7e   :  { %1559 = vmatprep.mubr.msk.f32.mxu0 %vm305_vm0, %v52_v50  ;;  %1623 = vmatprep.mubr.msk.f32.mxu1 %vm305_vm0, %v180_v51  ;;  %v209_v49 = vld [vmem:[%s3072_s0 + $0x610] sm:$0xff]  ;;  %v84_v50 = vld [vmem:[%s3072_s0 + $0x228] sm:$0xff] }
  0x7f   :  { %v212_v51 = vld [vmem:[%s3072_s0 + $0x628] sm:$0xff] }
  0x81   :  { %845 = vmatmul.mubr.f32.gmra.mrb[36].mxu0 %v51_v52  ;;  %1165 = vmatmul.mubr.f32.gmra.mrb[36].mxu1 %v179_v53  ;;  %v83_v52 = vld [vmem:[%s3072_s0 + $0x220] sm:$0xff] }
  0x82   :  { %1560 = vmatprep.mubr.msk.f32.mxu0 %vm305_vm0, %v54_v54  ;;  %1624 = vmatprep.mubr.msk.f32.mxu1 %vm305_vm0, %v182_v55  ;;  %v211_v53 = vld [vmem:[%s3072_s0 + $0x620] sm:$0xff]  ;;  %v86_v54 = vld [vmem:[%s3072_s0 + $0x238] sm:$0xff] }
  0x83   :  { %v214_v55 = vld [vmem:[%s3072_s0 + $0x638] sm:$0xff] }
  0x85   :  { %850 = vmatmul.mubr.f32.gmra.mrb[38].mxu0 %v53_v56  ;;  %1170 = vmatmul.mubr.f32.gmra.mrb[38].mxu1 %v181_v57  ;;  %v85_v56 = vld [vmem:[%s3072_s0 + $0x230] sm:$0xff] }
  0x86   :  { %1561 = vmatprep.mubr.msk.f32.mxu0 %vm305_vm0, %v56_v58  ;;  %1625 = vmatprep.mubr.msk.f32.mxu1 %vm305_vm0, %v184_v59  ;;  %v213_v57 = vld [vmem:[%s3072_s0 + $0x630] sm:$0xff]  ;;  %v88_v58 = vld [vmem:[%s3072_s0 + $0x248] sm:$0xff] }
  0x87   :  { %v216_v59 = vld [vmem:[%s3072_s0 + $0x648] sm:$0xff] }
  0x89   :  { %855 = vmatmul.mubr.f32.gmra.mrb[40].mxu0 %v55_v60  ;;  %1175 = vmatmul.mubr.f32.gmra.mrb[40].mxu1 %v183_v61  ;;  %v87_v60 = vld [vmem:[%s3072_s0 + $0x240] sm:$0xff] }
  0x8a   :  { %1562 = vmatprep.mubr.msk.f32.mxu0 %vm305_vm0, %v58_v62  ;;  %1626 = vmatprep.mubr.msk.f32.mxu1 %vm305_vm0, %v186_v63  ;;  %v215_v61 = vld [vmem:[%s3072_s0 + $0x640] sm:$0xff]  ;;  %v90_v62 = vld [vmem:[%s3072_s0 + $0x258] sm:$0xff] }
  0x8b   :  { %v218_v63 = vld [vmem:[%s3072_s0 + $0x658] sm:$0xff] }
  0x8d   :  { %860 = vmatmul.mubr.f32.gmra.mrb[42].mxu0 %v57_v0  ;;  %1180 = vmatmul.mubr.f32.gmra.mrb[42].mxu1 %v185_v1  ;;  %v89_v0 = vld [vmem:[%s3072_s0 + $0x250] sm:$0xff] }
  0x8e   :  { %1563 = vmatprep.mubr.msk.f32.mxu0 %vm305_vm0, %v60_v2  ;;  %1627 = vmatprep.mubr.msk.f32.mxu1 %vm305_vm0, %v188_v3  ;;  %v217_v1 = vld [vmem:[%s3072_s0 + $0x650] sm:$0xff]  ;;  %v92_v2 = vld [vmem:[%s3072_s0 + $0x268] sm:$0xff] }
  0x8f   :  { %v220_v3 = vld [vmem:[%s3072_s0 + $0x668] sm:$0xff] }
  0x91   :  { %865 = vmatmul.mubr.f32.gmra.mrb[44].mxu0 %v59_v4  ;;  %1185 = vmatmul.mubr.f32.gmra.mrb[44].mxu1 %v187_v5  ;;  %v91_v4 = vld [vmem:[%s3072_s0 + $0x260] sm:$0xff] }
  0x92   :  { %1564 = vmatprep.mubr.msk.f32.mxu0 %vm305_vm0, %v62_v6  ;;  %1628 = vmatprep.mubr.msk.f32.mxu1 %vm305_vm0, %v190_v7  ;;  %v219_v5 = vld [vmem:[%s3072_s0 + $0x660] sm:$0xff]  ;;  %v94_v6 = vld [vmem:[%s3072_s0 + $0x278] sm:$0xff] }
  0x93   :  { %v222_v7 = vld [vmem:[%s3072_s0 + $0x678] sm:$0xff] }
  0x95   :  { %870 = vmatmul.mubr.f32.gmra.mrb[46].mxu0 %v61_v8  ;;  %1190 = vmatmul.mubr.f32.gmra.mrb[46].mxu1 %v189_v9  ;;  %v93_v8 = vld [vmem:[%s3072_s0 + $0x270] sm:$0xff] }
  0x96   :  { %1565 = vmatprep.mubr.msk.f32.mxu0 %vm305_vm0, %v64_v10  ;;  %1629 = vmatprep.mubr.msk.f32.mxu1 %vm305_vm0, %v192_v11  ;;  %v221_v9 = vld [vmem:[%s3072_s0 + $0x670] sm:$0xff]  ;;  %v96_v10 = vld [vmem:[%s3072_s0 + $0x288] sm:$0xff] }
  0x97   :  { %v224_v11 = vld [vmem:[%s3072_s0 + $0x688] sm:$0xff] }
  0x99   :  { %875 = vmatmul.mubr.f32.gmra.mrb[48].mxu0 %v63_v12  ;;  %1195 = vmatmul.mubr.f32.gmra.mrb[48].mxu1 %v191_v13  ;;  %v95_v12 = vld [vmem:[%s3072_s0 + $0x280] sm:$0xff] }
  0x9a   :  { %1566 = vmatprep.mubr.msk.f32.mxu0 %vm305_vm0, %v66_v14  ;;  %1630 = vmatprep.mubr.msk.f32.mxu1 %vm305_vm0, %v194_v15  ;;  %v223_v13 = vld [vmem:[%s3072_s0 + $0x680] sm:$0xff]  ;;  %v98_v14 = vld [vmem:[%s3072_s0 + $0x298] sm:$0xff] }
  0x9b   :  { %v226_v15 = vld [vmem:[%s3072_s0 + $0x698] sm:$0xff] }
  0x9d   :  { %880 = vmatmul.mubr.f32.gmra.mrb[50].mxu0 %v65_v16  ;;  %1200 = vmatmul.mubr.f32.gmra.mrb[50].mxu1 %v193_v17  ;;  %v97_v16 = vld [vmem:[%s3072_s0 + $0x290] sm:$0xff] }
  0x9e   :  { %1567 = vmatprep.mubr.msk.f32.mxu0 %vm305_vm0, %v68_v18  ;;  %1631 = vmatprep.mubr.msk.f32.mxu1 %vm305_vm0, %v196_v19  ;;  %v225_v17 = vld [vmem:[%s3072_s0 + $0x690] sm:$0xff]  ;;  %v100_v18 = vld [vmem:[%s3072_s0 + $0x2a8] sm:$0xff] }
  0x9f   :  { %v228_v19 = vld [vmem:[%s3072_s0 + $0x6a8] sm:$0xff] }
  0xa1   :  { %885 = vmatmul.mubr.f32.gmra.mrb[52].mxu0 %v67_v20  ;;  %1205 = vmatmul.mubr.f32.gmra.mrb[52].mxu1 %v195_v21  ;;  %v99_v20 = vld [vmem:[%s3072_s0 + $0x2a0] sm:$0xff] }
  0xa2   :  { %1568 = vmatprep.mubr.msk.f32.mxu0 %vm305_vm0, %v70_v22  ;;  %1632 = vmatprep.mubr.msk.f32.mxu1 %vm305_vm0, %v198_v23  ;;  %v227_v21 = vld [vmem:[%s3072_s0 + $0x6a0] sm:$0xff]  ;;  %v102_v22 = vld [vmem:[%s3072_s0 + $0x2b8] sm:$0xff] }
  0xa3   :  { %v230_v23 = vld [vmem:[%s3072_s0 + $0x6b8] sm:$0xff] }
  0xa5   :  { %890 = vmatmul.mubr.f32.gmra.mrb[54].mxu0 %v69_v24  ;;  %1210 = vmatmul.mubr.f32.gmra.mrb[54].mxu1 %v197_v25  ;;  %v101_v24 = vld [vmem:[%s3072_s0 + $0x2b0] sm:$0xff] }
  0xa6   :  { %1569 = vmatprep.mubr.msk.f32.mxu0 %vm305_vm0, %v72_v26  ;;  %1633 = vmatprep.mubr.msk.f32.mxu1 %vm305_vm0, %v200_v27  ;;  %v229_v25 = vld [vmem:[%s3072_s0 + $0x6b0] sm:$0xff]  ;;  %v104_v26 = vld [vmem:[%s3072_s0 + $0x2c8] sm:$0xff] }
  0xa7   :  { %v232_v27 = vld [vmem:[%s3072_s0 + $0x6c8] sm:$0xff] }
  0xa9   :  { %895 = vmatmul.mubr.f32.gmra.mrb[56].mxu0 %v71_v28  ;;  %1215 = vmatmul.mubr.f32.gmra.mrb[56].mxu1 %v199_v29  ;;  %v103_v28 = vld [vmem:[%s3072_s0 + $0x2c0] sm:$0xff] }
  0xaa   :  { %1570 = vmatprep.mubr.msk.f32.mxu0 %vm305_vm0, %v74_v30  ;;  %1634 = vmatprep.mubr.msk.f32.mxu1 %vm305_vm0, %v202_v31  ;;  %v231_v29 = vld [vmem:[%s3072_s0 + $0x6c0] sm:$0xff]  ;;  %v106_v30 = vld [vmem:[%s3072_s0 + $0x2d8] sm:$0xff] }
  0xab   :  { %v234_v31 = vld [vmem:[%s3072_s0 + $0x6d8] sm:$0xff] }
  0xad   :  { %900 = vmatmul.mubr.f32.gmra.mrb[58].mxu0 %v73_v32  ;;  %1220 = vmatmul.mubr.f32.gmra.mrb[58].mxu1 %v201_v33  ;;  %v105_v32 = vld [vmem:[%s3072_s0 + $0x2d0] sm:$0xff] }
  0xae   :  { %1571 = vmatprep.mubr.msk.f32.mxu0 %vm305_vm0, %v76_v34  ;;  %1635 = vmatprep.mubr.msk.f32.mxu1 %vm305_vm0, %v204_v35  ;;  %v233_v33 = vld [vmem:[%s3072_s0 + $0x6d0] sm:$0xff]  ;;  %v108_v34 = vld [vmem:[%s3072_s0 + $0x2e8] sm:$0xff] }
  0xaf   :  { %v236_v35 = vld [vmem:[%s3072_s0 + $0x6e8] sm:$0xff] }
  0xb1   :  { %905 = vmatmul.mubr.f32.gmra.mrb[60].mxu0 %v75_v36  ;;  %1225 = vmatmul.mubr.f32.gmra.mrb[60].mxu1 %v203_v37  ;;  %v107_v36 = vld [vmem:[%s3072_s0 + $0x2e0] sm:$0xff] }
  0xb2   :  { %1572 = vmatprep.mubr.msk.f32.mxu0 %vm305_vm0, %v78_v38  ;;  %1636 = vmatprep.mubr.msk.f32.mxu1 %vm305_vm0, %v206_v39  ;;  %v235_v37 = vld [vmem:[%s3072_s0 + $0x6e0] sm:$0xff]  ;;  %v110_v38 = vld [vmem:[%s3072_s0 + $0x2f8] sm:$0xff] }
  0xb3   :  { %v238_v39 = vld [vmem:[%s3072_s0 + $0x6f8] sm:$0xff] }
  0xb5   :  { %910 = vmatmul.mubr.f32.gmra.mrb[62].mxu0 %v77_v40  ;;  %1230 = vmatmul.mubr.f32.gmra.mrb[62].mxu1 %v205_v41  ;;  %v109_v40 = vld [vmem:[%s3072_s0 + $0x2f0] sm:$0xff] }
  0xb6   :  { %1573 = vmatprep.mubr.msk.f32.mxu0 %vm305_vm0, %v80_v42  ;;  %1637 = vmatprep.mubr.msk.f32.mxu1 %vm305_vm0, %v208_v43  ;;  %v237_v41 = vld [vmem:[%s3072_s0 + $0x6f0] sm:$0xff]  ;;  %v112_v42 = vld [vmem:[%s3072_s0 + $0x308] sm:$0xff] }
  0xb7   :  { %v240_v43 = vld [vmem:[%s3072_s0 + $0x708] sm:$0xff] }
  0xb9   :  { %915 = vmatmul.mubr.f32.gmra.mrb[64].mxu0 %v79_v44  ;;  %1235 = vmatmul.mubr.f32.gmra.mrb[64].mxu1 %v207_v45  ;;  %v111_v44 = vld [vmem:[%s3072_s0 + $0x300] sm:$0xff] }
  0xba   :  { %1574 = vmatprep.mubr.msk.f32.mxu0 %vm305_vm0, %v82_v46  ;;  %1638 = vmatprep.mubr.msk.f32.mxu1 %vm305_vm0, %v210_v47  ;;  %v239_v45 = vld [vmem:[%s3072_s0 + $0x700] sm:$0xff]  ;;  %v114_v46 = vld [vmem:[%s3072_s0 + $0x318] sm:$0xff] }
  0xbb   :  { %v242_v47 = vld [vmem:[%s3072_s0 + $0x718] sm:$0xff] }
  0xbd   :  { %920 = vmatmul.mubr.f32.gmra.mrb[66].mxu0 %v81_v48  ;;  %1240 = vmatmul.mubr.f32.gmra.mrb[66].mxu1 %v209_v49  ;;  %v113_v48 = vld [vmem:[%s3072_s0 + $0x310] sm:$0xff] }
  0xbe   :  { %1575 = vmatprep.mubr.msk.f32.mxu0 %vm305_vm0, %v84_v50  ;;  %1639 = vmatprep.mubr.msk.f32.mxu1 %vm305_vm0, %v212_v51  ;;  %v241_v49 = vld [vmem:[%s3072_s0 + $0x710] sm:$0xff]  ;;  %v116_v50 = vld [vmem:[%s3072_s0 + $0x328] sm:$0xff] }
  0xbf   :  { %v244_v51 = vld [vmem:[%s3072_s0 + $0x728] sm:$0xff] }
  0xc1   :  { %925 = vmatmul.mubr.f32.gmra.mrb[68].mxu0 %v83_v52  ;;  %1245 = vmatmul.mubr.f32.gmra.mrb[68].mxu1 %v211_v53  ;;  %v115_v52 = vld [vmem:[%s3072_s0 + $0x320] sm:$0xff] }
  0xc2   :  { %1576 = vmatprep.mubr.msk.f32.mxu0 %vm305_vm0, %v86_v54  ;;  %1640 = vmatprep.mubr.msk.f32.mxu1 %vm305_vm0, %v214_v55  ;;  %v243_v53 = vld [vmem:[%s3072_s0 + $0x720] sm:$0xff]  ;;  %v118_v54 = vld [vmem:[%s3072_s0 + $0x338] sm:$0xff] }
  0xc3   :  { %v246_v55 = vld [vmem:[%s3072_s0 + $0x738] sm:$0xff] }
  0xc5   :  { %930 = vmatmul.mubr.f32.gmra.mrb[70].mxu0 %v85_v56  ;;  %1250 = vmatmul.mubr.f32.gmra.mrb[70].mxu1 %v213_v57  ;;  %v117_v56 = vld [vmem:[%s3072_s0 + $0x330] sm:$0xff] }
  0xc6   :  { %1577 = vmatprep.mubr.msk.f32.mxu0 %vm305_vm0, %v88_v58  ;;  %1641 = vmatprep.mubr.msk.f32.mxu1 %vm305_vm0, %v216_v59  ;;  %v245_v57 = vld [vmem:[%s3072_s0 + $0x730] sm:$0xff]  ;;  %v120_v58 = vld [vmem:[%s3072_s0 + $0x348] sm:$0xff] }
  0xc7   :  { %v248_v59 = vld [vmem:[%s3072_s0 + $0x748] sm:$0xff] }
  0xc9   :  { %935 = vmatmul.mubr.f32.gmra.mrb[72].mxu0 %v87_v60  ;;  %1255 = vmatmul.mubr.f32.gmra.mrb[72].mxu1 %v215_v61  ;;  %v119_v60 = vld [vmem:[%s3072_s0 + $0x340] sm:$0xff] }
  0xca   :  { %1578 = vmatprep.mubr.msk.f32.mxu0 %vm305_vm0, %v90_v62  ;;  %1642 = vmatprep.mubr.msk.f32.mxu1 %vm305_vm0, %v218_v63  ;;  %v247_v61 = vld [vmem:[%s3072_s0 + $0x740] sm:$0xff]  ;;  %v122_v62 = vld [vmem:[%s3072_s0 + $0x358] sm:$0xff] }
  0xcb   :  { %v250_v63 = vld [vmem:[%s3072_s0 + $0x758] sm:$0xff] }
  0xcd   :  { %940 = vmatmul.mubr.f32.gmra.mrb[74].mxu0 %v89_v0  ;;  %1260 = vmatmul.mubr.f32.gmra.mrb[74].mxu1 %v217_v1  ;;  %v2649_v0 = vld [vmem:[%s3074_s2] ss:$0 sm:$0xff]  ;;  %v121_v1 = vld [vmem:[%s3072_s0 + $0x350] sm:$0xff] }
  0xce   :  { %1579 = vmatprep.mubr.msk.f32.mxu0 %vm305_vm0, %v92_v2  ;;  %1643 = vmatprep.mubr.msk.f32.mxu1 %vm305_vm0, %v220_v3  ;;  %v249_v2 = vld [vmem:[%s3072_s0 + $0x750] sm:$0xff]  ;;  %v124_v3 = vld [vmem:[%s3072_s0 + $0x368] sm:$0xff] }
  0xd1   :  { %945 = vmatmul.mubr.f32.gmra.mrb[76].mxu0 %v91_v4  ;;  %1265 = vmatmul.mubr.f32.gmra.mrb[76].mxu1 %v219_v5  ;;  %v252_v4 = vld [vmem:[%s3072_s0 + $0x768] sm:$0xff] }
  0xd2   :  { %1580 = vmatprep.mubr.msk.f32.mxu0 %vm305_vm0, %v94_v6  ;;  %1644 = vmatprep.mubr.msk.f32.mxu1 %vm305_vm0, %v222_v7 }
  0xd5   :  { %950 = vmatmul.mubr.f32.gmra.mrb[78].mxu0 %v93_v8  ;;  %1270 = vmatmul.mubr.f32.gmra.mrb[78].mxu1 %v221_v9 }
  0xd6   :  { %1581 = vmatprep.mubr.msk.f32.mxu0 %vm305_vm0, %v96_v10  ;;  %1645 = vmatprep.mubr.msk.f32.mxu1 %vm305_vm0, %v224_v11  ;;  %v123_v11 = vld [vmem:[%s3072_s0 + $0x360] sm:$0xff] }
  0xd9   :  { %955 = vmatmul.mubr.f32.gmra.mrb[80].mxu0 %v95_v12  ;;  %1275 = vmatmul.mubr.f32.gmra.mrb[80].mxu1 %v223_v13  ;;  %v251_v12 = vld [vmem:[%s3072_s0 + $0x760] sm:$0xff]  ;;  %v126_v13 = vld [vmem:[%s3072_s0 + $0x378] sm:$0xff] }
  0xda   :  { %1582 = vmatprep.mubr.msk.f32.mxu0 %vm305_vm0, %v98_v14  ;;  %1646 = vmatprep.mubr.msk.f32.mxu1 %vm305_vm0, %v226_v15  ;;  %v254_v14 = vld [vmem:[%s3072_s0 + $0x778] sm:$0xff] }
  0xdd   :  { %960 = vmatmul.mubr.f32.gmra.mrb[82].mxu0 %v97_v16  ;;  %1280 = vmatmul.mubr.f32.gmra.mrb[82].mxu1 %v225_v17 }
  0xde   :  { %1583 = vmatprep.mubr.msk.f32.mxu0 %vm305_vm0, %v100_v18  ;;  %1647 = vmatprep.mubr.msk.f32.mxu1 %vm305_vm0, %v228_v19 }
  0xe1   :  { %965 = vmatmul.mubr.f32.gmra.mrb[84].mxu0 %v99_v20  ;;  %1285 = vmatmul.mubr.f32.gmra.mrb[84].mxu1 %v227_v21  ;;  %v125_v21 = vld [vmem:[%s3072_s0 + $0x370] sm:$0xff] }
  0xe2   :  { %1584 = vmatprep.mubr.msk.f32.mxu0 %vm305_vm0, %v102_v22  ;;  %1648 = vmatprep.mubr.msk.f32.mxu1 %vm305_vm0, %v230_v23  ;;  %v253_v22 = vld [vmem:[%s3072_s0 + $0x770] sm:$0xff]  ;;  %v128_v23 = vld [vmem:[%s3072_s0 + $0x388] sm:$0xff] }
  0xe5   :  { %970 = vmatmul.mubr.f32.gmra.mrb[86].mxu0 %v101_v24  ;;  %1290 = vmatmul.mubr.f32.gmra.mrb[86].mxu1 %v229_v25  ;;  %v256_v24 = vld [vmem:[%s3072_s0 + $0x788] sm:$0xff] }
  0xe6   :  { %1585 = vmatprep.mubr.msk.f32.mxu0 %vm305_vm0, %v104_v26  ;;  %1649 = vmatprep.mubr.msk.f32.mxu1 %vm305_vm0, %v232_v27 }
  0xe9   :  { %975 = vmatmul.mubr.f32.gmra.mrb[88].mxu0 %v103_v28  ;;  %1295 = vmatmul.mubr.f32.gmra.mrb[88].mxu1 %v231_v29 }
  0xea   :  { %1586 = vmatprep.mubr.msk.f32.mxu0 %vm305_vm0, %v106_v30  ;;  %1650 = vmatprep.mubr.msk.f32.mxu1 %vm305_vm0, %v234_v31  ;;  %v127_v31 = vld [vmem:[%s3072_s0 + $0x380] sm:$0xff] }
  0xed   :  { %980 = vmatmul.mubr.f32.gmra.mrb[90].mxu0 %v105_v32  ;;  %1300 = vmatmul.mubr.f32.gmra.mrb[90].mxu1 %v233_v33  ;;  %v255_v32 = vld [vmem:[%s3072_s0 + $0x780] sm:$0xff]  ;;  %v130_v33 = vld [vmem:[%s3072_s0 + $0x398] sm:$0xff] }
  0xee   :  { %1587 = vmatprep.mubr.msk.f32.mxu0 %vm305_vm0, %v108_v34  ;;  %1651 = vmatprep.mubr.msk.f32.mxu1 %vm305_vm0, %v236_v35  ;;  %v258_v34 = vld [vmem:[%s3072_s0 + $0x798] sm:$0xff] }
  0xf1   :  { %985 = vmatmul.mubr.f32.gmra.mrb[92].mxu0 %v107_v36  ;;  %1305 = vmatmul.mubr.f32.gmra.mrb[92].mxu1 %v235_v37 }
  0xf2   :  { %1588 = vmatprep.mubr.msk.f32.mxu0 %vm305_vm0, %v110_v38  ;;  %1652 = vmatprep.mubr.msk.f32.mxu1 %vm305_vm0, %v238_v39 }
  0xf5   :  { %990 = vmatmul.mubr.f32.gmra.mrb[94].mxu0 %v109_v40  ;;  %1310 = vmatmul.mubr.f32.gmra.mrb[94].mxu1 %v237_v41  ;;  %v129_v41 = vld [vmem:[%s3072_s0 + $0x390] sm:$0xff] }
  0xf6   :  { %1589 = vmatprep.mubr.msk.f32.mxu0 %vm305_vm0, %v112_v42  ;;  %1653 = vmatprep.mubr.msk.f32.mxu1 %vm305_vm0, %v240_v43  ;;  %v257_v42 = vld [vmem:[%s3072_s0 + $0x790] sm:$0xff]  ;;  %v132_v43 = vld [vmem:[%s3072_s0 + $0x3a8] sm:$0xff] }
  0xf9   :  { %995 = vmatmul.mubr.f32.gmra.mrb[96].mxu0 %v111_v44  ;;  %1315 = vmatmul.mubr.f32.gmra.mrb[96].mxu1 %v239_v45  ;;  %v260_v44 = vld [vmem:[%s3072_s0 + $0x7a8] sm:$0xff] }
  0xfa   :  { %1590 = vmatprep.mubr.msk.f32.mxu0 %vm305_vm0, %v114_v46  ;;  %1654 = vmatprep.mubr.msk.f32.mxu1 %vm305_vm0, %v242_v47 }
  0xfd   :  { %1000 = vmatmul.mubr.f32.gmra.mrb[98].mxu0 %v113_v48  ;;  %1320 = vmatmul.mubr.f32.gmra.mrb[98].mxu1 %v241_v49 }
  0xfe   :  { %1591 = vmatprep.mubr.msk.f32.mxu0 %vm305_vm0, %v116_v50  ;;  %1655 = vmatprep.mubr.msk.f32.mxu1 %vm305_vm0, %v244_v51  ;;  %v131_v51 = vld [vmem:[%s3072_s0 + $0x3a0] sm:$0xff] }
 0x101   :  { %1005 = vmatmul.mubr.f32.gmra.mrb[100].mxu0 %v115_v52  ;;  %1325 = vmatmul.mubr.f32.gmra.mrb[100].mxu1 %v243_v53  ;;  %v259_v52 = vld [vmem:[%s3072_s0 + $0x7a0] sm:$0xff]  ;;  %v134_v53 = vld [vmem:[%s3072_s0 + $0x3b8] sm:$0xff] }
 0x102   :  { %1592 = vmatprep.mubr.msk.f32.mxu0 %vm305_vm0, %v118_v54  ;;  %1656 = vmatprep.mubr.msk.f32.mxu1 %vm305_vm0, %v246_v55  ;;  %v262_v54 = vld [vmem:[%s3072_s0 + $0x7b8] sm:$0xff] }
 0x105   :  { %1010 = vmatmul.mubr.f32.gmra.mrb[102].mxu0 %v117_v56  ;;  %1330 = vmatmul.mubr.f32.gmra.mrb[102].mxu1 %v245_v57 }
 0x106   :  { %1593 = vmatprep.mubr.msk.f32.mxu0 %vm305_vm0, %v120_v58  ;;  %1657 = vmatprep.mubr.msk.f32.mxu1 %vm305_vm0, %v248_v59 }
 0x109   :  { %1015 = vmatmul.mubr.f32.gmra.mrb[104].mxu0 %v119_v60  ;;  %1335 = vmatmul.mubr.f32.gmra.mrb[104].mxu1 %v247_v61  ;;  %v133_v61 = vld [vmem:[%s3072_s0 + $0x3b0] sm:$0xff] }
 0x10a   :  { %1594 = vmatprep.mubr.msk.f32.mxu0 %vm305_vm0, %v122_v62  ;;  %1658 = vmatprep.mubr.msk.f32.mxu1 %vm305_vm0, %v250_v63  ;;  %v261_v62 = vld [vmem:[%s3072_s0 + $0x7b0] sm:$0xff]  ;;  %v136_v63 = vld [vmem:[%s3072_s0 + $0x3c8] sm:$0xff] }
 0x10c   :  { %v756_v5 = vpop.f32.mrb[0].mxu0  ;;  %v1076_v6 = vpop.f32.mrb[0].mxu1 }
 0x10d   :  { %v757_v7 = vadd.f32 %v2649_v0, %v756_v5  ;;  %v1077_v8 = vadd.f32 %v2649_v0, %v1076_v6  ;;  %v758_v9 = vpop.f32.mrb[1].mxu0  ;;  %1020 = vmatmul.mubr.f32.gmra.mrb[106].mxu0 %v121_v1  ;;  %v1078_v10 = vpop.f32.mrb[1].mxu1  ;;  %1340 = vmatmul.mubr.f32.gmra.mrb[106].mxu1 %v249_v2  ;;  %v264_v1 = vld [vmem:[%s3072_s0 + $0x7c8] sm:$0xff] }
 0x10e   :  { %1595 = vmatprep.mubr.msk.f32.mxu0 %vm305_vm0, %v124_v3  ;;  %1659 = vmatprep.mubr.msk.f32.mxu1 %vm305_vm0, %v252_v4  ;;  %v263_v9 = vld [vmem:[%s3072_s0 + $0x7c0] sm:$0xff]  ;;  %v138_v10 = vld [vmem:[%s3072_s0 + $0x3d8] sm:$0xff] }
 0x10f   :  { %1396 = vst.msk [vmem:[#allocation2] sm:$0xff] %vm1395_vm1, %v757_v7  ;;  %1460 = vst.msk [vmem:[#allocation2 + $0x200] sm:$0xff] %vm1395_vm1, %v1077_v8  ;;  %v135_v8 = vld [vmem:[%s3072_s0 + $0x3c0] sm:$0xff] }
 0x110   :  { %v761_v15 = vpop.f32.mrb[2].mxu0  ;;  %v1081_v16 = vpop.f32.mrb[2].mxu1 }
 0x111   :  { %v762_v17 = vadd.f32 %v2649_v0, %v761_v15  ;;  %v1082_v18 = vadd.f32 %v2649_v0, %v1081_v16  ;;  %v763_v19 = vpop.f32.mrb[3].mxu0  ;;  %1025 = vmatmul.mubr.f32.gmra.mrb[108].mxu0 %v123_v11  ;;  %v1083_v20 = vpop.f32.mrb[3].mxu1  ;;  %1345 = vmatmul.mubr.f32.gmra.mrb[108].mxu1 %v251_v12  ;;  %v266_v11 = vld [vmem:[%s3072_s0 + $0x7d8] sm:$0xff] }
 0x112   :  { %1596 = vmatprep.mubr.msk.f32.mxu0 %vm305_vm0, %v126_v13  ;;  %1660 = vmatprep.mubr.msk.f32.mxu1 %vm305_vm0, %v254_v14  ;;  %v265_v19 = vld [vmem:[%s3072_s0 + $0x7d0] sm:$0xff]  ;;  %v140_v20 = vld [vmem:[%s3072_s0 + $0x3e8] sm:$0xff] }
 0x113   :  { %1397 = vst.msk [vmem:[#allocation2 + $0x8] sm:$0xff] %vm1395_vm1, %v762_v17  ;;  %1461 = vst.msk [vmem:[#allocation2 + $0x208] sm:$0xff] %vm1395_vm1, %v1082_v18  ;;  %v137_v18 = vld [vmem:[%s3072_s0 + $0x3d0] sm:$0xff] }
 0x114   :  { %v766_v25 = vpop.f32.mrb[4].mxu0  ;;  %v1086_v26 = vpop.f32.mrb[4].mxu1 }
 0x115   :  { %v767_v27 = vadd.f32 %v2649_v0, %v766_v25  ;;  %v1087_v28 = vadd.f32 %v2649_v0, %v1086_v26  ;;  %v768_v29 = vpop.f32.mrb[5].mxu0  ;;  %1030 = vmatmul.mubr.f32.gmra.mrb[110].mxu0 %v125_v21  ;;  %v1088_v30 = vpop.f32.mrb[5].mxu1  ;;  %1350 = vmatmul.mubr.f32.gmra.mrb[110].mxu1 %v253_v22  ;;  %v268_v21 = vld [vmem:[%s3072_s0 + $0x7e8] sm:$0xff] }
 0x116   :  { %1597 = vmatprep.mubr.msk.f32.mxu0 %vm305_vm0, %v128_v23  ;;  %1661 = vmatprep.mubr.msk.f32.mxu1 %vm305_vm0, %v256_v24  ;;  %v267_v29 = vld [vmem:[%s3072_s0 + $0x7e0] sm:$0xff]  ;;  %v142_v30 = vld [vmem:[%s3072_s0 + $0x3f8] sm:$0xff] }
 0x117   :  { %1398 = vst.msk [vmem:[#allocation2 + $0x10] sm:$0xff] %vm1395_vm1, %v767_v27  ;;  %1462 = vst.msk [vmem:[#allocation2 + $0x210] sm:$0xff] %vm1395_vm1, %v1087_v28  ;;  %v139_v28 = vld [vmem:[%s3072_s0 + $0x3e0] sm:$0xff] }
 0x118   :  { %v771_v35 = vpop.f32.mrb[6].mxu0  ;;  %v1091_v36 = vpop.f32.mrb[6].mxu1 }
 0x119   :  { %v772_v37 = vadd.f32 %v2649_v0, %v771_v35  ;;  %v1092_v38 = vadd.f32 %v2649_v0, %v1091_v36  ;;  %v773_v39 = vpop.f32.mrb[7].mxu0  ;;  %1035 = vmatmul.mubr.f32.gmra.mrb[112].mxu0 %v127_v31  ;;  %v1093_v40 = vpop.f32.mrb[7].mxu1  ;;  %1355 = vmatmul.mubr.f32.gmra.mrb[112].mxu1 %v255_v32  ;;  %v270_v31 = vld [vmem:[%s3072_s0 + $0x7f8] sm:$0xff] }
 0x11a   :  { %1598 = vmatprep.mubr.msk.f32.mxu0 %vm305_vm0, %v130_v33  ;;  %1662 = vmatprep.mubr.msk.f32.mxu1 %vm305_vm0, %v258_v34  ;;  %v269_v39 = vld [vmem:[%s3072_s0 + $0x7f0] sm:$0xff] }
 0x11b   :  { %1399 = vst.msk [vmem:[#allocation2 + $0x18] sm:$0xff] %vm1395_vm1, %v772_v37  ;;  %1463 = vst.msk [vmem:[#allocation2 + $0x218] sm:$0xff] %vm1395_vm1, %v1092_v38  ;;  %v141_v38 = vld [vmem:[%s3072_s0 + $0x3f0] sm:$0xff] }
 0x11c   :  { %v776_v45 = vpop.f32.mrb[8].mxu0  ;;  %v1096_v46 = vpop.f32.mrb[8].mxu1 }
 0x11d   :  { %v777_v47 = vadd.f32 %v2649_v0, %v776_v45  ;;  %v1097_v48 = vadd.f32 %v2649_v0, %v1096_v46  ;;  %v778_v49 = vpop.f32.mrb[9].mxu0  ;;  %1040 = vmatmul.mubr.f32.gmra.mrb[114].mxu0 %v129_v41  ;;  %v1098_v50 = vpop.f32.mrb[9].mxu1  ;;  %1360 = vmatmul.mubr.f32.gmra.mrb[114].mxu1 %v257_v42 }
 0x11e   :  { %1599 = vmatprep.mubr.msk.f32.mxu0 %vm305_vm0, %v132_v43  ;;  %1663 = vmatprep.mubr.msk.f32.mxu1 %vm305_vm0, %v260_v44 }
 0x11f   :  { %1400 = vst.msk [vmem:[#allocation2 + $0x20] sm:$0xff] %vm1395_vm1, %v777_v47  ;;  %1464 = vst.msk [vmem:[#allocation2 + $0x220] sm:$0xff] %vm1395_vm1, %v1097_v48 }
 0x120   :  { %v781_v55 = vpop.f32.mrb[10].mxu0  ;;  %v1101_v56 = vpop.f32.mrb[10].mxu1 }
 0x121   :  { %v782_v57 = vadd.f32 %v2649_v0, %v781_v55  ;;  %v1102_v58 = vadd.f32 %v2649_v0, %v1101_v56  ;;  %v783_v59 = vpop.f32.mrb[11].mxu0  ;;  %1045 = vmatmul.mubr.f32.gmra.mrb[116].mxu0 %v131_v51  ;;  %v1103_v60 = vpop.f32.mrb[11].mxu1  ;;  %1365 = vmatmul.mubr.f32.gmra.mrb[116].mxu1 %v259_v52 }
 0x122   :  { %1600 = vmatprep.mubr.msk.f32.mxu0 %vm305_vm0, %v134_v53  ;;  %1664 = vmatprep.mubr.msk.f32.mxu1 %vm305_vm0, %v262_v54 }
 0x123   :  { %1401 = vst.msk [vmem:[#allocation2 + $0x28] sm:$0xff] %vm1395_vm1, %v782_v57  ;;  %1465 = vst.msk [vmem:[#allocation2 + $0x228] sm:$0xff] %vm1395_vm1, %v1102_v58 }
 0x124   :  { %v786_v2 = vpop.f32.mrb[12].mxu0  ;;  %v1106_v3 = vpop.f32.mrb[12].mxu1 }
 0x125   :  { %v787_v4 = vadd.f32 %v2649_v0, %v786_v2  ;;  %v1107_v5 = vadd.f32 %v2649_v0, %v1106_v3  ;;  %v788_v6 = vpop.f32.mrb[13].mxu0  ;;  %1050 = vmatmul.mubr.f32.gmra.mrb[118].mxu0 %v133_v61  ;;  %v1108_v7 = vpop.f32.mrb[13].mxu1  ;;  %1370 = vmatmul.mubr.f32.gmra.mrb[118].mxu1 %v261_v62 }
 0x126   :  { %1601 = vmatprep.mubr.msk.f32.mxu0 %vm305_vm0, %v136_v63  ;;  %1665 = vmatprep.mubr.msk.f32.mxu1 %vm305_vm0, %v264_v1 }
 0x127   :  { %1402 = vst.msk [vmem:[#allocation2 + $0x30] sm:$0xff] %vm1395_vm1, %v787_v4  ;;  %1466 = vst.msk [vmem:[#allocation2 + $0x230] sm:$0xff] %vm1395_vm1, %v1107_v5 }
 0x128   :  { %v791_v12 = vpop.f32.mrb[14].mxu0  ;;  %v1111_v13 = vpop.f32.mrb[14].mxu1 }
 0x129   :  { %v792_v14 = vadd.f32 %v2649_v0, %v791_v12  ;;  %v1112_v15 = vadd.f32 %v2649_v0, %v1111_v13  ;;  %v793_v16 = vpop.f32.mrb[15].mxu0  ;;  %1055 = vmatmul.mubr.f32.gmra.mrb[120].mxu0 %v135_v8  ;;  %v1113_v17 = vpop.f32.mrb[15].mxu1  ;;  %1375 = vmatmul.mubr.f32.gmra.mrb[120].mxu1 %v263_v9 }
 0x12a   :  { %1602 = vmatprep.mubr.msk.f32.mxu0 %vm305_vm0, %v138_v10  ;;  %1666 = vmatprep.mubr.msk.f32.mxu1 %vm305_vm0, %v266_v11 }
 0x12b   :  { %1403 = vst.msk [vmem:[#allocation2 + $0x38] sm:$0xff] %vm1395_vm1, %v792_v14  ;;  %1467 = vst.msk [vmem:[#allocation2 + $0x238] sm:$0xff] %vm1395_vm1, %v1112_v15 }
 0x12c   :  { %v796_v22 = vpop.f32.mrb[16].mxu0  ;;  %v1116_v23 = vpop.f32.mrb[16].mxu1 }
 0x12d   :  { %v797_v24 = vadd.f32 %v2649_v0, %v796_v22  ;;  %v1117_v25 = vadd.f32 %v2649_v0, %v1116_v23  ;;  %v798_v26 = vpop.f32.mrb[17].mxu0  ;;  %1060 = vmatmul.mubr.f32.gmra.mrb[122].mxu0 %v137_v18  ;;  %v1118_v27 = vpop.f32.mrb[17].mxu1  ;;  %1380 = vmatmul.mubr.f32.gmra.mrb[122].mxu1 %v265_v19 }
 0x12e   :  { %1603 = vmatprep.mubr.msk.f32.mxu0 %vm305_vm0, %v140_v20  ;;  %1667 = vmatprep.mubr.msk.f32.mxu1 %vm305_vm0, %v268_v21 }
 0x12f   :  { %1404 = vst.msk [vmem:[#allocation2 + $0x40] sm:$0xff] %vm1395_vm1, %v797_v24  ;;  %1468 = vst.msk [vmem:[#allocation2 + $0x240] sm:$0xff] %vm1395_vm1, %v1117_v25 }
 0x130   :  { %v801_v32 = vpop.f32.mrb[18].mxu0  ;;  %v1121_v33 = vpop.f32.mrb[18].mxu1 }
 0x131   :  { %v802_v34 = vadd.f32 %v2649_v0, %v801_v32  ;;  %v1122_v35 = vadd.f32 %v2649_v0, %v1121_v33  ;;  %v803_v36 = vpop.f32.mrb[19].mxu0  ;;  %1065 = vmatmul.mubr.f32.gmra.mrb[124].mxu0 %v139_v28  ;;  %v1123_v37 = vpop.f32.mrb[19].mxu1  ;;  %1385 = vmatmul.mubr.f32.gmra.mrb[124].mxu1 %v267_v29 }
 0x132   :  { %1604 = vmatprep.mubr.msk.f32.mxu0 %vm305_vm0, %v142_v30  ;;  %1668 = vmatprep.mubr.msk.f32.mxu1 %vm305_vm0, %v270_v31 }
 0x133   :  { %1405 = vst.msk [vmem:[#allocation2 + $0x48] sm:$0xff] %vm1395_vm1, %v802_v34  ;;  %1469 = vst.msk [vmem:[#allocation2 + $0x248] sm:$0xff] %vm1395_vm1, %v1122_v35 }
 0x134   :  { %v806_v40 = vpop.f32.mrb[20].mxu0  ;;  %v1126_v41 = vpop.f32.mrb[20].mxu1 }
 0x135   :  { %v807_v42 = vadd.f32 %v2649_v0, %v806_v40  ;;  %v1127_v43 = vadd.f32 %v2649_v0, %v1126_v41  ;;  %v808_v44 = vpop.f32.mrb[21].mxu0  ;;  %1070 = vmatmul.mubr.f32.gmra.mrb[126].mxu0 %v141_v38  ;;  %v1128_v45 = vpop.f32.mrb[21].mxu1  ;;  %1390 = vmatmul.mubr.f32.gmra.mrb[126].mxu1 %v269_v39 }
 0x137   :  { %1406 = vst.msk [vmem:[#allocation2 + $0x50] sm:$0xff] %vm1395_vm1, %v807_v42  ;;  %1470 = vst.msk [vmem:[#allocation2 + $0x250] sm:$0xff] %vm1395_vm1, %v1127_v43 }
 0x138   :  { %v811_v46 = vpop.f32.mrb[22].mxu0  ;;  %v1131_v47 = vpop.f32.mrb[22].mxu1 }
 0x139   :  { %v812_v48 = vadd.f32 %v2649_v0, %v811_v46  ;;  %v1132_v49 = vadd.f32 %v2649_v0, %v1131_v47  ;;  %v813_v50 = vpop.f32.mrb[23].mxu0  ;;  %v1133_v51 = vpop.f32.mrb[23].mxu1 }
 0x13b   :  { %1407 = vst.msk [vmem:[#allocation2 + $0x58] sm:$0xff] %vm1395_vm1, %v812_v48  ;;  %1471 = vst.msk [vmem:[#allocation2 + $0x258] sm:$0xff] %vm1395_vm1, %v1132_v49 }
 0x13c   :  { %v816_v52 = vpop.f32.mrb[24].mxu0  ;;  %v1136_v53 = vpop.f32.mrb[24].mxu1 }
 0x13d   :  { %v817_v54 = vadd.f32 %v2649_v0, %v816_v52  ;;  %v1137_v55 = vadd.f32 %v2649_v0, %v1136_v53  ;;  %v818_v56 = vpop.f32.mrb[25].mxu0  ;;  %v1138_v57 = vpop.f32.mrb[25].mxu1 }
 0x13f   :  { %1408 = vst.msk [vmem:[#allocation2 + $0x60] sm:$0xff] %vm1395_vm1, %v817_v54  ;;  %1472 = vst.msk [vmem:[#allocation2 + $0x260] sm:$0xff] %vm1395_vm1, %v1137_v55 }
 0x140   :  { %v821_v58 = vpop.f32.mrb[26].mxu0  ;;  %v1141_v59 = vpop.f32.mrb[26].mxu1 }
 0x141   :  { %v822_v60 = vadd.f32 %v2649_v0, %v821_v58  ;;  %v1142_v61 = vadd.f32 %v2649_v0, %v1141_v59  ;;  %v823_v62 = vpop.f32.mrb[27].mxu0  ;;  %v1143_v63 = vpop.f32.mrb[27].mxu1 }
 0x143   :  { %1409 = vst.msk [vmem:[#allocation2 + $0x68] sm:$0xff] %vm1395_vm1, %v822_v60  ;;  %1473 = vst.msk [vmem:[#allocation2 + $0x268] sm:$0xff] %vm1395_vm1, %v1142_v61 }
 0x144   :  { %v826_v1 = vpop.f32.mrb[28].mxu0  ;;  %v1146_v2 = vpop.f32.mrb[28].mxu1 }
 0x145   :  { %v827_v3 = vadd.f32 %v2649_v0, %v826_v1  ;;  %v1147_v4 = vadd.f32 %v2649_v0, %v1146_v2  ;;  %v828_v5 = vpop.f32.mrb[29].mxu0  ;;  %v1148_v6 = vpop.f32.mrb[29].mxu1 }
 0x147   :  { %1410 = vst.msk [vmem:[#allocation2 + $0x70] sm:$0xff] %vm1395_vm1, %v827_v3  ;;  %1474 = vst.msk [vmem:[#allocation2 + $0x270] sm:$0xff] %vm1395_vm1, %v1147_v4 }
 0x148   :  { %v831_v7 = vpop.f32.mrb[30].mxu0  ;;  %v1151_v8 = vpop.f32.mrb[30].mxu1 }
 0x149   :  { %v832_v9 = vadd.f32 %v2649_v0, %v831_v7  ;;  %v1152_v10 = vadd.f32 %v2649_v0, %v1151_v8  ;;  %v833_v11 = vpop.f32.mrb[31].mxu0  ;;  %v1153_v12 = vpop.f32.mrb[31].mxu1 }
 0x14b   :  { %1411 = vst.msk [vmem:[#allocation2 + $0x78] sm:$0xff] %vm1395_vm1, %v832_v9  ;;  %1475 = vst.msk [vmem:[#allocation2 + $0x278] sm:$0xff] %vm1395_vm1, %v1152_v10 }
 0x14c   :  { %v836_v13 = vpop.f32.mrb[32].mxu0  ;;  %v1156_v14 = vpop.f32.mrb[32].mxu1 }
 0x14d   :  { %v837_v15 = vadd.f32 %v2649_v0, %v836_v13  ;;  %v1157_v16 = vadd.f32 %v2649_v0, %v1156_v14  ;;  %v838_v17 = vpop.f32.mrb[33].mxu0  ;;  %v1158_v18 = vpop.f32.mrb[33].mxu1 }
 0x14f   :  { %1412 = vst.msk [vmem:[#allocation2 + $0x80] sm:$0xff] %vm1395_vm1, %v837_v15  ;;  %1476 = vst.msk [vmem:[#allocation2 + $0x280] sm:$0xff] %vm1395_vm1, %v1157_v16 }
 0x150   :  { %v841_v19 = vpop.f32.mrb[34].mxu0  ;;  %v1161_v20 = vpop.f32.mrb[34].mxu1 }
 0x151   :  { %v842_v21 = vadd.f32 %v2649_v0, %v841_v19  ;;  %v1162_v22 = vadd.f32 %v2649_v0, %v1161_v20  ;;  %v843_v23 = vpop.f32.mrb[35].mxu0  ;;  %v1163_v24 = vpop.f32.mrb[35].mxu1 }
 0x153   :  { %1413 = vst.msk [vmem:[#allocation2 + $0x88] sm:$0xff] %vm1395_vm1, %v842_v21  ;;  %1477 = vst.msk [vmem:[#allocation2 + $0x288] sm:$0xff] %vm1395_vm1, %v1162_v22 }
 0x154   :  { %v846_v25 = vpop.f32.mrb[36].mxu0  ;;  %v1166_v26 = vpop.f32.mrb[36].mxu1 }
 0x155   :  { %v847_v27 = vadd.f32 %v2649_v0, %v846_v25  ;;  %v1167_v28 = vadd.f32 %v2649_v0, %v1166_v26  ;;  %v848_v29 = vpop.f32.mrb[37].mxu0  ;;  %v1168_v30 = vpop.f32.mrb[37].mxu1 }
 0x157   :  { %1414 = vst.msk [vmem:[#allocation2 + $0x90] sm:$0xff] %vm1395_vm1, %v847_v27  ;;  %1478 = vst.msk [vmem:[#allocation2 + $0x290] sm:$0xff] %vm1395_vm1, %v1167_v28 }
 0x158   :  { %v851_v31 = vpop.f32.mrb[38].mxu0  ;;  %v1171_v32 = vpop.f32.mrb[38].mxu1 }
 0x159   :  { %v852_v33 = vadd.f32 %v2649_v0, %v851_v31  ;;  %v1172_v34 = vadd.f32 %v2649_v0, %v1171_v32  ;;  %v853_v35 = vpop.f32.mrb[39].mxu0  ;;  %v1173_v36 = vpop.f32.mrb[39].mxu1 }
 0x15b   :  { %1415 = vst.msk [vmem:[#allocation2 + $0x98] sm:$0xff] %vm1395_vm1, %v852_v33  ;;  %1479 = vst.msk [vmem:[#allocation2 + $0x298] sm:$0xff] %vm1395_vm1, %v1172_v34 }
 0x15c   :  { %v856_v37 = vpop.f32.mrb[40].mxu0  ;;  %v1176_v38 = vpop.f32.mrb[40].mxu1 }
 0x15d   :  { %v857_v39 = vadd.f32 %v2649_v0, %v856_v37  ;;  %v1177_v40 = vadd.f32 %v2649_v0, %v1176_v38  ;;  %v858_v41 = vpop.f32.mrb[41].mxu0  ;;  %v1178_v42 = vpop.f32.mrb[41].mxu1 }
 0x15f   :  { %1416 = vst.msk [vmem:[#allocation2 + $0xa0] sm:$0xff] %vm1395_vm1, %v857_v39  ;;  %1480 = vst.msk [vmem:[#allocation2 + $0x2a0] sm:$0xff] %vm1395_vm1, %v1177_v40 }
 0x160   :  { %v861_v43 = vpop.f32.mrb[42].mxu0  ;;  %v1181_v44 = vpop.f32.mrb[42].mxu1 }
 0x161   :  { %v862_v45 = vadd.f32 %v2649_v0, %v861_v43  ;;  %v1182_v46 = vadd.f32 %v2649_v0, %v1181_v44  ;;  %v863_v47 = vpop.f32.mrb[43].mxu0  ;;  %v1183_v48 = vpop.f32.mrb[43].mxu1 }
 0x163   :  { %1417 = vst.msk [vmem:[#allocation2 + $0xa8] sm:$0xff] %vm1395_vm1, %v862_v45  ;;  %1481 = vst.msk [vmem:[#allocation2 + $0x2a8] sm:$0xff] %vm1395_vm1, %v1182_v46 }
 0x164   :  { %v866_v49 = vpop.f32.mrb[44].mxu0  ;;  %v1186_v50 = vpop.f32.mrb[44].mxu1 }
 0x165   :  { %v867_v51 = vadd.f32 %v2649_v0, %v866_v49  ;;  %v1187_v52 = vadd.f32 %v2649_v0, %v1186_v50  ;;  %v868_v53 = vpop.f32.mrb[45].mxu0  ;;  %v1188_v54 = vpop.f32.mrb[45].mxu1 }
 0x167   :  { %1418 = vst.msk [vmem:[#allocation2 + $0xb0] sm:$0xff] %vm1395_vm1, %v867_v51  ;;  %1482 = vst.msk [vmem:[#allocation2 + $0x2b0] sm:$0xff] %vm1395_vm1, %v1187_v52 }
 0x168   :  { %v871_v55 = vpop.f32.mrb[46].mxu0  ;;  %v1191_v56 = vpop.f32.mrb[46].mxu1 }
 0x169   :  { %v872_v57 = vadd.f32 %v2649_v0, %v871_v55  ;;  %v1192_v58 = vadd.f32 %v2649_v0, %v1191_v56  ;;  %v873_v59 = vpop.f32.mrb[47].mxu0  ;;  %v1193_v60 = vpop.f32.mrb[47].mxu1 }
 0x16b   :  { %1419 = vst.msk [vmem:[#allocation2 + $0xb8] sm:$0xff] %vm1395_vm1, %v872_v57  ;;  %1483 = vst.msk [vmem:[#allocation2 + $0x2b8] sm:$0xff] %vm1395_vm1, %v1192_v58 }
 0x16c   :  { %v876_v61 = vpop.f32.mrb[48].mxu0  ;;  %v1196_v62 = vpop.f32.mrb[48].mxu1 }
 0x16d   :  { %v877_v63 = vadd.f32 %v2649_v0, %v876_v61  ;;  %v1197_v1 = vadd.f32 %v2649_v0, %v1196_v62  ;;  %v878_v2 = vpop.f32.mrb[49].mxu0  ;;  %v1198_v3 = vpop.f32.mrb[49].mxu1 }
 0x16f   :  { %1420 = vst.msk [vmem:[#allocation2 + $0xc0] sm:$0xff] %vm1395_vm1, %v877_v63  ;;  %1484 = vst.msk [vmem:[#allocation2 + $0x2c0] sm:$0xff] %vm1395_vm1, %v1197_v1 }
 0x170   :  { %v881_v4 = vpop.f32.mrb[50].mxu0  ;;  %v1201_v5 = vpop.f32.mrb[50].mxu1 }
 0x171   :  { %v882_v6 = vadd.f32 %v2649_v0, %v881_v4  ;;  %v1202_v7 = vadd.f32 %v2649_v0, %v1201_v5  ;;  %v883_v8 = vpop.f32.mrb[51].mxu0  ;;  %v1203_v9 = vpop.f32.mrb[51].mxu1 }
 0x173   :  { %1421 = vst.msk [vmem:[#allocation2 + $0xc8] sm:$0xff] %vm1395_vm1, %v882_v6  ;;  %1485 = vst.msk [vmem:[#allocation2 + $0x2c8] sm:$0xff] %vm1395_vm1, %v1202_v7 }
 0x174   :  { %v886_v10 = vpop.f32.mrb[52].mxu0  ;;  %v1206_v11 = vpop.f32.mrb[52].mxu1 }
 0x175   :  { %v887_v12 = vadd.f32 %v2649_v0, %v886_v10  ;;  %v1207_v13 = vadd.f32 %v2649_v0, %v1206_v11  ;;  %v888_v14 = vpop.f32.mrb[53].mxu0  ;;  %v1208_v15 = vpop.f32.mrb[53].mxu1 }
 0x177   :  { %1422 = vst.msk [vmem:[#allocation2 + $0xd0] sm:$0xff] %vm1395_vm1, %v887_v12  ;;  %1486 = vst.msk [vmem:[#allocation2 + $0x2d0] sm:$0xff] %vm1395_vm1, %v1207_v13 }
 0x178   :  { %v891_v16 = vpop.f32.mrb[54].mxu0  ;;  %v1211_v17 = vpop.f32.mrb[54].mxu1 }
 0x179   :  { %v892_v18 = vadd.f32 %v2649_v0, %v891_v16  ;;  %v1212_v19 = vadd.f32 %v2649_v0, %v1211_v17  ;;  %v893_v20 = vpop.f32.mrb[55].mxu0  ;;  %v1213_v21 = vpop.f32.mrb[55].mxu1 }
 0x17b   :  { %1423 = vst.msk [vmem:[#allocation2 + $0xd8] sm:$0xff] %vm1395_vm1, %v892_v18  ;;  %1487 = vst.msk [vmem:[#allocation2 + $0x2d8] sm:$0xff] %vm1395_vm1, %v1212_v19 }
 0x17c   :  { %v896_v22 = vpop.f32.mrb[56].mxu0  ;;  %v1216_v23 = vpop.f32.mrb[56].mxu1 }
 0x17d   :  { %v897_v24 = vadd.f32 %v2649_v0, %v896_v22  ;;  %v1217_v25 = vadd.f32 %v2649_v0, %v1216_v23  ;;  %v898_v26 = vpop.f32.mrb[57].mxu0  ;;  %v1218_v27 = vpop.f32.mrb[57].mxu1 }
 0x17f   :  { %1424 = vst.msk [vmem:[#allocation2 + $0xe0] sm:$0xff] %vm1395_vm1, %v897_v24  ;;  %1488 = vst.msk [vmem:[#allocation2 + $0x2e0] sm:$0xff] %vm1395_vm1, %v1217_v25 }
 0x180   :  { %v901_v28 = vpop.f32.mrb[58].mxu0  ;;  %v1221_v29 = vpop.f32.mrb[58].mxu1 }
 0x181   :  { %v902_v30 = vadd.f32 %v2649_v0, %v901_v28  ;;  %v1222_v31 = vadd.f32 %v2649_v0, %v1221_v29  ;;  %v903_v32 = vpop.f32.mrb[59].mxu0  ;;  %v1223_v33 = vpop.f32.mrb[59].mxu1 }
 0x183   :  { %1425 = vst.msk [vmem:[#allocation2 + $0xe8] sm:$0xff] %vm1395_vm1, %v902_v30  ;;  %1489 = vst.msk [vmem:[#allocation2 + $0x2e8] sm:$0xff] %vm1395_vm1, %v1222_v31 }
 0x184   :  { %v906_v34 = vpop.f32.mrb[60].mxu0  ;;  %v1226_v35 = vpop.f32.mrb[60].mxu1 }
 0x185   :  { %v907_v36 = vadd.f32 %v2649_v0, %v906_v34  ;;  %v1227_v37 = vadd.f32 %v2649_v0, %v1226_v35  ;;  %v908_v38 = vpop.f32.mrb[61].mxu0  ;;  %v1228_v39 = vpop.f32.mrb[61].mxu1 }
 0x187   :  { %1426 = vst.msk [vmem:[#allocation2 + $0xf0] sm:$0xff] %vm1395_vm1, %v907_v36  ;;  %1490 = vst.msk [vmem:[#allocation2 + $0x2f0] sm:$0xff] %vm1395_vm1, %v1227_v37 }
 0x188   :  { %v911_v40 = vpop.f32.mrb[62].mxu0  ;;  %v1231_v41 = vpop.f32.mrb[62].mxu1 }
 0x189   :  { %v912_v42 = vadd.f32 %v2649_v0, %v911_v40  ;;  %v1232_v43 = vadd.f32 %v2649_v0, %v1231_v41  ;;  %v913_v44 = vpop.f32.mrb[63].mxu0  ;;  %v1233_v45 = vpop.f32.mrb[63].mxu1 }
 0x18b   :  { %1427 = vst.msk [vmem:[#allocation2 + $0xf8] sm:$0xff] %vm1395_vm1, %v912_v42  ;;  %1491 = vst.msk [vmem:[#allocation2 + $0x2f8] sm:$0xff] %vm1395_vm1, %v1232_v43 }
 0x18c   :  { %v916_v46 = vpop.f32.mrb[64].mxu0  ;;  %v1236_v47 = vpop.f32.mrb[64].mxu1 }
 0x18d   :  { %v917_v48 = vadd.f32 %v2649_v0, %v916_v46  ;;  %v1237_v49 = vadd.f32 %v2649_v0, %v1236_v47  ;;  %v918_v50 = vpop.f32.mrb[65].mxu0  ;;  %v1238_v51 = vpop.f32.mrb[65].mxu1 }
 0x18f   :  { %1428 = vst.msk [vmem:[#allocation2 + $0x100] sm:$0xff] %vm1395_vm1, %v917_v48  ;;  %1492 = vst.msk [vmem:[#allocation2 + $0x300] sm:$0xff] %vm1395_vm1, %v1237_v49 }
 0x190   :  { %v921_v52 = vpop.f32.mrb[66].mxu0  ;;  %v1241_v53 = vpop.f32.mrb[66].mxu1 }
 0x191   :  { %v922_v54 = vadd.f32 %v2649_v0, %v921_v52  ;;  %v1242_v55 = vadd.f32 %v2649_v0, %v1241_v53  ;;  %v923_v56 = vpop.f32.mrb[67].mxu0  ;;  %v1243_v57 = vpop.f32.mrb[67].mxu1 }
 0x193   :  { %1429 = vst.msk [vmem:[#allocation2 + $0x108] sm:$0xff] %vm1395_vm1, %v922_v54  ;;  %1493 = vst.msk [vmem:[#allocation2 + $0x308] sm:$0xff] %vm1395_vm1, %v1242_v55 }
 0x194   :  { %v926_v58 = vpop.f32.mrb[68].mxu0  ;;  %v1246_v59 = vpop.f32.mrb[68].mxu1 }
 0x195   :  { %v927_v60 = vadd.f32 %v2649_v0, %v926_v58  ;;  %v1247_v61 = vadd.f32 %v2649_v0, %v1246_v59  ;;  %v928_v62 = vpop.f32.mrb[69].mxu0  ;;  %v1248_v63 = vpop.f32.mrb[69].mxu1 }
 0x197   :  { %1430 = vst.msk [vmem:[#allocation2 + $0x110] sm:$0xff] %vm1395_vm1, %v927_v60  ;;  %1494 = vst.msk [vmem:[#allocation2 + $0x310] sm:$0xff] %vm1395_vm1, %v1247_v61 }
 0x198   :  { %v931_v1 = vpop.f32.mrb[70].mxu0  ;;  %v1251_v2 = vpop.f32.mrb[70].mxu1 }
 0x199   :  { %v932_v3 = vadd.f32 %v2649_v0, %v931_v1  ;;  %v1252_v4 = vadd.f32 %v2649_v0, %v1251_v2  ;;  %v933_v5 = vpop.f32.mrb[71].mxu0  ;;  %v1253_v6 = vpop.f32.mrb[71].mxu1 }
 0x19b   :  { %1431 = vst.msk [vmem:[#allocation2 + $0x118] sm:$0xff] %vm1395_vm1, %v932_v3  ;;  %1495 = vst.msk [vmem:[#allocation2 + $0x318] sm:$0xff] %vm1395_vm1, %v1252_v4 }
 0x19c   :  { %v936_v7 = vpop.f32.mrb[72].mxu0  ;;  %v1256_v8 = vpop.f32.mrb[72].mxu1 }
 0x19d   :  { %v937_v9 = vadd.f32 %v2649_v0, %v936_v7  ;;  %v1257_v10 = vadd.f32 %v2649_v0, %v1256_v8  ;;  %v938_v11 = vpop.f32.mrb[73].mxu0  ;;  %v1258_v12 = vpop.f32.mrb[73].mxu1 }
 0x19f   :  { %1432 = vst.msk [vmem:[#allocation2 + $0x120] sm:$0xff] %vm1395_vm1, %v937_v9  ;;  %1496 = vst.msk [vmem:[#allocation2 + $0x320] sm:$0xff] %vm1395_vm1, %v1257_v10 }
 0x1a0   :  { %v941_v13 = vpop.f32.mrb[74].mxu0  ;;  %v1261_v14 = vpop.f32.mrb[74].mxu1 }
 0x1a1   :  { %v942_v15 = vadd.f32 %v2649_v0, %v941_v13  ;;  %v1262_v16 = vadd.f32 %v2649_v0, %v1261_v14  ;;  %v943_v17 = vpop.f32.mrb[75].mxu0  ;;  %v1263_v18 = vpop.f32.mrb[75].mxu1 }
 0x1a3   :  { %1433 = vst.msk [vmem:[#allocation2 + $0x128] sm:$0xff] %vm1395_vm1, %v942_v15  ;;  %1497 = vst.msk [vmem:[#allocation2 + $0x328] sm:$0xff] %vm1395_vm1, %v1262_v16 }
 0x1a4   :  { %v946_v19 = vpop.f32.mrb[76].mxu0  ;;  %v1266_v20 = vpop.f32.mrb[76].mxu1 }
 0x1a5   :  { %v947_v21 = vadd.f32 %v2649_v0, %v946_v19  ;;  %v1267_v22 = vadd.f32 %v2649_v0, %v1266_v20  ;;  %v948_v23 = vpop.f32.mrb[77].mxu0  ;;  %v1268_v24 = vpop.f32.mrb[77].mxu1 }
 0x1a7   :  { %1434 = vst.msk [vmem:[#allocation2 + $0x130] sm:$0xff] %vm1395_vm1, %v947_v21  ;;  %1498 = vst.msk [vmem:[#allocation2 + $0x330] sm:$0xff] %vm1395_vm1, %v1267_v22 }
 0x1a8   :  { %v951_v25 = vpop.f32.mrb[78].mxu0  ;;  %v1271_v26 = vpop.f32.mrb[78].mxu1 }
 0x1a9   :  { %v952_v27 = vadd.f32 %v2649_v0, %v951_v25  ;;  %v1272_v28 = vadd.f32 %v2649_v0, %v1271_v26  ;;  %v953_v29 = vpop.f32.mrb[79].mxu0  ;;  %v1273_v30 = vpop.f32.mrb[79].mxu1 }
 0x1ab   :  { %1435 = vst.msk [vmem:[#allocation2 + $0x138] sm:$0xff] %vm1395_vm1, %v952_v27  ;;  %1499 = vst.msk [vmem:[#allocation2 + $0x338] sm:$0xff] %vm1395_vm1, %v1272_v28 }
 0x1ac   :  { %v956_v31 = vpop.f32.mrb[80].mxu0  ;;  %v1276_v32 = vpop.f32.mrb[80].mxu1 }
 0x1ad   :  { %v957_v33 = vadd.f32 %v2649_v0, %v956_v31  ;;  %v1277_v34 = vadd.f32 %v2649_v0, %v1276_v32  ;;  %v958_v35 = vpop.f32.mrb[81].mxu0  ;;  %v1278_v36 = vpop.f32.mrb[81].mxu1 }
 0x1af   :  { %1436 = vst.msk [vmem:[#allocation2 + $0x140] sm:$0xff] %vm1395_vm1, %v957_v33  ;;  %1500 = vst.msk [vmem:[#allocation2 + $0x340] sm:$0xff] %vm1395_vm1, %v1277_v34 }
 0x1b0   :  { %v961_v37 = vpop.f32.mrb[82].mxu0  ;;  %v1281_v38 = vpop.f32.mrb[82].mxu1 }
 0x1b1   :  { %v962_v39 = vadd.f32 %v2649_v0, %v961_v37  ;;  %v1282_v40 = vadd.f32 %v2649_v0, %v1281_v38  ;;  %v963_v41 = vpop.f32.mrb[83].mxu0  ;;  %v1283_v42 = vpop.f32.mrb[83].mxu1 }
 0x1b3   :  { %1437 = vst.msk [vmem:[#allocation2 + $0x148] sm:$0xff] %vm1395_vm1, %v962_v39  ;;  %1501 = vst.msk [vmem:[#allocation2 + $0x348] sm:$0xff] %vm1395_vm1, %v1282_v40 }
 0x1b4   :  { %v966_v43 = vpop.f32.mrb[84].mxu0  ;;  %v1286_v44 = vpop.f32.mrb[84].mxu1 }
 0x1b5   :  { %v967_v45 = vadd.f32 %v2649_v0, %v966_v43  ;;  %v1287_v46 = vadd.f32 %v2649_v0, %v1286_v44  ;;  %v968_v47 = vpop.f32.mrb[85].mxu0  ;;  %v1288_v48 = vpop.f32.mrb[85].mxu1 }
 0x1b6   :  { %v3014_v48 = vld [vmem:[%s3074_s2] ss:$0 sm:$0xff]  ;;  %s1768_s2 = smov [#allocation2]  }
 0x1b7   :  { %1438 = vst.msk [vmem:[#allocation2 + $0x150] sm:$0xff] %vm1395_vm1, %v967_v45  ;;  %1502 = vst.msk [vmem:[#allocation2 + $0x350] sm:$0xff] %vm1395_vm1, %v1287_v46  ;;  %s1529_s23 = sshll.u32 %s1768_s2, 4  ;;  %s1530_s23 = int_to_ptr.vmem [resolvable:$true] %s1529_s23 }
 0x1b8   :  { %v971_v49 = vpop.f32.mrb[86].mxu0  ;;  %v1291_v50 = vpop.f32.mrb[86].mxu1  ;;  %s1742_s1 = scalar_lea.vmem %s1530_s23, 16384  ;;  %p1747_p1 = scmp.lt.s32.totalorder %s1530_s23, %s1530_s23 }
 0x1b9   :  { %v972_v51 = vadd.f32 %v2649_v0, %v971_v49  ;;  %v1292_v52 = vadd.f32 %v2649_v0, %v1291_v50  ;;  %v973_v53 = vpop.f32.mrb[87].mxu0  ;;  %v1293_v54 = vpop.f32.mrb[87].mxu1  ;;  %p1743_p0 = scmp.ne.s32.totalorder %s1530_s23, %s1742_s1  ;;  %p1748_p2 = scmp.lt.s32.totalorder %s1742_s1, %s1742_s1 }
 0x1bb   :  { %1439 = vst.msk [vmem:[#allocation2 + $0x158] sm:$0xff] %vm1395_vm1, %v972_v51  ;;  %1503 = vst.msk [vmem:[#allocation2 + $0x358] sm:$0xff] %vm1395_vm1, %v1292_v52  ;;  %p1749_p3 = por %p1748_p2, %p1747_p1 }
 0x1bc   :  { %v976_v55 = vpop.f32.mrb[88].mxu0  ;;  %v1296_v56 = vpop.f32.mrb[88].mxu1 }
 0x1bd   :  { %v977_v57 = vadd.f32 %v2649_v0, %v976_v55  ;;  %v1297_v58 = vadd.f32 %v2649_v0, %v1296_v56  ;;  %v978_v59 = vpop.f32.mrb[89].mxu0  ;;  %v1298_v60 = vpop.f32.mrb[89].mxu1  ;;  %p1750_p4 = pnand %p1749_p3, %p1743_p0 }
 0x1bf   :  { %1440 = vst.msk [vmem:[#allocation2 + $0x160] sm:$0xff] %vm1395_vm1, %v977_v57  ;;  %1504 = vst.msk [vmem:[#allocation2 + $0x360] sm:$0xff] %vm1395_vm1, %v1297_v58 }
 0x1c0   :  { %v981_v61 = vpop.f32.mrb[90].mxu0  ;;  %v1301_v62 = vpop.f32.mrb[90].mxu1 }
 0x1c1   :  { %v982_v63 = vadd.f32 %v2649_v0, %v981_v61  ;;  %v1302_v1 = vadd.f32 %v2649_v0, %v1301_v62  ;;  %v983_v2 = vpop.f32.mrb[91].mxu0  ;;  %v1303_v3 = vpop.f32.mrb[91].mxu1 }
 0x1c3   :  { %1441 = vst.msk [vmem:[#allocation2 + $0x168] sm:$0xff] %vm1395_vm1, %v982_v63  ;;  %1505 = vst.msk [vmem:[#allocation2 + $0x368] sm:$0xff] %vm1395_vm1, %v1302_v1 }
 0x1c4   :  { %v986_v4 = vpop.f32.mrb[92].mxu0  ;;  %v1306_v5 = vpop.f32.mrb[92].mxu1 }
 0x1c5   :  { %v987_v6 = vadd.f32 %v2649_v0, %v986_v4  ;;  %v1307_v7 = vadd.f32 %v2649_v0, %v1306_v5  ;;  %v988_v8 = vpop.f32.mrb[93].mxu0  ;;  %v1308_v9 = vpop.f32.mrb[93].mxu1 }
 0x1c7   :  { %1442 = vst.msk [vmem:[#allocation2 + $0x170] sm:$0xff] %vm1395_vm1, %v987_v6  ;;  %1506 = vst.msk [vmem:[#allocation2 + $0x370] sm:$0xff] %vm1395_vm1, %v1307_v7 }
 0x1c8   :  { %v991_v10 = vpop.f32.mrb[94].mxu0  ;;  %v1311_v11 = vpop.f32.mrb[94].mxu1 }
 0x1c9   :  { %v992_v12 = vadd.f32 %v2649_v0, %v991_v10  ;;  %v1312_v13 = vadd.f32 %v2649_v0, %v1311_v11  ;;  %v993_v14 = vpop.f32.mrb[95].mxu0  ;;  %v1313_v15 = vpop.f32.mrb[95].mxu1 }
 0x1cb   :  { %1443 = vst.msk [vmem:[#allocation2 + $0x178] sm:$0xff] %vm1395_vm1, %v992_v12  ;;  %1507 = vst.msk [vmem:[#allocation2 + $0x378] sm:$0xff] %vm1395_vm1, %v1312_v13 }
 0x1cc   :  { %v996_v16 = vpop.f32.mrb[96].mxu0  ;;  %v1316_v17 = vpop.f32.mrb[96].mxu1 }
 0x1cd   :  { %v997_v18 = vadd.f32 %v2649_v0, %v996_v16  ;;  %v1317_v19 = vadd.f32 %v2649_v0, %v1316_v17  ;;  %v998_v20 = vpop.f32.mrb[97].mxu0  ;;  %v1318_v21 = vpop.f32.mrb[97].mxu1 }
 0x1cf   :  { %1444 = vst.msk [vmem:[#allocation2 + $0x180] sm:$0xff] %vm1395_vm1, %v997_v18  ;;  %1508 = vst.msk [vmem:[#allocation2 + $0x380] sm:$0xff] %vm1395_vm1, %v1317_v19 }
 0x1d0   :  { %v1001_v22 = vpop.f32.mrb[98].mxu0  ;;  %v1321_v23 = vpop.f32.mrb[98].mxu1 }
 0x1d1   :  { %v1002_v24 = vadd.f32 %v2649_v0, %v1001_v22  ;;  %v1322_v25 = vadd.f32 %v2649_v0, %v1321_v23  ;;  %v1003_v26 = vpop.f32.mrb[99].mxu0  ;;  %v1323_v27 = vpop.f32.mrb[99].mxu1 }
 0x1d3   :  { %1445 = vst.msk [vmem:[#allocation2 + $0x188] sm:$0xff] %vm1395_vm1, %v1002_v24  ;;  %1509 = vst.msk [vmem:[#allocation2 + $0x388] sm:$0xff] %vm1395_vm1, %v1322_v25 }
 0x1d4   :  { %v1006_v28 = vpop.f32.mrb[100].mxu0  ;;  %v1326_v29 = vpop.f32.mrb[100].mxu1 }
 0x1d5   :  { %v1007_v30 = vadd.f32 %v2649_v0, %v1006_v28  ;;  %v1327_v31 = vadd.f32 %v2649_v0, %v1326_v29  ;;  %v1008_v32 = vpop.f32.mrb[101].mxu0  ;;  %v1328_v33 = vpop.f32.mrb[101].mxu1 }
 0x1d7   :  { %1446 = vst.msk [vmem:[#allocation2 + $0x190] sm:$0xff] %vm1395_vm1, %v1007_v30  ;;  %1510 = vst.msk [vmem:[#allocation2 + $0x390] sm:$0xff] %vm1395_vm1, %v1327_v31 }
 0x1d8   :  { %v1011_v34 = vpop.f32.mrb[102].mxu0  ;;  %v1331_v35 = vpop.f32.mrb[102].mxu1 }
 0x1d9   :  { %v1012_v36 = vadd.f32 %v2649_v0, %v1011_v34  ;;  %v1332_v37 = vadd.f32 %v2649_v0, %v1331_v35  ;;  %v1013_v38 = vpop.f32.mrb[103].mxu0  ;;  %v1333_v39 = vpop.f32.mrb[103].mxu1 }
 0x1db   :  { %1447 = vst.msk [vmem:[#allocation2 + $0x198] sm:$0xff] %vm1395_vm1, %v1012_v36  ;;  %1511 = vst.msk [vmem:[#allocation2 + $0x398] sm:$0xff] %vm1395_vm1, %v1332_v37 }
 0x1dc   :  { %v1016_v40 = vpop.f32.mrb[104].mxu0  ;;  %v1336_v41 = vpop.f32.mrb[104].mxu1 }
 0x1dd   :  { %v1017_v42 = vadd.f32 %v2649_v0, %v1016_v40  ;;  %v1337_v43 = vadd.f32 %v2649_v0, %v1336_v41  ;;  %v1018_v44 = vpop.f32.mrb[105].mxu0  ;;  %v1338_v45 = vpop.f32.mrb[105].mxu1 }
 0x1df   :  { %1448 = vst.msk [vmem:[#allocation2 + $0x1a0] sm:$0xff] %vm1395_vm1, %v1017_v42  ;;  %1512 = vst.msk [vmem:[#allocation2 + $0x3a0] sm:$0xff] %vm1395_vm1, %v1337_v43 }
 0x1e0   :  { %v1021_v46 = vpop.f32.mrb[106].mxu0  ;;  %v1341_v47 = vpop.f32.mrb[106].mxu1 }
 0x1e1   :  { %v1022_v49 = vadd.f32 %v3014_v48, %v1021_v46  ;;  %v1342_v50 = vadd.f32 %v3014_v48, %v1341_v47  ;;  %v1023_v51 = vpop.f32.mrb[107].mxu0  ;;  %v1343_v52 = vpop.f32.mrb[107].mxu1 }
 0x1e3   :  { %1449 = vst.msk [vmem:[#allocation2 + $0x1a8] sm:$0xff] %vm1395_vm1, %v1022_v49  ;;  %1513 = vst.msk [vmem:[#allocation2 + $0x3a8] sm:$0xff] %vm1395_vm1, %v1342_v50 }
 0x1e4   :  { %v1026_v0 = vpop.f32.mrb[108].mxu0  ;;  %v1346_v53 = vpop.f32.mrb[108].mxu1 }
 0x1e5   :  { %v1027_v54 = vadd.f32 %v3014_v48, %v1026_v0  ;;  %v1347_v55 = vadd.f32 %v3014_v48, %v1346_v53  ;;  %v1028_v56 = vpop.f32.mrb[109].mxu0  ;;  %v1348_v57 = vpop.f32.mrb[109].mxu1 }
 0x1e7   :  { %1450 = vst.msk [vmem:[#allocation2 + $0x1b0] sm:$0xff] %vm1395_vm1, %v1027_v54  ;;  %1514 = vst.msk [vmem:[#allocation2 + $0x3b0] sm:$0xff] %vm1395_vm1, %v1347_v55 }
 0x1e8   :  { %v1031_v58 = vpop.f32.mrb[110].mxu0  ;;  %v1351_v59 = vpop.f32.mrb[110].mxu1 }
 0x1e9   :  { %v1032_v60 = vadd.f32 %v3014_v48, %v1031_v58  ;;  %v1352_v61 = vadd.f32 %v3014_v48, %v1351_v59  ;;  %v1033_v62 = vpop.f32.mrb[111].mxu0  ;;  %v1353_v63 = vpop.f32.mrb[111].mxu1 }
 0x1eb   :  { %1451 = vst.msk [vmem:[#allocation2 + $0x1b8] sm:$0xff] %vm1395_vm1, %v1032_v60  ;;  %1515 = vst.msk [vmem:[#allocation2 + $0x3b8] sm:$0xff] %vm1395_vm1, %v1352_v61 }
 0x1ec   :  { %v1036_v1 = vpop.f32.mrb[112].mxu0  ;;  %v1356_v2 = vpop.f32.mrb[112].mxu1 }
 0x1ed   :  { %v1037_v3 = vadd.f32 %v3014_v48, %v1036_v1  ;;  %v1357_v4 = vadd.f32 %v3014_v48, %v1356_v2  ;;  %v1038_v5 = vpop.f32.mrb[113].mxu0  ;;  %v1358_v6 = vpop.f32.mrb[113].mxu1 }
 0x1ef   :  { %1452 = vst.msk [vmem:[#allocation2 + $0x1c0] sm:$0xff] %vm1395_vm1, %v1037_v3  ;;  %1516 = vst.msk [vmem:[#allocation2 + $0x3c0] sm:$0xff] %vm1395_vm1, %v1357_v4 }
 0x1f0   :  { %v1041_v7 = vpop.f32.mrb[114].mxu0  ;;  %v1361_v8 = vpop.f32.mrb[114].mxu1 }
 0x1f1   :  { %v1042_v9 = vadd.f32 %v3014_v48, %v1041_v7  ;;  %v1362_v10 = vadd.f32 %v3014_v48, %v1361_v8  ;;  %v1043_v11 = vpop.f32.mrb[115].mxu0  ;;  %v1363_v12 = vpop.f32.mrb[115].mxu1 }
 0x1f3   :  { %1453 = vst.msk [vmem:[#allocation2 + $0x1c8] sm:$0xff] %vm1395_vm1, %v1042_v9  ;;  %1517 = vst.msk [vmem:[#allocation2 + $0x3c8] sm:$0xff] %vm1395_vm1, %v1362_v10 }
 0x1f4   :  { %v1046_v13 = vpop.f32.mrb[116].mxu0  ;;  %v1366_v14 = vpop.f32.mrb[116].mxu1 }
 0x1f5   :  { %v1047_v15 = vadd.f32 %v3014_v48, %v1046_v13  ;;  %v1367_v16 = vadd.f32 %v3014_v48, %v1366_v14  ;;  %v1048_v17 = vpop.f32.mrb[117].mxu0  ;;  %v1368_v18 = vpop.f32.mrb[117].mxu1 }
 0x1f7   :  { %1454 = vst.msk [vmem:[#allocation2 + $0x1d0] sm:$0xff] %vm1395_vm1, %v1047_v15  ;;  %1518 = vst.msk [vmem:[#allocation2 + $0x3d0] sm:$0xff] %vm1395_vm1, %v1367_v16 }
 0x1f8   :  { %v1051_v19 = vpop.f32.mrb[118].mxu0  ;;  %v1371_v20 = vpop.f32.mrb[118].mxu1 }
 0x1f9   :  { %v1052_v21 = vadd.f32 %v3014_v48, %v1051_v19  ;;  %v1372_v22 = vadd.f32 %v3014_v48, %v1371_v20  ;;  %v1053_v23 = vpop.f32.mrb[119].mxu0  ;;  %v1373_v24 = vpop.f32.mrb[119].mxu1 }
 0x1fb   :  { %1455 = vst.msk [vmem:[#allocation2 + $0x1d8] sm:$0xff] %vm1395_vm1, %v1052_v21  ;;  %1519 = vst.msk [vmem:[#allocation2 + $0x3d8] sm:$0xff] %vm1395_vm1, %v1372_v22 }
 0x1fc   :  { %v1056_v25 = vpop.f32.mrb[120].mxu0  ;;  %v1376_v26 = vpop.f32.mrb[120].mxu1 }
 0x1fd   :  { %v1057_v27 = vadd.f32 %v3014_v48, %v1056_v25  ;;  %v1377_v28 = vadd.f32 %v3014_v48, %v1376_v26  ;;  %v1058_v29 = vpop.f32.mrb[121].mxu0  ;;  %v1378_v30 = vpop.f32.mrb[121].mxu1 }
 0x1ff   :  { %1456 = vst.msk [vmem:[#allocation2 + $0x1e0] sm:$0xff] %vm1395_vm1, %v1057_v27  ;;  %1520 = vst.msk [vmem:[#allocation2 + $0x3e0] sm:$0xff] %vm1395_vm1, %v1377_v28 }
 0x200   :  { %v1061_v31 = vpop.f32.mrb[122].mxu0  ;;  %v1381_v32 = vpop.f32.mrb[122].mxu1 }
 0x201   :  { %v1062_v33 = vadd.f32 %v3014_v48, %v1061_v31  ;;  %v1382_v34 = vadd.f32 %v3014_v48, %v1381_v32  ;;  %v1063_v35 = vpop.f32.mrb[123].mxu0  ;;  %v1383_v36 = vpop.f32.mrb[123].mxu1 }
 0x203   :  { %1457 = vst.msk [vmem:[#allocation2 + $0x1e8] sm:$0xff] %vm1395_vm1, %v1062_v33  ;;  %1521 = vst.msk [vmem:[#allocation2 + $0x3e8] sm:$0xff] %vm1395_vm1, %v1382_v34 }
 0x204   :  { %v1066_v37 = vpop.f32.mrb[124].mxu0  ;;  %v1386_v38 = vpop.f32.mrb[124].mxu1 }
 0x205   :  { %v1067_v39 = vadd.f32 %v3014_v48, %v1066_v37  ;;  %v1387_v40 = vadd.f32 %v3014_v48, %v1386_v38  ;;  %v1068_v41 = vpop.f32.mrb[125].mxu0  ;;  %v1388_v42 = vpop.f32.mrb[125].mxu1 }
 0x207   :  { %1458 = vst.msk [vmem:[#allocation2 + $0x1f0] sm:$0xff] %vm1395_vm1, %v1067_v39  ;;  %1522 = vst.msk [vmem:[#allocation2 + $0x3f0] sm:$0xff] %vm1395_vm1, %v1387_v40 }
 0x208   :  { %v1071_v43 = vpop.f32.mrb[126].mxu0  ;;  %v1391_v44 = vpop.f32.mrb[126].mxu1 }
 0x209   :  { %v1072_v45 = vadd.f32 %v3014_v48, %v1071_v43  ;;  %v1392_v46 = vadd.f32 %v3014_v48, %v1391_v44  ;;  %v1073_v47 = vpop.f32.mrb[127].mxu0  ;;  %v1393_v49 = vpop.f32.mrb[127].mxu1 }
 0x20b   :  { %1459 = vst.msk [vmem:[#allocation2 + $0x1f8] sm:$0xff] %vm1395_vm1, %v1072_v45  ;;  %1523 = vst.msk [vmem:[#allocation2 + $0x3f8] sm:$0xff] %vm1395_vm1, %v1392_v46 }
 0x20c   :  { %1753 = shalt.err (!%p1750_p4)
}
 0x20d   :  { %s1754_s26 = scalar_lea.hbm %s3075_s3, 16384 }
 0x20e   :  { %p1755_p5 = scmp.ne.s32.totalorder %s3075_s3, %s1754_s26  ;;  %p1758_p6 = scmp.lt.u32.totalorder %s1754_s26, %s3075_s3 }
 0x210   :  { %p1760_p7 = pnand %p1758_p6, %p1755_p5 }
 0x212   :  { %1763 = shalt.err (!%p1760_p7)
}
 0x213   :  { %s1769_s4 = smov 128   ;;  %s1770_s5 = smov 8  }
 0x214   :  { %1535 = dma.vmem_to_hbm [thread:$0]  %s1530_s23, 16384, %s3075_s3, [#allocation3], %s1769_s4, %s1769_s4, %s1770_s5  }
 0x215   :  { %1764 = dma.done.wait [#allocation3], 16384  }
 0x216   :  { %1765 = vsyncadd [#allocation3], 4294950912 }
 0x217   :  { %1539 = vsyncpa [#allocation3], 1 }

</bundles_post_ra>
